<compile_context>
chip_gen: v7x
topology: tpu7x:2x2x1
jax: 0.10.0
libtpu: 0.0.40
codegen_flags: <defaults>
</compile_context>

<pallas_src>
import functools

import jax
import jax.numpy as jnp
import numpy as np
from jax.experimental import pallas as pl
from jax.experimental.pallas import tpu as pltpu

_NEG = -1e30              # padding-lane logit bias (finite: no inf/nan in exp)
_FULL_UNROLL_LIMIT = 16   # fully unroll the time loop at trace time up to here
_UNROLL = 8               # fori_loop unroll factor for longer decodes


def _round_up(x, m):
    return ((x + m - 1) // m) * m


def _decoder_kernel(m_ref, whh_ref, bhh_ref, wout_ref, bout_ref, h0_ref,
                    logprobs_ref, hfinal_ref, *, max_len, sos_token, hp):
    """Whole greedy decode loop in one kernel invocation.

    m_ref:    (Vp, 3*Hp)  relu(emb) @ [W_ir|W_iz|W_in] + b_ih   (gate-blocked)
    whh_ref:  (Hp, 3*Hp)  [W_hr|W_hz|W_hn]                       (gate-blocked)
    bhh_ref:  (1, 3*Hp)
    wout_ref: (Hp, Vp)
    bout_ref: (1, Vp)     padded vocab lanes hold -1e30
    h0_ref:   (Bp, Hp)
    logprobs_ref: (T, Bp, Vp) time-major per-step log-softmax
    hfinal_ref:   (Bp, Hp)
    """
    Bp = logprobs_ref.shape[1]
    Vp = logprobs_ref.shape[2]
    lane_iota = jax.lax.broadcasted_iota(jnp.int32, (Bp, Vp), 1)
    w_dtype = m_ref.dtype            # MXU input dtype (f32 or bf16)

    h0 = h0_ref[...]
    tok0 = (lane_iota == sos_token).astype(jnp.float32)   # one-hot SOS

    def step(t, carry):
        h, tok = carry
        # Weight refs are read *inside* the step (not hoisted): lets Mosaic
        # stream VMEM straight into the MXU push instead of spilling vregs.
        # embedding + ReLU + input-gate matmuls + b_ih: one MXU pass
        gi = jnp.dot(tok.astype(w_dtype), m_ref[...],
                     preferred_element_type=jnp.float32)              # (Bp,3Hp)
        # all three hidden-gate matmuls fused: one MXU pass + one bias add
        gh = jnp.dot(h.astype(w_dtype), whh_ref[...],
                     preferred_element_type=jnp.float32) + bhh_ref[...]

        # PyTorch GRU gate order (r, z, n); slices are 128-lane aligned.
        r = jax.nn.sigmoid(gi[:, 0:hp] + gh[:, 0:hp])
        z = jax.nn.sigmoid(gi[:, hp:2 * hp] + gh[:, hp:2 * hp])
        n = jnp.tanh(gi[:, 2 * hp:3 * hp] + r * gh[:, 2 * hp:3 * hp])
        h_new = (1.0 - z) * n + z * h                                  # f32

        # output projection (padded vocab lanes get -1e30 via bout)
        logits = jnp.dot(h_new.astype(w_dtype), wout_ref[...],
                         preferred_element_type=jnp.float32) + bout_ref[...]

        # log_softmax in f32 (padded lanes underflow to exp()=0)
        m = jnp.max(logits, axis=-1, keepdims=True)
        shifted = logits - m
        lse = jnp.log(jnp.sum(jnp.exp(shifted), axis=-1, keepdims=True))
        logprobs_ref[t] = shifted - lse

        # greedy next token: first max lane (shifted == 0 exactly at the max,
        # always f32 so the equality trick is exact even with bf16 weights)
        idx = jnp.min(jnp.where(shifted == 0.0, lane_iota, Vp),
                      axis=-1, keepdims=True)
        tok_new = (lane_iota == idx).astype(jnp.float32)
        return h_new, tok_new

    if max_len <= _FULL_UNROLL_LIMIT:
        # Full trace-time unroll: no loop back-edge, maximum overlap between
        # step t's EUP/XLU tail + store and step t+1's matmuls.
        carry = (h0, tok0)
        for t in range(max_len):
            carry = step(t, carry)
        h_final, _ = carry
    else:
        h_final, _ = jax.lax.fori_loop(0, max_len, step, (h0, tok0),
                                       unroll=_UNROLL)

    hfinal_ref[...] = h_final            # written exactly once


def decoder_rnn_pallas(params, encoder_outputs, encoder_hidden, *, max_len,
                       sos_token, weight_dtype=jnp.float32):
    del encoder_outputs  # only used for batch size in the PyTorch module
    emb = params["emb"]            # (V, H)
    wih = params["wih"]            # (3, H, H)   wih[g] = W_i{r,z,n}^T
    bih = params["bih"]            # (3, 1, H)
    whh = params["whh"]            # (3, H, H)   whh[g] = W_h{r,z,n}^T
    bhh = params["bhh"]            # (3, 1, H)
    wout = params["wout"]          # (H, V)
    bout = params["bout"]          # (1, V)

    V, H = emb.shape
    h0 = encoder_hidden[0]         # (B, H)
    B = h0.shape[0]

    Hp = _round_up(H, 128)         # lane-align hidden
    Vp = _round_up(V, 128)         # lane-align vocab
    Bp = _round_up(B, 8)           # sublane-align batch

    # --- fold + pad parameters (zeros in padded lanes keep padded h exactly 0)
    x_tab = jnp.maximum(emb, 0.0)                                   # relu(emb)
    m_tab = jnp.zeros((Vp, 3 * Hp), jnp.float32)
    whh_cat = jnp.zeros((Hp, 3 * Hp), jnp.float32)
    bhh_cat = jnp.zeros((1, 3 * Hp), jnp.float32)
    for g in range(3):
        m_g = x_tab @ wih[g] + bih[g]                               # (V, H)
        m_tab = m_tab.at[:V, g * Hp:g * Hp + H].set(m_g)
        whh_cat = whh_cat.at[:H, g * Hp:g * Hp + H].set(whh[g])
        bhh_cat = bhh_cat.at[:1, g * Hp:g * Hp + H].set(bhh[g])
    wout_p = jnp.zeros((Hp, Vp), jnp.float32).at[:H, :V].set(wout)
    bout_p = jnp.full((1, Vp), _NEG, jnp.float32).at[:1, :V].set(bout)
    h0_p = jnp.zeros((Bp, Hp), jnp.float32).at[:B, :H].set(h0)

    # MXU inputs in weight_dtype (bf16 recommended on v5e/v6e/v7x); biases,
    # carried hidden state, accumulation and softmax stay f32.
    m_tab = m_tab.astype(weight_dtype)
    whh_cat = whh_cat.astype(weight_dtype)
    wout_p = wout_p.astype(weight_dtype)

    kernel = functools.partial(_decoder_kernel, max_len=max_len,
                               sos_token=sos_token, hp=Hp)

    def run(buffer_count):
        # grid=(1,): nothing to pipeline, so single-buffer every operand and
        # output to avoid doubling the resident VMEM footprint.
        kw = ({} if buffer_count is None
              else {"pipeline_mode": pl.Buffered(buffer_count)})
        grid_spec = pltpu.PrefetchScalarGridSpec(
            num_scalar_prefetch=0,
            grid=(1,),                          # time loop lives in the kernel
            in_specs=[
                pl.BlockSpec((Vp, 3 * Hp), lambda i: (0, 0), **kw),  # folded M
                pl.BlockSpec((Hp, 3 * Hp), lambda i: (0, 0), **kw),  # W_hh cat
                pl.BlockSpec((1, 3 * Hp), lambda i: (0, 0), **kw),   # b_hh cat
                pl.BlockSpec((Hp, Vp), lambda i: (0, 0), **kw),      # W_out^T
                pl.BlockSpec((1, Vp), lambda i: (0, 0), **kw),       # b_out
                pl.BlockSpec((Bp, Hp), lambda i: (0, 0), **kw),      # h0
            ],
            out_specs=[
                pl.BlockSpec((max_len, Bp, Vp), lambda i: (0, 0, 0), **kw),
                pl.BlockSpec((Bp, Hp), lambda i: (0, 0), **kw),
            ],
        )
        return pl.pallas_call(
            kernel,
            out_shape=(
                jax.ShapeDtypeStruct((max_len, Bp, Vp), jnp.float32),
                jax.ShapeDtypeStruct((Bp, Hp), jnp.float32),
            ),
            grid_spec=grid_spec,
            compiler_params=pltpu.CompilerParams(
                dimension_semantics=("arbitrary",)),
        )(m_tab, whh_cat, bhh_cat, wout_p, bout_p, h0_p)

    try:
        log_probs_tbv, h_final = run(1)
    except Exception:
        # Fallback for jax versions without BlockSpec pipeline_mode support:
        # identical semantics, default double-buffered specs.
        log_probs_tbv, h_final = run(None)

    # (T, Bp, Vp) -> (B, T, V), drop padding
    log_probs = jnp.transpose(log_probs_tbv, (1, 0, 2))[:B, :, :V]
    hidden = h_final[:B, :H][None]                                  # (1, B, H)
    return log_probs, hidden, None                                  # (outputs, hidden, None)


def decoder_rnn_reference(params, encoder_hidden, *, max_len, sos_token):
    """Pure-JAX reference mirroring the PyTorch forward (greedy path)."""
    emb, wih, bih = params["emb"], params["wih"], params["bih"]
    whh, bhh = params["whh"], params["bhh"]
    wout, bout = params["wout"], params["bout"]
    h = encoder_hidden[0]
    B = h.shape[0]
    tok = jnp.full((B,), sos_token, jnp.int32)
    outs = []
    for _ in range(max_len):
        x = jnp.maximum(emb[tok], 0.0)
        r = jax.nn.sigmoid(x @ wih[0] + bih[0] + h @ whh[0] + bhh[0])
        z = jax.nn.sigmoid(x @ wih[1] + bih[1] + h @ whh[1] + bhh[1])
        n = jnp.tanh(x @ wih[2] + bih[2] + r * (h @ whh[2] + bhh[2]))
        h = (1.0 - z) * n + z * h
        logits = h @ wout + bout
        outs.append(logits)
        tok = jnp.argmax(logits, axis=-1)
    out = jnp.stack(outs, axis=1)                                   # (B, T, V)
    return jax.nn.log_softmax(out, axis=-1), h[None], None


def make_params(key, hidden_size, output_size):
    H, V = hidden_size, output_size
    ks = jax.random.split(key, 7)
    bound = 1.0 / np.sqrt(H)
    u = lambda k, shape: jax.random.uniform(k, shape, jnp.float32, -bound, bound)
    return {
        "emb":  jax.random.normal(ks[0], (V, H), jnp.float32),
        "wih":  u(ks[1], (3, H, H)),
        "bih":  u(ks[2], (3, 1, H)),
        "whh":  u(ks[3], (3, H, H)),
        "bhh":  u(ks[4], (3, 1, H)),
        "wout": u(ks[5], (H, V)),
        "bout": u(ks[6], (1, V)),
    }


if __name__ == "__main__":
    B, H, V, SEQ, MAX_LEN, SOS = 4, 32, 16, 8, 8, 1

    key = jax.random.PRNGKey(0)
    kp, ke, kh = jax.random.split(key, 3)
    params = make_params(kp, H, V)
    encoder_outputs = jax.random.normal(ke, (B, SEQ, H), jnp.float32)
    encoder_hidden = jax.random.normal(kh, (1, B, H), jnp.float32)

    # f32 weights: bit-level comparable against the pure-JAX reference.
    log_probs, h_final, _ = decoder_rnn_pallas(
        params, encoder_outputs, encoder_hidden, max_len=MAX_LEN, sos_token=SOS)
    jax.block_until_ready((log_probs, h_final))

    ref_lp, ref_h, _ = decoder_rnn_reference(
        params, encoder_hidden, max_len=MAX_LEN, sos_token=SOS)

    np.testing.assert_allclose(np.asarray(log_probs), np.asarray(ref_lp),
                               rtol=2e-4, atol=2e-4)
    np.testing.assert_allclose(np.asarray(h_final), np.asarray(ref_h),
                               rtol=2e-4, atol=2e-4)

    # bf16 MXU weights (recommended on v5e/v6e/v7x). Greedy trajectories may
    # legitimately differ from the f32 reference near logit ties, so only
    # check that the fast path runs and produces finite values.
    lp_bf16, h_bf16, _ = decoder_rnn_pallas(
        params, encoder_outputs, encoder_hidden, max_len=MAX_LEN,
        sos_token=SOS, weight_dtype=jnp.bfloat16)
    jax.block_until_ready((lp_bf16, h_bf16))
    assert np.all(np.isfinite(np.asarray(lp_bf16)))
    assert np.all(np.isfinite(np.asarray(h_bf16)))

    print("KERNEL_OK")
</pallas_src>

<mosaic_0001>
module attributes {stable_mosaic.version = 11 : i64} {
  func.func @_decoder_kernel(%arg0: i32, %arg1: memref<128x384xf32, #tpu.memory_space<vmem>>, %arg2: memref<128x384xf32, #tpu.memory_space<vmem>>, %arg3: memref<1x384xf32, #tpu.memory_space<vmem>>, %arg4: memref<128x128xf32, #tpu.memory_space<vmem>>, %arg5: memref<1x128xf32, #tpu.memory_space<vmem>>, %arg6: memref<8x128xf32, #tpu.memory_space<vmem>>, %arg7: memref<8x8x128xf32, #tpu.memory_space<vmem>>, %arg8: memref<8x128xf32, #tpu.memory_space<vmem>>) attributes {dimension_semantics = [#tpu.dimension_semantics<arbitrary>], iteration_bounds = array<i64: 1>, scalar_prefetch = 0 : i64, scratch_operands = 0 : i64, tpu.core_type = #tpu.core_type<tc>, window_params = [{pipeline_mode = #tpu.pipeline_mode<synchronous>, transform_indices = @transform_0, window_bounds = array<i64: 128, 384>}, {pipeline_mode = #tpu.pipeline_mode<synchronous>, transform_indices = @transform_1, window_bounds = array<i64: 128, 384>}, {pipeline_mode = #tpu.pipeline_mode<synchronous>, transform_indices = @transform_2, window_bounds = array<i64: 1, 384>}, {pipeline_mode = #tpu.pipeline_mode<synchronous>, transform_indices = @transform_3, window_bounds = array<i64: 128, 128>}, {pipeline_mode = #tpu.pipeline_mode<synchronous>, transform_indices = @transform_4, window_bounds = array<i64: 1, 128>}, {pipeline_mode = #tpu.pipeline_mode<synchronous>, transform_indices = @transform_5, window_bounds = array<i64: 8, 128>}, {pipeline_mode = #tpu.pipeline_mode<synchronous>, transform_indices = @transform_6, window_bounds = array<i64: 8, 8, 128>}, {pipeline_mode = #tpu.pipeline_mode<synchronous>, transform_indices = @transform_7, window_bounds = array<i64: 8, 128>}]} {
    %0 = tpu.iota {dimensions = array<i32: 1>} : vector<8x128xi32>
    %c0 = arith.constant 0 : index
    %c0_0 = arith.constant 0 : index
    %1 = vector.load %arg6[%c0, %c0_0] : memref<8x128xf32, #tpu.memory_space<vmem>>, vector<8x128xf32>
    %c1_i32 = arith.constant 1 : i32
    %2 = vector.broadcast %c1_i32 : i32 to vector<8x128xi32>
    %3 = arith.cmpi eq, %0, %2 : vector<8x128xi32>
    %4 = arith.extui %3 : vector<8x128xi1> to vector<8x128xi32>
    %5 = arith.sitofp %4 : vector<8x128xi32> to vector<8x128xf32>
    %c0_1 = arith.constant 0 : index
    %c0_2 = arith.constant 0 : index
    %6 = vector.load %arg1[%c0_1, %c0_2] : memref<128x384xf32, #tpu.memory_space<vmem>>, vector<128x384xf32>
    %cst = arith.constant dense<0.000000e+00> : vector<8x384xf32>
    %7 = tpu.matmul %5, %6, %cst {dimension_numbers = #tpu.dot_dimension_numbers<[1], [0], [0], [1], [0, 0, 1, 1], [], []>} : vector<8x128xf32>, vector<128x384xf32>, vector<8x384xf32> -> vector<8x384xf32>
    %c0_3 = arith.constant 0 : index
    %c0_4 = arith.constant 0 : index
    %8 = vector.load %arg2[%c0_3, %c0_4] : memref<128x384xf32, #tpu.memory_space<vmem>>, vector<128x384xf32>
    %cst_5 = arith.constant dense<0.000000e+00> : vector<8x384xf32>
    %9 = tpu.matmul %1, %8, %cst_5 {dimension_numbers = #tpu.dot_dimension_numbers<[1], [0], [0], [1], [0, 0, 1, 1], [], []>} : vector<8x128xf32>, vector<128x384xf32>, vector<8x384xf32> -> vector<8x384xf32>
    %c0_6 = arith.constant 0 : index
    %c0_7 = arith.constant 0 : index
    %10 = vector.load %arg3[%c0_6, %c0_7] : memref<1x384xf32, #tpu.memory_space<vmem>>, vector<1x384xf32>
    %11 = vector.broadcast %10 : vector<1x384xf32> to vector<8x384xf32>
    %12 = arith.addf %9, %11 : vector<8x384xf32>
    %13 = vector.extract_strided_slice %7 {offsets = [0, 0], sizes = [8, 128], strides = [1, 1]} : vector<8x384xf32> to vector<8x128xf32>
    %14 = vector.extract_strided_slice %12 {offsets = [0, 0], sizes = [8, 128], strides = [1, 1]} : vector<8x384xf32> to vector<8x128xf32>
    %15 = arith.addf %13, %14 : vector<8x128xf32>
    %16 = arith.negf %15 : vector<8x128xf32>
    %17 = math.exp %16 : vector<8x128xf32>
    %cst_8 = arith.constant 1.000000e+00 : f32
    %18 = vector.broadcast %cst_8 : f32 to vector<8x128xf32>
    %19 = arith.addf %18, %17 : vector<8x128xf32>
    %20 = arith.divf %18, %19 : vector<8x128xf32>
    %21 = vector.extract_strided_slice %7 {offsets = [0, 128], sizes = [8, 128], strides = [1, 1]} : vector<8x384xf32> to vector<8x128xf32>
    %22 = vector.extract_strided_slice %12 {offsets = [0, 128], sizes = [8, 128], strides = [1, 1]} : vector<8x384xf32> to vector<8x128xf32>
    %23 = arith.addf %21, %22 : vector<8x128xf32>
    %24 = arith.negf %23 : vector<8x128xf32>
    %25 = math.exp %24 : vector<8x128xf32>
    %cst_9 = arith.constant 1.000000e+00 : f32
    %26 = vector.broadcast %cst_9 : f32 to vector<8x128xf32>
    %27 = arith.addf %26, %25 : vector<8x128xf32>
    %28 = arith.divf %26, %27 : vector<8x128xf32>
    %29 = vector.extract_strided_slice %7 {offsets = [0, 256], sizes = [8, 128], strides = [1, 1]} : vector<8x384xf32> to vector<8x128xf32>
    %30 = vector.extract_strided_slice %12 {offsets = [0, 256], sizes = [8, 128], strides = [1, 1]} : vector<8x384xf32> to vector<8x128xf32>
    %31 = arith.mulf %20, %30 : vector<8x128xf32>
    %32 = arith.addf %29, %31 : vector<8x128xf32>
    %33 = math.tanh %32 : vector<8x128xf32>
    %cst_10 = arith.constant 1.000000e+00 : f32
    %34 = vector.broadcast %cst_10 : f32 to vector<8x128xf32>
    %35 = arith.subf %34, %28 : vector<8x128xf32>
    %36 = arith.mulf %35, %33 : vector<8x128xf32>
    %37 = arith.mulf %28, %1 : vector<8x128xf32>
    %38 = arith.addf %36, %37 : vector<8x128xf32>
    %c0_11 = arith.constant 0 : index
    %c0_12 = arith.constant 0 : index
    %39 = vector.load %arg4[%c0_11, %c0_12] : memref<128x128xf32, #tpu.memory_space<vmem>>, vector<128x128xf32>
    %cst_13 = arith.constant dense<0.000000e+00> : vector<8x128xf32>
    %40 = tpu.matmul %38, %39, %cst_13 {dimension_numbers = #tpu.dot_dimension_numbers<[1], [0], [0], [1], [0, 0, 1, 1], [], []>} : vector<8x128xf32>, vector<128x128xf32>, vector<8x128xf32> -> vector<8x128xf32>
    %c0_14 = arith.constant 0 : index
    %c0_15 = arith.constant 0 : index
    %41 = vector.load %arg5[%c0_14, %c0_15] : memref<1x128xf32, #tpu.memory_space<vmem>>, vector<1x128xf32>
    %42 = vector.broadcast %41 : vector<1x128xf32> to vector<8x128xf32>
    %43 = arith.addf %40, %42 : vector<8x128xf32>
    %cst_16 = arith.constant dense<0xFF800000> : vector<8xf32>
    %44 = vector.multi_reduction <maximumf>, %43, %cst_16 [1] : vector<8x128xf32> to vector<8xf32>
    %45 = vector.shape_cast %44 : vector<8xf32> to vector<8x1xf32>
    %46 = vector.broadcast %45 : vector<8x1xf32> to vector<8x128xf32>
    %47 = arith.subf %43, %46 : vector<8x128xf32>
    %48 = math.exp %47 : vector<8x128xf32>
    %cst_17 = arith.constant dense<0.000000e+00> : vector<8xf32>
    %49 = vector.multi_reduction <add>, %48, %cst_17 [1] : vector<8x128xf32> to vector<8xf32>
    %50 = vector.shape_cast %49 : vector<8xf32> to vector<8x1xf32>
    %51 = math.log %50 : vector<8x1xf32>
    %52 = vector.broadcast %51 : vector<8x1xf32> to vector<8x128xf32>
    %53 = arith.subf %47, %52 : vector<8x128xf32>
    %c0_18 = arith.constant 0 : index
    %c0_19 = arith.constant 0 : index
    %c0_20 = arith.constant 0 : index
    %54 = vector.load %arg7[%c0_18, %c0_19, %c0_20] : memref<8x8x128xf32, #tpu.memory_space<vmem>>, vector<1x8x128xf32>
    %55 = vector.shape_cast %54 : vector<1x8x128xf32> to vector<8x128xf32>
    %56 = vector.shape_cast %53 : vector<8x128xf32> to vector<1x8x128xf32>
    tpu.vector_store %arg7[%c0_18, %c0_19, %c0_20], %56 {strides = array<i32>} : memref<8x8x128xf32, #tpu.memory_space<vmem>>, vector<1x8x128xf32>,
    %cst_21 = arith.constant 0.000000e+00 : f32
    %57 = vector.broadcast %cst_21 : f32 to vector<8x128xf32>
    %58 = arith.cmpf oeq, %47, %57 : vector<8x128xf32>
    %c128_i32 = arith.constant 128 : i32
    %59 = vector.broadcast %c128_i32 : i32 to vector<8x128xi32>
    %60 = arith.select %58, %0, %59 : vector<8x128xi1>, vector<8x128xi32>
    %cst_22 = arith.constant dense<2147483647> : vector<8xi32>
    %61 = vector.multi_reduction <minsi>, %60, %cst_22 [1] : vector<8x128xi32> to vector<8xi32>
    %62 = vector.shape_cast %61 : vector<8xi32> to vector<8x1xi32>
    %63 = vector.broadcast %62 : vector<8x1xi32> to vector<8x128xi32>
    %64 = arith.cmpi eq, %0, %63 : vector<8x128xi32>
    %65 = arith.extui %64 : vector<8x128xi1> to vector<8x128xi32>
    %66 = arith.sitofp %65 : vector<8x128xi32> to vector<8x128xf32>
    %c0_23 = arith.constant 0 : index
    %c0_24 = arith.constant 0 : index
    %67 = vector.load %arg1[%c0_23, %c0_24] : memref<128x384xf32, #tpu.memory_space<vmem>>, vector<128x384xf32>
    %cst_25 = arith.constant dense<0.000000e+00> : vector<8x384xf32>
    %68 = tpu.matmul %66, %67, %cst_25 {dimension_numbers = #tpu.dot_dimension_numbers<[1], [0], [0], [1], [0, 0, 1, 1], [], []>} : vector<8x128xf32>, vector<128x384xf32>, vector<8x384xf32> -> vector<8x384xf32>
    %c0_26 = arith.constant 0 : index
    %c0_27 = arith.constant 0 : index
    %69 = vector.load %arg2[%c0_26, %c0_27] : memref<128x384xf32, #tpu.memory_space<vmem>>, vector<128x384xf32>
    %cst_28 = arith.constant dense<0.000000e+00> : vector<8x384xf32>
    %70 = tpu.matmul %38, %69, %cst_28 {dimension_numbers = #tpu.dot_dimension_numbers<[1], [0], [0], [1], [0, 0, 1, 1], [], []>} : vector<8x128xf32>, vector<128x384xf32>, vector<8x384xf32> -> vector<8x384xf32>
    %c0_29 = arith.constant 0 : index
    %c0_30 = arith.constant 0 : index
    %71 = vector.load %arg3[%c0_29, %c0_30] : memref<1x384xf32, #tpu.memory_space<vmem>>, vector<1x384xf32>
    %72 = vector.broadcast %71 : vector<1x384xf32> to vector<8x384xf32>
    %73 = arith.addf %70, %72 : vector<8x384xf32>
    %74 = vector.extract_strided_slice %68 {offsets = [0, 0], sizes = [8, 128], strides = [1, 1]} : vector<8x384xf32> to vector<8x128xf32>
    %75 = vector.extract_strided_slice %73 {offsets = [0, 0], sizes = [8, 128], strides = [1, 1]} : vector<8x384xf32> to vector<8x128xf32>
    %76 = arith.addf %74, %75 : vector<8x128xf32>
    %77 = arith.negf %76 : vector<8x128xf32>
    %78 = math.exp %77 : vector<8x128xf32>
    %cst_31 = arith.constant 1.000000e+00 : f32
    %79 = vector.broadcast %cst_31 : f32 to vector<8x128xf32>
    %80 = arith.addf %79, %78 : vector<8x128xf32>
    %81 = arith.divf %79, %80 : vector<8x128xf32>
    %82 = vector.extract_strided_slice %68 {offsets = [0, 128], sizes = [8, 128], strides = [1, 1]} : vector<8x384xf32> to vector<8x128xf32>
    %83 = vector.extract_strided_slice %73 {offsets = [0, 128], sizes = [8, 128], strides = [1, 1]} : vector<8x384xf32> to vector<8x128xf32>
    %84 = arith.addf %82, %83 : vector<8x128xf32>
    %85 = arith.negf %84 : vector<8x128xf32>
    %86 = math.exp %85 : vector<8x128xf32>
    %cst_32 = arith.constant 1.000000e+00 : f32
    %87 = vector.broadcast %cst_32 : f32 to vector<8x128xf32>
    %88 = arith.addf %87, %86 : vector<8x128xf32>
    %89 = arith.divf %87, %88 : vector<8x128xf32>
    %90 = vector.extract_strided_slice %68 {offsets = [0, 256], sizes = [8, 128], strides = [1, 1]} : vector<8x384xf32> to vector<8x128xf32>
    %91 = vector.extract_strided_slice %73 {offsets = [0, 256], sizes = [8, 128], strides = [1, 1]} : vector<8x384xf32> to vector<8x128xf32>
    %92 = arith.mulf %81, %91 : vector<8x128xf32>
    %93 = arith.addf %90, %92 : vector<8x128xf32>
    %94 = math.tanh %93 : vector<8x128xf32>
    %cst_33 = arith.constant 1.000000e+00 : f32
    %95 = vector.broadcast %cst_33 : f32 to vector<8x128xf32>
    %96 = arith.subf %95, %89 : vector<8x128xf32>
    %97 = arith.mulf %96, %94 : vector<8x128xf32>
    %98 = arith.mulf %89, %38 : vector<8x128xf32>
    %99 = arith.addf %97, %98 : vector<8x128xf32>
    %c0_34 = arith.constant 0 : index
    %c0_35 = arith.constant 0 : index
    %100 = vector.load %arg4[%c0_34, %c0_35] : memref<128x128xf32, #tpu.memory_space<vmem>>, vector<128x128xf32>
    %cst_36 = arith.constant dense<0.000000e+00> : vector<8x128xf32>
    %101 = tpu.matmul %99, %100, %cst_36 {dimension_numbers = #tpu.dot_dimension_numbers<[1], [0], [0], [1], [0, 0, 1, 1], [], []>} : vector<8x128xf32>, vector<128x128xf32>, vector<8x128xf32> -> vector<8x128xf32>
    %c0_37 = arith.constant 0 : index
    %c0_38 = arith.constant 0 : index
    %102 = vector.load %arg5[%c0_37, %c0_38] : memref<1x128xf32, #tpu.memory_space<vmem>>, vector<1x128xf32>
    %103 = vector.broadcast %102 : vector<1x128xf32> to vector<8x128xf32>
    %104 = arith.addf %101, %103 : vector<8x128xf32>
    %cst_39 = arith.constant dense<0xFF800000> : vector<8xf32>
    %105 = vector.multi_reduction <maximumf>, %104, %cst_39 [1] : vector<8x128xf32> to vector<8xf32>
    %106 = vector.shape_cast %105 : vector<8xf32> to vector<8x1xf32>
    %107 = vector.broadcast %106 : vector<8x1xf32> to vector<8x128xf32>
    %108 = arith.subf %104, %107 : vector<8x128xf32>
    %109 = math.exp %108 : vector<8x128xf32>
    %cst_40 = arith.constant dense<0.000000e+00> : vector<8xf32>
    %110 = vector.multi_reduction <add>, %109, %cst_40 [1] : vector<8x128xf32> to vector<8xf32>
    %111 = vector.shape_cast %110 : vector<8xf32> to vector<8x1xf32>
    %112 = math.log %111 : vector<8x1xf32>
    %113 = vector.broadcast %112 : vector<8x1xf32> to vector<8x128xf32>
    %114 = arith.subf %108, %113 : vector<8x128xf32>
    %c1 = arith.constant 1 : index
    %c0_41 = arith.constant 0 : index
    %c0_42 = arith.constant 0 : index
    %115 = vector.load %arg7[%c1, %c0_41, %c0_42] : memref<8x8x128xf32, #tpu.memory_space<vmem>>, vector<1x8x128xf32>
    %116 = vector.shape_cast %115 : vector<1x8x128xf32> to vector<8x128xf32>
    %117 = vector.shape_cast %114 : vector<8x128xf32> to vector<1x8x128xf32>
    tpu.vector_store %arg7[%c1, %c0_41, %c0_42], %117 {strides = array<i32>} : memref<8x8x128xf32, #tpu.memory_space<vmem>>, vector<1x8x128xf32>,
    %cst_43 = arith.constant 0.000000e+00 : f32
    %118 = vector.broadcast %cst_43 : f32 to vector<8x128xf32>
    %119 = arith.cmpf oeq, %108, %118 : vector<8x128xf32>
    %c128_i32_44 = arith.constant 128 : i32
    %120 = vector.broadcast %c128_i32_44 : i32 to vector<8x128xi32>
    %121 = arith.select %119, %0, %120 : vector<8x128xi1>, vector<8x128xi32>
    %cst_45 = arith.constant dense<2147483647> : vector<8xi32>
    %122 = vector.multi_reduction <minsi>, %121, %cst_45 [1] : vector<8x128xi32> to vector<8xi32>
    %123 = vector.shape_cast %122 : vector<8xi32> to vector<8x1xi32>
    %124 = vector.broadcast %123 : vector<8x1xi32> to vector<8x128xi32>
    %125 = arith.cmpi eq, %0, %124 : vector<8x128xi32>
    %126 = arith.extui %125 : vector<8x128xi1> to vector<8x128xi32>
    %127 = arith.sitofp %126 : vector<8x128xi32> to vector<8x128xf32>
    %c0_46 = arith.constant 0 : index
    %c0_47 = arith.constant 0 : index
    %128 = vector.load %arg1[%c0_46, %c0_47] : memref<128x384xf32, #tpu.memory_space<vmem>>, vector<128x384xf32>
    %cst_48 = arith.constant dense<0.000000e+00> : vector<8x384xf32>
    %129 = tpu.matmul %127, %128, %cst_48 {dimension_numbers = #tpu.dot_dimension_numbers<[1], [0], [0], [1], [0, 0, 1, 1], [], []>} : vector<8x128xf32>, vector<128x384xf32>, vector<8x384xf32> -> vector<8x384xf32>
    %c0_49 = arith.constant 0 : index
    %c0_50 = arith.constant 0 : index
    %130 = vector.load %arg2[%c0_49, %c0_50] : memref<128x384xf32, #tpu.memory_space<vmem>>, vector<128x384xf32>
    %cst_51 = arith.constant dense<0.000000e+00> : vector<8x384xf32>
    %131 = tpu.matmul %99, %130, %cst_51 {dimension_numbers = #tpu.dot_dimension_numbers<[1], [0], [0], [1], [0, 0, 1, 1], [], []>} : vector<8x128xf32>, vector<128x384xf32>, vector<8x384xf32> -> vector<8x384xf32>
    %c0_52 = arith.constant 0 : index
    %c0_53 = arith.constant 0 : index
    %132 = vector.load %arg3[%c0_52, %c0_53] : memref<1x384xf32, #tpu.memory_space<vmem>>, vector<1x384xf32>
    %133 = vector.broadcast %132 : vector<1x384xf32> to vector<8x384xf32>
    %134 = arith.addf %131, %133 : vector<8x384xf32>
    %135 = vector.extract_strided_slice %129 {offsets = [0, 0], sizes = [8, 128], strides = [1, 1]} : vector<8x384xf32> to vector<8x128xf32>
    %136 = vector.extract_strided_slice %134 {offsets = [0, 0], sizes = [8, 128], strides = [1, 1]} : vector<8x384xf32> to vector<8x128xf32>
    %137 = arith.addf %135, %136 : vector<8x128xf32>
    %138 = arith.negf %137 : vector<8x128xf32>
    %139 = math.exp %138 : vector<8x128xf32>
    %cst_54 = arith.constant 1.000000e+00 : f32
    %140 = vector.broadcast %cst_54 : f32 to vector<8x128xf32>
    %141 = arith.addf %140, %139 : vector<8x128xf32>
    %142 = arith.divf %140, %141 : vector<8x128xf32>
    %143 = vector.extract_strided_slice %129 {offsets = [0, 128], sizes = [8, 128], strides = [1, 1]} : vector<8x384xf32> to vector<8x128xf32>
    %144 = vector.extract_strided_slice %134 {offsets = [0, 128], sizes = [8, 128], strides = [1, 1]} : vector<8x384xf32> to vector<8x128xf32>
    %145 = arith.addf %143, %144 : vector<8x128xf32>
    %146 = arith.negf %145 : vector<8x128xf32>
    %147 = math.exp %146 : vector<8x128xf32>
    %cst_55 = arith.constant 1.000000e+00 : f32
    %148 = vector.broadcast %cst_55 : f32 to vector<8x128xf32>
    %149 = arith.addf %148, %147 : vector<8x128xf32>
    %150 = arith.divf %148, %149 : vector<8x128xf32>
    %151 = vector.extract_strided_slice %129 {offsets = [0, 256], sizes = [8, 128], strides = [1, 1]} : vector<8x384xf32> to vector<8x128xf32>
    %152 = vector.extract_strided_slice %134 {offsets = [0, 256], sizes = [8, 128], strides = [1, 1]} : vector<8x384xf32> to vector<8x128xf32>
    %153 = arith.mulf %142, %152 : vector<8x128xf32>
    %154 = arith.addf %151, %153 : vector<8x128xf32>
    %155 = math.tanh %154 : vector<8x128xf32>
    %cst_56 = arith.constant 1.000000e+00 : f32
    %156 = vector.broadcast %cst_56 : f32 to vector<8x128xf32>
    %157 = arith.subf %156, %150 : vector<8x128xf32>
    %158 = arith.mulf %157, %155 : vector<8x128xf32>
    %159 = arith.mulf %150, %99 : vector<8x128xf32>
    %160 = arith.addf %158, %159 : vector<8x128xf32>
    %c0_57 = arith.constant 0 : index
    %c0_58 = arith.constant 0 : index
    %161 = vector.load %arg4[%c0_57, %c0_58] : memref<128x128xf32, #tpu.memory_space<vmem>>, vector<128x128xf32>
    %cst_59 = arith.constant dense<0.000000e+00> : vector<8x128xf32>
    %162 = tpu.matmul %160, %161, %cst_59 {dimension_numbers = #tpu.dot_dimension_numbers<[1], [0], [0], [1], [0, 0, 1, 1], [], []>} : vector<8x128xf32>, vector<128x128xf32>, vector<8x128xf32> -> vector<8x128xf32>
    %c0_60 = arith.constant 0 : index
    %c0_61 = arith.constant 0 : index
    %163 = vector.load %arg5[%c0_60, %c0_61] : memref<1x128xf32, #tpu.memory_space<vmem>>, vector<1x128xf32>
    %164 = vector.broadcast %163 : vector<1x128xf32> to vector<8x128xf32>
    %165 = arith.addf %162, %164 : vector<8x128xf32>
    %cst_62 = arith.constant dense<0xFF800000> : vector<8xf32>
    %166 = vector.multi_reduction <maximumf>, %165, %cst_62 [1] : vector<8x128xf32> to vector<8xf32>
    %167 = vector.shape_cast %166 : vector<8xf32> to vector<8x1xf32>
    %168 = vector.broadcast %167 : vector<8x1xf32> to vector<8x128xf32>
    %169 = arith.subf %165, %168 : vector<8x128xf32>
    %170 = math.exp %169 : vector<8x128xf32>
    %cst_63 = arith.constant dense<0.000000e+00> : vector<8xf32>
    %171 = vector.multi_reduction <add>, %170, %cst_63 [1] : vector<8x128xf32> to vector<8xf32>
    %172 = vector.shape_cast %171 : vector<8xf32> to vector<8x1xf32>
    %173 = math.log %172 : vector<8x1xf32>
    %174 = vector.broadcast %173 : vector<8x1xf32> to vector<8x128xf32>
    %175 = arith.subf %169, %174 : vector<8x128xf32>
    %c2 = arith.constant 2 : index
    %c0_64 = arith.constant 0 : index
    %c0_65 = arith.constant 0 : index
    %176 = vector.load %arg7[%c2, %c0_64, %c0_65] : memref<8x8x128xf32, #tpu.memory_space<vmem>>, vector<1x8x128xf32>
    %177 = vector.shape_cast %176 : vector<1x8x128xf32> to vector<8x128xf32>
    %178 = vector.shape_cast %175 : vector<8x128xf32> to vector<1x8x128xf32>
    tpu.vector_store %arg7[%c2, %c0_64, %c0_65], %178 {strides = array<i32>} : memref<8x8x128xf32, #tpu.memory_space<vmem>>, vector<1x8x128xf32>,
    %cst_66 = arith.constant 0.000000e+00 : f32
    %179 = vector.broadcast %cst_66 : f32 to vector<8x128xf32>
    %180 = arith.cmpf oeq, %169, %179 : vector<8x128xf32>
    %c128_i32_67 = arith.constant 128 : i32
    %181 = vector.broadcast %c128_i32_67 : i32 to vector<8x128xi32>
    %182 = arith.select %180, %0, %181 : vector<8x128xi1>, vector<8x128xi32>
    %cst_68 = arith.constant dense<2147483647> : vector<8xi32>
    %183 = vector.multi_reduction <minsi>, %182, %cst_68 [1] : vector<8x128xi32> to vector<8xi32>
    %184 = vector.shape_cast %183 : vector<8xi32> to vector<8x1xi32>
    %185 = vector.broadcast %184 : vector<8x1xi32> to vector<8x128xi32>
    %186 = arith.cmpi eq, %0, %185 : vector<8x128xi32>
    %187 = arith.extui %186 : vector<8x128xi1> to vector<8x128xi32>
    %188 = arith.sitofp %187 : vector<8x128xi32> to vector<8x128xf32>
    %c0_69 = arith.constant 0 : index
    %c0_70 = arith.constant 0 : index
    %189 = vector.load %arg1[%c0_69, %c0_70] : memref<128x384xf32, #tpu.memory_space<vmem>>, vector<128x384xf32>
    %cst_71 = arith.constant dense<0.000000e+00> : vector<8x384xf32>
    %190 = tpu.matmul %188, %189, %cst_71 {dimension_numbers = #tpu.dot_dimension_numbers<[1], [0], [0], [1], [0, 0, 1, 1], [], []>} : vector<8x128xf32>, vector<128x384xf32>, vector<8x384xf32> -> vector<8x384xf32>
    %c0_72 = arith.constant 0 : index
    %c0_73 = arith.constant 0 : index
    %191 = vector.load %arg2[%c0_72, %c0_73] : memref<128x384xf32, #tpu.memory_space<vmem>>, vector<128x384xf32>
    %cst_74 = arith.constant dense<0.000000e+00> : vector<8x384xf32>
    %192 = tpu.matmul %160, %191, %cst_74 {dimension_numbers = #tpu.dot_dimension_numbers<[1], [0], [0], [1], [0, 0, 1, 1], [], []>} : vector<8x128xf32>, vector<128x384xf32>, vector<8x384xf32> -> vector<8x384xf32>
    %c0_75 = arith.constant 0 : index
    %c0_76 = arith.constant 0 : index
    %193 = vector.load %arg3[%c0_75, %c0_76] : memref<1x384xf32, #tpu.memory_space<vmem>>, vector<1x384xf32>
    %194 = vector.broadcast %193 : vector<1x384xf32> to vector<8x384xf32>
    %195 = arith.addf %192, %194 : vector<8x384xf32>
    %196 = vector.extract_strided_slice %190 {offsets = [0, 0], sizes = [8, 128], strides = [1, 1]} : vector<8x384xf32> to vector<8x128xf32>
    %197 = vector.extract_strided_slice %195 {offsets = [0, 0], sizes = [8, 128], strides = [1, 1]} : vector<8x384xf32> to vector<8x128xf32>
    %198 = arith.addf %196, %197 : vector<8x128xf32>
    %199 = arith.negf %198 : vector<8x128xf32>
    %200 = math.exp %199 : vector<8x128xf32>
    %cst_77 = arith.constant 1.000000e+00 : f32
    %201 = vector.broadcast %cst_77 : f32 to vector<8x128xf32>
    %202 = arith.addf %201, %200 : vector<8x128xf32>
    %203 = arith.divf %201, %202 : vector<8x128xf32>
    %204 = vector.extract_strided_slice %190 {offsets = [0, 128], sizes = [8, 128], strides = [1, 1]} : vector<8x384xf32> to vector<8x128xf32>
    %205 = vector.extract_strided_slice %195 {offsets = [0, 128], sizes = [8, 128], strides = [1, 1]} : vector<8x384xf32> to vector<8x128xf32>
    %206 = arith.addf %204, %205 : vector<8x128xf32>
    %207 = arith.negf %206 : vector<8x128xf32>
    %208 = math.exp %207 : vector<8x128xf32>
    %cst_78 = arith.constant 1.000000e+00 : f32
    %209 = vector.broadcast %cst_78 : f32 to vector<8x128xf32>
    %210 = arith.addf %209, %208 : vector<8x128xf32>
    %211 = arith.divf %209, %210 : vector<8x128xf32>
    %212 = vector.extract_strided_slice %190 {offsets = [0, 256], sizes = [8, 128], strides = [1, 1]} : vector<8x384xf32> to vector<8x128xf32>
    %213 = vector.extract_strided_slice %195 {offsets = [0, 256], sizes = [8, 128], strides = [1, 1]} : vector<8x384xf32> to vector<8x128xf32>
    %214 = arith.mulf %203, %213 : vector<8x128xf32>
    %215 = arith.addf %212, %214 : vector<8x128xf32>
    %216 = math.tanh %215 : vector<8x128xf32>
    %cst_79 = arith.constant 1.000000e+00 : f32
    %217 = vector.broadcast %cst_79 : f32 to vector<8x128xf32>
    %218 = arith.subf %217, %211 : vector<8x128xf32>
    %219 = arith.mulf %218, %216 : vector<8x128xf32>
    %220 = arith.mulf %211, %160 : vector<8x128xf32>
    %221 = arith.addf %219, %220 : vector<8x128xf32>
    %c0_80 = arith.constant 0 : index
    %c0_81 = arith.constant 0 : index
    %222 = vector.load %arg4[%c0_80, %c0_81] : memref<128x128xf32, #tpu.memory_space<vmem>>, vector<128x128xf32>
    %cst_82 = arith.constant dense<0.000000e+00> : vector<8x128xf32>
    %223 = tpu.matmul %221, %222, %cst_82 {dimension_numbers = #tpu.dot_dimension_numbers<[1], [0], [0], [1], [0, 0, 1, 1], [], []>} : vector<8x128xf32>, vector<128x128xf32>, vector<8x128xf32> -> vector<8x128xf32>
    %c0_83 = arith.constant 0 : index
    %c0_84 = arith.constant 0 : index
    %224 = vector.load %arg5[%c0_83, %c0_84] : memref<1x128xf32, #tpu.memory_space<vmem>>, vector<1x128xf32>
    %225 = vector.broadcast %224 : vector<1x128xf32> to vector<8x128xf32>
    %226 = arith.addf %223, %225 : vector<8x128xf32>
    %cst_85 = arith.constant dense<0xFF800000> : vector<8xf32>
    %227 = vector.multi_reduction <maximumf>, %226, %cst_85 [1] : vector<8x128xf32> to vector<8xf32>
    %228 = vector.shape_cast %227 : vector<8xf32> to vector<8x1xf32>
    %229 = vector.broadcast %228 : vector<8x1xf32> to vector<8x128xf32>
    %230 = arith.subf %226, %229 : vector<8x128xf32>
    %231 = math.exp %230 : vector<8x128xf32>
    %cst_86 = arith.constant dense<0.000000e+00> : vector<8xf32>
    %232 = vector.multi_reduction <add>, %231, %cst_86 [1] : vector<8x128xf32> to vector<8xf32>
    %233 = vector.shape_cast %232 : vector<8xf32> to vector<8x1xf32>
    %234 = math.log %233 : vector<8x1xf32>
    %235 = vector.broadcast %234 : vector<8x1xf32> to vector<8x128xf32>
    %236 = arith.subf %230, %235 : vector<8x128xf32>
    %c3 = arith.constant 3 : index
    %c0_87 = arith.constant 0 : index
    %c0_88 = arith.constant 0 : index
    %237 = vector.load %arg7[%c3, %c0_87, %c0_88] : memref<8x8x128xf32, #tpu.memory_space<vmem>>, vector<1x8x128xf32>
    %238 = vector.shape_cast %237 : vector<1x8x128xf32> to vector<8x128xf32>
    %239 = vector.shape_cast %236 : vector<8x128xf32> to vector<1x8x128xf32>
    tpu.vector_store %arg7[%c3, %c0_87, %c0_88], %239 {strides = array<i32>} : memref<8x8x128xf32, #tpu.memory_space<vmem>>, vector<1x8x128xf32>,
    %cst_89 = arith.constant 0.000000e+00 : f32
    %240 = vector.broadcast %cst_89 : f32 to vector<8x128xf32>
    %241 = arith.cmpf oeq, %230, %240 : vector<8x128xf32>
    %c128_i32_90 = arith.constant 128 : i32
    %242 = vector.broadcast %c128_i32_90 : i32 to vector<8x128xi32>
    %243 = arith.select %241, %0, %242 : vector<8x128xi1>, vector<8x128xi32>
    %cst_91 = arith.constant dense<2147483647> : vector<8xi32>
    %244 = vector.multi_reduction <minsi>, %243, %cst_91 [1] : vector<8x128xi32> to vector<8xi32>
    %245 = vector.shape_cast %244 : vector<8xi32> to vector<8x1xi32>
    %246 = vector.broadcast %245 : vector<8x1xi32> to vector<8x128xi32>
    %247 = arith.cmpi eq, %0, %246 : vector<8x128xi32>
    %248 = arith.extui %247 : vector<8x128xi1> to vector<8x128xi32>
    %249 = arith.sitofp %248 : vector<8x128xi32> to vector<8x128xf32>
    %c0_92 = arith.constant 0 : index
    %c0_93 = arith.constant 0 : index
    %250 = vector.load %arg1[%c0_92, %c0_93] : memref<128x384xf32, #tpu.memory_space<vmem>>, vector<128x384xf32>
    %cst_94 = arith.constant dense<0.000000e+00> : vector<8x384xf32>
    %251 = tpu.matmul %249, %250, %cst_94 {dimension_numbers = #tpu.dot_dimension_numbers<[1], [0], [0], [1], [0, 0, 1, 1], [], []>} : vector<8x128xf32>, vector<128x384xf32>, vector<8x384xf32> -> vector<8x384xf32>
    %c0_95 = arith.constant 0 : index
    %c0_96 = arith.constant 0 : index
    %252 = vector.load %arg2[%c0_95, %c0_96] : memref<128x384xf32, #tpu.memory_space<vmem>>, vector<128x384xf32>
    %cst_97 = arith.constant dense<0.000000e+00> : vector<8x384xf32>
    %253 = tpu.matmul %221, %252, %cst_97 {dimension_numbers = #tpu.dot_dimension_numbers<[1], [0], [0], [1], [0, 0, 1, 1], [], []>} : vector<8x128xf32>, vector<128x384xf32>, vector<8x384xf32> -> vector<8x384xf32>
    %c0_98 = arith.constant 0 : index
    %c0_99 = arith.constant 0 : index
    %254 = vector.load %arg3[%c0_98, %c0_99] : memref<1x384xf32, #tpu.memory_space<vmem>>, vector<1x384xf32>
    %255 = vector.broadcast %254 : vector<1x384xf32> to vector<8x384xf32>
    %256 = arith.addf %253, %255 : vector<8x384xf32>
    %257 = vector.extract_strided_slice %251 {offsets = [0, 0], sizes = [8, 128], strides = [1, 1]} : vector<8x384xf32> to vector<8x128xf32>
    %258 = vector.extract_strided_slice %256 {offsets = [0, 0], sizes = [8, 128], strides = [1, 1]} : vector<8x384xf32> to vector<8x128xf32>
    %259 = arith.addf %257, %258 : vector<8x128xf32>
    %260 = arith.negf %259 : vector<8x128xf32>
    %261 = math.exp %260 : vector<8x128xf32>
    %cst_100 = arith.constant 1.000000e+00 : f32
    %262 = vector.broadcast %cst_100 : f32 to vector<8x128xf32>
    %263 = arith.addf %262, %261 : vector<8x128xf32>
    %264 = arith.divf %262, %263 : vector<8x128xf32>
    %265 = vector.extract_strided_slice %251 {offsets = [0, 128], sizes = [8, 128], strides = [1, 1]} : vector<8x384xf32> to vector<8x128xf32>
    %266 = vector.extract_strided_slice %256 {offsets = [0, 128], sizes = [8, 128], strides = [1, 1]} : vector<8x384xf32> to vector<8x128xf32>
    %267 = arith.addf %265, %266 : vector<8x128xf32>
    %268 = arith.negf %267 : vector<8x128xf32>
    %269 = math.exp %268 : vector<8x128xf32>
    %cst_101 = arith.constant 1.000000e+00 : f32
    %270 = vector.broadcast %cst_101 : f32 to vector<8x128xf32>
    %271 = arith.addf %270, %269 : vector<8x128xf32>
    %272 = arith.divf %270, %271 : vector<8x128xf32>
    %273 = vector.extract_strided_slice %251 {offsets = [0, 256], sizes = [8, 128], strides = [1, 1]} : vector<8x384xf32> to vector<8x128xf32>
    %274 = vector.extract_strided_slice %256 {offsets = [0, 256], sizes = [8, 128], strides = [1, 1]} : vector<8x384xf32> to vector<8x128xf32>
    %275 = arith.mulf %264, %274 : vector<8x128xf32>
    %276 = arith.addf %273, %275 : vector<8x128xf32>
    %277 = math.tanh %276 : vector<8x128xf32>
    %cst_102 = arith.constant 1.000000e+00 : f32
    %278 = vector.broadcast %cst_102 : f32 to vector<8x128xf32>
    %279 = arith.subf %278, %272 : vector<8x128xf32>
    %280 = arith.mulf %279, %277 : vector<8x128xf32>
    %281 = arith.mulf %272, %221 : vector<8x128xf32>
    %282 = arith.addf %280, %281 : vector<8x128xf32>
    %c0_103 = arith.constant 0 : index
    %c0_104 = arith.constant 0 : index
    %283 = vector.load %arg4[%c0_103, %c0_104] : memref<128x128xf32, #tpu.memory_space<vmem>>, vector<128x128xf32>
    %cst_105 = arith.constant dense<0.000000e+00> : vector<8x128xf32>
    %284 = tpu.matmul %282, %283, %cst_105 {dimension_numbers = #tpu.dot_dimension_numbers<[1], [0], [0], [1], [0, 0, 1, 1], [], []>} : vector<8x128xf32>, vector<128x128xf32>, vector<8x128xf32> -> vector<8x128xf32>
    %c0_106 = arith.constant 0 : index
    %c0_107 = arith.constant 0 : index
    %285 = vector.load %arg5[%c0_106, %c0_107] : memref<1x128xf32, #tpu.memory_space<vmem>>, vector<1x128xf32>
    %286 = vector.broadcast %285 : vector<1x128xf32> to vector<8x128xf32>
    %287 = arith.addf %284, %286 : vector<8x128xf32>
    %cst_108 = arith.constant dense<0xFF800000> : vector<8xf32>
    %288 = vector.multi_reduction <maximumf>, %287, %cst_108 [1] : vector<8x128xf32> to vector<8xf32>
    %289 = vector.shape_cast %288 : vector<8xf32> to vector<8x1xf32>
    %290 = vector.broadcast %289 : vector<8x1xf32> to vector<8x128xf32>
    %291 = arith.subf %287, %290 : vector<8x128xf32>
    %292 = math.exp %291 : vector<8x128xf32>
    %cst_109 = arith.constant dense<0.000000e+00> : vector<8xf32>
    %293 = vector.multi_reduction <add>, %292, %cst_109 [1] : vector<8x128xf32> to vector<8xf32>
    %294 = vector.shape_cast %293 : vector<8xf32> to vector<8x1xf32>
    %295 = math.log %294 : vector<8x1xf32>
    %296 = vector.broadcast %295 : vector<8x1xf32> to vector<8x128xf32>
    %297 = arith.subf %291, %296 : vector<8x128xf32>
    %c4 = arith.constant 4 : index
    %c0_110 = arith.constant 0 : index
    %c0_111 = arith.constant 0 : index
    %298 = vector.load %arg7[%c4, %c0_110, %c0_111] : memref<8x8x128xf32, #tpu.memory_space<vmem>>, vector<1x8x128xf32>
    %299 = vector.shape_cast %298 : vector<1x8x128xf32> to vector<8x128xf32>
    %300 = vector.shape_cast %297 : vector<8x128xf32> to vector<1x8x128xf32>
    tpu.vector_store %arg7[%c4, %c0_110, %c0_111], %300 {strides = array<i32>} : memref<8x8x128xf32, #tpu.memory_space<vmem>>, vector<1x8x128xf32>,
    %cst_112 = arith.constant 0.000000e+00 : f32
    %301 = vector.broadcast %cst_112 : f32 to vector<8x128xf32>
    %302 = arith.cmpf oeq, %291, %301 : vector<8x128xf32>
    %c128_i32_113 = arith.constant 128 : i32
    %303 = vector.broadcast %c128_i32_113 : i32 to vector<8x128xi32>
    %304 = arith.select %302, %0, %303 : vector<8x128xi1>, vector<8x128xi32>
    %cst_114 = arith.constant dense<2147483647> : vector<8xi32>
    %305 = vector.multi_reduction <minsi>, %304, %cst_114 [1] : vector<8x128xi32> to vector<8xi32>
    %306 = vector.shape_cast %305 : vector<8xi32> to vector<8x1xi32>
    %307 = vector.broadcast %306 : vector<8x1xi32> to vector<8x128xi32>
    %308 = arith.cmpi eq, %0, %307 : vector<8x128xi32>
    %309 = arith.extui %308 : vector<8x128xi1> to vector<8x128xi32>
    %310 = arith.sitofp %309 : vector<8x128xi32> to vector<8x128xf32>
    %c0_115 = arith.constant 0 : index
    %c0_116 = arith.constant 0 : index
    %311 = vector.load %arg1[%c0_115, %c0_116] : memref<128x384xf32, #tpu.memory_space<vmem>>, vector<128x384xf32>
    %cst_117 = arith.constant dense<0.000000e+00> : vector<8x384xf32>
    %312 = tpu.matmul %310, %311, %cst_117 {dimension_numbers = #tpu.dot_dimension_numbers<[1], [0], [0], [1], [0, 0, 1, 1], [], []>} : vector<8x128xf32>, vector<128x384xf32>, vector<8x384xf32> -> vector<8x384xf32>
    %c0_118 = arith.constant 0 : index
    %c0_119 = arith.constant 0 : index
    %313 = vector.load %arg2[%c0_118, %c0_119] : memref<128x384xf32, #tpu.memory_space<vmem>>, vector<128x384xf32>
    %cst_120 = arith.constant dense<0.000000e+00> : vector<8x384xf32>
    %314 = tpu.matmul %282, %313, %cst_120 {dimension_numbers = #tpu.dot_dimension_numbers<[1], [0], [0], [1], [0, 0, 1, 1], [], []>} : vector<8x128xf32>, vector<128x384xf32>, vector<8x384xf32> -> vector<8x384xf32>
    %c0_121 = arith.constant 0 : index
    %c0_122 = arith.constant 0 : index
    %315 = vector.load %arg3[%c0_121, %c0_122] : memref<1x384xf32, #tpu.memory_space<vmem>>, vector<1x384xf32>
    %316 = vector.broadcast %315 : vector<1x384xf32> to vector<8x384xf32>
    %317 = arith.addf %314, %316 : vector<8x384xf32>
    %318 = vector.extract_strided_slice %312 {offsets = [0, 0], sizes = [8, 128], strides = [1, 1]} : vector<8x384xf32> to vector<8x128xf32>
    %319 = vector.extract_strided_slice %317 {offsets = [0, 0], sizes = [8, 128], strides = [1, 1]} : vector<8x384xf32> to vector<8x128xf32>
    %320 = arith.addf %318, %319 : vector<8x128xf32>
    %321 = arith.negf %320 : vector<8x128xf32>
    %322 = math.exp %321 : vector<8x128xf32>
    %cst_123 = arith.constant 1.000000e+00 : f32
    %323 = vector.broadcast %cst_123 : f32 to vector<8x128xf32>
    %324 = arith.addf %323, %322 : vector<8x128xf32>
    %325 = arith.divf %323, %324 : vector<8x128xf32>
    %326 = vector.extract_strided_slice %312 {offsets = [0, 128], sizes = [8, 128], strides = [1, 1]} : vector<8x384xf32> to vector<8x128xf32>
    %327 = vector.extract_strided_slice %317 {offsets = [0, 128], sizes = [8, 128], strides = [1, 1]} : vector<8x384xf32> to vector<8x128xf32>
    %328 = arith.addf %326, %327 : vector<8x128xf32>
    %329 = arith.negf %328 : vector<8x128xf32>
    %330 = math.exp %329 : vector<8x128xf32>
    %cst_124 = arith.constant 1.000000e+00 : f32
    %331 = vector.broadcast %cst_124 : f32 to vector<8x128xf32>
    %332 = arith.addf %331, %330 : vector<8x128xf32>
    %333 = arith.divf %331, %332 : vector<8x128xf32>
    %334 = vector.extract_strided_slice %312 {offsets = [0, 256], sizes = [8, 128], strides = [1, 1]} : vector<8x384xf32> to vector<8x128xf32>
    %335 = vector.extract_strided_slice %317 {offsets = [0, 256], sizes = [8, 128], strides = [1, 1]} : vector<8x384xf32> to vector<8x128xf32>
    %336 = arith.mulf %325, %335 : vector<8x128xf32>
    %337 = arith.addf %334, %336 : vector<8x128xf32>
    %338 = math.tanh %337 : vector<8x128xf32>
    %cst_125 = arith.constant 1.000000e+00 : f32
    %339 = vector.broadcast %cst_125 : f32 to vector<8x128xf32>
    %340 = arith.subf %339, %333 : vector<8x128xf32>
    %341 = arith.mulf %340, %338 : vector<8x128xf32>
    %342 = arith.mulf %333, %282 : vector<8x128xf32>
    %343 = arith.addf %341, %342 : vector<8x128xf32>
    %c0_126 = arith.constant 0 : index
    %c0_127 = arith.constant 0 : index
    %344 = vector.load %arg4[%c0_126, %c0_127] : memref<128x128xf32, #tpu.memory_space<vmem>>, vector<128x128xf32>
    %cst_128 = arith.constant dense<0.000000e+00> : vector<8x128xf32>
    %345 = tpu.matmul %343, %344, %cst_128 {dimension_numbers = #tpu.dot_dimension_numbers<[1], [0], [0], [1], [0, 0, 1, 1], [], []>} : vector<8x128xf32>, vector<128x128xf32>, vector<8x128xf32> -> vector<8x128xf32>
    %c0_129 = arith.constant 0 : index
    %c0_130 = arith.constant 0 : index
    %346 = vector.load %arg5[%c0_129, %c0_130] : memref<1x128xf32, #tpu.memory_space<vmem>>, vector<1x128xf32>
    %347 = vector.broadcast %346 : vector<1x128xf32> to vector<8x128xf32>
    %348 = arith.addf %345, %347 : vector<8x128xf32>
    %cst_131 = arith.constant dense<0xFF800000> : vector<8xf32>
    %349 = vector.multi_reduction <maximumf>, %348, %cst_131 [1] : vector<8x128xf32> to vector<8xf32>
    %350 = vector.shape_cast %349 : vector<8xf32> to vector<8x1xf32>
    %351 = vector.broadcast %350 : vector<8x1xf32> to vector<8x128xf32>
    %352 = arith.subf %348, %351 : vector<8x128xf32>
    %353 = math.exp %352 : vector<8x128xf32>
    %cst_132 = arith.constant dense<0.000000e+00> : vector<8xf32>
    %354 = vector.multi_reduction <add>, %353, %cst_132 [1] : vector<8x128xf32> to vector<8xf32>
    %355 = vector.shape_cast %354 : vector<8xf32> to vector<8x1xf32>
    %356 = math.log %355 : vector<8x1xf32>
    %357 = vector.broadcast %356 : vector<8x1xf32> to vector<8x128xf32>
    %358 = arith.subf %352, %357 : vector<8x128xf32>
    %c5 = arith.constant 5 : index
    %c0_133 = arith.constant 0 : index
    %c0_134 = arith.constant 0 : index
    %359 = vector.load %arg7[%c5, %c0_133, %c0_134] : memref<8x8x128xf32, #tpu.memory_space<vmem>>, vector<1x8x128xf32>
    %360 = vector.shape_cast %359 : vector<1x8x128xf32> to vector<8x128xf32>
    %361 = vector.shape_cast %358 : vector<8x128xf32> to vector<1x8x128xf32>
    tpu.vector_store %arg7[%c5, %c0_133, %c0_134], %361 {strides = array<i32>} : memref<8x8x128xf32, #tpu.memory_space<vmem>>, vector<1x8x128xf32>,
    %cst_135 = arith.constant 0.000000e+00 : f32
    %362 = vector.broadcast %cst_135 : f32 to vector<8x128xf32>
    %363 = arith.cmpf oeq, %352, %362 : vector<8x128xf32>
    %c128_i32_136 = arith.constant 128 : i32
    %364 = vector.broadcast %c128_i32_136 : i32 to vector<8x128xi32>
    %365 = arith.select %363, %0, %364 : vector<8x128xi1>, vector<8x128xi32>
    %cst_137 = arith.constant dense<2147483647> : vector<8xi32>
    %366 = vector.multi_reduction <minsi>, %365, %cst_137 [1] : vector<8x128xi32> to vector<8xi32>
    %367 = vector.shape_cast %366 : vector<8xi32> to vector<8x1xi32>
    %368 = vector.broadcast %367 : vector<8x1xi32> to vector<8x128xi32>
    %369 = arith.cmpi eq, %0, %368 : vector<8x128xi32>
    %370 = arith.extui %369 : vector<8x128xi1> to vector<8x128xi32>
    %371 = arith.sitofp %370 : vector<8x128xi32> to vector<8x128xf32>
    %c0_138 = arith.constant 0 : index
    %c0_139 = arith.constant 0 : index
    %372 = vector.load %arg1[%c0_138, %c0_139] : memref<128x384xf32, #tpu.memory_space<vmem>>, vector<128x384xf32>
    %cst_140 = arith.constant dense<0.000000e+00> : vector<8x384xf32>
    %373 = tpu.matmul %371, %372, %cst_140 {dimension_numbers = #tpu.dot_dimension_numbers<[1], [0], [0], [1], [0, 0, 1, 1], [], []>} : vector<8x128xf32>, vector<128x384xf32>, vector<8x384xf32> -> vector<8x384xf32>
    %c0_141 = arith.constant 0 : index
    %c0_142 = arith.constant 0 : index
    %374 = vector.load %arg2[%c0_141, %c0_142] : memref<128x384xf32, #tpu.memory_space<vmem>>, vector<128x384xf32>
    %cst_143 = arith.constant dense<0.000000e+00> : vector<8x384xf32>
    %375 = tpu.matmul %343, %374, %cst_143 {dimension_numbers = #tpu.dot_dimension_numbers<[1], [0], [0], [1], [0, 0, 1, 1], [], []>} : vector<8x128xf32>, vector<128x384xf32>, vector<8x384xf32> -> vector<8x384xf32>
    %c0_144 = arith.constant 0 : index
    %c0_145 = arith.constant 0 : index
    %376 = vector.load %arg3[%c0_144, %c0_145] : memref<1x384xf32, #tpu.memory_space<vmem>>, vector<1x384xf32>
    %377 = vector.broadcast %376 : vector<1x384xf32> to vector<8x384xf32>
    %378 = arith.addf %375, %377 : vector<8x384xf32>
    %379 = vector.extract_strided_slice %373 {offsets = [0, 0], sizes = [8, 128], strides = [1, 1]} : vector<8x384xf32> to vector<8x128xf32>
    %380 = vector.extract_strided_slice %378 {offsets = [0, 0], sizes = [8, 128], strides = [1, 1]} : vector<8x384xf32> to vector<8x128xf32>
    %381 = arith.addf %379, %380 : vector<8x128xf32>
    %382 = arith.negf %381 : vector<8x128xf32>
    %383 = math.exp %382 : vector<8x128xf32>
    %cst_146 = arith.constant 1.000000e+00 : f32
    %384 = vector.broadcast %cst_146 : f32 to vector<8x128xf32>
    %385 = arith.addf %384, %383 : vector<8x128xf32>
    %386 = arith.divf %384, %385 : vector<8x128xf32>
    %387 = vector.extract_strided_slice %373 {offsets = [0, 128], sizes = [8, 128], strides = [1, 1]} : vector<8x384xf32> to vector<8x128xf32>
    %388 = vector.extract_strided_slice %378 {offsets = [0, 128], sizes = [8, 128], strides = [1, 1]} : vector<8x384xf32> to vector<8x128xf32>
    %389 = arith.addf %387, %388 : vector<8x128xf32>
    %390 = arith.negf %389 : vector<8x128xf32>
    %391 = math.exp %390 : vector<8x128xf32>
    %cst_147 = arith.constant 1.000000e+00 : f32
    %392 = vector.broadcast %cst_147 : f32 to vector<8x128xf32>
    %393 = arith.addf %392, %391 : vector<8x128xf32>
    %394 = arith.divf %392, %393 : vector<8x128xf32>
    %395 = vector.extract_strided_slice %373 {offsets = [0, 256], sizes = [8, 128], strides = [1, 1]} : vector<8x384xf32> to vector<8x128xf32>
    %396 = vector.extract_strided_slice %378 {offsets = [0, 256], sizes = [8, 128], strides = [1, 1]} : vector<8x384xf32> to vector<8x128xf32>
    %397 = arith.mulf %386, %396 : vector<8x128xf32>
    %398 = arith.addf %395, %397 : vector<8x128xf32>
    %399 = math.tanh %398 : vector<8x128xf32>
    %cst_148 = arith.constant 1.000000e+00 : f32
    %400 = vector.broadcast %cst_148 : f32 to vector<8x128xf32>
    %401 = arith.subf %400, %394 : vector<8x128xf32>
    %402 = arith.mulf %401, %399 : vector<8x128xf32>
    %403 = arith.mulf %394, %343 : vector<8x128xf32>
    %404 = arith.addf %402, %403 : vector<8x128xf32>
    %c0_149 = arith.constant 0 : index
    %c0_150 = arith.constant 0 : index
    %405 = vector.load %arg4[%c0_149, %c0_150] : memref<128x128xf32, #tpu.memory_space<vmem>>, vector<128x128xf32>
    %cst_151 = arith.constant dense<0.000000e+00> : vector<8x128xf32>
    %406 = tpu.matmul %404, %405, %cst_151 {dimension_numbers = #tpu.dot_dimension_numbers<[1], [0], [0], [1], [0, 0, 1, 1], [], []>} : vector<8x128xf32>, vector<128x128xf32>, vector<8x128xf32> -> vector<8x128xf32>
    %c0_152 = arith.constant 0 : index
    %c0_153 = arith.constant 0 : index
    %407 = vector.load %arg5[%c0_152, %c0_153] : memref<1x128xf32, #tpu.memory_space<vmem>>, vector<1x128xf32>
    %408 = vector.broadcast %407 : vector<1x128xf32> to vector<8x128xf32>
    %409 = arith.addf %406, %408 : vector<8x128xf32>
    %cst_154 = arith.constant dense<0xFF800000> : vector<8xf32>
    %410 = vector.multi_reduction <maximumf>, %409, %cst_154 [1] : vector<8x128xf32> to vector<8xf32>
    %411 = vector.shape_cast %410 : vector<8xf32> to vector<8x1xf32>
    %412 = vector.broadcast %411 : vector<8x1xf32> to vector<8x128xf32>
    %413 = arith.subf %409, %412 : vector<8x128xf32>
    %414 = math.exp %413 : vector<8x128xf32>
    %cst_155 = arith.constant dense<0.000000e+00> : vector<8xf32>
    %415 = vector.multi_reduction <add>, %414, %cst_155 [1] : vector<8x128xf32> to vector<8xf32>
    %416 = vector.shape_cast %415 : vector<8xf32> to vector<8x1xf32>
    %417 = math.log %416 : vector<8x1xf32>
    %418 = vector.broadcast %417 : vector<8x1xf32> to vector<8x128xf32>
    %419 = arith.subf %413, %418 : vector<8x128xf32>
    %c6 = arith.constant 6 : index
    %c0_156 = arith.constant 0 : index
    %c0_157 = arith.constant 0 : index
    %420 = vector.load %arg7[%c6, %c0_156, %c0_157] : memref<8x8x128xf32, #tpu.memory_space<vmem>>, vector<1x8x128xf32>
    %421 = vector.shape_cast %420 : vector<1x8x128xf32> to vector<8x128xf32>
    %422 = vector.shape_cast %419 : vector<8x128xf32> to vector<1x8x128xf32>
    tpu.vector_store %arg7[%c6, %c0_156, %c0_157], %422 {strides = array<i32>} : memref<8x8x128xf32, #tpu.memory_space<vmem>>, vector<1x8x128xf32>,
    %cst_158 = arith.constant 0.000000e+00 : f32
    %423 = vector.broadcast %cst_158 : f32 to vector<8x128xf32>
    %424 = arith.cmpf oeq, %413, %423 : vector<8x128xf32>
    %c128_i32_159 = arith.constant 128 : i32
    %425 = vector.broadcast %c128_i32_159 : i32 to vector<8x128xi32>
    %426 = arith.select %424, %0, %425 : vector<8x128xi1>, vector<8x128xi32>
    %cst_160 = arith.constant dense<2147483647> : vector<8xi32>
    %427 = vector.multi_reduction <minsi>, %426, %cst_160 [1] : vector<8x128xi32> to vector<8xi32>
    %428 = vector.shape_cast %427 : vector<8xi32> to vector<8x1xi32>
    %429 = vector.broadcast %428 : vector<8x1xi32> to vector<8x128xi32>
    %430 = arith.cmpi eq, %0, %429 : vector<8x128xi32>
    %431 = arith.extui %430 : vector<8x128xi1> to vector<8x128xi32>
    %432 = arith.sitofp %431 : vector<8x128xi32> to vector<8x128xf32>
    %c0_161 = arith.constant 0 : index
    %c0_162 = arith.constant 0 : index
    %433 = vector.load %arg1[%c0_161, %c0_162] : memref<128x384xf32, #tpu.memory_space<vmem>>, vector<128x384xf32>
    %cst_163 = arith.constant dense<0.000000e+00> : vector<8x384xf32>
    %434 = tpu.matmul %432, %433, %cst_163 {dimension_numbers = #tpu.dot_dimension_numbers<[1], [0], [0], [1], [0, 0, 1, 1], [], []>} : vector<8x128xf32>, vector<128x384xf32>, vector<8x384xf32> -> vector<8x384xf32>
    %c0_164 = arith.constant 0 : index
    %c0_165 = arith.constant 0 : index
    %435 = vector.load %arg2[%c0_164, %c0_165] : memref<128x384xf32, #tpu.memory_space<vmem>>, vector<128x384xf32>
    %cst_166 = arith.constant dense<0.000000e+00> : vector<8x384xf32>
    %436 = tpu.matmul %404, %435, %cst_166 {dimension_numbers = #tpu.dot_dimension_numbers<[1], [0], [0], [1], [0, 0, 1, 1], [], []>} : vector<8x128xf32>, vector<128x384xf32>, vector<8x384xf32> -> vector<8x384xf32>
    %c0_167 = arith.constant 0 : index
    %c0_168 = arith.constant 0 : index
    %437 = vector.load %arg3[%c0_167, %c0_168] : memref<1x384xf32, #tpu.memory_space<vmem>>, vector<1x384xf32>
    %438 = vector.broadcast %437 : vector<1x384xf32> to vector<8x384xf32>
    %439 = arith.addf %436, %438 : vector<8x384xf32>
    %440 = vector.extract_strided_slice %434 {offsets = [0, 0], sizes = [8, 128], strides = [1, 1]} : vector<8x384xf32> to vector<8x128xf32>
    %441 = vector.extract_strided_slice %439 {offsets = [0, 0], sizes = [8, 128], strides = [1, 1]} : vector<8x384xf32> to vector<8x128xf32>
    %442 = arith.addf %440, %441 : vector<8x128xf32>
    %443 = arith.negf %442 : vector<8x128xf32>
    %444 = math.exp %443 : vector<8x128xf32>
    %cst_169 = arith.constant 1.000000e+00 : f32
    %445 = vector.broadcast %cst_169 : f32 to vector<8x128xf32>
    %446 = arith.addf %445, %444 : vector<8x128xf32>
    %447 = arith.divf %445, %446 : vector<8x128xf32>
    %448 = vector.extract_strided_slice %434 {offsets = [0, 128], sizes = [8, 128], strides = [1, 1]} : vector<8x384xf32> to vector<8x128xf32>
    %449 = vector.extract_strided_slice %439 {offsets = [0, 128], sizes = [8, 128], strides = [1, 1]} : vector<8x384xf32> to vector<8x128xf32>
    %450 = arith.addf %448, %449 : vector<8x128xf32>
    %451 = arith.negf %450 : vector<8x128xf32>
    %452 = math.exp %451 : vector<8x128xf32>
    %cst_170 = arith.constant 1.000000e+00 : f32
    %453 = vector.broadcast %cst_170 : f32 to vector<8x128xf32>
    %454 = arith.addf %453, %452 : vector<8x128xf32>
    %455 = arith.divf %453, %454 : vector<8x128xf32>
    %456 = vector.extract_strided_slice %434 {offsets = [0, 256], sizes = [8, 128], strides = [1, 1]} : vector<8x384xf32> to vector<8x128xf32>
    %457 = vector.extract_strided_slice %439 {offsets = [0, 256], sizes = [8, 128], strides = [1, 1]} : vector<8x384xf32> to vector<8x128xf32>
    %458 = arith.mulf %447, %457 : vector<8x128xf32>
    %459 = arith.addf %456, %458 : vector<8x128xf32>
    %460 = math.tanh %459 : vector<8x128xf32>
    %cst_171 = arith.constant 1.000000e+00 : f32
    %461 = vector.broadcast %cst_171 : f32 to vector<8x128xf32>
    %462 = arith.subf %461, %455 : vector<8x128xf32>
    %463 = arith.mulf %462, %460 : vector<8x128xf32>
    %464 = arith.mulf %455, %404 : vector<8x128xf32>
    %465 = arith.addf %463, %464 : vector<8x128xf32>
    %c0_172 = arith.constant 0 : index
    %c0_173 = arith.constant 0 : index
    %466 = vector.load %arg4[%c0_172, %c0_173] : memref<128x128xf32, #tpu.memory_space<vmem>>, vector<128x128xf32>
    %cst_174 = arith.constant dense<0.000000e+00> : vector<8x128xf32>
    %467 = tpu.matmul %465, %466, %cst_174 {dimension_numbers = #tpu.dot_dimension_numbers<[1], [0], [0], [1], [0, 0, 1, 1], [], []>} : vector<8x128xf32>, vector<128x128xf32>, vector<8x128xf32> -> vector<8x128xf32>
    %c0_175 = arith.constant 0 : index
    %c0_176 = arith.constant 0 : index
    %468 = vector.load %arg5[%c0_175, %c0_176] : memref<1x128xf32, #tpu.memory_space<vmem>>, vector<1x128xf32>
    %469 = vector.broadcast %468 : vector<1x128xf32> to vector<8x128xf32>
    %470 = arith.addf %467, %469 : vector<8x128xf32>
    %cst_177 = arith.constant dense<0xFF800000> : vector<8xf32>
    %471 = vector.multi_reduction <maximumf>, %470, %cst_177 [1] : vector<8x128xf32> to vector<8xf32>
    %472 = vector.shape_cast %471 : vector<8xf32> to vector<8x1xf32>
    %473 = vector.broadcast %472 : vector<8x1xf32> to vector<8x128xf32>
    %474 = arith.subf %470, %473 : vector<8x128xf32>
    %475 = math.exp %474 : vector<8x128xf32>
    %cst_178 = arith.constant dense<0.000000e+00> : vector<8xf32>
    %476 = vector.multi_reduction <add>, %475, %cst_178 [1] : vector<8x128xf32> to vector<8xf32>
    %477 = vector.shape_cast %476 : vector<8xf32> to vector<8x1xf32>
    %478 = math.log %477 : vector<8x1xf32>
    %479 = vector.broadcast %478 : vector<8x1xf32> to vector<8x128xf32>
    %480 = arith.subf %474, %479 : vector<8x128xf32>
    %c7 = arith.constant 7 : index
    %c0_179 = arith.constant 0 : index
    %c0_180 = arith.constant 0 : index
    %481 = vector.load %arg7[%c7, %c0_179, %c0_180] : memref<8x8x128xf32, #tpu.memory_space<vmem>>, vector<1x8x128xf32>
    %482 = vector.shape_cast %481 : vector<1x8x128xf32> to vector<8x128xf32>
    %483 = vector.shape_cast %480 : vector<8x128xf32> to vector<1x8x128xf32>
    tpu.vector_store %arg7[%c7, %c0_179, %c0_180], %483 {strides = array<i32>} : memref<8x8x128xf32, #tpu.memory_space<vmem>>, vector<1x8x128xf32>,
    %c0_181 = arith.constant 0 : index
    %c0_182 = arith.constant 0 : index
    %484 = vector.load %arg8[%c0_181, %c0_182] : memref<8x128xf32, #tpu.memory_space<vmem>>, vector<8x128xf32>
    tpu.vector_store %arg8[%c0_181, %c0_182], %465 {strides = array<i32>} : memref<8x128xf32, #tpu.memory_space<vmem>>, vector<8x128xf32>,
    return
  }
  func.func @transform_0(%arg0: i32) -> (i32, i32) {
    %c0_i32 = arith.constant 0 : i32
    %c0_i32_0 = arith.constant 0 : i32
    %c0_i32_1 = arith.constant 0 : i32
    return %c0_i32, %c0_i32_0 : i32, i32
  }
  func.func @transform_1(%arg0: i32) -> (i32, i32) {
    %c0_i32 = arith.constant 0 : i32
    %c0_i32_0 = arith.constant 0 : i32
    %c0_i32_1 = arith.constant 0 : i32
    return %c0_i32, %c0_i32_0 : i32, i32
  }
  func.func @transform_2(%arg0: i32) -> (i32, i32) {
    %c0_i32 = arith.constant 0 : i32
    %c0_i32_0 = arith.constant 0 : i32
    %c0_i32_1 = arith.constant 0 : i32
    return %c0_i32, %c0_i32_0 : i32, i32
  }
  func.func @transform_3(%arg0: i32) -> (i32, i32) {
    %c0_i32 = arith.constant 0 : i32
    %c0_i32_0 = arith.constant 0 : i32
    %c0_i32_1 = arith.constant 0 : i32
    return %c0_i32, %c0_i32_0 : i32, i32
  }
  func.func @transform_4(%arg0: i32) -> (i32, i32) {
    %c0_i32 = arith.constant 0 : i32
    %c0_i32_0 = arith.constant 0 : i32
    %c0_i32_1 = arith.constant 0 : i32
    return %c0_i32, %c0_i32_0 : i32, i32
  }
  func.func @transform_5(%arg0: i32) -> (i32, i32) {
    %c0_i32 = arith.constant 0 : i32
    %c0_i32_0 = arith.constant 0 : i32
    %c0_i32_1 = arith.constant 0 : i32
    return %c0_i32, %c0_i32_0 : i32, i32
  }
  func.func @transform_6(%arg0: i32) -> (i32, i32, i32) {
    %c0_i32 = arith.constant 0 : i32
    %c0_i32_0 = arith.constant 0 : i32
    %c0_i32_1 = arith.constant 0 : i32
    %c0_i32_2 = arith.constant 0 : i32
    return %c0_i32, %c0_i32_0, %c0_i32_1 : i32, i32, i32
  }
  func.func @transform_7(%arg0: i32) -> (i32, i32) {
    %c0_i32 = arith.constant 0 : i32
    %c0_i32_0 = arith.constant 0 : i32
    %c0_i32_1 = arith.constant 0 : i32
    return %c0_i32, %c0_i32_0 : i32, i32
  }
}

module attributes {stable_mosaic.version = 11 : i64} {
  func.func @_decoder_kernel(%arg0: i32, %arg1: memref<128x384xf32, #tpu.memory_space<vmem>>, %arg2: memref<128x384xf32, #tpu.memory_space<vmem>>, %arg3: memref<1x384xf32, #tpu.memory_space<vmem>>, %arg4: memref<128x128xf32, #tpu.memory_space<vmem>>, %arg5: memref<1x128xf32, #tpu.memory_space<vmem>>, %arg6: memref<8x128xf32, #tpu.memory_space<vmem>>, %arg7: memref<8x8x128xf32, #tpu.memory_space<vmem>>, %arg8: memref<8x128xf32, #tpu.memory_space<vmem>>) attributes {dimension_semantics = [#tpu.dimension_semantics<arbitrary>], iteration_bounds = array<i64: 1>, scalar_prefetch = 0 : i64, scratch_operands = 0 : i64, tpu.core_type = #tpu.core_type<tc>, window_params = [{pipeline_mode = #tpu.pipeline_mode<synchronous>, transform_indices = @transform_0, window_bounds = array<i64: 128, 384>}, {pipeline_mode = #tpu.pipeline_mode<synchronous>, transform_indices = @transform_1, window_bounds = array<i64: 128, 384>}, {pipeline_mode = #tpu.pipeline_mode<synchronous>, transform_indices = @transform_2, window_bounds = array<i64: 1, 384>}, {pipeline_mode = #tpu.pipeline_mode<synchronous>, transform_indices = @transform_3, window_bounds = array<i64: 128, 128>}, {pipeline_mode = #tpu.pipeline_mode<synchronous>, transform_indices = @transform_4, window_bounds = array<i64: 1, 128>}, {pipeline_mode = #tpu.pipeline_mode<synchronous>, transform_indices = @transform_5, window_bounds = array<i64: 8, 128>}, {pipeline_mode = #tpu.pipeline_mode<synchronous>, transform_indices = @transform_6, window_bounds = array<i64: 8, 8, 128>}, {pipeline_mode = #tpu.pipeline_mode<synchronous>, transform_indices = @transform_7, window_bounds = array<i64: 8, 128>}]} {
    %0 = tpu.iota {dimensions = array<i32: 1>} : vector<8x128xi32>
    %c0 = arith.constant 0 : index
    %c0_0 = arith.constant 0 : index
    %1 = vector.load %arg6[%c0, %c0_0] : memref<8x128xf32, #tpu.memory_space<vmem>>, vector<8x128xf32>
    %c1_i32 = arith.constant 1 : i32
    %2 = vector.broadcast %c1_i32 : i32 to vector<8x128xi32>
    %3 = arith.cmpi eq, %0, %2 : vector<8x128xi32>
    %4 = arith.extui %3 : vector<8x128xi1> to vector<8x128xi32>
    %5 = arith.sitofp %4 : vector<8x128xi32> to vector<8x128xf32>
    %c0_1 = arith.constant 0 : index
    %c0_2 = arith.constant 0 : index
    %6 = vector.load %arg1[%c0_1, %c0_2] : memref<128x384xf32, #tpu.memory_space<vmem>>, vector<128x384xf32>
    %cst = arith.constant dense<0.000000e+00> : vector<8x384xf32>
    %7 = tpu.matmul %5, %6, %cst {dimension_numbers = #tpu.dot_dimension_numbers<[1], [0], [0], [1], [0, 0, 1, 1], [], []>} : vector<8x128xf32>, vector<128x384xf32>, vector<8x384xf32> -> vector<8x384xf32>
    %c0_3 = arith.constant 0 : index
    %c0_4 = arith.constant 0 : index
    %8 = vector.load %arg2[%c0_3, %c0_4] : memref<128x384xf32, #tpu.memory_space<vmem>>, vector<128x384xf32>
    %cst_5 = arith.constant dense<0.000000e+00> : vector<8x384xf32>
    %9 = tpu.matmul %1, %8, %cst_5 {dimension_numbers = #tpu.dot_dimension_numbers<[1], [0], [0], [1], [0, 0, 1, 1], [], []>} : vector<8x128xf32>, vector<128x384xf32>, vector<8x384xf32> -> vector<8x384xf32>
    %c0_6 = arith.constant 0 : index
    %c0_7 = arith.constant 0 : index
    %10 = vector.load %arg3[%c0_6, %c0_7] : memref<1x384xf32, #tpu.memory_space<vmem>>, vector<1x384xf32>
    %11 = vector.broadcast %10 : vector<1x384xf32> to vector<8x384xf32>
    %12 = arith.addf %9, %11 : vector<8x384xf32>
    %13 = vector.extract_strided_slice %7 {offsets = [0, 0], sizes = [8, 128], strides = [1, 1]} : vector<8x384xf32> to vector<8x128xf32>
    %14 = vector.extract_strided_slice %12 {offsets = [0, 0], sizes = [8, 128], strides = [1, 1]} : vector<8x384xf32> to vector<8x128xf32>
    %15 = arith.addf %13, %14 : vector<8x128xf32>
    %16 = arith.negf %15 : vector<8x128xf32>
    %17 = math.exp %16 : vector<8x128xf32>
    %cst_8 = arith.constant 1.000000e+00 : f32
    %18 = vector.broadcast %cst_8 : f32 to vector<8x128xf32>
    %19 = arith.addf %18, %17 : vector<8x128xf32>
    %20 = arith.divf %18, %19 : vector<8x128xf32>
    %21 = vector.extract_strided_slice %7 {offsets = [0, 128], sizes = [8, 128], strides = [1, 1]} : vector<8x384xf32> to vector<8x128xf32>
    %22 = vector.extract_strided_slice %12 {offsets = [0, 128], sizes = [8, 128], strides = [1, 1]} : vector<8x384xf32> to vector<8x128xf32>
    %23 = arith.addf %21, %22 : vector<8x128xf32>
    %24 = arith.negf %23 : vector<8x128xf32>
    %25 = math.exp %24 : vector<8x128xf32>
    %cst_9 = arith.constant 1.000000e+00 : f32
    %26 = vector.broadcast %cst_9 : f32 to vector<8x128xf32>
    %27 = arith.addf %26, %25 : vector<8x128xf32>
    %28 = arith.divf %26, %27 : vector<8x128xf32>
    %29 = vector.extract_strided_slice %7 {offsets = [0, 256], sizes = [8, 128], strides = [1, 1]} : vector<8x384xf32> to vector<8x128xf32>
    %30 = vector.extract_strided_slice %12 {offsets = [0, 256], sizes = [8, 128], strides = [1, 1]} : vector<8x384xf32> to vector<8x128xf32>
    %31 = arith.mulf %20, %30 : vector<8x128xf32>
    %32 = arith.addf %29, %31 : vector<8x128xf32>
    %33 = math.tanh %32 : vector<8x128xf32>
    %cst_10 = arith.constant 1.000000e+00 : f32
    %34 = vector.broadcast %cst_10 : f32 to vector<8x128xf32>
    %35 = arith.subf %34, %28 : vector<8x128xf32>
    %36 = arith.mulf %35, %33 : vector<8x128xf32>
    %37 = arith.mulf %28, %1 : vector<8x128xf32>
    %38 = arith.addf %36, %37 : vector<8x128xf32>
    %c0_11 = arith.constant 0 : index
    %c0_12 = arith.constant 0 : index
    %39 = vector.load %arg4[%c0_11, %c0_12] : memref<128x128xf32, #tpu.memory_space<vmem>>, vector<128x128xf32>
    %cst_13 = arith.constant dense<0.000000e+00> : vector<8x128xf32>
    %40 = tpu.matmul %38, %39, %cst_13 {dimension_numbers = #tpu.dot_dimension_numbers<[1], [0], [0], [1], [0, 0, 1, 1], [], []>} : vector<8x128xf32>, vector<128x128xf32>, vector<8x128xf32> -> vector<8x128xf32>
    %c0_14 = arith.constant 0 : index
    %c0_15 = arith.constant 0 : index
    %41 = vector.load %arg5[%c0_14, %c0_15] : memref<1x128xf32, #tpu.memory_space<vmem>>, vector<1x128xf32>
    %42 = vector.broadcast %41 : vector<1x128xf32> to vector<8x128xf32>
    %43 = arith.addf %40, %42 : vector<8x128xf32>
    %cst_16 = arith.constant dense<0xFF800000> : vector<8xf32>
    %44 = vector.multi_reduction <maximumf>, %43, %cst_16 [1] : vector<8x128xf32> to vector<8xf32>
    %45 = vector.shape_cast %44 : vector<8xf32> to vector<8x1xf32>
    %46 = vector.broadcast %45 : vector<8x1xf32> to vector<8x128xf32>
    %47 = arith.subf %43, %46 : vector<8x128xf32>
    %48 = math.exp %47 : vector<8x128xf32>
    %cst_17 = arith.constant dense<0.000000e+00> : vector<8xf32>
    %49 = vector.multi_reduction <add>, %48, %cst_17 [1] : vector<8x128xf32> to vector<8xf32>
    %50 = vector.shape_cast %49 : vector<8xf32> to vector<8x1xf32>
    %51 = math.log %50 : vector<8x1xf32>
    %52 = vector.broadcast %51 : vector<8x1xf32> to vector<8x128xf32>
    %53 = arith.subf %47, %52 : vector<8x128xf32>
    %c0_18 = arith.constant 0 : index
    %c0_19 = arith.constant 0 : index
    %c0_20 = arith.constant 0 : index
    %54 = vector.load %arg7[%c0_18, %c0_19, %c0_20] : memref<8x8x128xf32, #tpu.memory_space<vmem>>, vector<1x8x128xf32>
    %55 = vector.shape_cast %54 : vector<1x8x128xf32> to vector<8x128xf32>
    %56 = vector.shape_cast %53 : vector<8x128xf32> to vector<1x8x128xf32>
    tpu.vector_store %arg7[%c0_18, %c0_19, %c0_20], %56 {strides = array<i32>} : memref<8x8x128xf32, #tpu.memory_space<vmem>>, vector<1x8x128xf32>,
    %cst_21 = arith.constant 0.000000e+00 : f32
    %57 = vector.broadcast %cst_21 : f32 to vector<8x128xf32>
    %58 = arith.cmpf oeq, %47, %57 : vector<8x128xf32>
    %c128_i32 = arith.constant 128 : i32
    %59 = vector.broadcast %c128_i32 : i32 to vector<8x128xi32>
    %60 = arith.select %58, %0, %59 : vector<8x128xi1>, vector<8x128xi32>
    %cst_22 = arith.constant dense<2147483647> : vector<8xi32>
    %61 = vector.multi_reduction <minsi>, %60, %cst_22 [1] : vector<8x128xi32> to vector<8xi32>
    %62 = vector.shape_cast %61 : vector<8xi32> to vector<8x1xi32>
    %63 = vector.broadcast %62 : vector<8x1xi32> to vector<8x128xi32>
    %64 = arith.cmpi eq, %0, %63 : vector<8x128xi32>
    %65 = arith.extui %64 : vector<8x128xi1> to vector<8x128xi32>
    %66 = arith.sitofp %65 : vector<8x128xi32> to vector<8x128xf32>
    %c0_23 = arith.constant 0 : index
    %c0_24 = arith.constant 0 : index
    %67 = vector.load %arg1[%c0_23, %c0_24] : memref<128x384xf32, #tpu.memory_space<vmem>>, vector<128x384xf32>
    %cst_25 = arith.constant dense<0.000000e+00> : vector<8x384xf32>
    %68 = tpu.matmul %66, %67, %cst_25 {dimension_numbers = #tpu.dot_dimension_numbers<[1], [0], [0], [1], [0, 0, 1, 1], [], []>} : vector<8x128xf32>, vector<128x384xf32>, vector<8x384xf32> -> vector<8x384xf32>
    %c0_26 = arith.constant 0 : index
    %c0_27 = arith.constant 0 : index
    %69 = vector.load %arg2[%c0_26, %c0_27] : memref<128x384xf32, #tpu.memory_space<vmem>>, vector<128x384xf32>
    %cst_28 = arith.constant dense<0.000000e+00> : vector<8x384xf32>
    %70 = tpu.matmul %38, %69, %cst_28 {dimension_numbers = #tpu.dot_dimension_numbers<[1], [0], [0], [1], [0, 0, 1, 1], [], []>} : vector<8x128xf32>, vector<128x384xf32>, vector<8x384xf32> -> vector<8x384xf32>
    %c0_29 = arith.constant 0 : index
    %c0_30 = arith.constant 0 : index
    %71 = vector.load %arg3[%c0_29, %c0_30] : memref<1x384xf32, #tpu.memory_space<vmem>>, vector<1x384xf32>
    %72 = vector.broadcast %71 : vector<1x384xf32> to vector<8x384xf32>
    %73 = arith.addf %70, %72 : vector<8x384xf32>
    %74 = vector.extract_strided_slice %68 {offsets = [0, 0], sizes = [8, 128], strides = [1, 1]} : vector<8x384xf32> to vector<8x128xf32>
    %75 = vector.extract_strided_slice %73 {offsets = [0, 0], sizes = [8, 128], strides = [1, 1]} : vector<8x384xf32> to vector<8x128xf32>
    %76 = arith.addf %74, %75 : vector<8x128xf32>
    %77 = arith.negf %76 : vector<8x128xf32>
    %78 = math.exp %77 : vector<8x128xf32>
    %cst_31 = arith.constant 1.000000e+00 : f32
    %79 = vector.broadcast %cst_31 : f32 to vector<8x128xf32>
    %80 = arith.addf %79, %78 : vector<8x128xf32>
    %81 = arith.divf %79, %80 : vector<8x128xf32>
    %82 = vector.extract_strided_slice %68 {offsets = [0, 128], sizes = [8, 128], strides = [1, 1]} : vector<8x384xf32> to vector<8x128xf32>
    %83 = vector.extract_strided_slice %73 {offsets = [0, 128], sizes = [8, 128], strides = [1, 1]} : vector<8x384xf32> to vector<8x128xf32>
    %84 = arith.addf %82, %83 : vector<8x128xf32>
    %85 = arith.negf %84 : vector<8x128xf32>
    %86 = math.exp %85 : vector<8x128xf32>
    %cst_32 = arith.constant 1.000000e+00 : f32
    %87 = vector.broadcast %cst_32 : f32 to vector<8x128xf32>
    %88 = arith.addf %87, %86 : vector<8x128xf32>
    %89 = arith.divf %87, %88 : vector<8x128xf32>
    %90 = vector.extract_strided_slice %68 {offsets = [0, 256], sizes = [8, 128], strides = [1, 1]} : vector<8x384xf32> to vector<8x128xf32>
    %91 = vector.extract_strided_slice %73 {offsets = [0, 256], sizes = [8, 128], strides = [1, 1]} : vector<8x384xf32> to vector<8x128xf32>
    %92 = arith.mulf %81, %91 : vector<8x128xf32>
    %93 = arith.addf %90, %92 : vector<8x128xf32>
    %94 = math.tanh %93 : vector<8x128xf32>
    %cst_33 = arith.constant 1.000000e+00 : f32
    %95 = vector.broadcast %cst_33 : f32 to vector<8x128xf32>
    %96 = arith.subf %95, %89 : vector<8x128xf32>
    %97 = arith.mulf %96, %94 : vector<8x128xf32>
    %98 = arith.mulf %89, %38 : vector<8x128xf32>
    %99 = arith.addf %97, %98 : vector<8x128xf32>
    %c0_34 = arith.constant 0 : index
    %c0_35 = arith.constant 0 : index
    %100 = vector.load %arg4[%c0_34, %c0_35] : memref<128x128xf32, #tpu.memory_space<vmem>>, vector<128x128xf32>
    %cst_36 = arith.constant dense<0.000000e+00> : vector<8x128xf32>
    %101 = tpu.matmul %99, %100, %cst_36 {dimension_numbers = #tpu.dot_dimension_numbers<[1], [0], [0], [1], [0, 0, 1, 1], [], []>} : vector<8x128xf32>, vector<128x128xf32>, vector<8x128xf32> -> vector<8x128xf32>
    %c0_37 = arith.constant 0 : index
    %c0_38 = arith.constant 0 : index
    %102 = vector.load %arg5[%c0_37, %c0_38] : memref<1x128xf32, #tpu.memory_space<vmem>>, vector<1x128xf32>
    %103 = vector.broadcast %102 : vector<1x128xf32> to vector<8x128xf32>
    %104 = arith.addf %101, %103 : vector<8x128xf32>
    %cst_39 = arith.constant dense<0xFF800000> : vector<8xf32>
    %105 = vector.multi_reduction <maximumf>, %104, %cst_39 [1] : vector<8x128xf32> to vector<8xf32>
    %106 = vector.shape_cast %105 : vector<8xf32> to vector<8x1xf32>
    %107 = vector.broadcast %106 : vector<8x1xf32> to vector<8x128xf32>
    %108 = arith.subf %104, %107 : vector<8x128xf32>
    %109 = math.exp %108 : vector<8x128xf32>
    %cst_40 = arith.constant dense<0.000000e+00> : vector<8xf32>
    %110 = vector.multi_reduction <add>, %109, %cst_40 [1] : vector<8x128xf32> to vector<8xf32>
    %111 = vector.shape_cast %110 : vector<8xf32> to vector<8x1xf32>
    %112 = math.log %111 : vector<8x1xf32>
    %113 = vector.broadcast %112 : vector<8x1xf32> to vector<8x128xf32>
    %114 = arith.subf %108, %113 : vector<8x128xf32>
    %c1 = arith.constant 1 : index
    %c0_41 = arith.constant 0 : index
    %c0_42 = arith.constant 0 : index
    %115 = vector.load %arg7[%c1, %c0_41, %c0_42] : memref<8x8x128xf32, #tpu.memory_space<vmem>>, vector<1x8x128xf32>
    %116 = vector.shape_cast %115 : vector<1x8x128xf32> to vector<8x128xf32>
    %117 = vector.shape_cast %114 : vector<8x128xf32> to vector<1x8x128xf32>
    tpu.vector_store %arg7[%c1, %c0_41, %c0_42], %117 {strides = array<i32>} : memref<8x8x128xf32, #tpu.memory_space<vmem>>, vector<1x8x128xf32>,
    %cst_43 = arith.constant 0.000000e+00 : f32
    %118 = vector.broadcast %cst_43 : f32 to vector<8x128xf32>
    %119 = arith.cmpf oeq, %108, %118 : vector<8x128xf32>
    %c128_i32_44 = arith.constant 128 : i32
    %120 = vector.broadcast %c128_i32_44 : i32 to vector<8x128xi32>
    %121 = arith.select %119, %0, %120 : vector<8x128xi1>, vector<8x128xi32>
    %cst_45 = arith.constant dense<2147483647> : vector<8xi32>
    %122 = vector.multi_reduction <minsi>, %121, %cst_45 [1] : vector<8x128xi32> to vector<8xi32>
    %123 = vector.shape_cast %122 : vector<8xi32> to vector<8x1xi32>
    %124 = vector.broadcast %123 : vector<8x1xi32> to vector<8x128xi32>
    %125 = arith.cmpi eq, %0, %124 : vector<8x128xi32>
    %126 = arith.extui %125 : vector<8x128xi1> to vector<8x128xi32>
    %127 = arith.sitofp %126 : vector<8x128xi32> to vector<8x128xf32>
    %c0_46 = arith.constant 0 : index
    %c0_47 = arith.constant 0 : index
    %128 = vector.load %arg1[%c0_46, %c0_47] : memref<128x384xf32, #tpu.memory_space<vmem>>, vector<128x384xf32>
    %cst_48 = arith.constant dense<0.000000e+00> : vector<8x384xf32>
    %129 = tpu.matmul %127, %128, %cst_48 {dimension_numbers = #tpu.dot_dimension_numbers<[1], [0], [0], [1], [0, 0, 1, 1], [], []>} : vector<8x128xf32>, vector<128x384xf32>, vector<8x384xf32> -> vector<8x384xf32>
    %c0_49 = arith.constant 0 : index
    %c0_50 = arith.constant 0 : index
    %130 = vector.load %arg2[%c0_49, %c0_50] : memref<128x384xf32, #tpu.memory_space<vmem>>, vector<128x384xf32>
    %cst_51 = arith.constant dense<0.000000e+00> : vector<8x384xf32>
    %131 = tpu.matmul %99, %130, %cst_51 {dimension_numbers = #tpu.dot_dimension_numbers<[1], [0], [0], [1], [0, 0, 1, 1], [], []>} : vector<8x128xf32>, vector<128x384xf32>, vector<8x384xf32> -> vector<8x384xf32>
    %c0_52 = arith.constant 0 : index
    %c0_53 = arith.constant 0 : index
    %132 = vector.load %arg3[%c0_52, %c0_53] : memref<1x384xf32, #tpu.memory_space<vmem>>, vector<1x384xf32>
    %133 = vector.broadcast %132 : vector<1x384xf32> to vector<8x384xf32>
    %134 = arith.addf %131, %133 : vector<8x384xf32>
    %135 = vector.extract_strided_slice %129 {offsets = [0, 0], sizes = [8, 128], strides = [1, 1]} : vector<8x384xf32> to vector<8x128xf32>
    %136 = vector.extract_strided_slice %134 {offsets = [0, 0], sizes = [8, 128], strides = [1, 1]} : vector<8x384xf32> to vector<8x128xf32>
    %137 = arith.addf %135, %136 : vector<8x128xf32>
    %138 = arith.negf %137 : vector<8x128xf32>
    %139 = math.exp %138 : vector<8x128xf32>
    %cst_54 = arith.constant 1.000000e+00 : f32
    %140 = vector.broadcast %cst_54 : f32 to vector<8x128xf32>
    %141 = arith.addf %140, %139 : vector<8x128xf32>
    %142 = arith.divf %140, %141 : vector<8x128xf32>
    %143 = vector.extract_strided_slice %129 {offsets = [0, 128], sizes = [8, 128], strides = [1, 1]} : vector<8x384xf32> to vector<8x128xf32>
    %144 = vector.extract_strided_slice %134 {offsets = [0, 128], sizes = [8, 128], strides = [1, 1]} : vector<8x384xf32> to vector<8x128xf32>
    %145 = arith.addf %143, %144 : vector<8x128xf32>
    %146 = arith.negf %145 : vector<8x128xf32>
    %147 = math.exp %146 : vector<8x128xf32>
    %cst_55 = arith.constant 1.000000e+00 : f32
    %148 = vector.broadcast %cst_55 : f32 to vector<8x128xf32>
    %149 = arith.addf %148, %147 : vector<8x128xf32>
    %150 = arith.divf %148, %149 : vector<8x128xf32>
    %151 = vector.extract_strided_slice %129 {offsets = [0, 256], sizes = [8, 128], strides = [1, 1]} : vector<8x384xf32> to vector<8x128xf32>
    %152 = vector.extract_strided_slice %134 {offsets = [0, 256], sizes = [8, 128], strides = [1, 1]} : vector<8x384xf32> to vector<8x128xf32>
    %153 = arith.mulf %142, %152 : vector<8x128xf32>
    %154 = arith.addf %151, %153 : vector<8x128xf32>
    %155 = math.tanh %154 : vector<8x128xf32>
    %cst_56 = arith.constant 1.000000e+00 : f32
    %156 = vector.broadcast %cst_56 : f32 to vector<8x128xf32>
    %157 = arith.subf %156, %150 : vector<8x128xf32>
    %158 = arith.mulf %157, %155 : vector<8x128xf32>
    %159 = arith.mulf %150, %99 : vector<8x128xf32>
    %160 = arith.addf %158, %159 : vector<8x128xf32>
    %c0_57 = arith.constant 0 : index
    %c0_58 = arith.constant 0 : index
    %161 = vector.load %arg4[%c0_57, %c0_58] : memref<128x128xf32, #tpu.memory_space<vmem>>, vector<128x128xf32>
    %cst_59 = arith.constant dense<0.000000e+00> : vector<8x128xf32>
    %162 = tpu.matmul %160, %161, %cst_59 {dimension_numbers = #tpu.dot_dimension_numbers<[1], [0], [0], [1], [0, 0, 1, 1], [], []>} : vector<8x128xf32>, vector<128x128xf32>, vector<8x128xf32> -> vector<8x128xf32>
    %c0_60 = arith.constant 0 : index
    %c0_61 = arith.constant 0 : index
    %163 = vector.load %arg5[%c0_60, %c0_61] : memref<1x128xf32, #tpu.memory_space<vmem>>, vector<1x128xf32>
    %164 = vector.broadcast %163 : vector<1x128xf32> to vector<8x128xf32>
    %165 = arith.addf %162, %164 : vector<8x128xf32>
    %cst_62 = arith.constant dense<0xFF800000> : vector<8xf32>
    %166 = vector.multi_reduction <maximumf>, %165, %cst_62 [1] : vector<8x128xf32> to vector<8xf32>
    %167 = vector.shape_cast %166 : vector<8xf32> to vector<8x1xf32>
    %168 = vector.broadcast %167 : vector<8x1xf32> to vector<8x128xf32>
    %169 = arith.subf %165, %168 : vector<8x128xf32>
    %170 = math.exp %169 : vector<8x128xf32>
    %cst_63 = arith.constant dense<0.000000e+00> : vector<8xf32>
    %171 = vector.multi_reduction <add>, %170, %cst_63 [1] : vector<8x128xf32> to vector<8xf32>
    %172 = vector.shape_cast %171 : vector<8xf32> to vector<8x1xf32>
    %173 = math.log %172 : vector<8x1xf32>
    %174 = vector.broadcast %173 : vector<8x1xf32> to vector<8x128xf32>
    %175 = arith.subf %169, %174 : vector<8x128xf32>
    %c2 = arith.constant 2 : index
    %c0_64 = arith.constant 0 : index
    %c0_65 = arith.constant 0 : index
    %176 = vector.load %arg7[%c2, %c0_64, %c0_65] : memref<8x8x128xf32, #tpu.memory_space<vmem>>, vector<1x8x128xf32>
    %177 = vector.shape_cast %176 : vector<1x8x128xf32> to vector<8x128xf32>
    %178 = vector.shape_cast %175 : vector<8x128xf32> to vector<1x8x128xf32>
    tpu.vector_store %arg7[%c2, %c0_64, %c0_65], %178 {strides = array<i32>} : memref<8x8x128xf32, #tpu.memory_space<vmem>>, vector<1x8x128xf32>,
    %cst_66 = arith.constant 0.000000e+00 : f32
    %179 = vector.broadcast %cst_66 : f32 to vector<8x128xf32>
    %180 = arith.cmpf oeq, %169, %179 : vector<8x128xf32>
    %c128_i32_67 = arith.constant 128 : i32
    %181 = vector.broadcast %c128_i32_67 : i32 to vector<8x128xi32>
    %182 = arith.select %180, %0, %181 : vector<8x128xi1>, vector<8x128xi32>
    %cst_68 = arith.constant dense<2147483647> : vector<8xi32>
    %183 = vector.multi_reduction <minsi>, %182, %cst_68 [1] : vector<8x128xi32> to vector<8xi32>
    %184 = vector.shape_cast %183 : vector<8xi32> to vector<8x1xi32>
    %185 = vector.broadcast %184 : vector<8x1xi32> to vector<8x128xi32>
    %186 = arith.cmpi eq, %0, %185 : vector<8x128xi32>
    %187 = arith.extui %186 : vector<8x128xi1> to vector<8x128xi32>
    %188 = arith.sitofp %187 : vector<8x128xi32> to vector<8x128xf32>
    %c0_69 = arith.constant 0 : index
    %c0_70 = arith.constant 0 : index
    %189 = vector.load %arg1[%c0_69, %c0_70] : memref<128x384xf32, #tpu.memory_space<vmem>>, vector<128x384xf32>
    %cst_71 = arith.constant dense<0.000000e+00> : vector<8x384xf32>
    %190 = tpu.matmul %188, %189, %cst_71 {dimension_numbers = #tpu.dot_dimension_numbers<[1], [0], [0], [1], [0, 0, 1, 1], [], []>} : vector<8x128xf32>, vector<128x384xf32>, vector<8x384xf32> -> vector<8x384xf32>
    %c0_72 = arith.constant 0 : index
    %c0_73 = arith.constant 0 : index
    %191 = vector.load %arg2[%c0_72, %c0_73] : memref<128x384xf32, #tpu.memory_space<vmem>>, vector<128x384xf32>
    %cst_74 = arith.constant dense<0.000000e+00> : vector<8x384xf32>
    %192 = tpu.matmul %160, %191, %cst_74 {dimension_numbers = #tpu.dot_dimension_numbers<[1], [0], [0], [1], [0, 0, 1, 1], [], []>} : vector<8x128xf32>, vector<128x384xf32>, vector<8x384xf32> -> vector<8x384xf32>
    %c0_75 = arith.constant 0 : index
    %c0_76 = arith.constant 0 : index
    %193 = vector.load %arg3[%c0_75, %c0_76] : memref<1x384xf32, #tpu.memory_space<vmem>>, vector<1x384xf32>
    %194 = vector.broadcast %193 : vector<1x384xf32> to vector<8x384xf32>
    %195 = arith.addf %192, %194 : vector<8x384xf32>
    %196 = vector.extract_strided_slice %190 {offsets = [0, 0], sizes = [8, 128], strides = [1, 1]} : vector<8x384xf32> to vector<8x128xf32>
    %197 = vector.extract_strided_slice %195 {offsets = [0, 0], sizes = [8, 128], strides = [1, 1]} : vector<8x384xf32> to vector<8x128xf32>
    %198 = arith.addf %196, %197 : vector<8x128xf32>
    %199 = arith.negf %198 : vector<8x128xf32>
    %200 = math.exp %199 : vector<8x128xf32>
    %cst_77 = arith.constant 1.000000e+00 : f32
    %201 = vector.broadcast %cst_77 : f32 to vector<8x128xf32>
    %202 = arith.addf %201, %200 : vector<8x128xf32>
    %203 = arith.divf %201, %202 : vector<8x128xf32>
    %204 = vector.extract_strided_slice %190 {offsets = [0, 128], sizes = [8, 128], strides = [1, 1]} : vector<8x384xf32> to vector<8x128xf32>
    %205 = vector.extract_strided_slice %195 {offsets = [0, 128], sizes = [8, 128], strides = [1, 1]} : vector<8x384xf32> to vector<8x128xf32>
    %206 = arith.addf %204, %205 : vector<8x128xf32>
    %207 = arith.negf %206 : vector<8x128xf32>
    %208 = math.exp %207 : vector<8x128xf32>
    %cst_78 = arith.constant 1.000000e+00 : f32
    %209 = vector.broadcast %cst_78 : f32 to vector<8x128xf32>
    %210 = arith.addf %209, %208 : vector<8x128xf32>
    %211 = arith.divf %209, %210 : vector<8x128xf32>
    %212 = vector.extract_strided_slice %190 {offsets = [0, 256], sizes = [8, 128], strides = [1, 1]} : vector<8x384xf32> to vector<8x128xf32>
    %213 = vector.extract_strided_slice %195 {offsets = [0, 256], sizes = [8, 128], strides = [1, 1]} : vector<8x384xf32> to vector<8x128xf32>
    %214 = arith.mulf %203, %213 : vector<8x128xf32>
    %215 = arith.addf %212, %214 : vector<8x128xf32>
    %216 = math.tanh %215 : vector<8x128xf32>
    %cst_79 = arith.constant 1.000000e+00 : f32
    %217 = vector.broadcast %cst_79 : f32 to vector<8x128xf32>
    %218 = arith.subf %217, %211 : vector<8x128xf32>
    %219 = arith.mulf %218, %216 : vector<8x128xf32>
    %220 = arith.mulf %211, %160 : vector<8x128xf32>
    %221 = arith.addf %219, %220 : vector<8x128xf32>
    %c0_80 = arith.constant 0 : index
    %c0_81 = arith.constant 0 : index
    %222 = vector.load %arg4[%c0_80, %c0_81] : memref<128x128xf32, #tpu.memory_space<vmem>>, vector<128x128xf32>
    %cst_82 = arith.constant dense<0.000000e+00> : vector<8x128xf32>
    %223 = tpu.matmul %221, %222, %cst_82 {dimension_numbers = #tpu.dot_dimension_numbers<[1], [0], [0], [1], [0, 0, 1, 1], [], []>} : vector<8x128xf32>, vector<128x128xf32>, vector<8x128xf32> -> vector<8x128xf32>
    %c0_83 = arith.constant 0 : index
    %c0_84 = arith.constant 0 : index
    %224 = vector.load %arg5[%c0_83, %c0_84] : memref<1x128xf32, #tpu.memory_space<vmem>>, vector<1x128xf32>
    %225 = vector.broadcast %224 : vector<1x128xf32> to vector<8x128xf32>
    %226 = arith.addf %223, %225 : vector<8x128xf32>
    %cst_85 = arith.constant dense<0xFF800000> : vector<8xf32>
    %227 = vector.multi_reduction <maximumf>, %226, %cst_85 [1] : vector<8x128xf32> to vector<8xf32>
    %228 = vector.shape_cast %227 : vector<8xf32> to vector<8x1xf32>
    %229 = vector.broadcast %228 : vector<8x1xf32> to vector<8x128xf32>
    %230 = arith.subf %226, %229 : vector<8x128xf32>
    %231 = math.exp %230 : vector<8x128xf32>
    %cst_86 = arith.constant dense<0.000000e+00> : vector<8xf32>
    %232 = vector.multi_reduction <add>, %231, %cst_86 [1] : vector<8x128xf32> to vector<8xf32>
    %233 = vector.shape_cast %232 : vector<8xf32> to vector<8x1xf32>
    %234 = math.log %233 : vector<8x1xf32>
    %235 = vector.broadcast %234 : vector<8x1xf32> to vector<8x128xf32>
    %236 = arith.subf %230, %235 : vector<8x128xf32>
    %c3 = arith.constant 3 : index
    %c0_87 = arith.constant 0 : index
    %c0_88 = arith.constant 0 : index
    %237 = vector.load %arg7[%c3, %c0_87, %c0_88] : memref<8x8x128xf32, #tpu.memory_space<vmem>>, vector<1x8x128xf32>
    %238 = vector.shape_cast %237 : vector<1x8x128xf32> to vector<8x128xf32>
    %239 = vector.shape_cast %236 : vector<8x128xf32> to vector<1x8x128xf32>
    tpu.vector_store %arg7[%c3, %c0_87, %c0_88], %239 {strides = array<i32>} : memref<8x8x128xf32, #tpu.memory_space<vmem>>, vector<1x8x128xf32>,
    %cst_89 = arith.constant 0.000000e+00 : f32
    %240 = vector.broadcast %cst_89 : f32 to vector<8x128xf32>
    %241 = arith.cmpf oeq, %230, %240 : vector<8x128xf32>
    %c128_i32_90 = arith.constant 128 : i32
    %242 = vector.broadcast %c128_i32_90 : i32 to vector<8x128xi32>
    %243 = arith.select %241, %0, %242 : vector<8x128xi1>, vector<8x128xi32>
    %cst_91 = arith.constant dense<2147483647> : vector<8xi32>
    %244 = vector.multi_reduction <minsi>, %243, %cst_91 [1] : vector<8x128xi32> to vector<8xi32>
    %245 = vector.shape_cast %244 : vector<8xi32> to vector<8x1xi32>
    %246 = vector.broadcast %245 : vector<8x1xi32> to vector<8x128xi32>
    %247 = arith.cmpi eq, %0, %246 : vector<8x128xi32>
    %248 = arith.extui %247 : vector<8x128xi1> to vector<8x128xi32>
    %249 = arith.sitofp %248 : vector<8x128xi32> to vector<8x128xf32>
    %c0_92 = arith.constant 0 : index
    %c0_93 = arith.constant 0 : index
    %250 = vector.load %arg1[%c0_92, %c0_93] : memref<128x384xf32, #tpu.memory_space<vmem>>, vector<128x384xf32>
    %cst_94 = arith.constant dense<0.000000e+00> : vector<8x384xf32>
    %251 = tpu.matmul %249, %250, %cst_94 {dimension_numbers = #tpu.dot_dimension_numbers<[1], [0], [0], [1], [0, 0, 1, 1], [], []>} : vector<8x128xf32>, vector<128x384xf32>, vector<8x384xf32> -> vector<8x384xf32>
    %c0_95 = arith.constant 0 : index
    %c0_96 = arith.constant 0 : index
    %252 = vector.load %arg2[%c0_95, %c0_96] : memref<128x384xf32, #tpu.memory_space<vmem>>, vector<128x384xf32>
    %cst_97 = arith.constant dense<0.000000e+00> : vector<8x384xf32>
    %253 = tpu.matmul %221, %252, %cst_97 {dimension_numbers = #tpu.dot_dimension_numbers<[1], [0], [0], [1], [0, 0, 1, 1], [], []>} : vector<8x128xf32>, vector<128x384xf32>, vector<8x384xf32> -> vector<8x384xf32>
    %c0_98 = arith.constant 0 : index
    %c0_99 = arith.constant 0 : index
    %254 = vector.load %arg3[%c0_98, %c0_99] : memref<1x384xf32, #tpu.memory_space<vmem>>, vector<1x384xf32>
    %255 = vector.broadcast %254 : vector<1x384xf32> to vector<8x384xf32>
    %256 = arith.addf %253, %255 : vector<8x384xf32>
    %257 = vector.extract_strided_slice %251 {offsets = [0, 0], sizes = [8, 128], strides = [1, 1]} : vector<8x384xf32> to vector<8x128xf32>
    %258 = vector.extract_strided_slice %256 {offsets = [0, 0], sizes = [8, 128], strides = [1, 1]} : vector<8x384xf32> to vector<8x128xf32>
    %259 = arith.addf %257, %258 : vector<8x128xf32>
    %260 = arith.negf %259 : vector<8x128xf32>
    %261 = math.exp %260 : vector<8x128xf32>
    %cst_100 = arith.constant 1.000000e+00 : f32
    %262 = vector.broadcast %cst_100 : f32 to vector<8x128xf32>
    %263 = arith.addf %262, %261 : vector<8x128xf32>
    %264 = arith.divf %262, %263 : vector<8x128xf32>
    %265 = vector.extract_strided_slice %251 {offsets = [0, 128], sizes = [8, 128], strides = [1, 1]} : vector<8x384xf32> to vector<8x128xf32>
    %266 = vector.extract_strided_slice %256 {offsets = [0, 128], sizes = [8, 128], strides = [1, 1]} : vector<8x384xf32> to vector<8x128xf32>
    %267 = arith.addf %265, %266 : vector<8x128xf32>
    %268 = arith.negf %267 : vector<8x128xf32>
    %269 = math.exp %268 : vector<8x128xf32>
    %cst_101 = arith.constant 1.000000e+00 : f32
    %270 = vector.broadcast %cst_101 : f32 to vector<8x128xf32>
    %271 = arith.addf %270, %269 : vector<8x128xf32>
    %272 = arith.divf %270, %271 : vector<8x128xf32>
    %273 = vector.extract_strided_slice %251 {offsets = [0, 256], sizes = [8, 128], strides = [1, 1]} : vector<8x384xf32> to vector<8x128xf32>
    %274 = vector.extract_strided_slice %256 {offsets = [0, 256], sizes = [8, 128], strides = [1, 1]} : vector<8x384xf32> to vector<8x128xf32>
    %275 = arith.mulf %264, %274 : vector<8x128xf32>
    %276 = arith.addf %273, %275 : vector<8x128xf32>
    %277 = math.tanh %276 : vector<8x128xf32>
    %cst_102 = arith.constant 1.000000e+00 : f32
    %278 = vector.broadcast %cst_102 : f32 to vector<8x128xf32>
    %279 = arith.subf %278, %272 : vector<8x128xf32>
    %280 = arith.mulf %279, %277 : vector<8x128xf32>
    %281 = arith.mulf %272, %221 : vector<8x128xf32>
    %282 = arith.addf %280, %281 : vector<8x128xf32>
    %c0_103 = arith.constant 0 : index
    %c0_104 = arith.constant 0 : index
    %283 = vector.load %arg4[%c0_103, %c0_104] : memref<128x128xf32, #tpu.memory_space<vmem>>, vector<128x128xf32>
    %cst_105 = arith.constant dense<0.000000e+00> : vector<8x128xf32>
    %284 = tpu.matmul %282, %283, %cst_105 {dimension_numbers = #tpu.dot_dimension_numbers<[1], [0], [0], [1], [0, 0, 1, 1], [], []>} : vector<8x128xf32>, vector<128x128xf32>, vector<8x128xf32> -> vector<8x128xf32>
    %c0_106 = arith.constant 0 : index
    %c0_107 = arith.constant 0 : index
    %285 = vector.load %arg5[%c0_106, %c0_107] : memref<1x128xf32, #tpu.memory_space<vmem>>, vector<1x128xf32>
    %286 = vector.broadcast %285 : vector<1x128xf32> to vector<8x128xf32>
    %287 = arith.addf %284, %286 : vector<8x128xf32>
    %cst_108 = arith.constant dense<0xFF800000> : vector<8xf32>
    %288 = vector.multi_reduction <maximumf>, %287, %cst_108 [1] : vector<8x128xf32> to vector<8xf32>
    %289 = vector.shape_cast %288 : vector<8xf32> to vector<8x1xf32>
    %290 = vector.broadcast %289 : vector<8x1xf32> to vector<8x128xf32>
    %291 = arith.subf %287, %290 : vector<8x128xf32>
    %292 = math.exp %291 : vector<8x128xf32>
    %cst_109 = arith.constant dense<0.000000e+00> : vector<8xf32>
    %293 = vector.multi_reduction <add>, %292, %cst_109 [1] : vector<8x128xf32> to vector<8xf32>
    %294 = vector.shape_cast %293 : vector<8xf32> to vector<8x1xf32>
    %295 = math.log %294 : vector<8x1xf32>
    %296 = vector.broadcast %295 : vector<8x1xf32> to vector<8x128xf32>
    %297 = arith.subf %291, %296 : vector<8x128xf32>
    %c4 = arith.constant 4 : index
    %c0_110 = arith.constant 0 : index
    %c0_111 = arith.constant 0 : index
    %298 = vector.load %arg7[%c4, %c0_110, %c0_111] : memref<8x8x128xf32, #tpu.memory_space<vmem>>, vector<1x8x128xf32>
    %299 = vector.shape_cast %298 : vector<1x8x128xf32> to vector<8x128xf32>
    %300 = vector.shape_cast %297 : vector<8x128xf32> to vector<1x8x128xf32>
    tpu.vector_store %arg7[%c4, %c0_110, %c0_111], %300 {strides = array<i32>} : memref<8x8x128xf32, #tpu.memory_space<vmem>>, vector<1x8x128xf32>,
    %cst_112 = arith.constant 0.000000e+00 : f32
    %301 = vector.broadcast %cst_112 : f32 to vector<8x128xf32>
    %302 = arith.cmpf oeq, %291, %301 : vector<8x128xf32>
    %c128_i32_113 = arith.constant 128 : i32
    %303 = vector.broadcast %c128_i32_113 : i32 to vector<8x128xi32>
    %304 = arith.select %302, %0, %303 : vector<8x128xi1>, vector<8x128xi32>
    %cst_114 = arith.constant dense<2147483647> : vector<8xi32>
    %305 = vector.multi_reduction <minsi>, %304, %cst_114 [1] : vector<8x128xi32> to vector<8xi32>
    %306 = vector.shape_cast %305 : vector<8xi32> to vector<8x1xi32>
    %307 = vector.broadcast %306 : vector<8x1xi32> to vector<8x128xi32>
    %308 = arith.cmpi eq, %0, %307 : vector<8x128xi32>
    %309 = arith.extui %308 : vector<8x128xi1> to vector<8x128xi32>
    %310 = arith.sitofp %309 : vector<8x128xi32> to vector<8x128xf32>
    %c0_115 = arith.constant 0 : index
    %c0_116 = arith.constant 0 : index
    %311 = vector.load %arg1[%c0_115, %c0_116] : memref<128x384xf32, #tpu.memory_space<vmem>>, vector<128x384xf32>
    %cst_117 = arith.constant dense<0.000000e+00> : vector<8x384xf32>
    %312 = tpu.matmul %310, %311, %cst_117 {dimension_numbers = #tpu.dot_dimension_numbers<[1], [0], [0], [1], [0, 0, 1, 1], [], []>} : vector<8x128xf32>, vector<128x384xf32>, vector<8x384xf32> -> vector<8x384xf32>
    %c0_118 = arith.constant 0 : index
    %c0_119 = arith.constant 0 : index
    %313 = vector.load %arg2[%c0_118, %c0_119] : memref<128x384xf32, #tpu.memory_space<vmem>>, vector<128x384xf32>
    %cst_120 = arith.constant dense<0.000000e+00> : vector<8x384xf32>
    %314 = tpu.matmul %282, %313, %cst_120 {dimension_numbers = #tpu.dot_dimension_numbers<[1], [0], [0], [1], [0, 0, 1, 1], [], []>} : vector<8x128xf32>, vector<128x384xf32>, vector<8x384xf32> -> vector<8x384xf32>
    %c0_121 = arith.constant 0 : index
    %c0_122 = arith.constant 0 : index
    %315 = vector.load %arg3[%c0_121, %c0_122] : memref<1x384xf32, #tpu.memory_space<vmem>>, vector<1x384xf32>
    %316 = vector.broadcast %315 : vector<1x384xf32> to vector<8x384xf32>
    %317 = arith.addf %314, %316 : vector<8x384xf32>
    %318 = vector.extract_strided_slice %312 {offsets = [0, 0], sizes = [8, 128], strides = [1, 1]} : vector<8x384xf32> to vector<8x128xf32>
    %319 = vector.extract_strided_slice %317 {offsets = [0, 0], sizes = [8, 128], strides = [1, 1]} : vector<8x384xf32> to vector<8x128xf32>
    %320 = arith.addf %318, %319 : vector<8x128xf32>
    %321 = arith.negf %320 : vector<8x128xf32>
    %322 = math.exp %321 : vector<8x128xf32>
    %cst_123 = arith.constant 1.000000e+00 : f32
    %323 = vector.broadcast %cst_123 : f32 to vector<8x128xf32>
    %324 = arith.addf %323, %322 : vector<8x128xf32>
    %325 = arith.divf %323, %324 : vector<8x128xf32>
    %326 = vector.extract_strided_slice %312 {offsets = [0, 128], sizes = [8, 128], strides = [1, 1]} : vector<8x384xf32> to vector<8x128xf32>
    %327 = vector.extract_strided_slice %317 {offsets = [0, 128], sizes = [8, 128], strides = [1, 1]} : vector<8x384xf32> to vector<8x128xf32>
    %328 = arith.addf %326, %327 : vector<8x128xf32>
    %329 = arith.negf %328 : vector<8x128xf32>
    %330 = math.exp %329 : vector<8x128xf32>
    %cst_124 = arith.constant 1.000000e+00 : f32
    %331 = vector.broadcast %cst_124 : f32 to vector<8x128xf32>
    %332 = arith.addf %331, %330 : vector<8x128xf32>
    %333 = arith.divf %331, %332 : vector<8x128xf32>
    %334 = vector.extract_strided_slice %312 {offsets = [0, 256], sizes = [8, 128], strides = [1, 1]} : vector<8x384xf32> to vector<8x128xf32>
    %335 = vector.extract_strided_slice %317 {offsets = [0, 256], sizes = [8, 128], strides = [1, 1]} : vector<8x384xf32> to vector<8x128xf32>
    %336 = arith.mulf %325, %335 : vector<8x128xf32>
    %337 = arith.addf %334, %336 : vector<8x128xf32>
    %338 = math.tanh %337 : vector<8x128xf32>
    %cst_125 = arith.constant 1.000000e+00 : f32
    %339 = vector.broadcast %cst_125 : f32 to vector<8x128xf32>
    %340 = arith.subf %339, %333 : vector<8x128xf32>
    %341 = arith.mulf %340, %338 : vector<8x128xf32>
    %342 = arith.mulf %333, %282 : vector<8x128xf32>
    %343 = arith.addf %341, %342 : vector<8x128xf32>
    %c0_126 = arith.constant 0 : index
    %c0_127 = arith.constant 0 : index
    %344 = vector.load %arg4[%c0_126, %c0_127] : memref<128x128xf32, #tpu.memory_space<vmem>>, vector<128x128xf32>
    %cst_128 = arith.constant dense<0.000000e+00> : vector<8x128xf32>
    %345 = tpu.matmul %343, %344, %cst_128 {dimension_numbers = #tpu.dot_dimension_numbers<[1], [0], [0], [1], [0, 0, 1, 1], [], []>} : vector<8x128xf32>, vector<128x128xf32>, vector<8x128xf32> -> vector<8x128xf32>
    %c0_129 = arith.constant 0 : index
    %c0_130 = arith.constant 0 : index
    %346 = vector.load %arg5[%c0_129, %c0_130] : memref<1x128xf32, #tpu.memory_space<vmem>>, vector<1x128xf32>
    %347 = vector.broadcast %346 : vector<1x128xf32> to vector<8x128xf32>
    %348 = arith.addf %345, %347 : vector<8x128xf32>
    %cst_131 = arith.constant dense<0xFF800000> : vector<8xf32>
    %349 = vector.multi_reduction <maximumf>, %348, %cst_131 [1] : vector<8x128xf32> to vector<8xf32>
    %350 = vector.shape_cast %349 : vector<8xf32> to vector<8x1xf32>
    %351 = vector.broadcast %350 : vector<8x1xf32> to vector<8x128xf32>
    %352 = arith.subf %348, %351 : vector<8x128xf32>
    %353 = math.exp %352 : vector<8x128xf32>
    %cst_132 = arith.constant dense<0.000000e+00> : vector<8xf32>
    %354 = vector.multi_reduction <add>, %353, %cst_132 [1] : vector<8x128xf32> to vector<8xf32>
    %355 = vector.shape_cast %354 : vector<8xf32> to vector<8x1xf32>
    %356 = math.log %355 : vector<8x1xf32>
    %357 = vector.broadcast %356 : vector<8x1xf32> to vector<8x128xf32>
    %358 = arith.subf %352, %357 : vector<8x128xf32>
    %c5 = arith.constant 5 : index
    %c0_133 = arith.constant 0 : index
    %c0_134 = arith.constant 0 : index
    %359 = vector.load %arg7[%c5, %c0_133, %c0_134] : memref<8x8x128xf32, #tpu.memory_space<vmem>>, vector<1x8x128xf32>
    %360 = vector.shape_cast %359 : vector<1x8x128xf32> to vector<8x128xf32>
    %361 = vector.shape_cast %358 : vector<8x128xf32> to vector<1x8x128xf32>
    tpu.vector_store %arg7[%c5, %c0_133, %c0_134], %361 {strides = array<i32>} : memref<8x8x128xf32, #tpu.memory_space<vmem>>, vector<1x8x128xf32>,
    %cst_135 = arith.constant 0.000000e+00 : f32
    %362 = vector.broadcast %cst_135 : f32 to vector<8x128xf32>
    %363 = arith.cmpf oeq, %352, %362 : vector<8x128xf32>
    %c128_i32_136 = arith.constant 128 : i32
    %364 = vector.broadcast %c128_i32_136 : i32 to vector<8x128xi32>
    %365 = arith.select %363, %0, %364 : vector<8x128xi1>, vector<8x128xi32>
    %cst_137 = arith.constant dense<2147483647> : vector<8xi32>
    %366 = vector.multi_reduction <minsi>, %365, %cst_137 [1] : vector<8x128xi32> to vector<8xi32>
    %367 = vector.shape_cast %366 : vector<8xi32> to vector<8x1xi32>
    %368 = vector.broadcast %367 : vector<8x1xi32> to vector<8x128xi32>
    %369 = arith.cmpi eq, %0, %368 : vector<8x128xi32>
    %370 = arith.extui %369 : vector<8x128xi1> to vector<8x128xi32>
    %371 = arith.sitofp %370 : vector<8x128xi32> to vector<8x128xf32>
    %c0_138 = arith.constant 0 : index
    %c0_139 = arith.constant 0 : index
    %372 = vector.load %arg1[%c0_138, %c0_139] : memref<128x384xf32, #tpu.memory_space<vmem>>, vector<128x384xf32>
    %cst_140 = arith.constant dense<0.000000e+00> : vector<8x384xf32>
    %373 = tpu.matmul %371, %372, %cst_140 {dimension_numbers = #tpu.dot_dimension_numbers<[1], [0], [0], [1], [0, 0, 1, 1], [], []>} : vector<8x128xf32>, vector<128x384xf32>, vector<8x384xf32> -> vector<8x384xf32>
    %c0_141 = arith.constant 0 : index
    %c0_142 = arith.constant 0 : index
    %374 = vector.load %arg2[%c0_141, %c0_142] : memref<128x384xf32, #tpu.memory_space<vmem>>, vector<128x384xf32>
    %cst_143 = arith.constant dense<0.000000e+00> : vector<8x384xf32>
    %375 = tpu.matmul %343, %374, %cst_143 {dimension_numbers = #tpu.dot_dimension_numbers<[1], [0], [0], [1], [0, 0, 1, 1], [], []>} : vector<8x128xf32>, vector<128x384xf32>, vector<8x384xf32> -> vector<8x384xf32>
    %c0_144 = arith.constant 0 : index
    %c0_145 = arith.constant 0 : index
    %376 = vector.load %arg3[%c0_144, %c0_145] : memref<1x384xf32, #tpu.memory_space<vmem>>, vector<1x384xf32>
    %377 = vector.broadcast %376 : vector<1x384xf32> to vector<8x384xf32>
    %378 = arith.addf %375, %377 : vector<8x384xf32>
    %379 = vector.extract_strided_slice %373 {offsets = [0, 0], sizes = [8, 128], strides = [1, 1]} : vector<8x384xf32> to vector<8x128xf32>
    %380 = vector.extract_strided_slice %378 {offsets = [0, 0], sizes = [8, 128], strides = [1, 1]} : vector<8x384xf32> to vector<8x128xf32>
    %381 = arith.addf %379, %380 : vector<8x128xf32>
    %382 = arith.negf %381 : vector<8x128xf32>
    %383 = math.exp %382 : vector<8x128xf32>
    %cst_146 = arith.constant 1.000000e+00 : f32
    %384 = vector.broadcast %cst_146 : f32 to vector<8x128xf32>
    %385 = arith.addf %384, %383 : vector<8x128xf32>
    %386 = arith.divf %384, %385 : vector<8x128xf32>
    %387 = vector.extract_strided_slice %373 {offsets = [0, 128], sizes = [8, 128], strides = [1, 1]} : vector<8x384xf32> to vector<8x128xf32>
    %388 = vector.extract_strided_slice %378 {offsets = [0, 128], sizes = [8, 128], strides = [1, 1]} : vector<8x384xf32> to vector<8x128xf32>
    %389 = arith.addf %387, %388 : vector<8x128xf32>
    %390 = arith.negf %389 : vector<8x128xf32>
    %391 = math.exp %390 : vector<8x128xf32>
    %cst_147 = arith.constant 1.000000e+00 : f32
    %392 = vector.broadcast %cst_147 : f32 to vector<8x128xf32>
    %393 = arith.addf %392, %391 : vector<8x128xf32>
    %394 = arith.divf %392, %393 : vector<8x128xf32>
    %395 = vector.extract_strided_slice %373 {offsets = [0, 256], sizes = [8, 128], strides = [1, 1]} : vector<8x384xf32> to vector<8x128xf32>
    %396 = vector.extract_strided_slice %378 {offsets = [0, 256], sizes = [8, 128], strides = [1, 1]} : vector<8x384xf32> to vector<8x128xf32>
    %397 = arith.mulf %386, %396 : vector<8x128xf32>
    %398 = arith.addf %395, %397 : vector<8x128xf32>
    %399 = math.tanh %398 : vector<8x128xf32>
    %cst_148 = arith.constant 1.000000e+00 : f32
    %400 = vector.broadcast %cst_148 : f32 to vector<8x128xf32>
    %401 = arith.subf %400, %394 : vector<8x128xf32>
    %402 = arith.mulf %401, %399 : vector<8x128xf32>
    %403 = arith.mulf %394, %343 : vector<8x128xf32>
    %404 = arith.addf %402, %403 : vector<8x128xf32>
    %c0_149 = arith.constant 0 : index
    %c0_150 = arith.constant 0 : index
    %405 = vector.load %arg4[%c0_149, %c0_150] : memref<128x128xf32, #tpu.memory_space<vmem>>, vector<128x128xf32>
    %cst_151 = arith.constant dense<0.000000e+00> : vector<8x128xf32>
    %406 = tpu.matmul %404, %405, %cst_151 {dimension_numbers = #tpu.dot_dimension_numbers<[1], [0], [0], [1], [0, 0, 1, 1], [], []>} : vector<8x128xf32>, vector<128x128xf32>, vector<8x128xf32> -> vector<8x128xf32>
    %c0_152 = arith.constant 0 : index
    %c0_153 = arith.constant 0 : index
    %407 = vector.load %arg5[%c0_152, %c0_153] : memref<1x128xf32, #tpu.memory_space<vmem>>, vector<1x128xf32>
    %408 = vector.broadcast %407 : vector<1x128xf32> to vector<8x128xf32>
    %409 = arith.addf %406, %408 : vector<8x128xf32>
    %cst_154 = arith.constant dense<0xFF800000> : vector<8xf32>
    %410 = vector.multi_reduction <maximumf>, %409, %cst_154 [1] : vector<8x128xf32> to vector<8xf32>
    %411 = vector.shape_cast %410 : vector<8xf32> to vector<8x1xf32>
    %412 = vector.broadcast %411 : vector<8x1xf32> to vector<8x128xf32>
    %413 = arith.subf %409, %412 : vector<8x128xf32>
    %414 = math.exp %413 : vector<8x128xf32>
    %cst_155 = arith.constant dense<0.000000e+00> : vector<8xf32>
    %415 = vector.multi_reduction <add>, %414, %cst_155 [1] : vector<8x128xf32> to vector<8xf32>
    %416 = vector.shape_cast %415 : vector<8xf32> to vector<8x1xf32>
    %417 = math.log %416 : vector<8x1xf32>
    %418 = vector.broadcast %417 : vector<8x1xf32> to vector<8x128xf32>
    %419 = arith.subf %413, %418 : vector<8x128xf32>
    %c6 = arith.constant 6 : index
    %c0_156 = arith.constant 0 : index
    %c0_157 = arith.constant 0 : index
    %420 = vector.load %arg7[%c6, %c0_156, %c0_157] : memref<8x8x128xf32, #tpu.memory_space<vmem>>, vector<1x8x128xf32>
    %421 = vector.shape_cast %420 : vector<1x8x128xf32> to vector<8x128xf32>
    %422 = vector.shape_cast %419 : vector<8x128xf32> to vector<1x8x128xf32>
    tpu.vector_store %arg7[%c6, %c0_156, %c0_157], %422 {strides = array<i32>} : memref<8x8x128xf32, #tpu.memory_space<vmem>>, vector<1x8x128xf32>,
    %cst_158 = arith.constant 0.000000e+00 : f32
    %423 = vector.broadcast %cst_158 : f32 to vector<8x128xf32>
    %424 = arith.cmpf oeq, %413, %423 : vector<8x128xf32>
    %c128_i32_159 = arith.constant 128 : i32
    %425 = vector.broadcast %c128_i32_159 : i32 to vector<8x128xi32>
    %426 = arith.select %424, %0, %425 : vector<8x128xi1>, vector<8x128xi32>
    %cst_160 = arith.constant dense<2147483647> : vector<8xi32>
    %427 = vector.multi_reduction <minsi>, %426, %cst_160 [1] : vector<8x128xi32> to vector<8xi32>
    %428 = vector.shape_cast %427 : vector<8xi32> to vector<8x1xi32>
    %429 = vector.broadcast %428 : vector<8x1xi32> to vector<8x128xi32>
    %430 = arith.cmpi eq, %0, %429 : vector<8x128xi32>
    %431 = arith.extui %430 : vector<8x128xi1> to vector<8x128xi32>
    %432 = arith.sitofp %431 : vector<8x128xi32> to vector<8x128xf32>
    %c0_161 = arith.constant 0 : index
    %c0_162 = arith.constant 0 : index
    %433 = vector.load %arg1[%c0_161, %c0_162] : memref<128x384xf32, #tpu.memory_space<vmem>>, vector<128x384xf32>
    %cst_163 = arith.constant dense<0.000000e+00> : vector<8x384xf32>
    %434 = tpu.matmul %432, %433, %cst_163 {dimension_numbers = #tpu.dot_dimension_numbers<[1], [0], [0], [1], [0, 0, 1, 1], [], []>} : vector<8x128xf32>, vector<128x384xf32>, vector<8x384xf32> -> vector<8x384xf32>
    %c0_164 = arith.constant 0 : index
    %c0_165 = arith.constant 0 : index
    %435 = vector.load %arg2[%c0_164, %c0_165] : memref<128x384xf32, #tpu.memory_space<vmem>>, vector<128x384xf32>
    %cst_166 = arith.constant dense<0.000000e+00> : vector<8x384xf32>
    %436 = tpu.matmul %404, %435, %cst_166 {dimension_numbers = #tpu.dot_dimension_numbers<[1], [0], [0], [1], [0, 0, 1, 1], [], []>} : vector<8x128xf32>, vector<128x384xf32>, vector<8x384xf32> -> vector<8x384xf32>
    %c0_167 = arith.constant 0 : index
    %c0_168 = arith.constant 0 : index
    %437 = vector.load %arg3[%c0_167, %c0_168] : memref<1x384xf32, #tpu.memory_space<vmem>>, vector<1x384xf32>
    %438 = vector.broadcast %437 : vector<1x384xf32> to vector<8x384xf32>
    %439 = arith.addf %436, %438 : vector<8x384xf32>
    %440 = vector.extract_strided_slice %434 {offsets = [0, 0], sizes = [8, 128], strides = [1, 1]} : vector<8x384xf32> to vector<8x128xf32>
    %441 = vector.extract_strided_slice %439 {offsets = [0, 0], sizes = [8, 128], strides = [1, 1]} : vector<8x384xf32> to vector<8x128xf32>
    %442 = arith.addf %440, %441 : vector<8x128xf32>
    %443 = arith.negf %442 : vector<8x128xf32>
    %444 = math.exp %443 : vector<8x128xf32>
    %cst_169 = arith.constant 1.000000e+00 : f32
    %445 = vector.broadcast %cst_169 : f32 to vector<8x128xf32>
    %446 = arith.addf %445, %444 : vector<8x128xf32>
    %447 = arith.divf %445, %446 : vector<8x128xf32>
    %448 = vector.extract_strided_slice %434 {offsets = [0, 128], sizes = [8, 128], strides = [1, 1]} : vector<8x384xf32> to vector<8x128xf32>
    %449 = vector.extract_strided_slice %439 {offsets = [0, 128], sizes = [8, 128], strides = [1, 1]} : vector<8x384xf32> to vector<8x128xf32>
    %450 = arith.addf %448, %449 : vector<8x128xf32>
    %451 = arith.negf %450 : vector<8x128xf32>
    %452 = math.exp %451 : vector<8x128xf32>
    %cst_170 = arith.constant 1.000000e+00 : f32
    %453 = vector.broadcast %cst_170 : f32 to vector<8x128xf32>
    %454 = arith.addf %453, %452 : vector<8x128xf32>
    %455 = arith.divf %453, %454 : vector<8x128xf32>
    %456 = vector.extract_strided_slice %434 {offsets = [0, 256], sizes = [8, 128], strides = [1, 1]} : vector<8x384xf32> to vector<8x128xf32>
    %457 = vector.extract_strided_slice %439 {offsets = [0, 256], sizes = [8, 128], strides = [1, 1]} : vector<8x384xf32> to vector<8x128xf32>
    %458 = arith.mulf %447, %457 : vector<8x128xf32>
    %459 = arith.addf %456, %458 : vector<8x128xf32>
    %460 = math.tanh %459 : vector<8x128xf32>
    %cst_171 = arith.constant 1.000000e+00 : f32
    %461 = vector.broadcast %cst_171 : f32 to vector<8x128xf32>
    %462 = arith.subf %461, %455 : vector<8x128xf32>
    %463 = arith.mulf %462, %460 : vector<8x128xf32>
    %464 = arith.mulf %455, %404 : vector<8x128xf32>
    %465 = arith.addf %463, %464 : vector<8x128xf32>
    %c0_172 = arith.constant 0 : index
    %c0_173 = arith.constant 0 : index
    %466 = vector.load %arg4[%c0_172, %c0_173] : memref<128x128xf32, #tpu.memory_space<vmem>>, vector<128x128xf32>
    %cst_174 = arith.constant dense<0.000000e+00> : vector<8x128xf32>
    %467 = tpu.matmul %465, %466, %cst_174 {dimension_numbers = #tpu.dot_dimension_numbers<[1], [0], [0], [1], [0, 0, 1, 1], [], []>} : vector<8x128xf32>, vector<128x128xf32>, vector<8x128xf32> -> vector<8x128xf32>
    %c0_175 = arith.constant 0 : index
    %c0_176 = arith.constant 0 : index
    %468 = vector.load %arg5[%c0_175, %c0_176] : memref<1x128xf32, #tpu.memory_space<vmem>>, vector<1x128xf32>
    %469 = vector.broadcast %468 : vector<1x128xf32> to vector<8x128xf32>
    %470 = arith.addf %467, %469 : vector<8x128xf32>
    %cst_177 = arith.constant dense<0xFF800000> : vector<8xf32>
    %471 = vector.multi_reduction <maximumf>, %470, %cst_177 [1] : vector<8x128xf32> to vector<8xf32>
    %472 = vector.shape_cast %471 : vector<8xf32> to vector<8x1xf32>
    %473 = vector.broadcast %472 : vector<8x1xf32> to vector<8x128xf32>
    %474 = arith.subf %470, %473 : vector<8x128xf32>
    %475 = math.exp %474 : vector<8x128xf32>
    %cst_178 = arith.constant dense<0.000000e+00> : vector<8xf32>
    %476 = vector.multi_reduction <add>, %475, %cst_178 [1] : vector<8x128xf32> to vector<8xf32>
    %477 = vector.shape_cast %476 : vector<8xf32> to vector<8x1xf32>
    %478 = math.log %477 : vector<8x1xf32>
    %479 = vector.broadcast %478 : vector<8x1xf32> to vector<8x128xf32>
    %480 = arith.subf %474, %479 : vector<8x128xf32>
    %c7 = arith.constant 7 : index
    %c0_179 = arith.constant 0 : index
    %c0_180 = arith.constant 0 : index
    %481 = vector.load %arg7[%c7, %c0_179, %c0_180] : memref<8x8x128xf32, #tpu.memory_space<vmem>>, vector<1x8x128xf32>
    %482 = vector.shape_cast %481 : vector<1x8x128xf32> to vector<8x128xf32>
    %483 = vector.shape_cast %480 : vector<8x128xf32> to vector<1x8x128xf32>
    tpu.vector_store %arg7[%c7, %c0_179, %c0_180], %483 {strides = array<i32>} : memref<8x8x128xf32, #tpu.memory_space<vmem>>, vector<1x8x128xf32>,
    %c0_181 = arith.constant 0 : index
    %c0_182 = arith.constant 0 : index
    %484 = vector.load %arg8[%c0_181, %c0_182] : memref<8x128xf32, #tpu.memory_space<vmem>>, vector<8x128xf32>
    tpu.vector_store %arg8[%c0_181, %c0_182], %465 {strides = array<i32>} : memref<8x128xf32, #tpu.memory_space<vmem>>, vector<8x128xf32>,
    return
  }
  func.func @transform_0(%arg0: i32) -> (i32, i32) {
    %c0_i32 = arith.constant 0 : i32
    %c0_i32_0 = arith.constant 0 : i32
    %c0_i32_1 = arith.constant 0 : i32
    return %c0_i32, %c0_i32_0 : i32, i32
  }
  func.func @transform_1(%arg0: i32) -> (i32, i32) {
    %c0_i32 = arith.constant 0 : i32
    %c0_i32_0 = arith.constant 0 : i32
    %c0_i32_1 = arith.constant 0 : i32
    return %c0_i32, %c0_i32_0 : i32, i32
  }
  func.func @transform_2(%arg0: i32) -> (i32, i32) {
    %c0_i32 = arith.constant 0 : i32
    %c0_i32_0 = arith.constant 0 : i32
    %c0_i32_1 = arith.constant 0 : i32
    return %c0_i32, %c0_i32_0 : i32, i32
  }
  func.func @transform_3(%arg0: i32) -> (i32, i32) {
    %c0_i32 = arith.constant 0 : i32
    %c0_i32_0 = arith.constant 0 : i32
    %c0_i32_1 = arith.constant 0 : i32
    return %c0_i32, %c0_i32_0 : i32, i32
  }
  func.func @transform_4(%arg0: i32) -> (i32, i32) {
    %c0_i32 = arith.constant 0 : i32
    %c0_i32_0 = arith.constant 0 : i32
    %c0_i32_1 = arith.constant 0 : i32
    return %c0_i32, %c0_i32_0 : i32, i32
  }
  func.func @transform_5(%arg0: i32) -> (i32, i32) {
    %c0_i32 = arith.constant 0 : i32
    %c0_i32_0 = arith.constant 0 : i32
    %c0_i32_1 = arith.constant 0 : i32
    return %c0_i32, %c0_i32_0 : i32, i32
  }
  func.func @transform_6(%arg0: i32) -> (i32, i32, i32) {
    %c0_i32 = arith.constant 0 : i32
    %c0_i32_0 = arith.constant 0 : i32
    %c0_i32_1 = arith.constant 0 : i32
    %c0_i32_2 = arith.constant 0 : i32
    return %c0_i32, %c0_i32_0, %c0_i32_1 : i32, i32, i32
  }
  func.func @transform_7(%arg0: i32) -> (i32, i32) {
    %c0_i32 = arith.constant 0 : i32
    %c0_i32_0 = arith.constant 0 : i32
    %c0_i32_1 = arith.constant 0 : i32
    return %c0_i32, %c0_i32_0 : i32, i32
  }
}

</mosaic_0001>

<bundles_post_ra>
// kernel: tpu_custom_call.1
= control target key start
LH: loop header
LB: loop body
LE: loop exit
PB: predicated region body
PF: predicated region fallthrough
CT: control target
= control target key end

     0   :  { %13 = vsyncpa [#allocation3], 0  ;;  %s8574_s0 = inlined_call_operand.hbm [shape: f32[128,384], index: 0, kind: input, shape index: {}]   ;;  %s8575_s1 = inlined_call_operand.hbm [shape: f32[128,384], index: 1, kind: input, shape index: {}]   ;;  %s8576_s2 = inlined_call_operand.vmem [shape: f32[1,384], index: 2, kind: input, shape index: {}]   ;;  %s8577_s3 = inlined_call_operand.hbm [shape: f32[128,128], index: 3, kind: input, shape index: {}]   ;;  %s8578_s4 = inlined_call_operand.vmem [shape: f32[1,128], index: 4, kind: input, shape index: {}]   ;;  %s8579_s5 = inlined_call_operand.vmem [shape: f32[8,128], index: 5, kind: input, shape index: {}]   ;;  %s8580_s6 = inlined_call_operand.hbm [shape: f32[8,8,128], index: 6, kind: output, shape index: {0}]   ;;  %s8581_s7 = inlined_call_operand.hbm [shape: f32[8,128], index: 7, kind: output, shape index: {1}]  }
   0x1   :  { %14 = vsyncpa [#allocation6], 0 }
   0x2   :  { %15 = vsyncpa [#allocation4], 0 }
   0x3   :  { %16 = vsyncpa [#allocation10], 0  ;;  %s7066_s24 = smov [#allocation5]   ;;  %s7067_s26 = smov [#allocation2]  }
   0x4   :  { %s34_s25 = sshll.u32 %s7066_s24, 4  ;;  %s22_s27 = sshll.u32 %s7067_s26, 4  ;;  %s35_s25 = int_to_ptr.vmem [resolvable:$true] %s34_s25  ;;  %s7119_s27 = int_to_ptr.vmem [resolvable:$true] %s22_s27 }
   0x5   :  { %s6948_s30 = scalar_lea.hbm %s8575_s1, 6144 }
   0x6   :  { %p6949_p0 = scmp.ne.s32.totalorder %s8575_s1, %s6948_s30  ;;  %p6952_p1 = scmp.lt.u32.totalorder %s6948_s30, %s8575_s1 }
   0x8   :  { %p6954_p2 = pnand %p6952_p1, %p6949_p0 }
   0xa   :  { %6957 = shalt.err (!%p6954_p2)
}
   0xb   :  { %s6958_s12 = scalar_lea.vmem %s35_s25, 6144  ;;  %p6963_p4 = scmp.lt.s32.totalorder %s35_s25, %s35_s25 }
   0xc   :  { %p6959_p3 = scmp.ne.s32.totalorder %s35_s25, %s6958_s12  ;;  %p6964_p5 = scmp.lt.s32.totalorder %s6958_s12, %s6958_s12 }
   0xe   :  { %p6965_p6 = por %p6964_p5, %p6963_p4 }
  0x10   :  { %p6966_p7 = pnand %p6965_p6, %p6959_p3 }
  0x12   :  { %6969 = shalt.err (!%p6966_p7)
}
  0x13   :  { %s7068_s13 = smov 384   ;;  %s7069_s14 = smov 24  }
  0x14   :  { %40 = dma.hbm_to_vmem [thread:$0]  %s8575_s1, 6144, %s35_s25, [#allocation6], %s7068_s13, %s7068_s13, %s7069_s14  }
  0x15   :  { %s6970_s19 = scalar_lea.hbm %s8574_s0, 6144 }
  0x16   :  { %p6971_p8 = scmp.ne.s32.totalorder %s8574_s0, %s6970_s19  ;;  %p6974_p9 = scmp.lt.u32.totalorder %s6970_s19, %s8574_s0 }
  0x18   :  { %p6976_p10 = pnand %p6974_p9, %p6971_p8 }
  0x1a   :  { %6979 = shalt.err (!%p6976_p10)
}
  0x1b   :  { %s6980_s24 = scalar_lea.vmem %s7119_s27, 6144  ;;  %p6985_p12 = scmp.lt.s32.totalorder %s7119_s27, %s7119_s27 }
  0x1c   :  { %p6981_p11 = scmp.ne.s32.totalorder %s7119_s27, %s6980_s24  ;;  %p6986_p13 = scmp.lt.s32.totalorder %s6980_s24, %s6980_s24 }
  0x1e   :  { %p6987_p0 = por %p6986_p13, %p6985_p12 }
  0x20   :  { %p6988_p1 = pnand %p6987_p0, %p6981_p11 }
  0x22   :  { %6991 = shalt.err (!%p6988_p1)
}
  0x23   :  { %28 = dma.hbm_to_vmem [thread:$0]  %s8574_s0, 6144, %s7119_s27, [#allocation3], %s7068_s13, %s7068_s13, %s7069_s14  }
  0x24   :  { %s7070_s26 = smov [#allocation7]   ;;  %s6992_s8 = scalar_lea.hbm %s8577_s3, 2048 }
  0x25   :  { %s48_s28 = sshll.u32 %s7070_s26, 4  ;;  %p6993_p2 = scmp.ne.s32.totalorder %s8577_s3, %s6992_s8  ;;  %s49_s28 = int_to_ptr.vmem [resolvable:$true] %s48_s28 }
  0x26   :  { %p6996_p3 = scmp.lt.u32.totalorder %s6992_s8, %s8577_s3 }
  0x28   :  { %p6998_p4 = pnand %p6996_p3, %p6993_p2 }
  0x2a   :  { %7001 = shalt.err (!%p6998_p4)
}
  0x2b   :  { %s7002_s15 = scalar_lea.vmem %s49_s28, 2048  ;;  %p7007_p6 = scmp.lt.s32.totalorder %s49_s28, %s49_s28 }
  0x2c   :  { %p7003_p5 = scmp.ne.s32.totalorder %s49_s28, %s7002_s15  ;;  %p7008_p7 = scmp.lt.s32.totalorder %s7002_s15, %s7002_s15 }
  0x2e   :  { %p7009_p8 = por %p7008_p7, %p7007_p6 }
  0x30   :  { %p7010_p9 = pnand %p7009_p8, %p7003_p5 }
  0x32   :  { %7013 = shalt.err (!%p7010_p9)
}
  0x33   :  { %s7071_s0 = smov 128   ;;  %s7072_s27 = smov 8  }
  0x34   :  { %54 = dma.hbm_to_vmem [thread:$0]  %s8577_s3, 2048, %s49_s28, [#allocation6], %s7071_s0, %s7071_s0, %s7072_s27  }
  0x35   :  { %7058 = dma.done.wait [#allocation3], 6144  }
  0x36   :  { %7059 = vsyncadd [#allocation3], 4294961152 }
  0x37   :  { %7060 = dma.done.wait [#allocation6], 8192  }
  0x38   :  { %7061 = vsyncadd [#allocation6], 4294959104  ;;  %v8584_v0 = vmov 0.0|0.0   ;;  %v8586_v1 = vmov 0.0   ;;  %vm7075_vm0 = vmmov 0   ;;  %v75_v2 = vld [vmem:[#allocation2 + $0x8] sm:$0xff]  ;;  %v68_v61 = vlaneseq }
  0x39   :  { %5735 = vmatprep.subr.bf16.mxu1 %v8584_v0  ;;  %186 = vmatprep.mubr.f32.mxu0 %v8586_v1  ;;  %v78_v3 = vld [vmem:[#allocation2 + $0x20] sm:$0xff]  ;;  %v77_v6 = vld [vmem:[#allocation2 + $0x18] sm:$0xff]  ;;  %v84_v8 = vld [vmem:[#allocation2 + $0x50] sm:$0xff] }
  0x3a   :  { %4895 = vmatprep.mubr.msk.f32.mxu1 %vm7075_vm0, %v8586_v1  ;;  %v74_v4 = vld [vmem:[#allocation2] sm:$0xff]  ;;  %v7169_v5 = vpack.c.bf16 %v78_v3, %v75_v2  ;;  %v81_v7 = vld [vmem:[#allocation2 + $0x38] sm:$0xff]  ;;  %v80_v11 = vld [vmem:[#allocation2 + $0x30] sm:$0xff] }
  0x3b   :  { %v7171_v9 = vpack.c.bf16 %v77_v6, %v74_v4  ;;  %v7173_v10 = vpack.c.bf16 %v84_v8, %v81_v7  ;;  %v83_v12 = vld [vmem:[#allocation2 + $0x48] sm:$0xff]  ;;  %v90_v14 = vld [vmem:[#allocation2 + $0x80] sm:$0xff]  ;;  %v89_v18 = vld [vmem:[#allocation2 + $0x78] sm:$0xff] }
  0x3c   :  { %v87_v13 = vld [vmem:[#allocation2 + $0x68] sm:$0xff]  ;;  %5704 = vmatprep.subr.bf16.mxu0 %v7169_v5  ;;  %v7177_v15 = vpack.c.bf16 %v83_v12, %v80_v11  ;;  %v86_v17 = vld [vmem:[#allocation2 + $0x60] sm:$0xff]  ;;  %v93_v19 = vld [vmem:[#allocation2 + $0x98] sm:$0xff]  ;;  %v7234_v11 = vand.u32 127, %v68_v61 }
  0x3d   :  { %5706 = vmatpush1.bf16.msra.mxu0 %v7171_v9  ;;  %v7180_v16 = vpack.c.bf16 %v90_v14, %v87_v13  ;;  %v96_v20 = vld [vmem:[#allocation2 + $0xb0] sm:$0xff]  ;;  %v7183_v21 = vpack.c.bf16 %v89_v18, %v86_v17  ;;  %v95_v24 = vld [vmem:[#allocation2 + $0xa8] sm:$0xff]  ;;  %v102_v28 = vld [vmem:[#allocation2 + $0xe0] sm:$0xff] }
  0x3e   :  { %5708 = vmatprep.subr.bf16.mxu0 %v7173_v10  ;;  %v92_v22 = vld [vmem:[#allocation2 + $0x90] sm:$0xff]  ;;  %v7186_v23 = vpack.c.bf16 %v96_v20, %v93_v19  ;;  %v79_v26 = vld [vmem:[#allocation2 + $0x28] sm:$0xff]  ;;  %v82_v30 = vld [vmem:[#allocation2 + $0x40] sm:$0xff]  ;;  %vm71_vm1 = vcmp.eq.s32.totalorder %v7234_v11, 1 }
  0x3f   :  { %v76_v25 = vld [vmem:[#allocation2 + $0x10] sm:$0xff]  ;;  %v99_v27 = vld [vmem:[#allocation2 + $0xc8] sm:$0xff]  ;;  %v85_v31 = vld [vmem:[#allocation2 + $0x58] sm:$0xff]  ;;  %v7191_v32 = vpack.c.bf16 %v95_v24, %v92_v22 }
  0x40   :  { %v7188_v29 = vpack.c.bf16 %v79_v26, %v76_v25  ;;  %v98_v33 = vld [vmem:[#allocation2 + $0xc0] sm:$0xff]  ;;  %v7194_v34 = vpack.c.bf16 %v85_v31, %v82_v30  ;;  %v7197_v35 = vpack.c.bf16 %v102_v28, %v99_v27  ;;  %v101_v36 = vld [vmem:[#allocation2 + $0xd8] sm:$0xff]  ;;  %v88_v37 = vld [vmem:[#allocation2 + $0x70] sm:$0xff] }
  0x41   :  { %5710 = vmatpush1.bf16.msra.mxu0 %v7177_v15  ;;  %v91_v38 = vld [vmem:[#allocation2 + $0x88] sm:$0xff]  ;;  %v105_v39 = vld [vmem:[#allocation2 + $0xf8] sm:$0xff]  ;;  %v108_v40 = vld [vmem:[#allocation2 + $0x110] sm:$0xff]  ;;  %v7201_v41 = vpack.c.bf16 %v101_v36, %v98_v33 }
  0x42   :  { %5712 = vmatprep.subr.bf16.mxu0 %v7180_v16  ;;  %5737 = vmatpush3.bf16.msra.mxu1 %v7188_v29  ;;  %v104_v42 = vld [vmem:[#allocation2 + $0xf0] sm:$0xff]  ;;  %v7204_v43 = vpack.c.bf16 %v91_v38, %v88_v37  ;;  %v7207_v44 = vpack.c.bf16 %v108_v40, %v105_v39  ;;  %v107_v45 = vld [vmem:[#allocation2 + $0x108] sm:$0xff]  ;;  %v94_v46 = vld [vmem:[#allocation2 + $0xa0] sm:$0xff]  ;;  %v8582_v37 = vmov 1.0  }
  0x43   :  { %5738 = vmatprep.subr.bf16.mxu1 %v8584_v0  ;;  %v97_v47 = vld [vmem:[#allocation2 + $0xb8] sm:$0xff]  ;;  %v111_v48 = vld [vmem:[#allocation2 + $0x128] sm:$0xff]  ;;  %v114_v49 = vld [vmem:[#allocation2 + $0x140] sm:$0xff]  ;;  %v7211_v50 = vpack.c.bf16 %v107_v45, %v104_v42 }
  0x44   :  { %v110_v51 = vld [vmem:[#allocation2 + $0x120] sm:$0xff]  ;;  %v7214_v52 = vpack.c.bf16 %v97_v47, %v94_v46  ;;  %v7217_v53 = vpack.c.bf16 %v114_v49, %v111_v48  ;;  %v113_v54 = vld [vmem:[#allocation2 + $0x138] sm:$0xff]  ;;  %v100_v55 = vld [vmem:[#allocation2 + $0xd0] sm:$0xff] }
  0x45   :  { %5714 = vmatpush1.bf16.msra.mxu0 %v7183_v21  ;;  %v103_v56 = vld [vmem:[#allocation2 + $0xe8] sm:$0xff]  ;;  %v117_v57 = vld [vmem:[#allocation2 + $0x158] sm:$0xff]  ;;  %v120_v58 = vld [vmem:[#allocation2 + $0x170] sm:$0xff]  ;;  %v7221_v59 = vpack.c.bf16 %v113_v54, %v110_v51 }
  0x46   :  { %5716 = vmatprep.subr.bf16.mxu0 %v7186_v23  ;;  %5740 = vmatpush3.bf16.msra.mxu1 %v7194_v34  ;;  %v116_v60 = vld [vmem:[#allocation2 + $0x150] sm:$0xff]  ;;  %v7224_v62 = vpack.c.bf16 %v103_v56, %v100_v55  ;;  %v7227_v63 = vpack.c.bf16 %v120_v58, %v117_v57  ;;  %v119_v2 = vld [vmem:[#allocation2 + $0x168] sm:$0xff]  ;;  %v106_v3 = vld [vmem:[#allocation2 + $0x100] sm:$0xff] }
  0x47   :  { %5741 = vmatprep.subr.bf16.mxu1 %v8584_v0  ;;  %v109_v4 = vld [vmem:[#allocation2 + $0x118] sm:$0xff]  ;;  %v264_v6 = vld [vmem:[#allocation5 + $0x8] sm:$0xff]  ;;  %v267_v7 = vld [vmem:[#allocation5 + $0x20] sm:$0xff]  ;;  %v7231_v8 = vpack.c.bf16 %v119_v2, %v116_v60 }
  0x48   :  { %v263_v12 = vld [vmem:[#allocation5] sm:$0xff]  ;;  %v7237_v13 = vpack.c.bf16 %v109_v4, %v106_v3  ;;  %v7240_v14 = vpack.c.bf16 %v267_v7, %v264_v6  ;;  %v266_v17 = vld [vmem:[#allocation5 + $0x18] sm:$0xff]  ;;  %v112_v18 = vld [vmem:[#allocation2 + $0x130] sm:$0xff] }
  0x49   :  { %5718 = vmatpush1.bf16.msra.mxu0 %v7191_v32  ;;  %v115_v19 = vld [vmem:[#allocation2 + $0x148] sm:$0xff]  ;;  %v270_v20 = vld [vmem:[#allocation5 + $0x38] sm:$0xff]  ;;  %v273_v22 = vld [vmem:[#allocation5 + $0x50] sm:$0xff]  ;;  %v7245_v24 = vpack.c.bf16 %v266_v17, %v263_v12 }
  0x4a   :  { %5720 = vmatprep.subr.bf16.mxu0 %v7197_v35  ;;  %5743 = vmatpush3.bf16.msra.mxu1 %v7204_v43  ;;  %v269_v25 = vld [vmem:[#allocation5 + $0x30] sm:$0xff]  ;;  %v7248_v26 = vpack.c.bf16 %v115_v19, %v112_v18  ;;  %v7251_v27 = vpack.c.bf16 %v273_v22, %v270_v20  ;;  %v272_v28 = vld [vmem:[#allocation5 + $0x48] sm:$0xff]  ;;  %v118_v30 = vld [vmem:[#allocation2 + $0x160] sm:$0xff] }
  0x4b   :  { %5744 = vmatprep.subr.bf16.mxu1 %v8584_v0  ;;  %v121_v31 = vld [vmem:[#allocation2 + $0x178] sm:$0xff]  ;;  %v276_v33 = vld [vmem:[#allocation5 + $0x68] sm:$0xff]  ;;  %v279_v36 = vld [vmem:[#allocation5 + $0x80] sm:$0xff]  ;;  %v7258_v38 = vpack.c.bf16 %v272_v28, %v269_v25 }
  0x4c   :  { %v275_v39 = vld [vmem:[#allocation5 + $0x60] sm:$0xff]  ;;  %v7261_v40 = vpack.c.bf16 %v121_v31, %v118_v30  ;;  %v7264_v42 = vpack.c.bf16 %v279_v36, %v276_v33  ;;  %v278_v45 = vld [vmem:[#allocation5 + $0x78] sm:$0xff]  ;;  %v265_v46 = vld [vmem:[#allocation5 + $0x10] sm:$0xff] }
  0x4d   :  { %5722 = vmatpush1.bf16.msra.mxu0 %v7201_v41  ;;  %v268_v47 = vld [vmem:[#allocation5 + $0x28] sm:$0xff]  ;;  %v282_v48 = vld [vmem:[#allocation5 + $0x98] sm:$0xff]  ;;  %v285_v49 = vld [vmem:[#allocation5 + $0xb0] sm:$0xff]  ;;  %v7269_v51 = vpack.c.bf16 %v278_v45, %v275_v39 }
  0x4e   :  { %5724 = vmatprep.subr.bf16.mxu0 %v7207_v44  ;;  %5746 = vmatpush3.bf16.msra.mxu1 %v7214_v52  ;;  %v281_v54 = vld [vmem:[#allocation5 + $0x90] sm:$0xff]  ;;  %v7272_v55 = vpack.c.bf16 %v268_v47, %v265_v46  ;;  %v7275_v56 = vpack.c.bf16 %v285_v49, %v282_v48  ;;  %v284_v57 = vld [vmem:[#allocation5 + $0xa8] sm:$0xff]  ;;  %v271_v58 = vld [vmem:[#allocation5 + $0x40] sm:$0xff] }
  0x4f   :  { %5747 = vmatprep.subr.bf16.mxu1 %v8584_v0  ;;  %v274_v60 = vld [vmem:[#allocation5 + $0x58] sm:$0xff]  ;;  %v288_v2 = vld [vmem:[#allocation5 + $0xc8] sm:$0xff]  ;;  %v291_v3 = vld [vmem:[#allocation5 + $0xe0] sm:$0xff]  ;;  %v7282_v4 = vpack.c.bf16 %v284_v57, %v281_v54 }
  0x50   :  { %v287_v6 = vld [vmem:[#allocation5 + $0xc0] sm:$0xff]  ;;  %v7285_v7 = vpack.c.bf16 %v274_v60, %v271_v58  ;;  %v7288_v12 = vpack.c.bf16 %v291_v3, %v288_v2  ;;  %v290_v17 = vld [vmem:[#allocation5 + $0xd8] sm:$0xff]  ;;  %v277_v18 = vld [vmem:[#allocation5 + $0x70] sm:$0xff] }
  0x51   :  { %5726 = vmatpush1.bf16.msra.mxu0 %v7211_v50  ;;  %v280_v19 = vld [vmem:[#allocation5 + $0x88] sm:$0xff]  ;;  %v294_v20 = vld [vmem:[#allocation5 + $0xf8] sm:$0xff]  ;;  %v297_v22 = vld [vmem:[#allocation5 + $0x110] sm:$0xff]  ;;  %v7294_v25 = vpack.c.bf16 %v290_v17, %v287_v6 }
  0x52   :  { %5728 = vmatprep.subr.bf16.mxu0 %v7217_v53  ;;  %5749 = vmatpush3.bf16.msra.mxu1 %v7224_v62  ;;  %v293_v28 = vld [vmem:[#allocation5 + $0xf0] sm:$0xff]  ;;  %v7297_v30 = vpack.c.bf16 %v280_v19, %v277_v18  ;;  %v7300_v31 = vpack.c.bf16 %v297_v22, %v294_v20  ;;  %v296_v33 = vld [vmem:[#allocation5 + $0x108] sm:$0xff]  ;;  %v283_v36 = vld [vmem:[#allocation5 + $0xa0] sm:$0xff] }
  0x53   :  { %5750 = vmatprep.subr.bf16.mxu1 %v8584_v0  ;;  %v286_v39 = vld [vmem:[#allocation5 + $0xb8] sm:$0xff]  ;;  %v300_v45 = vld [vmem:[#allocation5 + $0x128] sm:$0xff]  ;;  %v303_v46 = vld [vmem:[#allocation5 + $0x140] sm:$0xff]  ;;  %v7304_v47 = vpack.c.bf16 %v296_v33, %v293_v28 }
  0x54   :  { %v299_v48 = vld [vmem:[#allocation5 + $0x120] sm:$0xff]  ;;  %v7307_v49 = vpack.c.bf16 %v286_v39, %v283_v36  ;;  %v7310_v54 = vpack.c.bf16 %v303_v46, %v300_v45  ;;  %v302_v57 = vld [vmem:[#allocation5 + $0x138] sm:$0xff]  ;;  %v289_v58 = vld [vmem:[#allocation5 + $0xd0] sm:$0xff] }
  0x55   :  { %5730 = vmatpush1.bf16.msra.mxu0 %v7221_v59  ;;  %v292_v60 = vld [vmem:[#allocation5 + $0xe8] sm:$0xff]  ;;  %v306_v2 = vld [vmem:[#allocation5 + $0x158] sm:$0xff]  ;;  %v309_v3 = vld [vmem:[#allocation5 + $0x170] sm:$0xff]  ;;  %v7314_v6 = vpack.c.bf16 %v302_v57, %v299_v48 }
  0x56   :  { %5732 = vmatprep.subr.bf16.mxu0 %v7227_v63  ;;  %5752 = vmatpush3.bf16.msra.mxu1 %v7237_v13  ;;  %v305_v17 = vld [vmem:[#allocation5 + $0x150] sm:$0xff]  ;;  %v7317_v18 = vpack.c.bf16 %v292_v60, %v289_v58  ;;  %v7320_v19 = vpack.c.bf16 %v309_v3, %v306_v2  ;;  %v308_v20 = vld [vmem:[#allocation5 + $0x168] sm:$0xff]  ;;  %v295_v22 = vld [vmem:[#allocation5 + $0x100] sm:$0xff] }
  0x57   :  { %5753 = vmatprep.subr.bf16.mxu1 %v8584_v0  ;;  %v298_v28 = vld [vmem:[#allocation5 + $0x118] sm:$0xff]  ;;  %v7324_v33 = vpack.c.bf16 %v308_v20, %v305_v17  ;;  %v301_v39 = vld [vmem:[#allocation5 + $0x130] sm:$0xff]  ;;  %v304_v45 = vld [vmem:[#allocation5 + $0x148] sm:$0xff] }
  0x58   :  { %v7327_v36 = vpack.c.bf16 %v298_v28, %v295_v22  ;;  %v7335_v46 = vld [vmem:[%s8579_s5] sm:$0xff]  ;;  %v7338_v48 = vpack.c.bf16 %v304_v45, %v301_v39  ;;  %v310_v58 = vld [vmem:[#allocation5 + $0x178] sm:$0xff]  ;;  %v503_v17 = vld [vmem:[#allocation7 + $0x68] sm:$0xff] }
  0x59   :  { %5734 = vmatpush1.bf16.msra.mxu0 %v7231_v8  ;;  %v307_v57 = vld [vmem:[#allocation5 + $0x160] sm:$0xff]  ;;  %v504_v22 = vld [vmem:[#allocation7 + $0x70] sm:$0xff]  ;;  %v505_v28 = vld [vmem:[#allocation7 + $0x78] sm:$0xff] }
  0x5a   :  { %5760 = vmatprep.subr.bf16.mxu0 %v7240_v14  ;;  %5755 = vmatpush3.bf16.msra.mxu1 %v7248_v26  ;;  %v7344_v60 = vpack.c.bf16 %v310_v58, %v307_v57  ;;  %v502_v3 = vld [vmem:[#allocation7 + $0x60] sm:$0xff]  ;;  %v7396_v39 = vpack.c.bf16 %v505_v28, %v504_v22  ;;  %v314_v58 = vshrl.u32 %v68_v61, 7 }
  0x5b   :  { %5756 = vmatprep.subr.bf16.mxu1 %v8584_v0  ;;  %v7392_v20 = vpack.c.bf16 %v503_v17, %v502_v3 }
  0x5c   :  { %4408 = vmatmul.mubr.msk.f32.vlgmr.msra.gmra.mrb[0].mxu0 %vm71_vm1, %v8582_v37  ;;  %v7411_v22 = vsub.s32 2, %v314_v58 }
  0x5d   :  { %5762 = vmatpush1.bf16.msra.mxu0 %v7245_v24  ;;  %392 = vmatprep.mubr.f32.mxu0 %v8586_v1 }
  0x5e   :  { %5764 = vmatprep.subr.bf16.mxu0 %v7251_v27  ;;  %5758 = vmatpush3.bf16.msra.mxu1 %v7261_v40 }
  0x5f   :  { %5791 = vmatprep.subr.bf16.mxu1 %v8584_v0 }
  0x61   :  { %5766 = vmatpush1.bf16.msra.mxu0 %v7258_v38  ;;  %4896 = vmatmul.mubr.msk.f32.vlgmr.msra.gmra.mrb[0].mxu1 %vm71_vm1, %v8582_v37 }
  0x62   :  { %5768 = vmatprep.subr.bf16.mxu0 %v7264_v42  ;;  %5793 = vmatpush3.bf16.msra.mxu1 %v7272_v55 }
  0x63   :  { %5794 = vmatprep.subr.bf16.mxu1 %v8584_v0  ;;  %4930 = vmatprep.mubr.msk.f32.mxu1 %vm7075_vm0, %v8586_v1 }
  0x65   :  { %5770 = vmatpush1.bf16.msra.mxu0 %v7269_v51 }
  0x66   :  { %5772 = vmatprep.subr.bf16.mxu0 %v7275_v56  ;;  %5796 = vmatpush3.bf16.msra.mxu1 %v7285_v7 }
  0x67   :  { %5797 = vmatprep.subr.bf16.mxu1 %v8584_v0 }
  0x69   :  { %5774 = vmatpush1.bf16.msra.mxu0 %v7282_v4 }
  0x6a   :  { %5776 = vmatprep.subr.bf16.mxu0 %v7288_v12  ;;  %5799 = vmatpush3.bf16.msra.mxu1 %v7297_v30 }
  0x6b   :  { %5800 = vmatprep.subr.bf16.mxu1 %v8584_v0 }
  0x6d   :  { %5778 = vmatpush1.bf16.msra.mxu0 %v7294_v25 }
  0x6e   :  { %5780 = vmatprep.subr.bf16.mxu0 %v7300_v31  ;;  %5802 = vmatpush3.bf16.msra.mxu1 %v7307_v49 }
  0x6f   :  { %5803 = vmatprep.subr.bf16.mxu1 %v8584_v0 }
  0x71   :  { %5782 = vmatpush1.bf16.msra.mxu0 %v7304_v47 }
  0x72   :  { %5784 = vmatprep.subr.bf16.mxu0 %v7310_v54  ;;  %5805 = vmatpush3.bf16.msra.mxu1 %v7317_v18 }
  0x73   :  { %5806 = vmatprep.subr.bf16.mxu1 %v8584_v0 }
  0x75   :  { %5786 = vmatpush1.bf16.msra.mxu0 %v7314_v6 }
  0x76   :  { %5788 = vmatprep.subr.bf16.mxu0 %v7320_v19  ;;  %5808 = vmatpush3.bf16.msra.mxu1 %v7327_v36 }
  0x77   :  { %5809 = vmatprep.subr.bf16.mxu1 %v8584_v0 }
  0x79   :  { %5790 = vmatpush1.bf16.msra.mxu0 %v7324_v33 }
  0x7a   :  { %5815 = vmatprep.subr.bf16.mxu0 %v8584_v0  ;;  %5811 = vmatpush3.bf16.msra.mxu1 %v7338_v48 }
  0x7b   :  { %5812 = vmatprep.subr.bf16.mxu1 %v8584_v0 }
  0x7c   :  { %393 = vmatmul.mubr.f32.vlgmr.msra.gmra.mrb[0].mxu0 %v7335_v46 }
  0x7d   :  { %4965 = vmatprep.mubr.msk.f32.mxu0 %vm7075_vm0, %v8586_v1 }
  0x7e   :  { %5814 = vmatpush3.bf16.msra.mxu1 %v7344_v60 }
  0x7f   :  { %5840 = vmatprep.subr.bf16.mxu1 %v7169_v5  ;;  %v490_v5 = vld [vmem:[#allocation7] sm:$0xff] }
  0x81   :  { %4931 = vmatmul.mubr.f32.vlgmr.msra.gmra.mrb[2].mxu1 %v7335_v46 }
  0x82   :  { %5842 = vmatpush1.bf16.msra.mxu1 %v7171_v9  ;;  %725 = vmatprep.mubr.f32.mxu1 %v8586_v1  ;;  %v491_v9 = vld [vmem:[#allocation7 + $0x8] sm:$0xff] }
  0x83   :  { %5844 = vmatprep.subr.bf16.mxu1 %v7173_v10  ;;  %v7369_v10 = vpack.c.bf16 %v491_v9, %v490_v5  ;;  %v7402_v5 = vsub.s32 0, %v314_v58  ;;  %v311_v9 = vld [vmem:[%s8576_s2] sm:$0x7] }
  0x84   :  { %v324_v28 = vrot.slane %v311_v9, %v7411_v22 }
  0x85   :  { %5817 = vmatpush3.bf16.msra.mxu0 %v7369_v10  ;;  %8613 = vst [vmem:[#allocation15_spill] sm:$0xff] %v7402_v5 }
  0x86   :  { %5846 = vmatpush1.bf16.msra.mxu1 %v7177_v15  ;;  %5818 = vmatprep.subr.bf16.mxu0 %v8584_v0  ;;  %v492_v15 = vld [vmem:[#allocation7 + $0x10] sm:$0xff] }
  0x87   :  { %5848 = vmatprep.subr.bf16.mxu1 %v7180_v16  ;;  %v493_v16 = vld [vmem:[#allocation7 + $0x18] sm:$0xff] }
  0x8a   :  { %5850 = vmatpush1.bf16.msra.mxu1 %v7183_v21  ;;  %v7373_v21 = vpack.c.bf16 %v493_v16, %v492_v15  ;;  %v7407_v15 = vsub.s32 1, %v314_v58  ;;  %v316_v16 = vrot.slane %v311_v9, %v7402_v5  ;;  %v8615_v58 = vmov 0.0  }
  0x8b   :  { %5852 = vmatprep.subr.bf16.mxu1 %v7186_v23  ;;  %v494_v23 = vld [vmem:[#allocation7 + $0x20] sm:$0xff] }
  0x8c   :  { %5820 = vmatpush3.bf16.msra.mxu0 %v7373_v21  ;;  %8614 = vst [vmem:[#allocation16_spill] sm:$0xff] %v7407_v15 }
  0x8d   :  { %5821 = vmatprep.subr.bf16.mxu0 %v8584_v0 }
  0x8e   :  { %5854 = vmatpush1.bf16.msra.mxu1 %v7191_v32  ;;  %v495_v32 = vld [vmem:[#allocation7 + $0x28] sm:$0xff] }
  0x8f   :  { %5856 = vmatprep.subr.bf16.mxu1 %v7197_v35  ;;  %v7377_v35 = vpack.c.bf16 %v495_v32, %v494_v23  ;;  %v320_v32 = vrot.slane %v311_v9, %v7407_v15  ;;  %v8616_v9 = vmov 0.0|0.0  }
  0x91   :  { %5823 = vmatpush3.bf16.msra.mxu0 %v7377_v35 }
  0x92   :  { %5858 = vmatpush1.bf16.msra.mxu1 %v7201_v41  ;;  %5824 = vmatprep.subr.bf16.mxu0 %v8584_v0  ;;  %v496_v41 = vld [vmem:[#allocation7 + $0x30] sm:$0xff] }
  0x93   :  { %5860 = vmatprep.subr.bf16.mxu1 %v7207_v44  ;;  %v497_v44 = vld [vmem:[#allocation7 + $0x38] sm:$0xff] }
  0x96   :  { %5862 = vmatpush1.bf16.msra.mxu1 %v7211_v50  ;;  %v7381_v50 = vpack.c.bf16 %v497_v44, %v496_v41 }
  0x97   :  { %5864 = vmatprep.subr.bf16.mxu1 %v7217_v53  ;;  %v498_v53 = vld [vmem:[#allocation7 + $0x40] sm:$0xff] }
  0x98   :  { %5826 = vmatpush3.bf16.msra.mxu0 %v7381_v50 }
  0x99   :  { %5827 = vmatprep.subr.bf16.mxu0 %v8584_v0 }
  0x9a   :  { %5866 = vmatpush1.bf16.msra.mxu1 %v7221_v59  ;;  %v499_v59 = vld [vmem:[#allocation7 + $0x48] sm:$0xff] }
  0x9b   :  { %5868 = vmatprep.subr.bf16.mxu1 %v7227_v63  ;;  %v7385_v63 = vpack.c.bf16 %v499_v59, %v498_v53 }
  0x9d   :  { %5829 = vmatpush3.bf16.msra.mxu0 %v7385_v63 }
  0x9e   :  { %5870 = vmatpush1.bf16.msra.mxu1 %v7231_v8  ;;  %v500_v8 = vld [vmem:[#allocation7 + $0x50] sm:$0xff]  ;;  %5830 = vmatprep.subr.bf16.mxu0 %v8584_v0 }
  0x9f   :  { %5896 = vmatprep.subr.bf16.mxu1 %v7240_v14  ;;  %v501_v14 = vld [vmem:[#allocation7 + $0x58] sm:$0xff] }
  0xa0   :  { %v7389_v2 = vpack.c.bf16 %v501_v14, %v500_v8 }
  0xa2   :  { %5832 = vmatpush3.bf16.msra.mxu0 %v7389_v2 }
  0xa3   :  { %5833 = vmatprep.subr.bf16.mxu0 %v8584_v0 }
  0xa6   :  { %5835 = vmatpush3.bf16.msra.mxu0 %v7392_v20 }
  0xa7   :  { %5836 = vmatprep.subr.bf16.mxu0 %v8584_v0 }
  0xaa   :  { %5838 = vmatpush3.bf16.msra.mxu0 %v7396_v39 }
  0xab   :  { %5871 = vmatprep.subr.bf16.mxu0 %v8584_v0 }
 0x134   :  { %v259_v45 = vpop.f32.mrb[0].mxu1 }
 0x135   :  { %v4897_v57 = vpop.f32.mrb[1].mxu1 }
 0x14f   :  { %v394_v23 = vpop.f32.mrb[0].mxu0 }
 0x150   :  { %v395_v41 = vadd.f32 %v394_v23, %v316_v16  ;;  %v396_v44 = vpop.f32.mrb[1].mxu0 }
 0x151   :  { %v397_v59 = vadd.f32 %v396_v44, %v320_v32 }
 0x152   :  { %v4410_v53 = vmul.f32 -1.442695, %v395_v41 }
 0x153   :  { %v4411_v8 = vmul.f32 -1.442695, %v397_v59 }
 0x154   :  { %6836 = vpow2.f32 %v4410_v53  ;;  %v465_v61 = vpop.f32.mrb[2].mxu1 }
 0x155   :  { %v4932_v14 = vpop.f32.mrb[3].mxu1  ;;  %6838 = vpow2.f32 %v4411_v8  ;;  %v466_v0 = vadd.f32 %v465_v61, %v324_v28 }
 0x15e   :  { %v6837_v3 = vpop.eup %6836 }
 0x15f   :  { %v473_v17 = vadd.f32 1.0, %v6837_v3  ;;  %v6839_v57 = vpop.eup %6838 }
 0x160   :  { %v480_v37 = vadd.f32 1.0, %v6839_v57  ;;  %v8618_v57 = vmov 1.0  }
 0x161   :  { %6840 = vrcp.f32 %v473_v17 }
 0x162   :  { %6842 = vrcp.f32 %v480_v37 }
 0x16b   :  { %v6841_v1 = vpop.eup %6840 }
 0x16c   :  { %v483_v16 = vmul.f32 %v6841_v1, %v466_v0  ;;  %v6843_v32 = vpop.eup %6842  ;;  %v7439_v0 = vld [vmem:[%s8578_s4] ss:$0 sm:$0xff] }
 0x16d   :  { %v486_v41 = vsub.f32 1.0, %v6843_v32  ;;  %v488_v59 = vmul.f32 %v6843_v32, %v7335_v46 }
 0x16e   :  { %v484_v23 = vadd.f32 %v483_v16, %v259_v45 }
 0x170   :  { %6844 = vtanh.f32 %v484_v23 }
 0x17a   :  { %v6845_v44 = vpop.eup %6844 }
 0x17b   :  { %v487_v53 = vmul.f32 %v6845_v44, %v486_v41 }
 0x17d   :  { %v7415_v8 = vadd.f32 %v488_v59, %v487_v53  ;;  %v1154_v53 = vld [vmem:[#allocation2 + $0x8] sm:$0xff]  ;;  %v1157_v59 = vld [vmem:[#allocation2 + $0x20] sm:$0xff] }
 0x17f   :  { %4966 = vmatmul.mubr.f32.vlgmr.msra.gmra.mrb[2].mxu0 %v7415_v8 }
 0x180   :  { %5873 = vmatpush3.bf16.msra.mxu0 %v7188_v29  ;;  %5000 = vmatprep.mubr.msk.f32.mxu0 %vm7075_vm0, %v8615_v58 }
 0x181   :  { %5874 = vmatprep.subr.bf16.mxu0 %v8616_v9 }
 0x184   :  { %5876 = vmatpush3.bf16.msra.mxu0 %v7194_v34 }
 0x185   :  { %5877 = vmatprep.subr.bf16.mxu0 %v8616_v9 }
 0x188   :  { %5879 = vmatpush3.bf16.msra.mxu0 %v7204_v43 }
 0x189   :  { %5880 = vmatprep.subr.bf16.mxu0 %v8616_v9 }
 0x18c   :  { %5882 = vmatpush3.bf16.msra.mxu0 %v7214_v52 }
 0x18d   :  { %5883 = vmatprep.subr.bf16.mxu0 %v8616_v9 }
 0x190   :  { %5885 = vmatpush3.bf16.msra.mxu0 %v7224_v62 }
 0x191   :  { %5886 = vmatprep.subr.bf16.mxu0 %v8616_v9 }
 0x194   :  { %5888 = vmatpush3.bf16.msra.mxu0 %v7237_v13 }
 0x195   :  { %5889 = vmatprep.subr.bf16.mxu0 %v8616_v9 }
 0x198   :  { %5891 = vmatpush3.bf16.msra.mxu0 %v7248_v26 }
 0x199   :  { %5892 = vmatprep.subr.bf16.mxu0 %v8616_v9 }
 0x19c   :  { %5894 = vmatpush3.bf16.msra.mxu0 %v7261_v40 }
 0x19d   :  { %5927 = vmatprep.subr.bf16.mxu0 %v8616_v9 }
 0x252   :  { %v579_v1 = vpop.f32.mrb[2].mxu0 }
 0x253   :  { %v580_v29 = vadd.f32 %v7439_v0, %v579_v1  ;;  %v4967_v34 = vpop.f32.mrb[3].mxu0  ;;  %v1156_v1 = vld [vmem:[#allocation2 + $0x18] sm:$0xff] }
 0x254   :  { %v1158_v34 = vld [vmem:[#allocation2 + $0x28] sm:$0xff] }
 0x255   :  { %583 = vmax.xlane.f32.xlu0 %v580_v29 }
 0x2e2   :  { %v584_v43 = vpop.xlane.xlu0 %583 }
 0x2e3   :  { %v7442_v52 = vsub.f32 %v580_v29, %v584_v43  ;;  %v1155_v29 = vld [vmem:[#allocation2 + $0x10] sm:$0xff] }
 0x2e5   :  { %8617 = vst [vmem:[#allocation17_spill] sm:$0xff] %v7442_v52  ;;  %vm594_vm2 = vcmp.eq.f32.partialorder %v7442_v52, 0.0  ;;  %v1389_v52 = vld [vmem:[#allocation5 + $0x178] sm:$0xff] }
 0x2e6   :  { %v595_v62 = vsel %vm594_vm2, %v7234_v11, 128 }
 0x2e7   :  { %v597_v13 = vshra.s32 %v595_v62, 16  ;;  %v596_v37 = vand.u32 65535, %v595_v62  ;;  %v7531_v62 = vpack.c.bf16 %v1158_v34, %v1155_v29  ;;  %v1189_v29 = vld [vmem:[#allocation2 + $0x120] sm:$0xff] }
 0x2e9   :  { %v599_v26 = vcvt.s32.f32 %v597_v13  ;;  %v598_v46 = vcvt.s32.f32 %v596_v37  ;;  %v1160_v13 = vld [vmem:[#allocation2 + $0x38] sm:$0xff]  ;;  %v1159_v37 = vld [vmem:[#allocation2 + $0x30] sm:$0xff] }
 0x2eb   :  { %600 = vmin.xlane.f32.xlu0 %v599_v26 }
 0x378   :  { %v601_v40 = vpop.xlane.xlu0 %600 }
 0x379   :  { %vm602_vm3 = vcmp.eq.f32.partialorder %v599_v26, %v601_v40  ;;  %v607_v61 = vcvt.f32.s32 %v601_v40  ;;  %v1163_v26 = vld [vmem:[#allocation2 + $0x50] sm:$0xff] }
 0x37a   :  { %v603_v45 = vsel %vm602_vm3, %v598_v46, inf  ;;  %v7534_v40 = vpack.c.bf16 %v1163_v26, %v1160_v13  ;;  %v1162_v46 = vld [vmem:[#allocation2 + $0x48] sm:$0xff]  ;;  %v1192_v13 = vld [vmem:[#allocation2 + $0x138] sm:$0xff]  ;;  %v1191_v26 = vld [vmem:[#allocation2 + $0x130] sm:$0xff] }
 0x37b   :  { %604 = vmin.xlane.f32.xlu1 %v603_v45  ;;  %v608_v3 = vshll.u32 %v607_v61, 16  ;;  %v1161_v45 = vld [vmem:[#allocation2 + $0x40] sm:$0xff]  ;;  %v1164_v61 = vld [vmem:[#allocation2 + $0x58] sm:$0xff] }
 0x408   :  { %v605_v14 = vpop.xlane.xlu1 %604 }
 0x409   :  { %v606_v17 = vcvt.f32.s32 %v605_v14  ;;  %v7538_v14 = vpack.c.bf16 %v1162_v46, %v1159_v37  ;;  %v1194_v37 = vld [vmem:[#allocation2 + $0x148] sm:$0xff]  ;;  %v7588_v46 = vpack.c.bf16 %v1192_v13, %v1189_v29  ;;  %v1348_v29 = vld [vmem:[#allocation5 + $0x30] sm:$0xff] }
 0x40b   :  { %v609_v28 = vadd.s32 %v608_v3, %v606_v17  ;;  %v7540_v3 = vpack.c.bf16 %v1164_v61, %v1161_v45  ;;  %v1166_v17 = vld [vmem:[#allocation2 + $0x68] sm:$0xff]  ;;  %v7590_v45 = vpack.c.bf16 %v1194_v37, %v1191_v26  ;;  %v1350_v37 = vld [vmem:[#allocation5 + $0x40] sm:$0xff] }
 0x40c   :  { %v1351_v26 = vld [vmem:[#allocation5 + $0x48] sm:$0xff] }
 0x40d   :  { %vm610_vm4 = vcmp.eq.s32.totalorder %v7234_v11, %v609_v28  ;;  %v1169_v28 = vld [vmem:[#allocation2 + $0x80] sm:$0xff] }
 0x40e   :  { %4414 = vmatmul.mubr.msk.f32.vlgmr.msra.gmra.mrb[4].mxu1 %vm610_vm4, %v8618_v57  ;;  %5001 = vmatmul.mubr.msk.f32.vlgmr.msra.gmra.mrb[4].mxu0 %vm610_vm4, %v8618_v57 }
 0x40f   :  { %5898 = vmatpush1.bf16.msra.mxu1 %v7245_v24  ;;  %5929 = vmatpush3.bf16.msra.mxu0 %v7272_v55 }
 0x410   :  { %5900 = vmatprep.subr.bf16.mxu1 %v7251_v27  ;;  %5930 = vmatprep.subr.bf16.mxu0 %v8616_v9 }
 0x411   :  { %931 = vmatprep.mubr.f32.mxu1 %v8615_v58  ;;  %5035 = vmatprep.mubr.msk.f32.mxu0 %vm7075_vm0, %v8615_v58 }
 0x413   :  { %5902 = vmatpush1.bf16.msra.mxu1 %v7258_v38  ;;  %5932 = vmatpush3.bf16.msra.mxu0 %v7285_v7  ;;  %v850_v38 = vld [vmem:[%s8576_s2] sm:$0x7] }
 0x414   :  { %5904 = vmatprep.subr.bf16.mxu1 %v7264_v42  ;;  %5933 = vmatprep.subr.bf16.mxu0 %v8616_v9  ;;  %v855_v42 = vrot.slane %v850_v38, %v7402_v5 }
 0x417   :  { %5906 = vmatpush1.bf16.msra.mxu1 %v7269_v51  ;;  %5935 = vmatpush3.bf16.msra.mxu0 %v7297_v30 }
 0x418   :  { %5908 = vmatprep.subr.bf16.mxu1 %v7275_v56  ;;  %5936 = vmatprep.subr.bf16.mxu0 %v8616_v9  ;;  %v859_v56 = vrot.slane %v850_v38, %v7407_v15 }
 0x41b   :  { %5910 = vmatpush1.bf16.msra.mxu1 %v7282_v4  ;;  %5938 = vmatpush3.bf16.msra.mxu0 %v7307_v49 }
 0x41c   :  { %5912 = vmatprep.subr.bf16.mxu1 %v7288_v12  ;;  %5939 = vmatprep.subr.bf16.mxu0 %v8616_v9 }
 0x41f   :  { %5914 = vmatpush1.bf16.msra.mxu1 %v7294_v25  ;;  %5941 = vmatpush3.bf16.msra.mxu0 %v7317_v18 }
 0x420   :  { %5916 = vmatprep.subr.bf16.mxu1 %v7300_v31  ;;  %5942 = vmatprep.subr.bf16.mxu0 %v8616_v9 }
 0x423   :  { %5918 = vmatpush1.bf16.msra.mxu1 %v7304_v47  ;;  %5944 = vmatpush3.bf16.msra.mxu0 %v7327_v36 }
 0x424   :  { %5920 = vmatprep.subr.bf16.mxu1 %v7310_v54  ;;  %5945 = vmatprep.subr.bf16.mxu0 %v8616_v9 }
 0x427   :  { %5922 = vmatpush1.bf16.msra.mxu1 %v7314_v6  ;;  %5947 = vmatpush3.bf16.msra.mxu0 %v7338_v48  ;;  %v863_v6 = vrot.slane %v850_v38, %v7411_v22  ;;  %v1168_v38 = vld [vmem:[#allocation2 + $0x78] sm:$0xff] }
 0x428   :  { %5924 = vmatprep.subr.bf16.mxu1 %v7320_v19  ;;  %5948 = vmatprep.subr.bf16.mxu0 %v8616_v9 }
 0x42b   :  { %5926 = vmatpush1.bf16.msra.mxu1 %v7324_v33  ;;  %5950 = vmatpush3.bf16.msra.mxu0 %v7344_v60 }
 0x42c   :  { %5951 = vmatprep.subr.bf16.mxu1 %v8616_v9 }
 0x42e   :  { %932 = vmatmul.mubr.f32.vlgmr.msra.gmra.mrb[4].mxu1 %v7415_v8  ;;  %5036 = vmatmul.mubr.f32.vlgmr.msra.gmra.mrb[6].mxu0 %v7415_v8 }
 0x42f   :  { %5953 = vmatpush3.bf16.msra.mxu1 %v7369_v10  ;;  %5070 = vmatprep.mubr.msk.f32.mxu1 %vm7075_vm0, %v8615_v58 }
 0x430   :  { %5954 = vmatprep.subr.bf16.mxu1 %v8616_v9  ;;  %1265 = vmatprep.mubr.f32.mxu0 %v8615_v58 }
 0x433   :  { %5956 = vmatpush3.bf16.msra.mxu1 %v7373_v21 }
 0x434   :  { %5957 = vmatprep.subr.bf16.mxu1 %v8616_v9 }
 0x437   :  { %5959 = vmatpush3.bf16.msra.mxu1 %v7377_v35 }
 0x438   :  { %5960 = vmatprep.subr.bf16.mxu1 %v8616_v9 }
 0x43b   :  { %5962 = vmatpush3.bf16.msra.mxu1 %v7381_v50 }
 0x43c   :  { %5963 = vmatprep.subr.bf16.mxu1 %v8616_v9 }
 0x43f   :  { %5965 = vmatpush3.bf16.msra.mxu1 %v7385_v63 }
 0x440   :  { %5966 = vmatprep.subr.bf16.mxu1 %v8616_v9 }
 0x443   :  { %5968 = vmatpush3.bf16.msra.mxu1 %v7389_v2 }
 0x444   :  { %5969 = vmatprep.subr.bf16.mxu1 %v8616_v9 }
 0x447   :  { %5971 = vmatpush3.bf16.msra.mxu1 %v7392_v20 }
 0x448   :  { %5972 = vmatprep.subr.bf16.mxu1 %v8616_v9 }
 0x44b   :  { %5974 = vmatpush3.bf16.msra.mxu1 %v7396_v39 }
 0x44c   :  { %6007 = vmatprep.subr.bf16.mxu1 %v8616_v9 }
 0x4e1   :  { %v798_v24 = vpop.f32.mrb[4].mxu0 }
 0x4e2   :  { %v5002_v27 = vpop.f32.mrb[5].mxu0 }
 0x4e3   :  { %v7544_v27 = vpack.c.bf16 %v1169_v28, %v1166_v17 }
 0x501   :  { %v933_v51 = vpop.f32.mrb[4].mxu1  ;;  %v1004_v55 = vpop.f32.mrb[6].mxu0 }
 0x502   :  { %v934_v4 = vadd.f32 %v933_v51, %v855_v42  ;;  %v935_v7 = vpop.f32.mrb[5].mxu1  ;;  %v5037_v12 = vpop.f32.mrb[7].mxu0  ;;  %v1005_v19 = vadd.f32 %v1004_v55, %v863_v6  ;;  %v1167_v42 = vld [vmem:[#allocation2 + $0x70] sm:$0xff]  ;;  %v1170_v51 = vld [vmem:[#allocation2 + $0x88] sm:$0xff]  ;;  %v1172_v55 = vld [vmem:[#allocation2 + $0x98] sm:$0xff] }
 0x503   :  { %v936_v30 = vadd.f32 %v935_v7, %v859_v56  ;;  %v1175_v56 = vld [vmem:[#allocation2 + $0xb0] sm:$0xff]  ;;  %v7550_v7 = vpack.c.bf16 %v1170_v51, %v1167_v42 }
 0x504   :  { %v4416_v25 = vmul.f32 -1.442695, %v934_v4  ;;  %v1171_v12 = vld [vmem:[#allocation2 + $0x90] sm:$0xff] }
 0x505   :  { %v4417_v31 = vmul.f32 -1.442695, %v936_v30  ;;  %v1174_v30 = vld [vmem:[#allocation2 + $0xa8] sm:$0xff]  ;;  %v1199_v42 = vld [vmem:[#allocation2 + $0x170] sm:$0xff] }
 0x506   :  { %6846 = vpow2.f32 %v4416_v25  ;;  %v7554_v25 = vpack.c.bf16 %v1175_v56, %v1172_v55  ;;  %v7558_v6 = vpack.c.bf16 %v1174_v30, %v1171_v12  ;;  %v1195_v55 = vld [vmem:[#allocation2 + $0x150] sm:$0xff]  ;;  %v1198_v56 = vld [vmem:[#allocation2 + $0x168] sm:$0xff]  ;;  %v1197_v12 = vld [vmem:[#allocation2 + $0x160] sm:$0xff] }
 0x507   :  { %6848 = vpow2.f32 %v4417_v31  ;;  %v1173_v31 = vld [vmem:[#allocation2 + $0xa0] sm:$0xff]  ;;  %v7601_v30 = vpack.c.bf16 %v1198_v56, %v1195_v55  ;;  %v1357_v56 = vld [vmem:[#allocation5 + $0x78] sm:$0xff] }
 0x510   :  { %v6847_v47 = vpop.eup %6846 }
 0x511   :  { %v1012_v49 = vadd.f32 1.0, %v6847_v47  ;;  %v6849_v54 = vpop.eup %6848  ;;  %v1176_v47 = vld [vmem:[#allocation2 + $0xb8] sm:$0xff] }
 0x512   :  { %v1019_v18 = vadd.f32 1.0, %v6849_v54  ;;  %v1181_v54 = vld [vmem:[#allocation2 + $0xe0] sm:$0xff] }
 0x513   :  { %6850 = vrcp.f32 %v1012_v49  ;;  %v1178_v49 = vld [vmem:[#allocation2 + $0xc8] sm:$0xff] }
 0x514   :  { %6852 = vrcp.f32 %v1019_v18  ;;  %v7560_v18 = vpack.c.bf16 %v1176_v47, %v1173_v31  ;;  %v1200_v31 = vld [vmem:[#allocation2 + $0x178] sm:$0xff] }
 0x515   :  { %v7604_v47 = vpack.c.bf16 %v1200_v31, %v1197_v12  ;;  %v1356_v12 = vld [vmem:[#allocation5 + $0x70] sm:$0xff]  ;;  %v1359_v31 = vld [vmem:[#allocation5 + $0x88] sm:$0xff] }
 0x51d   :  { %v6851_v33 = vpop.eup %6850 }
 0x51e   :  { %v1022_v36 = vmul.f32 %v6851_v33, %v1005_v19  ;;  %v6853_v60 = vpop.eup %6852  ;;  %v1177_v19 = vld [vmem:[#allocation2 + $0xc0] sm:$0xff]  ;;  %v7564_v33 = vpack.c.bf16 %v1181_v54, %v1178_v49 }
 0x51f   :  { %v1025_v10 = vsub.f32 1.0, %v6853_v60  ;;  %v1027_v50 = vmul.f32 %v6853_v60, %v7415_v8  ;;  %v1153_v8 = vld [vmem:[#allocation2] sm:$0xff]  ;;  %v1182_v60 = vld [vmem:[#allocation2 + $0xe8] sm:$0xff] }
 0x520   :  { %v1023_v48 = vadd.f32 %v1022_v36, %v798_v24  ;;  %v7529_v43 = vpack.c.bf16 %v1156_v1, %v1153_v8  ;;  %v1165_v24 = vld [vmem:[#allocation2 + $0x60] sm:$0xff]  ;;  %v1180_v36 = vld [vmem:[#allocation2 + $0xd8] sm:$0xff] }
 0x521   :  { %v7548_v4 = vpack.c.bf16 %v1168_v38, %v1165_v24  ;;  %v1196_v38 = vld [vmem:[#allocation2 + $0x158] sm:$0xff] }
 0x522   :  { %6854 = vtanh.f32 %v1023_v48  ;;  %v1179_v48 = vld [vmem:[#allocation2 + $0xd0] sm:$0xff]  ;;  %v7599_v51 = vpack.c.bf16 %v1199_v42, %v1196_v38  ;;  %v1354_v42 = vld [vmem:[#allocation5 + $0x60] sm:$0xff] }
 0x52c   :  { %v6855_v21 = vpop.eup %6854 }
 0x52d   :  { %v1026_v35 = vmul.f32 %v6855_v21, %v1025_v10  ;;  %v1184_v10 = vld [vmem:[#allocation2 + $0xf8] sm:$0xff]  ;;  %v1187_v21 = vld [vmem:[#allocation2 + $0x110] sm:$0xff] }
 0x52f   :  { %v7511_v63 = vadd.f32 %v1027_v50, %v1026_v35  ;;  %v7568_v35 = vpack.c.bf16 %v1180_v36, %v1177_v19  ;;  %v7570_v50 = vpack.c.bf16 %v1182_v60, %v1179_v48  ;;  %v1342_v19 = vld [vmem:[#allocation5] sm:$0xff]  ;;  %v1345_v48 = vld [vmem:[#allocation5 + $0x18] sm:$0xff]  ;;  %v1344_v60 = vld [vmem:[#allocation5 + $0x10] sm:$0xff] }
 0x531   :  { %5071 = vmatmul.mubr.f32.vlgmr.msra.gmra.mrb[6].mxu1 %v7511_v63 }
 0x532   :  { %5105 = vmatprep.mubr.msk.f32.mxu1 %vm7075_vm0, %v8615_v58  ;;  %6009 = vmatpush3.bf16.msra.mxu1 %v7531_v62 }
 0x533   :  { %6010 = vmatprep.subr.bf16.mxu1 %v8616_v9 }
 0x536   :  { %6012 = vmatpush3.bf16.msra.mxu1 %v7540_v3 }
 0x537   :  { %6013 = vmatprep.subr.bf16.mxu1 %v8616_v9 }
 0x53a   :  { %6015 = vmatpush3.bf16.msra.mxu1 %v7550_v7 }
 0x53b   :  { %6016 = vmatprep.subr.bf16.mxu1 %v8616_v9 }
 0x53e   :  { %6018 = vmatpush3.bf16.msra.mxu1 %v7560_v18 }
 0x53f   :  { %6019 = vmatprep.subr.bf16.mxu1 %v8616_v9 }
 0x542   :  { %6021 = vmatpush3.bf16.msra.mxu1 %v7570_v50 }
 0x543   :  { %6022 = vmatprep.subr.bf16.mxu1 %v8616_v9 }
 0x604   :  { %v1118_v2 = vpop.f32.mrb[6].mxu1 }
 0x605   :  { %v1119_v20 = vadd.f32 %v7439_v0, %v1118_v2  ;;  %v5072_v39 = vpop.f32.mrb[7].mxu1  ;;  %v7527_v0 = vpack.c.bf16 %v1157_v59, %v1154_v53  ;;  %v1183_v2 = vld [vmem:[#allocation2 + $0xf0] sm:$0xff]  ;;  %v1190_v53 = vld [vmem:[#allocation2 + $0x128] sm:$0xff]  ;;  %v1193_v59 = vld [vmem:[#allocation2 + $0x140] sm:$0xff] }
 0x606   :  { %v1186_v39 = vld [vmem:[#allocation2 + $0x108] sm:$0xff]  ;;  %v7584_v34 = vpack.c.bf16 %v1193_v59, %v1190_v53  ;;  %v7612_v53 = vpack.c.bf16 %v1345_v48, %v1342_v19  ;;  %v7638_v19 = vpack.c.bf16 %v1359_v31, %v1356_v12  ;;  %v1372_v31 = vld [vmem:[#allocation5 + $0xf0] sm:$0xff] }
 0x607   :  { %1122 = vmax.xlane.f32.xlu1 %v1119_v20  ;;  %5976 = vmatprep.subr.bf16.mxu0 %v7527_v0  ;;  %v7578_v8 = vpack.c.bf16 %v1186_v39, %v1183_v2  ;;  %v1349_v39 = vld [vmem:[#allocation5 + $0x38] sm:$0xff] }
 0x608   :  { %5978 = vmatpush1.bf16.msra.mxu0 %v7529_v43 }
 0x609   :  { %5980 = vmatprep.subr.bf16.mxu0 %v7534_v40 }
 0x60c   :  { %5982 = vmatpush1.bf16.msra.mxu0 %v7538_v14 }
 0x60d   :  { %5984 = vmatprep.subr.bf16.mxu0 %v7544_v27 }
 0x610   :  { %5986 = vmatpush1.bf16.msra.mxu0 %v7548_v4 }
 0x611   :  { %5988 = vmatprep.subr.bf16.mxu0 %v7554_v25 }
 0x614   :  { %5990 = vmatpush1.bf16.msra.mxu0 %v7558_v6 }
 0x615   :  { %5992 = vmatprep.subr.bf16.mxu0 %v7564_v33 }
 0x618   :  { %5994 = vmatpush1.bf16.msra.mxu0 %v7568_v35 }
 0x694   :  { %v1123_v16 = vpop.xlane.xlu1 %1122 }
 0x695   :  { %v7517_v23 = vsub.f32 %v1119_v20, %v1123_v16  ;;  %v7574_v20 = vpack.c.bf16 %v1187_v21, %v1184_v10  ;;  %v1185_v16 = vld [vmem:[#allocation2 + $0x100] sm:$0xff]  ;;  %v1347_v10 = vld [vmem:[#allocation5 + $0x28] sm:$0xff] }
 0x696   :  { %v7614_v59 = vpack.c.bf16 %v1347_v10, %v1344_v60  ;;  %v1363_v60 = vld [vmem:[#allocation5 + $0xa8] sm:$0xff]  ;;  %v1362_v10 = vld [vmem:[#allocation5 + $0xa0] sm:$0xff] }
 0x697   :  { %8619 = vst [vmem:[#allocation18_spill] sm:$0xff] %v7517_v23  ;;  %vm1134_vm5 = vcmp.eq.f32.partialorder %v7517_v23, 0.0  ;;  %5996 = vmatprep.subr.bf16.mxu0 %v7574_v20  ;;  %v1388_v23 = vld [vmem:[#allocation5 + $0x170] sm:$0xff] }
 0x698   :  { %v7521_v32 = vsel %vm1134_vm5, %v7234_v11, 128  ;;  %5998 = vmatpush1.bf16.msra.mxu0 %v7578_v8 }
 0x699   :  { %v1137_v41 = vshra.s32 %v7521_v32, 16  ;;  %6000 = vmatprep.subr.bf16.mxu0 %v7584_v34  ;;  %v1136_v61 = vand.u32 65535, %v7521_v32  ;;  %v1343_v32 = vld [vmem:[#allocation5 + $0x8] sm:$0xff] }
 0x69b   :  { %v7524_v44 = vcvt.s32.f32 %v1137_v41  ;;  %v1188_v41 = vld [vmem:[#allocation2 + $0x118] sm:$0xff]  ;;  %v1138_v28 = vcvt.s32.f32 %v1136_v61 }
 0x69c   :  { %v7580_v1 = vpack.c.bf16 %v1188_v41, %v1185_v16  ;;  %6002 = vmatpush1.bf16.msra.mxu0 %v7588_v46  ;;  %v1352_v16 = vld [vmem:[#allocation5 + $0x50] sm:$0xff]  ;;  %v1353_v61 = vld [vmem:[#allocation5 + $0x58] sm:$0xff] }
 0x69d   :  { %1140 = vmin.xlane.f32.xlu0 %v7524_v44  ;;  %6004 = vmatprep.subr.bf16.mxu0 %v7599_v51  ;;  %v7616_v13 = vpack.c.bf16 %v1352_v16, %v1349_v39  ;;  %v7625_v38 = vpack.c.bf16 %v1353_v61, %v1350_v37  ;;  %v1370_v39 = vld [vmem:[#allocation5 + $0xe0] sm:$0xff]  ;;  %v1369_v37 = vld [vmem:[#allocation5 + $0xd8] sm:$0xff]  ;;  %v1368_v61 = vld [vmem:[#allocation5 + $0xd0] sm:$0xff] }
 0x69e   :  { %6024 = vmatpush3.bf16.msra.mxu1 %v7580_v1 }
 0x69f   :  { %6025 = vmatprep.subr.bf16.mxu1 %v8616_v9 }
 0x6a0   :  { %6006 = vmatpush1.bf16.msra.mxu0 %v7601_v30 }
 0x6a2   :  { %6027 = vmatpush3.bf16.msra.mxu1 %v7590_v45 }
 0x6a3   :  { %6028 = vmatprep.subr.bf16.mxu1 %v8616_v9 }
 0x6a6   :  { %6030 = vmatpush3.bf16.msra.mxu1 %v7604_v47 }
 0x6a7   :  { %6063 = vmatprep.subr.bf16.mxu1 %v8616_v9 }
 0x72a   :  { %v1141_v17 = vpop.xlane.xlu0 %1140 }
 0x72b   :  { %vm1142_vm6 = vcmp.eq.f32.partialorder %v7524_v44, %v1141_v17  ;;  %v1346_v44 = vld [vmem:[#allocation5 + $0x20] sm:$0xff]  ;;  %v1147_v54 = vcvt.f32.s32 %v1141_v17  ;;  %v1355_v17 = vld [vmem:[#allocation5 + $0x68] sm:$0xff] }
 0x72c   :  { %v1143_v24 = vsel %vm1142_vm6, %v1138_v28, inf  ;;  %v7608_v49 = vpack.c.bf16 %v1346_v44, %v1343_v32  ;;  %v1358_v28 = vld [vmem:[#allocation5 + $0x80] sm:$0xff]  ;;  %v1361_v32 = vld [vmem:[#allocation5 + $0x98] sm:$0xff]  ;;  %v1364_v44 = vld [vmem:[#allocation5 + $0xb0] sm:$0xff] }
 0x72d   :  { %1144 = vmin.xlane.f32.xlu1 %v1143_v24  ;;  %v1148_v21 = vshll.u32 %v1147_v54, 16  ;;  %v7623_v24 = vpack.c.bf16 %v1351_v26, %v1348_v29  ;;  %v7629_v55 = vpack.c.bf16 %v1358_v28, %v1355_v17  ;;  %v7636_v54 = vpack.c.bf16 %v1357_v56, %v1354_v42  ;;  %v1366_v29 = vld [vmem:[#allocation5 + $0xc0] sm:$0xff]  ;;  %v1371_v17 = vld [vmem:[#allocation5 + $0xe8] sm:$0xff]  ;;  %v1373_v28 = vld [vmem:[#allocation5 + $0xf8] sm:$0xff] }
 0x72e   :  { %6032 = vmatprep.subr.bf16.mxu0 %v7608_v49  ;;  %v7642_v48 = vpack.c.bf16 %v1364_v44, %v1361_v32  ;;  %v1376_v42 = vld [vmem:[#allocation5 + $0x110] sm:$0xff]  ;;  %v7656_v56 = vpack.c.bf16 %v1369_v37, %v1366_v29  ;;  %v7658_v12 = vpack.c.bf16 %v1371_v17, %v1368_v61  ;;  %v1375_v44 = vld [vmem:[#allocation5 + $0x108] sm:$0xff]  ;;  %v1378_v29 = vld [vmem:[#allocation5 + $0x120] sm:$0xff] }
 0x72f   :  { %v7662_v32 = vpack.c.bf16 %v1376_v42, %v1373_v28  ;;  %v1381_v61 = vld [vmem:[#allocation5 + $0x138] sm:$0xff]  ;;  %v1380_v17 = vld [vmem:[#allocation5 + $0x130] sm:$0xff]  ;;  %v1383_v28 = vld [vmem:[#allocation5 + $0x148] sm:$0xff] }
 0x730   :  { %v1385_v42 = vld [vmem:[#allocation5 + $0x158] sm:$0xff] }
 0x7ba   :  { %v1145_v36 = vpop.xlane.xlu1 %1144 }
 0x7bb   :  { %v1146_v2 = vcvt.f32.s32 %v1145_v36  ;;  %v1360_v36 = vld [vmem:[#allocation5 + $0x90] sm:$0xff] }
 0x7bc   :  { %v7646_v16 = vpack.c.bf16 %v1363_v60, %v1360_v36  ;;  %v1374_v36 = vld [vmem:[#allocation5 + $0x100] sm:$0xff]  ;;  %v1377_v60 = vld [vmem:[#allocation5 + $0x118] sm:$0xff] }
 0x7bd   :  { %v1149_v41 = vadd.s32 %v1148_v21, %v1146_v2  ;;  %v1365_v21 = vld [vmem:[#allocation5 + $0xb8] sm:$0xff]  ;;  %v1367_v2 = vld [vmem:[#allocation5 + $0xc8] sm:$0xff] }
 0x7be   :  { %v7652_v26 = vpack.c.bf16 %v1370_v39, %v1367_v2  ;;  %v7666_v2 = vpack.c.bf16 %v1375_v44, %v1372_v31  ;;  %v7668_v39 = vpack.c.bf16 %v1377_v60, %v1374_v36  ;;  %v7676_v31 = vpack.c.bf16 %v1381_v61, %v1378_v29  ;;  %v1384_v36 = vld [vmem:[#allocation5 + $0x150] sm:$0xff]  ;;  %v1582_v61 = vld [vmem:[#allocation7 + $0x68] sm:$0xff] }
 0x7bf   :  { %vm1150_vm7 = vcmp.eq.s32.totalorder %v7234_v11, %v1149_v41  ;;  %v7648_v41 = vpack.c.bf16 %v1365_v21, %v1362_v10  ;;  %v1379_v10 = vld [vmem:[#allocation5 + $0x128] sm:$0xff]  ;;  %v1382_v21 = vld [vmem:[#allocation5 + $0x140] sm:$0xff]  ;;  %v7678_v44 = vpack.c.bf16 %v1383_v28, %v1380_v17  ;;  %v7682_v60 = vpack.c.bf16 %v1388_v23, %v1385_v42  ;;  %v1583_v28 = vld [vmem:[#allocation7 + $0x70] sm:$0xff] }
 0x7c0   :  { %4420 = vmatmul.mubr.msk.f32.vlgmr.msra.gmra.mrb[8].mxu0 %vm1150_vm7, %v8618_v57  ;;  %5106 = vmatmul.mubr.msk.f32.vlgmr.msra.gmra.mrb[8].mxu1 %vm1150_vm7, %v8618_v57  ;;  %8620 = vst [vmem:[#allocation19_spill] sm:$0xff] %v7666_v2  ;;  %v7672_v37 = vpack.c.bf16 %v1382_v21, %v1379_v10  ;;  %v1387_v10 = vld [vmem:[#allocation5 + $0x168] sm:$0xff]  ;;  %v1386_v21 = vld [vmem:[#allocation5 + $0x160] sm:$0xff]  ;;  %v1584_v42 = vld [vmem:[#allocation7 + $0x78] sm:$0xff] }
 0x7c1   :  { %6034 = vmatpush1.bf16.msra.mxu0 %v7612_v53  ;;  %6065 = vmatpush3.bf16.msra.mxu1 %v7614_v59  ;;  %v7688_v29 = vpack.c.bf16 %v1389_v52, %v1386_v21  ;;  %v1569_v52 = vld [vmem:[#allocation7] sm:$0xff]  ;;  %v1570_v23 = vld [vmem:[#allocation7 + $0x8] sm:$0xff] }
 0x7c2   :  { %6036 = vmatprep.subr.bf16.mxu0 %v7616_v13  ;;  %6066 = vmatprep.subr.bf16.mxu1 %v8616_v9 }
 0x7c3   :  { %1471 = vmatprep.mubr.f32.mxu0 %v8615_v58  ;;  %5140 = vmatprep.mubr.msk.f32.mxu1 %vm7075_vm0, %v8615_v58 }
 0x7c5   :  { %6038 = vmatpush1.bf16.msra.mxu0 %v7623_v24  ;;  %6068 = vmatpush3.bf16.msra.mxu1 %v7625_v38 }
 0x7c6   :  { %6040 = vmatprep.subr.bf16.mxu0 %v7629_v55  ;;  %6069 = vmatprep.subr.bf16.mxu1 %v8616_v9 }
 0x7c9   :  { %6042 = vmatpush1.bf16.msra.mxu0 %v7636_v54  ;;  %6071 = vmatpush3.bf16.msra.mxu1 %v7638_v19 }
 0x7ca   :  { %6044 = vmatprep.subr.bf16.mxu0 %v7642_v48  ;;  %6072 = vmatprep.subr.bf16.mxu1 %v8616_v9 }
 0x7cd   :  { %6046 = vmatpush1.bf16.msra.mxu0 %v7646_v16  ;;  %6074 = vmatpush3.bf16.msra.mxu1 %v7648_v41 }
 0x7ce   :  { %6048 = vmatprep.subr.bf16.mxu0 %v7652_v26  ;;  %6075 = vmatprep.subr.bf16.mxu1 %v8616_v9 }
 0x7d1   :  { %6050 = vmatpush1.bf16.msra.mxu0 %v7656_v56  ;;  %6077 = vmatpush3.bf16.msra.mxu1 %v7658_v12 }
 0x7d2   :  { %6052 = vmatprep.subr.bf16.mxu0 %v7662_v32  ;;  %6078 = vmatprep.subr.bf16.mxu1 %v8616_v9 }
 0x7d5   :  { %6054 = vmatpush1.bf16.msra.mxu0 %v7666_v2  ;;  %6080 = vmatpush3.bf16.msra.mxu1 %v7668_v39  ;;  %v7686_v2 = vpack.c.bf16 %v1387_v10, %v1384_v36  ;;  %v7744_v36 = vpack.c.bf16 %v1584_v42, %v1583_v28 }
 0x7d6   :  { %6056 = vmatprep.subr.bf16.mxu0 %v7672_v37  ;;  %6081 = vmatprep.subr.bf16.mxu1 %v8616_v9 }
 0x7d7   :  { %8621 = vst [vmem:[#allocation20_spill] sm:$0xff] %v7744_v36 }
 0x7d9   :  { %6058 = vmatpush1.bf16.msra.mxu0 %v7676_v31  ;;  %6083 = vmatpush3.bf16.msra.mxu1 %v7678_v44 }
 0x7da   :  { %6060 = vmatprep.subr.bf16.mxu0 %v7682_v60  ;;  %6084 = vmatprep.subr.bf16.mxu1 %v8616_v9 }
 0x7dd   :  { %6062 = vmatpush1.bf16.msra.mxu0 %v7686_v2  ;;  %6086 = vmatpush3.bf16.msra.mxu1 %v7688_v29 }
 0x7de   :  { %6087 = vmatprep.subr.bf16.mxu0 %v8616_v9  ;;  %6112 = vmatprep.subr.bf16.mxu1 %v7527_v0  ;;  %v7717_v0 = vpack.c.bf16 %v1570_v23, %v1569_v52  ;;  %v1390_v52 = vld [vmem:[%s8576_s2] sm:$0x7] }
 0x7df   :  { %v1395_v23 = vrot.slane %v1390_v52, %v7402_v5  ;;  %v1403_v28 = vrot.slane %v1390_v52, %v7411_v22 }
 0x7e0   :  { %1472 = vmatmul.mubr.f32.vlgmr.msra.gmra.mrb[8].mxu0 %v7511_v63  ;;  %5141 = vmatmul.mubr.f32.vlgmr.msra.gmra.mrb[10].mxu1 %v7511_v63 }
 0x7e1   :  { %5175 = vmatprep.mubr.msk.f32.mxu0 %vm7075_vm0, %v8615_v58  ;;  %6114 = vmatpush1.bf16.msra.mxu1 %v7529_v43  ;;  %v1571_v43 = vld [vmem:[#allocation7 + $0x10] sm:$0xff] }
 0x7e2   :  { %6116 = vmatprep.subr.bf16.mxu1 %v7534_v40  ;;  %1805 = vmatprep.mubr.f32.mxu1 %v8615_v58  ;;  %v1572_v40 = vld [vmem:[#allocation7 + $0x18] sm:$0xff] }
 0x7e3   :  { %6089 = vmatpush3.bf16.msra.mxu0 %v7717_v0 }
 0x7e4   :  { %6090 = vmatprep.subr.bf16.mxu0 %v8616_v9 }
 0x7e5   :  { %6118 = vmatpush1.bf16.msra.mxu1 %v7538_v14  ;;  %v7721_v14 = vpack.c.bf16 %v1572_v40, %v1571_v43 }
 0x7e6   :  { %6120 = vmatprep.subr.bf16.mxu1 %v7544_v27  ;;  %v1573_v27 = vld [vmem:[#allocation7 + $0x20] sm:$0xff] }
 0x7e7   :  { %6092 = vmatpush3.bf16.msra.mxu0 %v7721_v14 }
 0x7e8   :  { %6093 = vmatprep.subr.bf16.mxu0 %v8616_v9 }
 0x7e9   :  { %6122 = vmatpush1.bf16.msra.mxu1 %v7548_v4  ;;  %v1574_v4 = vld [vmem:[#allocation7 + $0x28] sm:$0xff] }
 0x7ea   :  { %6124 = vmatprep.subr.bf16.mxu1 %v7554_v25  ;;  %v7725_v25 = vpack.c.bf16 %v1574_v4, %v1573_v27  ;;  %v1399_v27 = vrot.slane %v1390_v52, %v7407_v15 }
 0x7ec   :  { %6095 = vmatpush3.bf16.msra.mxu0 %v7725_v25 }
 0x7ed   :  { %6126 = vmatpush1.bf16.msra.mxu1 %v7558_v6  ;;  %6096 = vmatprep.subr.bf16.mxu0 %v8616_v9  ;;  %v1575_v6 = vld [vmem:[#allocation7 + $0x30] sm:$0xff] }
 0x7ee   :  { %6128 = vmatprep.subr.bf16.mxu1 %v7564_v33  ;;  %v1576_v33 = vld [vmem:[#allocation7 + $0x38] sm:$0xff] }
 0x7f1   :  { %6130 = vmatpush1.bf16.msra.mxu1 %v7568_v35  ;;  %v7729_v35 = vpack.c.bf16 %v1576_v33, %v1575_v6 }
 0x7f2   :  { %6132 = vmatprep.subr.bf16.mxu1 %v7574_v20  ;;  %v1577_v20 = vld [vmem:[#allocation7 + $0x40] sm:$0xff] }
 0x7f3   :  { %6098 = vmatpush3.bf16.msra.mxu0 %v7729_v35 }
 0x7f4   :  { %6099 = vmatprep.subr.bf16.mxu0 %v8616_v9 }
 0x7f5   :  { %6134 = vmatpush1.bf16.msra.mxu1 %v7578_v8  ;;  %v1578_v8 = vld [vmem:[#allocation7 + $0x48] sm:$0xff] }
 0x7f6   :  { %6136 = vmatprep.subr.bf16.mxu1 %v7584_v34  ;;  %v7733_v34 = vpack.c.bf16 %v1578_v8, %v1577_v20 }
 0x7f8   :  { %6101 = vmatpush3.bf16.msra.mxu0 %v7733_v34 }
 0x7f9   :  { %6138 = vmatpush1.bf16.msra.mxu1 %v7588_v46  ;;  %v1579_v46 = vld [vmem:[#allocation7 + $0x50] sm:$0xff]  ;;  %6102 = vmatprep.subr.bf16.mxu0 %v8616_v9 }
 0x7fa   :  { %6140 = vmatprep.subr.bf16.mxu1 %v7599_v51  ;;  %v1580_v51 = vld [vmem:[#allocation7 + $0x58] sm:$0xff] }
 0x7fd   :  { %6142 = vmatpush1.bf16.msra.mxu1 %v7601_v30  ;;  %v7737_v30 = vpack.c.bf16 %v1580_v51, %v1579_v46 }
 0x7fe   :  { %6168 = vmatprep.subr.bf16.mxu1 %v7608_v49  ;;  %v1581_v49 = vld [vmem:[#allocation7 + $0x60] sm:$0xff] }
 0x7ff   :  { %6104 = vmatpush3.bf16.msra.mxu0 %v7737_v30  ;;  %v7740_v17 = vpack.c.bf16 %v1582_v61, %v1581_v49 }
 0x800   :  { %6105 = vmatprep.subr.bf16.mxu0 %v8616_v9 }
 0x803   :  { %6107 = vmatpush3.bf16.msra.mxu0 %v7740_v17 }
 0x804   :  { %6108 = vmatprep.subr.bf16.mxu0 %v8616_v9 }
 0x807   :  { %6110 = vmatpush3.bf16.msra.mxu0 %v7744_v36 }
 0x808   :  { %6143 = vmatprep.subr.bf16.mxu0 %v8616_v9 }
 0x893   :  { %v1338_v10 = vpop.f32.mrb[8].mxu1 }
 0x894   :  { %v5107_v21 = vpop.f32.mrb[9].mxu1 }
 0x8b3   :  { %v1473_v43 = vpop.f32.mrb[8].mxu0  ;;  %v1544_v40 = vpop.f32.mrb[10].mxu1 }
 0x8b4   :  { %v1474_v4 = vadd.f32 %v1473_v43, %v1395_v23  ;;  %v1475_v6 = vpop.f32.mrb[9].mxu0  ;;  %v5142_v33 = vpop.f32.mrb[11].mxu1  ;;  %v1545_v21 = vadd.f32 %v1544_v40, %v1403_v28 }
 0x8b5   :  { %v1476_v8 = vadd.f32 %v1475_v6, %v1399_v27 }
 0x8b6   :  { %v4422_v20 = vmul.f32 -1.442695, %v1474_v4 }
 0x8b7   :  { %v4423_v46 = vmul.f32 -1.442695, %v1476_v8 }
 0x8b8   :  { %6856 = vpow2.f32 %v4422_v20 }
 0x8b9   :  { %6858 = vpow2.f32 %v4423_v46 }
 0x8c2   :  { %v6857_v51 = vpop.eup %6856 }
 0x8c3   :  { %v1552_v49 = vadd.f32 1.0, %v6857_v51  ;;  %v6859_v61 = vpop.eup %6858 }
 0x8c4   :  { %v1559_v42 = vadd.f32 1.0, %v6859_v61 }
 0x8c5   :  { %6860 = vrcp.f32 %v1552_v49 }
 0x8c6   :  { %6862 = vrcp.f32 %v1559_v42 }
 0x8cf   :  { %v6861_v5 = vpop.eup %6860 }
 0x8d0   :  { %v1562_v36 = vmul.f32 %v6861_v5, %v1545_v21  ;;  %v6863_v23 = vpop.eup %6862  ;;  %v7780_v5 = vld [vmem:[%s8578_s4] ss:$0 sm:$0xff] }
 0x8d1   :  { %v1565_v43 = vsub.f32 1.0, %v6863_v23  ;;  %v1567_v6 = vmul.f32 %v6863_v23, %v7511_v63 }
 0x8d2   :  { %v1563_v15 = vadd.f32 %v1562_v36, %v1338_v10 }
 0x8d4   :  { %6864 = vtanh.f32 %v1563_v15 }
 0x8de   :  { %v6865_v4 = vpop.eup %6864 }
 0x8df   :  { %v1566_v27 = vmul.f32 %v6865_v4, %v1565_v43 }
 0x8e1   :  { %v7756_v33 = vadd.f32 %v1567_v6, %v1566_v27 }
 0x8e3   :  { %5176 = vmatmul.mubr.f32.vlgmr.msra.gmra.mrb[10].mxu0 %v7756_v33 }
 0x8e4   :  { %6145 = vmatpush3.bf16.msra.mxu0 %v7531_v62  ;;  %5210 = vmatprep.mubr.msk.f32.mxu0 %vm7075_vm0, %v8615_v58 }
 0x8e5   :  { %6146 = vmatprep.subr.bf16.mxu0 %v8616_v9 }
 0x8e8   :  { %6148 = vmatpush3.bf16.msra.mxu0 %v7540_v3 }
 0x8e9   :  { %6149 = vmatprep.subr.bf16.mxu0 %v8616_v9 }
 0x8ec   :  { %6151 = vmatpush3.bf16.msra.mxu0 %v7550_v7 }
 0x8ed   :  { %6152 = vmatprep.subr.bf16.mxu0 %v8616_v9 }
 0x8f0   :  { %6154 = vmatpush3.bf16.msra.mxu0 %v7560_v18 }
 0x8f1   :  { %6155 = vmatprep.subr.bf16.mxu0 %v8616_v9 }
 0x8f4   :  { %6157 = vmatpush3.bf16.msra.mxu0 %v7570_v50 }
 0x8f5   :  { %6158 = vmatprep.subr.bf16.mxu0 %v8616_v9 }
 0x8f8   :  { %6160 = vmatpush3.bf16.msra.mxu0 %v7580_v1 }
 0x8f9   :  { %6161 = vmatprep.subr.bf16.mxu0 %v8616_v9 }
 0x8fc   :  { %6163 = vmatpush3.bf16.msra.mxu0 %v7590_v45 }
 0x8fd   :  { %6164 = vmatprep.subr.bf16.mxu0 %v8616_v9 }
 0x900   :  { %6166 = vmatpush3.bf16.msra.mxu0 %v7604_v47 }
 0x901   :  { %6199 = vmatprep.subr.bf16.mxu0 %v8616_v9 }
 0x9b6   :  { %v1658_v15 = vpop.f32.mrb[10].mxu0 }
 0x9b7   :  { %v1659_v63 = vadd.f32 %v7780_v5, %v1658_v15  ;;  %v5177_v62 = vpop.f32.mrb[11].mxu0  ;;  %v2237_v15 = vld [vmem:[#allocation2 + $0x20] sm:$0xff] }
 0x9b8   :  { %v2236_v62 = vld [vmem:[#allocation2 + $0x18] sm:$0xff] }
 0x9b9   :  { %1662 = vmax.xlane.f32.xlu0 %v1659_v63 }
 0xa46   :  { %v1663_v3 = vpop.xlane.xlu0 %1662 }
 0xa47   :  { %v7783_v7 = vsub.f32 %v1659_v63, %v1663_v3  ;;  %v2233_v63 = vld [vmem:[#allocation2] sm:$0xff]  ;;  %v2235_v3 = vld [vmem:[#allocation2 + $0x10] sm:$0xff] }
 0xa49   :  { %8622 = vst [vmem:[#allocation21_spill] sm:$0xff] %v7783_v7  ;;  %vm1674_vm8 = vcmp.eq.f32.partialorder %v7783_v7, 0.0  ;;  %v2469_v7 = vld [vmem:[#allocation5 + $0x178] sm:$0xff] }
 0xa4a   :  { %v1675_v18 = vsel %vm1674_vm8, %v7234_v11, 128 }
 0xa4b   :  { %v1677_v50 = vshra.s32 %v1675_v18, 16  ;;  %v1676_v45 = vand.u32 65535, %v1675_v18  ;;  %v2238_v18 = vld [vmem:[#allocation2 + $0x28] sm:$0xff] }
 0xa4d   :  { %v1679_v1 = vcvt.s32.f32 %v1677_v50  ;;  %v1678_v36 = vcvt.s32.f32 %v1676_v45  ;;  %v7870_v50 = vpack.c.bf16 %v2236_v62, %v2233_v63  ;;  %v2240_v45 = vld [vmem:[#allocation2 + $0x38] sm:$0xff] }
 0xa4f   :  { %1680 = vmin.xlane.f32.xlu1 %v1679_v1 }
 0xadc   :  { %v1681_v47 = vpop.xlane.xlu1 %1680 }
 0xadd   :  { %vm1682_vm9 = vcmp.eq.f32.partialorder %v1679_v1, %v1681_v47  ;;  %v1687_v52 = vcvt.f32.s32 %v1681_v47  ;;  %v7872_v1 = vpack.c.bf16 %v2238_v18, %v2235_v3  ;;  %v2243_v47 = vld [vmem:[#allocation2 + $0x50] sm:$0xff]  ;;  %v2269_v3 = vld [vmem:[#allocation2 + $0x120] sm:$0xff] }
 0xade   :  { %v1683_v10 = vsel %vm1682_vm9, %v1678_v36, inf  ;;  %v2239_v36 = vld [vmem:[#allocation2 + $0x30] sm:$0xff] }
 0xadf   :  { %1684 = vmin.xlane.f32.xlu0 %v1683_v10  ;;  %v1688_v20 = vshll.u32 %v1687_v52, 16  ;;  %v7875_v10 = vpack.c.bf16 %v2243_v47, %v2240_v45  ;;  %v2242_v52 = vld [vmem:[#allocation2 + $0x48] sm:$0xff]  ;;  %v2272_v45 = vld [vmem:[#allocation2 + $0x138] sm:$0xff]  ;;  %v2271_v47 = vld [vmem:[#allocation2 + $0x130] sm:$0xff] }
 0xb6c   :  { %v1685_v40 = vpop.xlane.xlu0 %1684 }
 0xb6d   :  { %v1686_v8 = vcvt.f32.s32 %v1685_v40  ;;  %v2241_v40 = vld [vmem:[#allocation2 + $0x40] sm:$0xff] }
 0xb6f   :  { %v1689_v46 = vadd.s32 %v1688_v20, %v1686_v8  ;;  %v2244_v20 = vld [vmem:[#allocation2 + $0x58] sm:$0xff]  ;;  %v7879_v8 = vpack.c.bf16 %v2242_v52, %v2239_v36  ;;  %v2274_v36 = vld [vmem:[#allocation2 + $0x148] sm:$0xff]  ;;  %v7929_v52 = vpack.c.bf16 %v2272_v45, %v2269_v3  ;;  %v2428_v3 = vld [vmem:[#allocation5 + $0x30] sm:$0xff] }
 0xb71   :  { %vm1690_vm10 = vcmp.eq.s32.totalorder %v7234_v11, %v1689_v46  ;;  %v7881_v46 = vpack.c.bf16 %v2244_v20, %v2241_v40  ;;  %v7931_v40 = vpack.c.bf16 %v2274_v36, %v2271_v47  ;;  %v2431_v47 = vld [vmem:[#allocation5 + $0x48] sm:$0xff]  ;;  %v2430_v36 = vld [vmem:[#allocation5 + $0x40] sm:$0xff] }
 0xb72   :  { %4426 = vmatmul.mubr.msk.f32.vlgmr.msra.gmra.mrb[12].mxu1 %vm1690_vm10, %v8618_v57  ;;  %5211 = vmatmul.mubr.msk.f32.vlgmr.msra.gmra.mrb[12].mxu0 %vm1690_vm10, %v8618_v57 }
 0xb73   :  { %6170 = vmatpush1.bf16.msra.mxu1 %v7612_v53  ;;  %6201 = vmatpush3.bf16.msra.mxu0 %v7614_v59  ;;  %v8623_v53 = vld [vmem:[#allocation19_spill] sm:$0xff]  ;;  %v8624_v59 = vld [vmem:[#allocation20_spill] sm:$0xff] }
 0xb74   :  { %6172 = vmatprep.subr.bf16.mxu1 %v7616_v13  ;;  %6202 = vmatprep.subr.bf16.mxu0 %v8616_v9 }
 0xb75   :  { %2011 = vmatprep.mubr.f32.mxu1 %v8615_v58  ;;  %5245 = vmatprep.mubr.msk.f32.mxu0 %vm7075_vm0, %v8615_v58 }
 0xb77   :  { %6174 = vmatpush1.bf16.msra.mxu1 %v7623_v24  ;;  %6204 = vmatpush3.bf16.msra.mxu0 %v7625_v38  ;;  %v1930_v38 = vld [vmem:[%s8576_s2] sm:$0x7] }
 0xb78   :  { %6176 = vmatprep.subr.bf16.mxu1 %v7629_v55  ;;  %6205 = vmatprep.subr.bf16.mxu0 %v8616_v9  ;;  %v8625_v55 = vld [vmem:[#allocation15_spill] sm:$0xff] }
 0xb7b   :  { %6178 = vmatpush1.bf16.msra.mxu1 %v7636_v54  ;;  %6207 = vmatpush3.bf16.msra.mxu0 %v7638_v19  ;;  %v1935_v54 = vrot.slane %v1930_v38, %v8625_v55 }
 0xb7c   :  { %6180 = vmatprep.subr.bf16.mxu1 %v7642_v48  ;;  %6208 = vmatprep.subr.bf16.mxu0 %v8616_v9 }
 0xb7f   :  { %6182 = vmatpush1.bf16.msra.mxu1 %v7646_v16  ;;  %6210 = vmatpush3.bf16.msra.mxu0 %v7648_v41  ;;  %v8626_v16 = vld [vmem:[#allocation16_spill] sm:$0xff] }
 0xb80   :  { %6184 = vmatprep.subr.bf16.mxu1 %v7652_v26  ;;  %6211 = vmatprep.subr.bf16.mxu0 %v8616_v9  ;;  %v1939_v41 = vrot.slane %v1930_v38, %v8626_v16 }
 0xb83   :  { %6186 = vmatpush1.bf16.msra.mxu1 %v7656_v56  ;;  %6213 = vmatpush3.bf16.msra.mxu0 %v7658_v12 }
 0xb84   :  { %6188 = vmatprep.subr.bf16.mxu1 %v7662_v32  ;;  %6214 = vmatprep.subr.bf16.mxu0 %v8616_v9 }
 0xb87   :  { %6190 = vmatpush1.bf16.msra.mxu1 %v8623_v53  ;;  %6216 = vmatpush3.bf16.msra.mxu0 %v7668_v39  ;;  %v2246_v53 = vld [vmem:[#allocation2 + $0x68] sm:$0xff] }
 0xb88   :  { %6192 = vmatprep.subr.bf16.mxu1 %v7672_v37  ;;  %6217 = vmatprep.subr.bf16.mxu0 %v8616_v9 }
 0xb8b   :  { %6194 = vmatpush1.bf16.msra.mxu1 %v7676_v31  ;;  %6219 = vmatpush3.bf16.msra.mxu0 %v7678_v44 }
 0xb8c   :  { %6196 = vmatprep.subr.bf16.mxu1 %v7682_v60  ;;  %6220 = vmatprep.subr.bf16.mxu0 %v8616_v9  ;;  %v1943_v60 = vrot.slane %v1930_v38, %v7411_v22  ;;  %v2248_v38 = vld [vmem:[#allocation2 + $0x78] sm:$0xff] }
 0xb8f   :  { %6198 = vmatpush1.bf16.msra.mxu1 %v7686_v2  ;;  %6222 = vmatpush3.bf16.msra.mxu0 %v7688_v29 }
 0xb90   :  { %6223 = vmatprep.subr.bf16.mxu1 %v8616_v9 }
 0xb92   :  { %2012 = vmatmul.mubr.f32.vlgmr.msra.gmra.mrb[12].mxu1 %v7756_v33  ;;  %5246 = vmatmul.mubr.f32.vlgmr.msra.gmra.mrb[14].mxu0 %v7756_v33 }
 0xb93   :  { %6225 = vmatpush3.bf16.msra.mxu1 %v7717_v0  ;;  %5280 = vmatprep.mubr.msk.f32.mxu1 %vm7075_vm0, %v8615_v58 }
 0xb94   :  { %6226 = vmatprep.subr.bf16.mxu1 %v8616_v9  ;;  %2345 = vmatprep.mubr.f32.mxu0 %v8615_v58 }
 0xb97   :  { %6228 = vmatpush3.bf16.msra.mxu1 %v7721_v14 }
 0xb98   :  { %6229 = vmatprep.subr.bf16.mxu1 %v8616_v9 }
 0xb9b   :  { %6231 = vmatpush3.bf16.msra.mxu1 %v7725_v25 }
 0xb9c   :  { %6232 = vmatprep.subr.bf16.mxu1 %v8616_v9 }
 0xb9f   :  { %6234 = vmatpush3.bf16.msra.mxu1 %v7729_v35 }
 0xba0   :  { %6235 = vmatprep.subr.bf16.mxu1 %v8616_v9 }
 0xba3   :  { %6237 = vmatpush3.bf16.msra.mxu1 %v7733_v34 }
 0xba4   :  { %6238 = vmatprep.subr.bf16.mxu1 %v8616_v9 }
 0xba7   :  { %6240 = vmatpush3.bf16.msra.mxu1 %v7737_v30 }
 0xba8   :  { %6241 = vmatprep.subr.bf16.mxu1 %v8616_v9 }
 0xbab   :  { %6243 = vmatpush3.bf16.msra.mxu1 %v7740_v17 }
 0xbac   :  { %6244 = vmatprep.subr.bf16.mxu1 %v8616_v9 }
 0xbaf   :  { %6246 = vmatpush3.bf16.msra.mxu1 %v8624_v59  ;;  %v2249_v59 = vld [vmem:[#allocation2 + $0x80] sm:$0xff] }
 0xbb0   :  { %6279 = vmatprep.subr.bf16.mxu1 %v8616_v9 }
 0xc45   :  { %v1878_v13 = vpop.f32.mrb[12].mxu0 }
 0xc46   :  { %v5212_v24 = vpop.f32.mrb[13].mxu0 }
 0xc47   :  { %v7885_v24 = vpack.c.bf16 %v2249_v59, %v2246_v53 }
 0xc65   :  { %v2013_v19 = vpop.f32.mrb[12].mxu1  ;;  %v2084_v48 = vpop.f32.mrb[14].mxu0 }
 0xc66   :  { %v2014_v26 = vadd.f32 %v2013_v19, %v1935_v54  ;;  %v2015_v56 = vpop.f32.mrb[13].mxu1  ;;  %v5247_v12 = vpop.f32.mrb[15].mxu0  ;;  %v2085_v0 = vadd.f32 %v2084_v48, %v1943_v60  ;;  %v2247_v54 = vld [vmem:[#allocation2 + $0x70] sm:$0xff]  ;;  %v2250_v19 = vld [vmem:[#allocation2 + $0x88] sm:$0xff]  ;;  %v2252_v48 = vld [vmem:[#allocation2 + $0x98] sm:$0xff] }
 0xc67   :  { %v2016_v2 = vadd.f32 %v2015_v56, %v1939_v41  ;;  %v2255_v41 = vld [vmem:[#allocation2 + $0xb0] sm:$0xff]  ;;  %v7891_v56 = vpack.c.bf16 %v2250_v19, %v2247_v54 }
 0xc68   :  { %v4428_v32 = vmul.f32 -1.442695, %v2014_v26  ;;  %v2251_v12 = vld [vmem:[#allocation2 + $0x90] sm:$0xff] }
 0xc69   :  { %v4429_v39 = vmul.f32 -1.442695, %v2016_v2  ;;  %v2254_v2 = vld [vmem:[#allocation2 + $0xa8] sm:$0xff]  ;;  %v2279_v54 = vld [vmem:[#allocation2 + $0x170] sm:$0xff] }
 0xc6a   :  { %6866 = vpow2.f32 %v4428_v32  ;;  %v7895_v32 = vpack.c.bf16 %v2255_v41, %v2252_v48  ;;  %v7899_v60 = vpack.c.bf16 %v2254_v2, %v2251_v12  ;;  %v2275_v48 = vld [vmem:[#allocation2 + $0x150] sm:$0xff]  ;;  %v2278_v41 = vld [vmem:[#allocation2 + $0x168] sm:$0xff]  ;;  %v2277_v12 = vld [vmem:[#allocation2 + $0x160] sm:$0xff] }
 0xc6b   :  { %6868 = vpow2.f32 %v4429_v39  ;;  %v2253_v39 = vld [vmem:[#allocation2 + $0xa0] sm:$0xff]  ;;  %v7942_v2 = vpack.c.bf16 %v2278_v41, %v2275_v48  ;;  %v2437_v41 = vld [vmem:[#allocation5 + $0x78] sm:$0xff] }
 0xc74   :  { %v6867_v37 = vpop.eup %6866 }
 0xc75   :  { %v2092_v31 = vadd.f32 1.0, %v6867_v37  ;;  %v6869_v44 = vpop.eup %6868  ;;  %v2256_v37 = vld [vmem:[#allocation2 + $0xb8] sm:$0xff] }
 0xc76   :  { %v2099_v29 = vadd.f32 1.0, %v6869_v44  ;;  %v2261_v44 = vld [vmem:[#allocation2 + $0xe0] sm:$0xff] }
 0xc77   :  { %6870 = vrcp.f32 %v2092_v31  ;;  %v2258_v31 = vld [vmem:[#allocation2 + $0xc8] sm:$0xff] }
 0xc78   :  { %6872 = vrcp.f32 %v2099_v29  ;;  %v7901_v29 = vpack.c.bf16 %v2256_v37, %v2253_v39  ;;  %v2280_v39 = vld [vmem:[#allocation2 + $0x178] sm:$0xff] }
 0xc79   :  { %v7945_v37 = vpack.c.bf16 %v2280_v39, %v2277_v12  ;;  %v2436_v12 = vld [vmem:[#allocation5 + $0x70] sm:$0xff]  ;;  %v2439_v39 = vld [vmem:[#allocation5 + $0x88] sm:$0xff] }
 0xc81   :  { %v6871_v14 = vpop.eup %6870 }
 0xc82   :  { %v2102_v25 = vmul.f32 %v6871_v14, %v2085_v0  ;;  %v6873_v34 = vpop.eup %6872  ;;  %v2257_v0 = vld [vmem:[#allocation2 + $0xc0] sm:$0xff]  ;;  %v7905_v14 = vpack.c.bf16 %v2261_v44, %v2258_v31 }
 0xc83   :  { %v2105_v30 = vsub.f32 1.0, %v6873_v34  ;;  %v2107_v49 = vmul.f32 %v6873_v34, %v7756_v33  ;;  %v2234_v33 = vld [vmem:[#allocation2 + $0x8] sm:$0xff] }
 0xc84   :  { %v2103_v35 = vadd.f32 %v2102_v25, %v1878_v13  ;;  %v2245_v13 = vld [vmem:[#allocation2 + $0x60] sm:$0xff]  ;;  %v2260_v25 = vld [vmem:[#allocation2 + $0xd8] sm:$0xff]  ;;  %v2262_v34 = vld [vmem:[#allocation2 + $0xe8] sm:$0xff] }
 0xc85   :  { %v7889_v26 = vpack.c.bf16 %v2248_v38, %v2245_v13  ;;  %v2276_v38 = vld [vmem:[#allocation2 + $0x158] sm:$0xff] }
 0xc86   :  { %6874 = vtanh.f32 %v2103_v35  ;;  %v2259_v35 = vld [vmem:[#allocation2 + $0xd0] sm:$0xff]  ;;  %v7940_v19 = vpack.c.bf16 %v2279_v54, %v2276_v38  ;;  %v2434_v54 = vld [vmem:[#allocation5 + $0x60] sm:$0xff] }
 0xc90   :  { %v6875_v17 = vpop.eup %6874 }
 0xc91   :  { %v2106_v51 = vmul.f32 %v6875_v17, %v2105_v30  ;;  %v2264_v30 = vld [vmem:[#allocation2 + $0xf8] sm:$0xff]  ;;  %v2267_v17 = vld [vmem:[#allocation2 + $0x110] sm:$0xff] }
 0xc93   :  { %v7852_v61 = vadd.f32 %v2107_v49, %v2106_v51  ;;  %v7909_v51 = vpack.c.bf16 %v2260_v25, %v2257_v0  ;;  %v7911_v49 = vpack.c.bf16 %v2262_v34, %v2259_v35  ;;  %v2422_v0 = vld [vmem:[#allocation5] sm:$0xff]  ;;  %v2425_v35 = vld [vmem:[#allocation5 + $0x18] sm:$0xff]  ;;  %v2424_v34 = vld [vmem:[#allocation5 + $0x10] sm:$0xff] }
 0xc95   :  { %5281 = vmatmul.mubr.f32.vlgmr.msra.gmra.mrb[14].mxu1 %v7852_v61 }
 0xc96   :  { %5315 = vmatprep.mubr.msk.f32.mxu1 %vm7075_vm0, %v8615_v58  ;;  %6281 = vmatpush3.bf16.msra.mxu1 %v7872_v1 }
 0xc97   :  { %6282 = vmatprep.subr.bf16.mxu1 %v8616_v9 }
 0xc9a   :  { %6284 = vmatpush3.bf16.msra.mxu1 %v7881_v46 }
 0xc9b   :  { %6285 = vmatprep.subr.bf16.mxu1 %v8616_v9 }
 0xc9e   :  { %6287 = vmatpush3.bf16.msra.mxu1 %v7891_v56 }
 0xc9f   :  { %6288 = vmatprep.subr.bf16.mxu1 %v8616_v9 }
 0xca2   :  { %6290 = vmatpush3.bf16.msra.mxu1 %v7901_v29 }
 0xca3   :  { %6291 = vmatprep.subr.bf16.mxu1 %v8616_v9 }
 0xca6   :  { %6293 = vmatpush3.bf16.msra.mxu1 %v7911_v49 }
 0xca7   :  { %6294 = vmatprep.subr.bf16.mxu1 %v8616_v9 }
 0xd68   :  { %v2198_v28 = vpop.f32.mrb[14].mxu1 }
 0xd69   :  { %v2199_v42 = vadd.f32 %v7780_v5, %v2198_v28  ;;  %v5282_v21 = vpop.f32.mrb[15].mxu1  ;;  %v7868_v5 = vpack.c.bf16 %v2237_v15, %v2234_v33  ;;  %v2263_v28 = vld [vmem:[#allocation2 + $0xf0] sm:$0xff]  ;;  %v2270_v33 = vld [vmem:[#allocation2 + $0x128] sm:$0xff]  ;;  %v2273_v15 = vld [vmem:[#allocation2 + $0x140] sm:$0xff] }
 0xd6a   :  { %v2266_v21 = vld [vmem:[#allocation2 + $0x108] sm:$0xff]  ;;  %v7925_v18 = vpack.c.bf16 %v2273_v15, %v2270_v33  ;;  %v7953_v33 = vpack.c.bf16 %v2425_v35, %v2422_v0  ;;  %v7979_v0 = vpack.c.bf16 %v2439_v39, %v2436_v12  ;;  %v2452_v39 = vld [vmem:[#allocation5 + $0xf0] sm:$0xff] }
 0xd6b   :  { %2202 = vmax.xlane.f32.xlu1 %v2199_v42  ;;  %6248 = vmatprep.subr.bf16.mxu0 %v7868_v5  ;;  %v7919_v63 = vpack.c.bf16 %v2266_v21, %v2263_v28  ;;  %v2429_v21 = vld [vmem:[#allocation5 + $0x38] sm:$0xff] }
 0xd6c   :  { %6250 = vmatpush1.bf16.msra.mxu0 %v7870_v50 }
 0xd6d   :  { %6252 = vmatprep.subr.bf16.mxu0 %v7875_v10 }
 0xd70   :  { %6254 = vmatpush1.bf16.msra.mxu0 %v7879_v8 }
 0xd71   :  { %6256 = vmatprep.subr.bf16.mxu0 %v7885_v24 }
 0xd74   :  { %6258 = vmatpush1.bf16.msra.mxu0 %v7889_v26 }
 0xd75   :  { %6260 = vmatprep.subr.bf16.mxu0 %v7895_v32 }
 0xd78   :  { %6262 = vmatpush1.bf16.msra.mxu0 %v7899_v60 }
 0xd79   :  { %6264 = vmatprep.subr.bf16.mxu0 %v7905_v14 }
 0xd7c   :  { %6266 = vmatpush1.bf16.msra.mxu0 %v7909_v51 }
 0xdf8   :  { %v2203_v23 = vpop.xlane.xlu1 %2202 }
 0xdf9   :  { %v7858_v43 = vsub.f32 %v2199_v42, %v2203_v23  ;;  %v7915_v42 = vpack.c.bf16 %v2267_v17, %v2264_v30  ;;  %v2265_v23 = vld [vmem:[#allocation2 + $0x100] sm:$0xff]  ;;  %v2427_v30 = vld [vmem:[#allocation5 + $0x28] sm:$0xff] }
 0xdfa   :  { %v7955_v15 = vpack.c.bf16 %v2427_v30, %v2424_v34  ;;  %v2443_v34 = vld [vmem:[#allocation5 + $0xa8] sm:$0xff]  ;;  %v2442_v30 = vld [vmem:[#allocation5 + $0xa0] sm:$0xff] }
 0xdfb   :  { %8627 = vst [vmem:[#allocation19_spill] sm:$0xff] %v7858_v43  ;;  %vm2214_vm11 = vcmp.eq.f32.partialorder %v7858_v43, 0.0  ;;  %6268 = vmatprep.subr.bf16.mxu0 %v7915_v42  ;;  %v2468_v43 = vld [vmem:[#allocation5 + $0x170] sm:$0xff] }
 0xdfc   :  { %v7862_v4 = vsel %vm2214_vm11, %v7234_v11, 128  ;;  %6270 = vmatpush1.bf16.msra.mxu0 %v7919_v63 }
 0xdfd   :  { %v2217_v27 = vshra.s32 %v7862_v4, 16  ;;  %6272 = vmatprep.subr.bf16.mxu0 %v7925_v18  ;;  %v2216_v20 = vand.u32 65535, %v7862_v4  ;;  %v2423_v4 = vld [vmem:[#allocation5 + $0x8] sm:$0xff] }
 0xdff   :  { %v7865_v6 = vcvt.s32.f32 %v2217_v27  ;;  %v2268_v27 = vld [vmem:[#allocation2 + $0x118] sm:$0xff]  ;;  %v2218_v59 = vcvt.s32.f32 %v2216_v20 }
 0xe00   :  { %v7921_v62 = vpack.c.bf16 %v2268_v27, %v2265_v23  ;;  %6274 = vmatpush1.bf16.msra.mxu0 %v7929_v52  ;;  %v2432_v23 = vld [vmem:[#allocation5 + $0x50] sm:$0xff]  ;;  %v2433_v20 = vld [vmem:[#allocation5 + $0x58] sm:$0xff] }
 0xe01   :  { %2220 = vmin.xlane.f32.xlu0 %v7865_v6  ;;  %6276 = vmatprep.subr.bf16.mxu0 %v7940_v19  ;;  %v7957_v45 = vpack.c.bf16 %v2432_v23, %v2429_v21  ;;  %v7966_v38 = vpack.c.bf16 %v2433_v20, %v2430_v36  ;;  %v2450_v21 = vld [vmem:[#allocation5 + $0xe0] sm:$0xff]  ;;  %v2449_v36 = vld [vmem:[#allocation5 + $0xd8] sm:$0xff]  ;;  %v2448_v20 = vld [vmem:[#allocation5 + $0xd0] sm:$0xff] }
 0xe02   :  { %6296 = vmatpush3.bf16.msra.mxu1 %v7921_v62 }
 0xe03   :  { %6297 = vmatprep.subr.bf16.mxu1 %v8616_v9 }
 0xe04   :  { %6278 = vmatpush1.bf16.msra.mxu0 %v7942_v2 }
 0xe06   :  { %6299 = vmatpush3.bf16.msra.mxu1 %v7931_v40 }
 0xe07   :  { %6300 = vmatprep.subr.bf16.mxu1 %v8616_v9 }
 0xe0a   :  { %6302 = vmatpush3.bf16.msra.mxu1 %v7945_v37 }
 0xe0b   :  { %6335 = vmatprep.subr.bf16.mxu1 %v8616_v9 }
 0xe8e   :  { %v2221_v53 = vpop.xlane.xlu0 %2220 }
 0xe8f   :  { %vm2222_vm12 = vcmp.eq.f32.partialorder %v7865_v6, %v2221_v53  ;;  %v2426_v6 = vld [vmem:[#allocation5 + $0x20] sm:$0xff]  ;;  %v2227_v44 = vcvt.f32.s32 %v2221_v53  ;;  %v2435_v53 = vld [vmem:[#allocation5 + $0x68] sm:$0xff] }
 0xe90   :  { %v2223_v13 = vsel %vm2222_vm12, %v2218_v59, inf  ;;  %v7949_v31 = vpack.c.bf16 %v2426_v6, %v2423_v4  ;;  %v2438_v59 = vld [vmem:[#allocation5 + $0x80] sm:$0xff]  ;;  %v2441_v4 = vld [vmem:[#allocation5 + $0x98] sm:$0xff]  ;;  %v2444_v6 = vld [vmem:[#allocation5 + $0xb0] sm:$0xff] }
 0xe91   :  { %2224 = vmin.xlane.f32.xlu1 %v2223_v13  ;;  %v2228_v17 = vshll.u32 %v2227_v44, 16  ;;  %v7964_v13 = vpack.c.bf16 %v2431_v47, %v2428_v3  ;;  %v7970_v48 = vpack.c.bf16 %v2438_v59, %v2435_v53  ;;  %v7977_v44 = vpack.c.bf16 %v2437_v41, %v2434_v54  ;;  %v2446_v3 = vld [vmem:[#allocation5 + $0xc0] sm:$0xff]  ;;  %v2451_v53 = vld [vmem:[#allocation5 + $0xe8] sm:$0xff]  ;;  %v2453_v59 = vld [vmem:[#allocation5 + $0xf8] sm:$0xff] }
 0xe92   :  { %6304 = vmatprep.subr.bf16.mxu0 %v7949_v31  ;;  %v7983_v35 = vpack.c.bf16 %v2444_v6, %v2441_v4  ;;  %v2456_v54 = vld [vmem:[#allocation5 + $0x110] sm:$0xff]  ;;  %v7997_v41 = vpack.c.bf16 %v2449_v36, %v2446_v3  ;;  %v7999_v12 = vpack.c.bf16 %v2451_v53, %v2448_v20  ;;  %v2455_v6 = vld [vmem:[#allocation5 + $0x108] sm:$0xff]  ;;  %v2458_v3 = vld [vmem:[#allocation5 + $0x120] sm:$0xff] }
 0xe93   :  { %v8003_v4 = vpack.c.bf16 %v2456_v54, %v2453_v59  ;;  %v2461_v20 = vld [vmem:[#allocation5 + $0x138] sm:$0xff]  ;;  %v2460_v53 = vld [vmem:[#allocation5 + $0x130] sm:$0xff]  ;;  %v2463_v59 = vld [vmem:[#allocation5 + $0x148] sm:$0xff] }
 0xe94   :  { %v2465_v54 = vld [vmem:[#allocation5 + $0x158] sm:$0xff] }
 0xf1e   :  { %v2225_v25 = vpop.xlane.xlu1 %2224 }
 0xf1f   :  { %v2226_v28 = vcvt.f32.s32 %v2225_v25  ;;  %v2440_v25 = vld [vmem:[#allocation5 + $0x90] sm:$0xff] }
 0xf20   :  { %v7987_v23 = vpack.c.bf16 %v2443_v34, %v2440_v25  ;;  %v2454_v25 = vld [vmem:[#allocation5 + $0x100] sm:$0xff]  ;;  %v2457_v34 = vld [vmem:[#allocation5 + $0x118] sm:$0xff] }
 0xf21   :  { %v2229_v27 = vadd.s32 %v2228_v17, %v2226_v28  ;;  %v2445_v17 = vld [vmem:[#allocation5 + $0xb8] sm:$0xff]  ;;  %v2447_v28 = vld [vmem:[#allocation5 + $0xc8] sm:$0xff] }
 0xf22   :  { %v7993_v47 = vpack.c.bf16 %v2450_v21, %v2447_v28  ;;  %v8007_v28 = vpack.c.bf16 %v2455_v6, %v2452_v39  ;;  %v8009_v21 = vpack.c.bf16 %v2457_v34, %v2454_v25  ;;  %v8017_v39 = vpack.c.bf16 %v2461_v20, %v2458_v3  ;;  %v2464_v25 = vld [vmem:[#allocation5 + $0x150] sm:$0xff]  ;;  %v2662_v20 = vld [vmem:[#allocation7 + $0x68] sm:$0xff] }
 0xf23   :  { %vm2230_vm13 = vcmp.eq.s32.totalorder %v7234_v11, %v2229_v27  ;;  %v7989_v27 = vpack.c.bf16 %v2445_v17, %v2442_v30  ;;  %v2459_v30 = vld [vmem:[#allocation5 + $0x128] sm:$0xff]  ;;  %v2462_v17 = vld [vmem:[#allocation5 + $0x140] sm:$0xff]  ;;  %v8019_v6 = vpack.c.bf16 %v2463_v59, %v2460_v53  ;;  %v8023_v34 = vpack.c.bf16 %v2468_v43, %v2465_v54  ;;  %v2663_v59 = vld [vmem:[#allocation7 + $0x70] sm:$0xff] }
 0xf24   :  { %4432 = vmatmul.mubr.msk.f32.vlgmr.msra.gmra.mrb[16].mxu0 %vm2230_vm13, %v8618_v57  ;;  %5316 = vmatmul.mubr.msk.f32.vlgmr.msra.gmra.mrb[16].mxu1 %vm2230_vm13, %v8618_v57  ;;  %8628 = vst [vmem:[#allocation20_spill] sm:$0xff] %v8007_v28  ;;  %v8013_v36 = vpack.c.bf16 %v2462_v17, %v2459_v30  ;;  %v2467_v30 = vld [vmem:[#allocation5 + $0x168] sm:$0xff]  ;;  %v2466_v17 = vld [vmem:[#allocation5 + $0x160] sm:$0xff]  ;;  %v2664_v54 = vld [vmem:[#allocation7 + $0x78] sm:$0xff] }
 0xf25   :  { %6306 = vmatpush1.bf16.msra.mxu0 %v7953_v33  ;;  %6337 = vmatpush3.bf16.msra.mxu1 %v7955_v15  ;;  %v8029_v3 = vpack.c.bf16 %v2469_v7, %v2466_v17  ;;  %v2649_v7 = vld [vmem:[#allocation7] sm:$0xff]  ;;  %v2650_v43 = vld [vmem:[#allocation7 + $0x8] sm:$0xff] }
 0xf26   :  { %6308 = vmatprep.subr.bf16.mxu0 %v7957_v45  ;;  %6338 = vmatprep.subr.bf16.mxu1 %v8616_v9 }
 0xf27   :  { %2551 = vmatprep.mubr.f32.mxu0 %v8615_v58  ;;  %5350 = vmatprep.mubr.msk.f32.mxu1 %vm7075_vm0, %v8615_v58 }
 0xf29   :  { %6310 = vmatpush1.bf16.msra.mxu0 %v7964_v13  ;;  %6340 = vmatpush3.bf16.msra.mxu1 %v7966_v38 }
 0xf2a   :  { %6312 = vmatprep.subr.bf16.mxu0 %v7970_v48  ;;  %6341 = vmatprep.subr.bf16.mxu1 %v8616_v9 }
 0xf2d   :  { %6314 = vmatpush1.bf16.msra.mxu0 %v7977_v44  ;;  %6343 = vmatpush3.bf16.msra.mxu1 %v7979_v0 }
 0xf2e   :  { %6316 = vmatprep.subr.bf16.mxu0 %v7983_v35  ;;  %6344 = vmatprep.subr.bf16.mxu1 %v8616_v9 }
 0xf31   :  { %6318 = vmatpush1.bf16.msra.mxu0 %v7987_v23  ;;  %6346 = vmatpush3.bf16.msra.mxu1 %v7989_v27 }
 0xf32   :  { %6320 = vmatprep.subr.bf16.mxu0 %v7993_v47  ;;  %6347 = vmatprep.subr.bf16.mxu1 %v8616_v9 }
 0xf35   :  { %6322 = vmatpush1.bf16.msra.mxu0 %v7997_v41  ;;  %6349 = vmatpush3.bf16.msra.mxu1 %v7999_v12 }
 0xf36   :  { %6324 = vmatprep.subr.bf16.mxu0 %v8003_v4  ;;  %6350 = vmatprep.subr.bf16.mxu1 %v8616_v9 }
 0xf39   :  { %6326 = vmatpush1.bf16.msra.mxu0 %v8007_v28  ;;  %6352 = vmatpush3.bf16.msra.mxu1 %v8009_v21  ;;  %v8027_v28 = vpack.c.bf16 %v2467_v30, %v2464_v25  ;;  %v8085_v25 = vpack.c.bf16 %v2664_v54, %v2663_v59 }
 0xf3a   :  { %6328 = vmatprep.subr.bf16.mxu0 %v8013_v36  ;;  %6353 = vmatprep.subr.bf16.mxu1 %v8616_v9 }
 0xf3b   :  { %8629 = vst [vmem:[#allocation22_spill] sm:$0xff] %v8085_v25 }
 0xf3d   :  { %6330 = vmatpush1.bf16.msra.mxu0 %v8017_v39  ;;  %6355 = vmatpush3.bf16.msra.mxu1 %v8019_v6 }
 0xf3e   :  { %6332 = vmatprep.subr.bf16.mxu0 %v8023_v34  ;;  %6356 = vmatprep.subr.bf16.mxu1 %v8616_v9 }
 0xf41   :  { %6334 = vmatpush1.bf16.msra.mxu0 %v8027_v28  ;;  %6358 = vmatpush3.bf16.msra.mxu1 %v8029_v3 }
 0xf42   :  { %6359 = vmatprep.subr.bf16.mxu0 %v8616_v9  ;;  %6384 = vmatprep.subr.bf16.mxu1 %v7868_v5  ;;  %v8058_v5 = vpack.c.bf16 %v2650_v43, %v2649_v7  ;;  %v2470_v7 = vld [vmem:[%s8576_s2] sm:$0x7] }
 0xf43   :  { %v2475_v43 = vrot.slane %v2470_v7, %v8625_v55  ;;  %v2483_v59 = vrot.slane %v2470_v7, %v7411_v22 }
 0xf44   :  { %2552 = vmatmul.mubr.f32.vlgmr.msra.gmra.mrb[16].mxu0 %v7852_v61  ;;  %5351 = vmatmul.mubr.f32.vlgmr.msra.gmra.mrb[18].mxu1 %v7852_v61 }
 0xf45   :  { %5385 = vmatprep.mubr.msk.f32.mxu0 %vm7075_vm0, %v8615_v58  ;;  %6386 = vmatpush1.bf16.msra.mxu1 %v7870_v50  ;;  %v2651_v50 = vld [vmem:[#allocation7 + $0x10] sm:$0xff] }
 0xf46   :  { %6388 = vmatprep.subr.bf16.mxu1 %v7875_v10  ;;  %2885 = vmatprep.mubr.f32.mxu1 %v8615_v58  ;;  %v2652_v10 = vld [vmem:[#allocation7 + $0x18] sm:$0xff] }
 0xf47   :  { %6361 = vmatpush3.bf16.msra.mxu0 %v8058_v5 }
 0xf48   :  { %6362 = vmatprep.subr.bf16.mxu0 %v8616_v9 }
 0xf49   :  { %6390 = vmatpush1.bf16.msra.mxu1 %v7879_v8  ;;  %v8062_v8 = vpack.c.bf16 %v2652_v10, %v2651_v50 }
 0xf4a   :  { %6392 = vmatprep.subr.bf16.mxu1 %v7885_v24  ;;  %v2653_v24 = vld [vmem:[#allocation7 + $0x20] sm:$0xff] }
 0xf4b   :  { %6364 = vmatpush3.bf16.msra.mxu0 %v8062_v8 }
 0xf4c   :  { %6365 = vmatprep.subr.bf16.mxu0 %v8616_v9 }
 0xf4d   :  { %6394 = vmatpush1.bf16.msra.mxu1 %v7889_v26  ;;  %v2654_v26 = vld [vmem:[#allocation7 + $0x28] sm:$0xff] }
 0xf4e   :  { %6396 = vmatprep.subr.bf16.mxu1 %v7895_v32  ;;  %v8066_v32 = vpack.c.bf16 %v2654_v26, %v2653_v24  ;;  %v2479_v24 = vrot.slane %v2470_v7, %v8626_v16 }
 0xf50   :  { %6367 = vmatpush3.bf16.msra.mxu0 %v8066_v32 }
 0xf51   :  { %6398 = vmatpush1.bf16.msra.mxu1 %v7899_v60  ;;  %6368 = vmatprep.subr.bf16.mxu0 %v8616_v9  ;;  %v2655_v60 = vld [vmem:[#allocation7 + $0x30] sm:$0xff] }
 0xf52   :  { %6400 = vmatprep.subr.bf16.mxu1 %v7905_v14  ;;  %v2656_v14 = vld [vmem:[#allocation7 + $0x38] sm:$0xff] }
 0xf55   :  { %6402 = vmatpush1.bf16.msra.mxu1 %v7909_v51  ;;  %v8070_v51 = vpack.c.bf16 %v2656_v14, %v2655_v60 }
 0xf56   :  { %6404 = vmatprep.subr.bf16.mxu1 %v7915_v42  ;;  %v2657_v42 = vld [vmem:[#allocation7 + $0x40] sm:$0xff] }
 0xf57   :  { %6370 = vmatpush3.bf16.msra.mxu0 %v8070_v51 }
 0xf58   :  { %6371 = vmatprep.subr.bf16.mxu0 %v8616_v9 }
 0xf59   :  { %6406 = vmatpush1.bf16.msra.mxu1 %v7919_v63  ;;  %v2658_v63 = vld [vmem:[#allocation7 + $0x48] sm:$0xff] }
 0xf5a   :  { %6408 = vmatprep.subr.bf16.mxu1 %v7925_v18  ;;  %v8074_v18 = vpack.c.bf16 %v2658_v63, %v2657_v42 }
 0xf5c   :  { %6373 = vmatpush3.bf16.msra.mxu0 %v8074_v18 }
 0xf5d   :  { %6410 = vmatpush1.bf16.msra.mxu1 %v7929_v52  ;;  %v2659_v52 = vld [vmem:[#allocation7 + $0x50] sm:$0xff]  ;;  %6374 = vmatprep.subr.bf16.mxu0 %v8616_v9 }
 0xf5e   :  { %6412 = vmatprep.subr.bf16.mxu1 %v7940_v19  ;;  %v2660_v19 = vld [vmem:[#allocation7 + $0x58] sm:$0xff] }
 0xf61   :  { %6414 = vmatpush1.bf16.msra.mxu1 %v7942_v2  ;;  %v8078_v2 = vpack.c.bf16 %v2660_v19, %v2659_v52 }
 0xf62   :  { %6440 = vmatprep.subr.bf16.mxu1 %v7949_v31  ;;  %v2661_v31 = vld [vmem:[#allocation7 + $0x60] sm:$0xff] }
 0xf63   :  { %6376 = vmatpush3.bf16.msra.mxu0 %v8078_v2  ;;  %v8081_v53 = vpack.c.bf16 %v2662_v20, %v2661_v31 }
 0xf64   :  { %6377 = vmatprep.subr.bf16.mxu0 %v8616_v9 }
 0xf67   :  { %6379 = vmatpush3.bf16.msra.mxu0 %v8081_v53 }
 0xf68   :  { %6380 = vmatprep.subr.bf16.mxu0 %v8616_v9 }
 0xf6b   :  { %6382 = vmatpush3.bf16.msra.mxu0 %v8085_v25 }
 0xf6c   :  { %6415 = vmatprep.subr.bf16.mxu0 %v8616_v9 }
 0xff7   :  { %v2418_v30 = vpop.f32.mrb[16].mxu1 }
 0xff8   :  { %v5317_v17 = vpop.f32.mrb[17].mxu1 }
0x1017   :  { %v2553_v50 = vpop.f32.mrb[16].mxu0  ;;  %v2624_v10 = vpop.f32.mrb[18].mxu1 }
0x1018   :  { %v2554_v26 = vadd.f32 %v2553_v50, %v2475_v43  ;;  %v2555_v60 = vpop.f32.mrb[17].mxu0  ;;  %v5352_v14 = vpop.f32.mrb[19].mxu1  ;;  %v2625_v17 = vadd.f32 %v2624_v10, %v2483_v59 }
0x1019   :  { %v2556_v63 = vadd.f32 %v2555_v60, %v2479_v24 }
0x101a   :  { %v4434_v42 = vmul.f32 -1.442695, %v2554_v26 }
0x101b   :  { %v4435_v52 = vmul.f32 -1.442695, %v2556_v63 }
0x101c   :  { %6876 = vpow2.f32 %v4434_v42 }
0x101d   :  { %6878 = vpow2.f32 %v4435_v52 }
0x1026   :  { %v6877_v19 = vpop.eup %6876 }
0x1027   :  { %v2632_v31 = vadd.f32 1.0, %v6877_v19  ;;  %v6879_v20 = vpop.eup %6878 }
0x1028   :  { %v2639_v54 = vadd.f32 1.0, %v6879_v20 }
0x1029   :  { %6880 = vrcp.f32 %v2632_v31 }
0x102a   :  { %6882 = vrcp.f32 %v2639_v54 }
0x1033   :  { %v6881_v55 = vpop.eup %6880 }
0x1034   :  { %v2642_v25 = vmul.f32 %v6881_v55, %v2625_v17  ;;  %v6883_v43 = vpop.eup %6882  ;;  %v8121_v55 = vld [vmem:[%s8578_s4] ss:$0 sm:$0xff] }
0x1035   :  { %v2645_v50 = vsub.f32 1.0, %v6883_v43  ;;  %v2647_v60 = vmul.f32 %v6883_v43, %v7852_v61 }
0x1036   :  { %v2643_v16 = vadd.f32 %v2642_v25, %v2418_v30 }
0x1038   :  { %6884 = vtanh.f32 %v2643_v16 }
0x1042   :  { %v6885_v26 = vpop.eup %6884 }
0x1043   :  { %v2646_v24 = vmul.f32 %v6885_v26, %v2645_v50 }
0x1045   :  { %v8097_v14 = vadd.f32 %v2647_v60, %v2646_v24 }
0x1047   :  { %5386 = vmatmul.mubr.f32.vlgmr.msra.gmra.mrb[18].mxu0 %v8097_v14 }
0x1048   :  { %6417 = vmatpush3.bf16.msra.mxu0 %v7872_v1  ;;  %5420 = vmatprep.mubr.msk.f32.mxu0 %vm7075_vm0, %v8615_v58 }
0x1049   :  { %6418 = vmatprep.subr.bf16.mxu0 %v8616_v9 }
0x104c   :  { %6420 = vmatpush3.bf16.msra.mxu0 %v7881_v46 }
0x104d   :  { %6421 = vmatprep.subr.bf16.mxu0 %v8616_v9 }
0x1050   :  { %6423 = vmatpush3.bf16.msra.mxu0 %v7891_v56 }
0x1051   :  { %6424 = vmatprep.subr.bf16.mxu0 %v8616_v9 }
0x1054   :  { %6426 = vmatpush3.bf16.msra.mxu0 %v7901_v29 }
0x1055   :  { %6427 = vmatprep.subr.bf16.mxu0 %v8616_v9 }
0x1058   :  { %6429 = vmatpush3.bf16.msra.mxu0 %v7911_v49 }
0x1059   :  { %6430 = vmatprep.subr.bf16.mxu0 %v8616_v9 }
0x105c   :  { %6432 = vmatpush3.bf16.msra.mxu0 %v7921_v62 }
0x105d   :  { %6433 = vmatprep.subr.bf16.mxu0 %v8616_v9 }
0x1060   :  { %6435 = vmatpush3.bf16.msra.mxu0 %v7931_v40 }
0x1061   :  { %6436 = vmatprep.subr.bf16.mxu0 %v8616_v9 }
0x1064   :  { %6438 = vmatpush3.bf16.msra.mxu0 %v7945_v37 }
0x1065   :  { %6471 = vmatprep.subr.bf16.mxu0 %v8616_v9 }
0x111a   :  { %v2738_v16 = vpop.f32.mrb[18].mxu0 }
0x111b   :  { %v2739_v61 = vadd.f32 %v8121_v55, %v2738_v16  ;;  %v5387_v1 = vpop.f32.mrb[19].mxu0  ;;  %v3317_v16 = vld [vmem:[#allocation2 + $0x20] sm:$0xff] }
0x111c   :  { %v3316_v1 = vld [vmem:[#allocation2 + $0x18] sm:$0xff] }
0x111d   :  { %2742 = vmax.xlane.f32.xlu0 %v2739_v61 }
0x11aa   :  { %v2743_v46 = vpop.xlane.xlu0 %2742 }
0x11ab   :  { %v8124_v56 = vsub.f32 %v2739_v61, %v2743_v46  ;;  %v3313_v61 = vld [vmem:[#allocation2] sm:$0xff]  ;;  %v3315_v46 = vld [vmem:[#allocation2 + $0x10] sm:$0xff] }
0x11ad   :  { %vm2754_vm14 = vcmp.eq.f32.partialorder %v8124_v56, 0.0 }
0x11ae   :  { %v2755_v29 = vsel %vm2754_vm14, %v7234_v11, 128 }
0x11af   :  { %v2757_v49 = vshra.s32 %v2755_v29, 16  ;;  %v2756_v40 = vand.u32 65535, %v2755_v29  ;;  %v3318_v29 = vld [vmem:[#allocation2 + $0x28] sm:$0xff] }
0x11b1   :  { %v2759_v62 = vcvt.s32.f32 %v2757_v49  ;;  %v2758_v25 = vcvt.s32.f32 %v2756_v40  ;;  %v8211_v49 = vpack.c.bf16 %v3316_v1, %v3313_v61  ;;  %v3320_v40 = vld [vmem:[#allocation2 + $0x38] sm:$0xff] }
0x11b3   :  { %2760 = vmin.xlane.f32.xlu1 %v2759_v62 }
0x1240   :  { %v2761_v37 = vpop.xlane.xlu1 %2760 }
0x1241   :  { %vm2762_vm15 = vcmp.eq.f32.partialorder %v2759_v62, %v2761_v37  ;;  %v2767_v7 = vcvt.f32.s32 %v2761_v37  ;;  %v8213_v62 = vpack.c.bf16 %v3318_v29, %v3315_v46  ;;  %v3323_v37 = vld [vmem:[#allocation2 + $0x50] sm:$0xff]  ;;  %v3349_v46 = vld [vmem:[#allocation2 + $0x120] sm:$0xff] }
0x1242   :  { %v2763_v30 = vsel %vm2762_vm15, %v2758_v25, inf  ;;  %v3319_v25 = vld [vmem:[#allocation2 + $0x30] sm:$0xff] }
0x1243   :  { %2764 = vmin.xlane.f32.xlu0 %v2763_v30  ;;  %v2768_v42 = vshll.u32 %v2767_v7, 16  ;;  %v8216_v30 = vpack.c.bf16 %v3323_v37, %v3320_v40  ;;  %v3322_v7 = vld [vmem:[#allocation2 + $0x48] sm:$0xff]  ;;  %v3352_v40 = vld [vmem:[#allocation2 + $0x138] sm:$0xff]  ;;  %v3351_v37 = vld [vmem:[#allocation2 + $0x130] sm:$0xff] }
0x12d0   :  { %v2765_v10 = vpop.xlane.xlu0 %2764 }
0x12d1   :  { %v2766_v63 = vcvt.f32.s32 %v2765_v10  ;;  %v3321_v10 = vld [vmem:[#allocation2 + $0x40] sm:$0xff] }
0x12d3   :  { %v2769_v52 = vadd.s32 %v2768_v42, %v2766_v63  ;;  %v3324_v42 = vld [vmem:[#allocation2 + $0x58] sm:$0xff]  ;;  %v8220_v63 = vpack.c.bf16 %v3322_v7, %v3319_v25  ;;  %v3354_v25 = vld [vmem:[#allocation2 + $0x148] sm:$0xff]  ;;  %v8270_v7 = vpack.c.bf16 %v3352_v40, %v3349_v46  ;;  %v3508_v46 = vld [vmem:[#allocation5 + $0x30] sm:$0xff] }
0x12d5   :  { %vm2770_vm1 = vcmp.eq.s32.totalorder %v7234_v11, %v2769_v52  ;;  %v8222_v52 = vpack.c.bf16 %v3324_v42, %v3321_v10  ;;  %v8272_v10 = vpack.c.bf16 %v3354_v25, %v3351_v37  ;;  %v3511_v37 = vld [vmem:[#allocation5 + $0x48] sm:$0xff]  ;;  %v3510_v25 = vld [vmem:[#allocation5 + $0x40] sm:$0xff] }
0x12d6   :  { %4438 = vmatmul.mubr.msk.f32.vlgmr.msra.gmra.mrb[20].mxu1 %vm2770_vm1, %v8618_v57  ;;  %5421 = vmatmul.mubr.msk.f32.vlgmr.msra.gmra.mrb[20].mxu0 %vm2770_vm1, %v8618_v57 }
0x12d7   :  { %6442 = vmatpush1.bf16.msra.mxu1 %v7953_v33  ;;  %6473 = vmatpush3.bf16.msra.mxu0 %v7955_v15  ;;  %v8630_v33 = vld [vmem:[#allocation20_spill] sm:$0xff]  ;;  %v8631_v15 = vld [vmem:[#allocation22_spill] sm:$0xff] }
0x12d8   :  { %6444 = vmatprep.subr.bf16.mxu1 %v7957_v45  ;;  %6474 = vmatprep.subr.bf16.mxu0 %v8616_v9 }
0x12d9   :  { %3091 = vmatprep.mubr.f32.mxu1 %v8615_v58  ;;  %5455 = vmatprep.mubr.msk.f32.mxu0 %vm7075_vm0, %v8615_v58 }
0x12db   :  { %6446 = vmatpush1.bf16.msra.mxu1 %v7964_v13  ;;  %6476 = vmatpush3.bf16.msra.mxu0 %v7966_v38  ;;  %v3010_v38 = vld [vmem:[%s8576_s2] sm:$0x7] }
0x12dc   :  { %6448 = vmatprep.subr.bf16.mxu1 %v7970_v48  ;;  %6477 = vmatprep.subr.bf16.mxu0 %v8616_v9  ;;  %v8632_v48 = vld [vmem:[#allocation15_spill] sm:$0xff] }
0x12df   :  { %6450 = vmatpush1.bf16.msra.mxu1 %v7977_v44  ;;  %6479 = vmatpush3.bf16.msra.mxu0 %v7979_v0  ;;  %v3015_v44 = vrot.slane %v3010_v38, %v8632_v48 }
0x12e0   :  { %6452 = vmatprep.subr.bf16.mxu1 %v7983_v35  ;;  %6480 = vmatprep.subr.bf16.mxu0 %v8616_v9 }
0x12e3   :  { %6454 = vmatpush1.bf16.msra.mxu1 %v7987_v23  ;;  %6482 = vmatpush3.bf16.msra.mxu0 %v7989_v27  ;;  %v8633_v23 = vld [vmem:[#allocation16_spill] sm:$0xff] }
0x12e4   :  { %6456 = vmatprep.subr.bf16.mxu1 %v7993_v47  ;;  %6483 = vmatprep.subr.bf16.mxu0 %v8616_v9  ;;  %v3019_v27 = vrot.slane %v3010_v38, %v8633_v23 }
0x12e7   :  { %6458 = vmatpush1.bf16.msra.mxu1 %v7997_v41  ;;  %6485 = vmatpush3.bf16.msra.mxu0 %v7999_v12 }
0x12e8   :  { %6460 = vmatprep.subr.bf16.mxu1 %v8003_v4  ;;  %6486 = vmatprep.subr.bf16.mxu0 %v8616_v9 }
0x12eb   :  { %6462 = vmatpush1.bf16.msra.mxu1 %v8630_v33  ;;  %6488 = vmatpush3.bf16.msra.mxu0 %v8009_v21  ;;  %v3326_v33 = vld [vmem:[#allocation2 + $0x68] sm:$0xff] }
0x12ec   :  { %6464 = vmatprep.subr.bf16.mxu1 %v8013_v36  ;;  %6489 = vmatprep.subr.bf16.mxu0 %v8616_v9 }
0x12ef   :  { %6466 = vmatpush1.bf16.msra.mxu1 %v8017_v39  ;;  %6491 = vmatpush3.bf16.msra.mxu0 %v8019_v6 }
0x12f0   :  { %6468 = vmatprep.subr.bf16.mxu1 %v8023_v34  ;;  %6492 = vmatprep.subr.bf16.mxu0 %v8616_v9  ;;  %v3023_v34 = vrot.slane %v3010_v38, %v7411_v22  ;;  %v3328_v38 = vld [vmem:[#allocation2 + $0x78] sm:$0xff] }
0x12f3   :  { %6470 = vmatpush1.bf16.msra.mxu1 %v8027_v28  ;;  %6494 = vmatpush3.bf16.msra.mxu0 %v8029_v3 }
0x12f4   :  { %6495 = vmatprep.subr.bf16.mxu1 %v8616_v9 }
0x12f6   :  { %3092 = vmatmul.mubr.f32.vlgmr.msra.gmra.mrb[20].mxu1 %v8097_v14  ;;  %5456 = vmatmul.mubr.f32.vlgmr.msra.gmra.mrb[22].mxu0 %v8097_v14 }
0x12f7   :  { %6497 = vmatpush3.bf16.msra.mxu1 %v8058_v5  ;;  %5490 = vmatprep.mubr.msk.f32.mxu1 %vm7075_vm0, %v8615_v58 }
0x12f8   :  { %6498 = vmatprep.subr.bf16.mxu1 %v8616_v9  ;;  %3425 = vmatprep.mubr.f32.mxu0 %v8615_v58 }
0x12fb   :  { %6500 = vmatpush3.bf16.msra.mxu1 %v8062_v8 }
0x12fc   :  { %6501 = vmatprep.subr.bf16.mxu1 %v8616_v9 }
0x12ff   :  { %6503 = vmatpush3.bf16.msra.mxu1 %v8066_v32 }
0x1300   :  { %6504 = vmatprep.subr.bf16.mxu1 %v8616_v9 }
0x1303   :  { %6506 = vmatpush3.bf16.msra.mxu1 %v8070_v51 }
0x1304   :  { %6507 = vmatprep.subr.bf16.mxu1 %v8616_v9 }
0x1307   :  { %6509 = vmatpush3.bf16.msra.mxu1 %v8074_v18 }
0x1308   :  { %6510 = vmatprep.subr.bf16.mxu1 %v8616_v9 }
0x130b   :  { %6512 = vmatpush3.bf16.msra.mxu1 %v8078_v2 }
0x130c   :  { %6513 = vmatprep.subr.bf16.mxu1 %v8616_v9 }
0x130f   :  { %6515 = vmatpush3.bf16.msra.mxu1 %v8081_v53 }
0x1310   :  { %6516 = vmatprep.subr.bf16.mxu1 %v8616_v9 }
0x1313   :  { %6518 = vmatpush3.bf16.msra.mxu1 %v8631_v15  ;;  %v3329_v15 = vld [vmem:[#allocation2 + $0x80] sm:$0xff] }
0x1314   :  { %6551 = vmatprep.subr.bf16.mxu1 %v8616_v9 }
0x13a9   :  { %v2958_v45 = vpop.f32.mrb[20].mxu0 }
0x13aa   :  { %v5422_v13 = vpop.f32.mrb[21].mxu0 }
0x13ab   :  { %v8226_v13 = vpack.c.bf16 %v3329_v15, %v3326_v33 }
0x13c9   :  { %v3093_v0 = vpop.f32.mrb[20].mxu1  ;;  %v3164_v35 = vpop.f32.mrb[22].mxu0 }
0x13ca   :  { %v3094_v47 = vadd.f32 %v3093_v0, %v3015_v44  ;;  %v3095_v41 = vpop.f32.mrb[21].mxu1  ;;  %v5457_v12 = vpop.f32.mrb[23].mxu0  ;;  %v3165_v5 = vadd.f32 %v3164_v35, %v3023_v34  ;;  %v3327_v44 = vld [vmem:[#allocation2 + $0x70] sm:$0xff]  ;;  %v3330_v0 = vld [vmem:[#allocation2 + $0x88] sm:$0xff]  ;;  %v3332_v35 = vld [vmem:[#allocation2 + $0x98] sm:$0xff] }
0x13cb   :  { %v3096_v28 = vadd.f32 %v3095_v41, %v3019_v27  ;;  %v3335_v27 = vld [vmem:[#allocation2 + $0xb0] sm:$0xff]  ;;  %v8232_v41 = vpack.c.bf16 %v3330_v0, %v3327_v44 }
0x13cc   :  { %v4440_v4 = vmul.f32 -1.442695, %v3094_v47  ;;  %v3331_v12 = vld [vmem:[#allocation2 + $0x90] sm:$0xff] }
0x13cd   :  { %v4441_v21 = vmul.f32 -1.442695, %v3096_v28  ;;  %v3334_v28 = vld [vmem:[#allocation2 + $0xa8] sm:$0xff]  ;;  %v3359_v44 = vld [vmem:[#allocation2 + $0x170] sm:$0xff] }
0x13ce   :  { %6886 = vpow2.f32 %v4440_v4  ;;  %v8236_v4 = vpack.c.bf16 %v3335_v27, %v3332_v35  ;;  %v8240_v34 = vpack.c.bf16 %v3334_v28, %v3331_v12  ;;  %v3355_v35 = vld [vmem:[#allocation2 + $0x150] sm:$0xff]  ;;  %v3358_v27 = vld [vmem:[#allocation2 + $0x168] sm:$0xff]  ;;  %v3357_v12 = vld [vmem:[#allocation2 + $0x160] sm:$0xff] }
0x13cf   :  { %6888 = vpow2.f32 %v4441_v21  ;;  %v3333_v21 = vld [vmem:[#allocation2 + $0xa0] sm:$0xff]  ;;  %v8283_v28 = vpack.c.bf16 %v3358_v27, %v3355_v35  ;;  %v3517_v27 = vld [vmem:[#allocation5 + $0x78] sm:$0xff] }
0x13d8   :  { %v6887_v36 = vpop.eup %6886 }
0x13d9   :  { %v3172_v39 = vadd.f32 1.0, %v6887_v36  ;;  %v6889_v6 = vpop.eup %6888  ;;  %v3336_v36 = vld [vmem:[#allocation2 + $0xb8] sm:$0xff] }
0x13da   :  { %v3179_v3 = vadd.f32 1.0, %v6889_v6  ;;  %v3341_v6 = vld [vmem:[#allocation2 + $0xe0] sm:$0xff] }
0x13db   :  { %6890 = vrcp.f32 %v3172_v39  ;;  %v3338_v39 = vld [vmem:[#allocation2 + $0xc8] sm:$0xff] }
0x13dc   :  { %6892 = vrcp.f32 %v3179_v3  ;;  %v8242_v3 = vpack.c.bf16 %v3336_v36, %v3333_v21  ;;  %v3360_v21 = vld [vmem:[#allocation2 + $0x178] sm:$0xff] }
0x13dd   :  { %v8286_v36 = vpack.c.bf16 %v3360_v21, %v3357_v12  ;;  %v3516_v12 = vld [vmem:[#allocation5 + $0x70] sm:$0xff]  ;;  %v3519_v21 = vld [vmem:[#allocation5 + $0x88] sm:$0xff] }
0x13e5   :  { %v6891_v8 = vpop.eup %6890 }
0x13e6   :  { %v3182_v32 = vmul.f32 %v6891_v8, %v3165_v5  ;;  %v6893_v18 = vpop.eup %6892  ;;  %v3337_v5 = vld [vmem:[#allocation2 + $0xc0] sm:$0xff]  ;;  %v8246_v8 = vpack.c.bf16 %v3341_v6, %v3338_v39 }
0x13e7   :  { %v3185_v2 = vsub.f32 1.0, %v6893_v18  ;;  %v3187_v31 = vmul.f32 %v6893_v18, %v8097_v14  ;;  %v3314_v14 = vld [vmem:[#allocation2 + $0x8] sm:$0xff] }
0x13e8   :  { %v3183_v51 = vadd.f32 %v3182_v32, %v2958_v45  ;;  %v3325_v45 = vld [vmem:[#allocation2 + $0x60] sm:$0xff]  ;;  %v3340_v32 = vld [vmem:[#allocation2 + $0xd8] sm:$0xff]  ;;  %v3342_v18 = vld [vmem:[#allocation2 + $0xe8] sm:$0xff] }
0x13e9   :  { %v8230_v47 = vpack.c.bf16 %v3328_v38, %v3325_v45  ;;  %v3356_v38 = vld [vmem:[#allocation2 + $0x158] sm:$0xff] }
0x13ea   :  { %6894 = vtanh.f32 %v3183_v51  ;;  %v3339_v51 = vld [vmem:[#allocation2 + $0xd0] sm:$0xff]  ;;  %v8281_v0 = vpack.c.bf16 %v3359_v44, %v3356_v38  ;;  %v3514_v44 = vld [vmem:[#allocation5 + $0x60] sm:$0xff] }
0x13f4   :  { %v6895_v53 = vpop.eup %6894 }
0x13f5   :  { %v3186_v19 = vmul.f32 %v6895_v53, %v3185_v2  ;;  %v3344_v2 = vld [vmem:[#allocation2 + $0xf8] sm:$0xff]  ;;  %v3347_v53 = vld [vmem:[#allocation2 + $0x110] sm:$0xff] }
0x13f7   :  { %v8193_v20 = vadd.f32 %v3187_v31, %v3186_v19  ;;  %v8250_v19 = vpack.c.bf16 %v3340_v32, %v3337_v5  ;;  %v8252_v31 = vpack.c.bf16 %v3342_v18, %v3339_v51  ;;  %v3502_v5 = vld [vmem:[#allocation5] sm:$0xff]  ;;  %v3505_v51 = vld [vmem:[#allocation5 + $0x18] sm:$0xff]  ;;  %v3504_v18 = vld [vmem:[#allocation5 + $0x10] sm:$0xff] }
0x13f9   :  { %5491 = vmatmul.mubr.f32.vlgmr.msra.gmra.mrb[22].mxu1 %v8193_v20 }
0x13fa   :  { %5525 = vmatprep.mubr.msk.f32.mxu1 %vm7075_vm0, %v8615_v58  ;;  %6553 = vmatpush3.bf16.msra.mxu1 %v8213_v62 }
0x13fb   :  { %6554 = vmatprep.subr.bf16.mxu1 %v8616_v9 }
0x13fe   :  { %6556 = vmatpush3.bf16.msra.mxu1 %v8222_v52 }
0x13ff   :  { %6557 = vmatprep.subr.bf16.mxu1 %v8616_v9 }
0x1402   :  { %6559 = vmatpush3.bf16.msra.mxu1 %v8232_v41 }
0x1403   :  { %6560 = vmatprep.subr.bf16.mxu1 %v8616_v9 }
0x1406   :  { %6562 = vmatpush3.bf16.msra.mxu1 %v8242_v3 }
0x1407   :  { %6563 = vmatprep.subr.bf16.mxu1 %v8616_v9 }
0x140a   :  { %6565 = vmatpush3.bf16.msra.mxu1 %v8252_v31 }
0x140b   :  { %6566 = vmatprep.subr.bf16.mxu1 %v8616_v9 }
0x14cc   :  { %v3278_v59 = vpop.f32.mrb[22].mxu1 }
0x14cd   :  { %v3279_v54 = vadd.f32 %v8121_v55, %v3278_v59  ;;  %v5492_v17 = vpop.f32.mrb[23].mxu1  ;;  %v8209_v55 = vpack.c.bf16 %v3317_v16, %v3314_v14  ;;  %v3343_v59 = vld [vmem:[#allocation2 + $0xf0] sm:$0xff]  ;;  %v3350_v14 = vld [vmem:[#allocation2 + $0x128] sm:$0xff]  ;;  %v3353_v16 = vld [vmem:[#allocation2 + $0x140] sm:$0xff] }
0x14ce   :  { %v3346_v17 = vld [vmem:[#allocation2 + $0x108] sm:$0xff]  ;;  %v8266_v29 = vpack.c.bf16 %v3353_v16, %v3350_v14  ;;  %v8294_v14 = vpack.c.bf16 %v3505_v51, %v3502_v5  ;;  %v8320_v5 = vpack.c.bf16 %v3519_v21, %v3516_v12  ;;  %v3532_v21 = vld [vmem:[#allocation5 + $0xf0] sm:$0xff] }
0x14cf   :  { %3282 = vmax.xlane.f32.xlu1 %v3279_v54  ;;  %6520 = vmatprep.subr.bf16.mxu0 %v8209_v55  ;;  %v8260_v61 = vpack.c.bf16 %v3346_v17, %v3343_v59  ;;  %v3509_v17 = vld [vmem:[#allocation5 + $0x38] sm:$0xff] }
0x14d0   :  { %6522 = vmatpush1.bf16.msra.mxu0 %v8211_v49 }
0x14d1   :  { %6524 = vmatprep.subr.bf16.mxu0 %v8216_v30 }
0x14d4   :  { %6526 = vmatpush1.bf16.msra.mxu0 %v8220_v63 }
0x14d5   :  { %6528 = vmatprep.subr.bf16.mxu0 %v8226_v13 }
0x14d8   :  { %6530 = vmatpush1.bf16.msra.mxu0 %v8230_v47 }
0x14d9   :  { %6532 = vmatprep.subr.bf16.mxu0 %v8236_v4 }
0x14dc   :  { %6534 = vmatpush1.bf16.msra.mxu0 %v8240_v34 }
0x14dd   :  { %6536 = vmatprep.subr.bf16.mxu0 %v8246_v8 }
0x14e0   :  { %6538 = vmatpush1.bf16.msra.mxu0 %v8250_v19 }
0x155c   :  { %v3283_v43 = vpop.xlane.xlu1 %3282 }
0x155d   :  { %v8199_v50 = vsub.f32 %v3279_v54, %v3283_v43  ;;  %v8256_v54 = vpack.c.bf16 %v3347_v53, %v3344_v2  ;;  %v3345_v43 = vld [vmem:[#allocation2 + $0x100] sm:$0xff]  ;;  %v3507_v2 = vld [vmem:[#allocation5 + $0x28] sm:$0xff] }
0x155e   :  { %v8296_v16 = vpack.c.bf16 %v3507_v2, %v3504_v18  ;;  %v3523_v18 = vld [vmem:[#allocation5 + $0xa8] sm:$0xff]  ;;  %v3522_v2 = vld [vmem:[#allocation5 + $0xa0] sm:$0xff] }
0x155f   :  { %8634 = vst [vmem:[#allocation20_spill] sm:$0xff] %v8199_v50  ;;  %vm3294_vm2 = vcmp.eq.f32.partialorder %v8199_v50, 0.0  ;;  %6540 = vmatprep.subr.bf16.mxu0 %v8256_v54  ;;  %v3548_v50 = vld [vmem:[#allocation5 + $0x170] sm:$0xff] }
0x1560   :  { %v8203_v26 = vsel %vm3294_vm2, %v7234_v11, 128  ;;  %6542 = vmatpush1.bf16.msra.mxu0 %v8260_v61 }
0x1561   :  { %v3297_v24 = vshra.s32 %v8203_v26, 16  ;;  %6544 = vmatprep.subr.bf16.mxu0 %v8266_v29  ;;  %v3296_v42 = vand.u32 65535, %v8203_v26  ;;  %v3503_v26 = vld [vmem:[#allocation5 + $0x8] sm:$0xff] }
0x1563   :  { %v8206_v60 = vcvt.s32.f32 %v3297_v24  ;;  %v3348_v24 = vld [vmem:[#allocation2 + $0x118] sm:$0xff]  ;;  %v3298_v15 = vcvt.s32.f32 %v3296_v42 }
0x1564   :  { %v8262_v1 = vpack.c.bf16 %v3348_v24, %v3345_v43  ;;  %6546 = vmatpush1.bf16.msra.mxu0 %v8270_v7  ;;  %v3512_v43 = vld [vmem:[#allocation5 + $0x50] sm:$0xff]  ;;  %v3513_v42 = vld [vmem:[#allocation5 + $0x58] sm:$0xff] }
0x1565   :  { %3300 = vmin.xlane.f32.xlu0 %v8206_v60  ;;  %6548 = vmatprep.subr.bf16.mxu0 %v8281_v0  ;;  %v8298_v40 = vpack.c.bf16 %v3512_v43, %v3509_v17  ;;  %v8307_v38 = vpack.c.bf16 %v3513_v42, %v3510_v25  ;;  %v3530_v17 = vld [vmem:[#allocation5 + $0xe0] sm:$0xff]  ;;  %v3529_v25 = vld [vmem:[#allocation5 + $0xd8] sm:$0xff]  ;;  %v3528_v42 = vld [vmem:[#allocation5 + $0xd0] sm:$0xff] }
0x1566   :  { %6568 = vmatpush3.bf16.msra.mxu1 %v8262_v1 }
0x1567   :  { %6569 = vmatprep.subr.bf16.mxu1 %v8616_v9 }
0x1568   :  { %6550 = vmatpush1.bf16.msra.mxu0 %v8283_v28 }
0x156a   :  { %6571 = vmatpush3.bf16.msra.mxu1 %v8272_v10 }
0x156b   :  { %6572 = vmatprep.subr.bf16.mxu1 %v8616_v9 }
0x156e   :  { %6574 = vmatpush3.bf16.msra.mxu1 %v8286_v36 }
0x156f   :  { %6607 = vmatprep.subr.bf16.mxu1 %v8616_v9 }
0x15f2   :  { %v3301_v33 = vpop.xlane.xlu0 %3300 }
0x15f3   :  { %vm3302_vm3 = vcmp.eq.f32.partialorder %v8206_v60, %v3301_v33  ;;  %v3506_v60 = vld [vmem:[#allocation5 + $0x20] sm:$0xff]  ;;  %v3307_v6 = vcvt.f32.s32 %v3301_v33  ;;  %v3515_v33 = vld [vmem:[#allocation5 + $0x68] sm:$0xff] }
0x15f4   :  { %v3303_v45 = vsel %vm3302_vm3, %v3298_v15, inf  ;;  %v8290_v39 = vpack.c.bf16 %v3506_v60, %v3503_v26  ;;  %v3518_v15 = vld [vmem:[#allocation5 + $0x80] sm:$0xff]  ;;  %v3521_v26 = vld [vmem:[#allocation5 + $0x98] sm:$0xff]  ;;  %v3524_v60 = vld [vmem:[#allocation5 + $0xb0] sm:$0xff] }
0x15f5   :  { %3304 = vmin.xlane.f32.xlu1 %v3303_v45  ;;  %v3308_v53 = vshll.u32 %v3307_v6, 16  ;;  %v8305_v45 = vpack.c.bf16 %v3511_v37, %v3508_v46  ;;  %v8311_v35 = vpack.c.bf16 %v3518_v15, %v3515_v33  ;;  %v8318_v6 = vpack.c.bf16 %v3517_v27, %v3514_v44  ;;  %v3526_v46 = vld [vmem:[#allocation5 + $0xc0] sm:$0xff]  ;;  %v3531_v33 = vld [vmem:[#allocation5 + $0xe8] sm:$0xff]  ;;  %v3533_v15 = vld [vmem:[#allocation5 + $0xf8] sm:$0xff] }
0x15f6   :  { %6576 = vmatprep.subr.bf16.mxu0 %v8290_v39  ;;  %v8324_v51 = vpack.c.bf16 %v3524_v60, %v3521_v26  ;;  %v3536_v44 = vld [vmem:[#allocation5 + $0x110] sm:$0xff]  ;;  %v8338_v27 = vpack.c.bf16 %v3529_v25, %v3526_v46  ;;  %v8340_v12 = vpack.c.bf16 %v3531_v33, %v3528_v42  ;;  %v3535_v60 = vld [vmem:[#allocation5 + $0x108] sm:$0xff]  ;;  %v3538_v46 = vld [vmem:[#allocation5 + $0x120] sm:$0xff] }
0x15f7   :  { %v8344_v26 = vpack.c.bf16 %v3536_v44, %v3533_v15  ;;  %v3541_v42 = vld [vmem:[#allocation5 + $0x138] sm:$0xff]  ;;  %v3540_v33 = vld [vmem:[#allocation5 + $0x130] sm:$0xff]  ;;  %v3543_v15 = vld [vmem:[#allocation5 + $0x148] sm:$0xff] }
0x15f8   :  { %v3545_v44 = vld [vmem:[#allocation5 + $0x158] sm:$0xff] }
0x15f9   :  { %8635 = vst [vmem:[#allocation22_spill] sm:$0xff] %v8344_v26 }
0x1682   :  { %v3305_v32 = vpop.xlane.xlu1 %3304 }
0x1683   :  { %v3306_v59 = vcvt.f32.s32 %v3305_v32  ;;  %v3520_v32 = vld [vmem:[#allocation5 + $0x90] sm:$0xff] }
0x1684   :  { %v8328_v43 = vpack.c.bf16 %v3523_v18, %v3520_v32  ;;  %v3534_v32 = vld [vmem:[#allocation5 + $0x100] sm:$0xff]  ;;  %v3537_v18 = vld [vmem:[#allocation5 + $0x118] sm:$0xff] }
0x1685   :  { %v3309_v24 = vadd.s32 %v3308_v53, %v3306_v59  ;;  %v3525_v53 = vld [vmem:[#allocation5 + $0xb8] sm:$0xff]  ;;  %v3527_v59 = vld [vmem:[#allocation5 + $0xc8] sm:$0xff] }
0x1686   :  { %v8334_v37 = vpack.c.bf16 %v3530_v17, %v3527_v59  ;;  %v8348_v59 = vpack.c.bf16 %v3535_v60, %v3532_v21  ;;  %v8350_v17 = vpack.c.bf16 %v3537_v18, %v3534_v32  ;;  %v8358_v21 = vpack.c.bf16 %v3541_v42, %v3538_v46  ;;  %v3544_v32 = vld [vmem:[#allocation5 + $0x150] sm:$0xff]  ;;  %v3742_v42 = vld [vmem:[#allocation7 + $0x68] sm:$0xff] }
0x1687   :  { %vm3310_vm4 = vcmp.eq.s32.totalorder %v7234_v11, %v3309_v24  ;;  %v8330_v24 = vpack.c.bf16 %v3525_v53, %v3522_v2  ;;  %v3539_v2 = vld [vmem:[#allocation5 + $0x128] sm:$0xff]  ;;  %v3542_v53 = vld [vmem:[#allocation5 + $0x140] sm:$0xff]  ;;  %v8360_v60 = vpack.c.bf16 %v3543_v15, %v3540_v33  ;;  %v8364_v18 = vpack.c.bf16 %v3548_v50, %v3545_v44  ;;  %v3743_v15 = vld [vmem:[#allocation7 + $0x70] sm:$0xff] }
0x1688   :  { %4444 = vmatmul.mubr.msk.f32.vlgmr.msra.gmra.mrb[24].mxu0 %vm3310_vm4, %v8618_v57  ;;  %5526 = vmatmul.mubr.msk.f32.vlgmr.msra.gmra.mrb[24].mxu1 %vm3310_vm4, %v8618_v57  ;;  %8636 = vst [vmem:[#allocation23_spill] sm:$0xff] %v8348_v59  ;;  %v8354_v25 = vpack.c.bf16 %v3542_v53, %v3539_v2  ;;  %v3547_v2 = vld [vmem:[#allocation5 + $0x168] sm:$0xff]  ;;  %v3546_v53 = vld [vmem:[#allocation5 + $0x160] sm:$0xff]  ;;  %v3744_v44 = vld [vmem:[#allocation7 + $0x78] sm:$0xff] }
0x1689   :  { %6578 = vmatpush1.bf16.msra.mxu0 %v8294_v14  ;;  %6609 = vmatpush3.bf16.msra.mxu1 %v8296_v16  ;;  %v3729_v50 = vld [vmem:[#allocation7] sm:$0xff] }
0x168a   :  { %6580 = vmatprep.subr.bf16.mxu0 %v8298_v40  ;;  %6610 = vmatprep.subr.bf16.mxu1 %v8616_v9 }
0x168b   :  { %3631 = vmatprep.mubr.f32.mxu0 %v8615_v58  ;;  %5560 = vmatprep.mubr.msk.f32.mxu1 %vm7075_vm0, %v8615_v58 }
0x168d   :  { %6582 = vmatpush1.bf16.msra.mxu0 %v8305_v45  ;;  %6612 = vmatpush3.bf16.msra.mxu1 %v8307_v38 }
0x168e   :  { %6584 = vmatprep.subr.bf16.mxu0 %v8311_v35  ;;  %6613 = vmatprep.subr.bf16.mxu1 %v8616_v9 }
0x1691   :  { %6586 = vmatpush1.bf16.msra.mxu0 %v8318_v6  ;;  %6615 = vmatpush3.bf16.msra.mxu1 %v8320_v5 }
0x1692   :  { %6588 = vmatprep.subr.bf16.mxu0 %v8324_v51  ;;  %6616 = vmatprep.subr.bf16.mxu1 %v8616_v9 }
0x1695   :  { %6590 = vmatpush1.bf16.msra.mxu0 %v8328_v43  ;;  %6618 = vmatpush3.bf16.msra.mxu1 %v8330_v24 }
0x1696   :  { %6592 = vmatprep.subr.bf16.mxu0 %v8334_v37  ;;  %6619 = vmatprep.subr.bf16.mxu1 %v8616_v9 }
0x1699   :  { %6594 = vmatpush1.bf16.msra.mxu0 %v8338_v27  ;;  %6621 = vmatpush3.bf16.msra.mxu1 %v8340_v12 }
0x169a   :  { %6596 = vmatprep.subr.bf16.mxu0 %v8344_v26  ;;  %6622 = vmatprep.subr.bf16.mxu1 %v8616_v9  ;;  %v3549_v26 = vld [vmem:[#allocation5 + $0x178] sm:$0xff] }
0x169b   :  { %v8370_v46 = vpack.c.bf16 %v3549_v26, %v3546_v53  ;;  %v3741_v26 = vld [vmem:[#allocation7 + $0x60] sm:$0xff] }
0x169c   :  { %v8422_v33 = vpack.c.bf16 %v3742_v42, %v3741_v26 }
0x169d   :  { %6598 = vmatpush1.bf16.msra.mxu0 %v8348_v59  ;;  %6624 = vmatpush3.bf16.msra.mxu1 %v8350_v17  ;;  %v8368_v59 = vpack.c.bf16 %v3547_v2, %v3544_v32  ;;  %v8426_v32 = vpack.c.bf16 %v3744_v44, %v3743_v15 }
0x169e   :  { %6600 = vmatprep.subr.bf16.mxu0 %v8354_v25  ;;  %6625 = vmatprep.subr.bf16.mxu1 %v8616_v9 }
0x169f   :  { %8637 = vst [vmem:[#allocation24_spill] sm:$0xff] %v8426_v32 }
0x16a1   :  { %6602 = vmatpush1.bf16.msra.mxu0 %v8358_v21  ;;  %6627 = vmatpush3.bf16.msra.mxu1 %v8360_v60 }
0x16a2   :  { %6604 = vmatprep.subr.bf16.mxu0 %v8364_v18  ;;  %6628 = vmatprep.subr.bf16.mxu1 %v8616_v9 }
0x16a5   :  { %6606 = vmatpush1.bf16.msra.mxu0 %v8368_v59  ;;  %6630 = vmatpush3.bf16.msra.mxu1 %v8370_v46 }
0x16a6   :  { %6631 = vmatprep.subr.bf16.mxu0 %v8616_v9  ;;  %6656 = vmatprep.subr.bf16.mxu1 %v8209_v55  ;;  %v3730_v55 = vld [vmem:[#allocation7 + $0x8] sm:$0xff] }
0x16a8   :  { %3632 = vmatmul.mubr.f32.vlgmr.msra.gmra.mrb[24].mxu0 %v8193_v20  ;;  %5561 = vmatmul.mubr.f32.vlgmr.msra.gmra.mrb[26].mxu1 %v8193_v20 }
0x16a9   :  { %5595 = vmatprep.mubr.msk.f32.mxu0 %vm7075_vm0, %v8615_v58  ;;  %6658 = vmatpush1.bf16.msra.mxu1 %v8211_v49  ;;  %v8399_v49 = vpack.c.bf16 %v3730_v55, %v3729_v50  ;;  %v3550_v50 = vld [vmem:[%s8576_s2] sm:$0x7] }
0x16aa   :  { %6660 = vmatprep.subr.bf16.mxu1 %v8216_v30  ;;  %3965 = vmatprep.mubr.f32.mxu1 %v8615_v58  ;;  %v3731_v30 = vld [vmem:[#allocation7 + $0x10] sm:$0xff]  ;;  %v3555_v55 = vrot.slane %v3550_v50, %v8632_v48  ;;  %v3563_v15 = vrot.slane %v3550_v50, %v7411_v22 }
0x16ab   :  { %6633 = vmatpush3.bf16.msra.mxu0 %v8399_v49 }
0x16ac   :  { %6634 = vmatprep.subr.bf16.mxu0 %v8616_v9 }
0x16ad   :  { %6662 = vmatpush1.bf16.msra.mxu1 %v8220_v63  ;;  %v3732_v63 = vld [vmem:[#allocation7 + $0x18] sm:$0xff] }
0x16ae   :  { %6664 = vmatprep.subr.bf16.mxu1 %v8226_v13  ;;  %v8403_v13 = vpack.c.bf16 %v3732_v63, %v3731_v30 }
0x16b0   :  { %6636 = vmatpush3.bf16.msra.mxu0 %v8403_v13 }
0x16b1   :  { %6666 = vmatpush1.bf16.msra.mxu1 %v8230_v47  ;;  %6637 = vmatprep.subr.bf16.mxu0 %v8616_v9  ;;  %v3733_v47 = vld [vmem:[#allocation7 + $0x20] sm:$0xff] }
0x16b2   :  { %6668 = vmatprep.subr.bf16.mxu1 %v8236_v4  ;;  %v3734_v4 = vld [vmem:[#allocation7 + $0x28] sm:$0xff] }
0x16b5   :  { %6670 = vmatpush1.bf16.msra.mxu1 %v8240_v34  ;;  %v8407_v34 = vpack.c.bf16 %v3734_v4, %v3733_v47  ;;  %v3559_v47 = vrot.slane %v3550_v50, %v8633_v23 }
0x16b6   :  { %6672 = vmatprep.subr.bf16.mxu1 %v8246_v8  ;;  %v3735_v8 = vld [vmem:[#allocation7 + $0x30] sm:$0xff] }
0x16b7   :  { %6639 = vmatpush3.bf16.msra.mxu0 %v8407_v34 }
0x16b8   :  { %6640 = vmatprep.subr.bf16.mxu0 %v8616_v9 }
0x16b9   :  { %6674 = vmatpush1.bf16.msra.mxu1 %v8250_v19  ;;  %v3736_v19 = vld [vmem:[#allocation7 + $0x38] sm:$0xff] }
0x16ba   :  { %6676 = vmatprep.subr.bf16.mxu1 %v8256_v54  ;;  %v8411_v54 = vpack.c.bf16 %v3736_v19, %v3735_v8 }
0x16bc   :  { %6642 = vmatpush3.bf16.msra.mxu0 %v8411_v54 }
0x16bd   :  { %6678 = vmatpush1.bf16.msra.mxu1 %v8260_v61  ;;  %6643 = vmatprep.subr.bf16.mxu0 %v8616_v9  ;;  %v3737_v61 = vld [vmem:[#allocation7 + $0x40] sm:$0xff] }
0x16be   :  { %6680 = vmatprep.subr.bf16.mxu1 %v8266_v29  ;;  %v3738_v29 = vld [vmem:[#allocation7 + $0x48] sm:$0xff] }
0x16c1   :  { %6682 = vmatpush1.bf16.msra.mxu1 %v8270_v7  ;;  %v8415_v7 = vpack.c.bf16 %v3738_v29, %v3737_v61 }
0x16c2   :  { %6684 = vmatprep.subr.bf16.mxu1 %v8281_v0  ;;  %v3739_v0 = vld [vmem:[#allocation7 + $0x50] sm:$0xff] }
0x16c3   :  { %6645 = vmatpush3.bf16.msra.mxu0 %v8415_v7 }
0x16c4   :  { %6646 = vmatprep.subr.bf16.mxu0 %v8616_v9 }
0x16c5   :  { %6686 = vmatpush1.bf16.msra.mxu1 %v8283_v28  ;;  %v3740_v28 = vld [vmem:[#allocation7 + $0x58] sm:$0xff] }
0x16c6   :  { %6712 = vmatprep.subr.bf16.mxu1 %v8290_v39  ;;  %v8419_v39 = vpack.c.bf16 %v3740_v28, %v3739_v0 }
0x16c8   :  { %6648 = vmatpush3.bf16.msra.mxu0 %v8419_v39 }
0x16c9   :  { %6649 = vmatprep.subr.bf16.mxu0 %v8616_v9 }
0x16cc   :  { %6651 = vmatpush3.bf16.msra.mxu0 %v8422_v33 }
0x16cd   :  { %6652 = vmatprep.subr.bf16.mxu0 %v8616_v9 }
0x16d0   :  { %6654 = vmatpush3.bf16.msra.mxu0 %v8426_v32 }
0x16d1   :  { %6687 = vmatprep.subr.bf16.mxu0 %v8616_v9 }
0x175b   :  { %v3498_v2 = vpop.f32.mrb[24].mxu1 }
0x175c   :  { %v5527_v53 = vpop.f32.mrb[25].mxu1 }
0x177b   :  { %v3633_v30 = vpop.f32.mrb[24].mxu0  ;;  %v3704_v63 = vpop.f32.mrb[26].mxu1 }
0x177c   :  { %v3634_v4 = vadd.f32 %v3633_v30, %v3555_v55  ;;  %v3635_v8 = vpop.f32.mrb[25].mxu0  ;;  %v5562_v19 = vpop.f32.mrb[27].mxu1  ;;  %v3705_v53 = vadd.f32 %v3704_v63, %v3563_v15  ;;  %v2745_v63 = vmul.f32 1.442695, %v8124_v56 }
0x177d   :  { %v3636_v29 = vadd.f32 %v3635_v8, %v3559_v47 }
0x177e   :  { %v4446_v61 = vmul.f32 -1.442695, %v3634_v4 }
0x177f   :  { %v4447_v0 = vmul.f32 -1.442695, %v3636_v29 }
0x1780   :  { %6896 = vpow2.f32 %v4446_v61 }
0x1781   :  { %6898 = vpow2.f32 %v4447_v0 }
0x178a   :  { %v6897_v28 = vpop.eup %6896 }
0x178b   :  { %v3712_v26 = vadd.f32 1.0, %v6897_v28  ;;  %v6899_v42 = vpop.eup %6898 }
0x178c   :  { %v3719_v44 = vadd.f32 1.0, %v6899_v42 }
0x178d   :  { %6900 = vrcp.f32 %v3712_v26 }
0x178e   :  { %6902 = vrcp.f32 %v3719_v44 }
0x1797   :  { %v6901_v48 = vpop.eup %6900 }
0x1798   :  { %v3722_v32 = vmul.f32 %v6901_v48, %v3705_v53  ;;  %v6903_v55 = vpop.eup %6902  ;;  %v8462_v48 = vld [vmem:[%s8578_s4] ss:$0 sm:$0xff] }
0x1799   :  { %v3725_v30 = vsub.f32 1.0, %v6903_v55  ;;  %v3727_v8 = vmul.f32 %v6903_v55, %v8193_v20 }
0x179a   :  { %v3723_v23 = vadd.f32 %v3722_v32, %v3498_v2  ;;  %v8639_v32 = vld [vmem:[#allocation21_spill] sm:$0xff] }
0x179b   :  { %v1665_v2 = vmul.f32 1.442695, %v8639_v32 }
0x179c   :  { %6904 = vtanh.f32 %v3723_v23 }
0x17a6   :  { %v6905_v4 = vpop.eup %6904 }
0x17a7   :  { %v3726_v47 = vmul.f32 %v6905_v4, %v3725_v30 }
0x17a9   :  { %v8438_v19 = vadd.f32 %v3727_v8, %v3726_v47 }
0x17ab   :  { %5596 = vmatmul.mubr.f32.vlgmr.msra.gmra.mrb[26].mxu0 %v8438_v19 }
0x17ac   :  { %6689 = vmatpush3.bf16.msra.mxu0 %v8213_v62  ;;  %5630 = vmatprep.mubr.msk.f32.mxu0 %vm7075_vm0, %v8615_v58 }
0x17ad   :  { %6690 = vmatprep.subr.bf16.mxu0 %v8616_v9 }
0x17b0   :  { %6692 = vmatpush3.bf16.msra.mxu0 %v8222_v52 }
0x17b1   :  { %6693 = vmatprep.subr.bf16.mxu0 %v8616_v9 }
0x17b4   :  { %6695 = vmatpush3.bf16.msra.mxu0 %v8232_v41 }
0x17b5   :  { %6696 = vmatprep.subr.bf16.mxu0 %v8616_v9 }
0x17b8   :  { %6698 = vmatpush3.bf16.msra.mxu0 %v8242_v3 }
0x17b9   :  { %6699 = vmatprep.subr.bf16.mxu0 %v8616_v9 }
0x17bc   :  { %6701 = vmatpush3.bf16.msra.mxu0 %v8252_v31 }
0x17bd   :  { %6702 = vmatprep.subr.bf16.mxu0 %v8616_v9 }
0x17c0   :  { %6704 = vmatpush3.bf16.msra.mxu0 %v8262_v1 }
0x17c1   :  { %6705 = vmatprep.subr.bf16.mxu0 %v8616_v9 }
0x17c4   :  { %6707 = vmatpush3.bf16.msra.mxu0 %v8272_v10  ;;  %v8638_v10 = vld [vmem:[#allocation17_spill] sm:$0xff] }
0x17c5   :  { %6708 = vmatprep.subr.bf16.mxu0 %v8616_v9 }
0x17c8   :  { %6710 = vmatpush3.bf16.msra.mxu0 %v8286_v36  ;;  %v586_v36 = vmul.f32 1.442695, %v8638_v10 }
0x17c9   :  { %6743 = vmatprep.subr.bf16.mxu0 %v8616_v9 }
0x17ca   :  { %6906 = vpow2.f32 %v586_v36 }
0x17cb   :  { %6908 = vpow2.f32 %v1665_v2 }
0x17cc   :  { %6910 = vpow2.f32 %v2745_v63 }
0x17d4   :  { %v6907_v26 = vpop.eup %6906 }
0x17d5   :  { %v6909_v42 = vpop.eup %6908 }
0x17d6   :  { %v6911_v15 = vpop.eup %6910 }
0x187e   :  { %v3818_v23 = vpop.f32.mrb[26].mxu0 }
0x187f   :  { %v3819_v20 = vadd.f32 %v8462_v48, %v3818_v23  ;;  %v5597_v62 = vpop.f32.mrb[27].mxu0 }
0x1881   :  { %3822 = vmax.xlane.f32.xlu0 %v3819_v20 }
0x190e   :  { %v3823_v52 = vpop.xlane.xlu0 %3822 }
0x190f   :  { %v8465_v41 = vsub.f32 %v3819_v20, %v3823_v52  ;;  %v8641_v20 = vld [vmem:[#allocation23_spill] sm:$0xff] }
0x1911   :  { %vm3834_vm5 = vcmp.eq.f32.partialorder %v8465_v41, 0.0  ;;  %v3825_v28 = vmul.f32 1.442695, %v8465_v41 }
0x1912   :  { %v3835_v3 = vsel %vm3834_vm5, %v7234_v11, 128 }
0x1913   :  { %v3837_v31 = vshra.s32 %v3835_v3, 16  ;;  %v3836_v50 = vand.u32 65535, %v3835_v3  ;;  %6912 = vpow2.f32 %v3825_v28 }
0x1915   :  { %v3839_v1 = vcvt.s32.f32 %v3837_v31  ;;  %v3838_v29 = vcvt.s32.f32 %v3836_v50 }
0x1917   :  { %3840 = vmin.xlane.f32.xlu1 %v3839_v1 }
0x191d   :  { %v6913_v44 = vpop.eup %6912 }
0x19a4   :  { %v3841_v61 = vpop.xlane.xlu1 %3840 }
0x19a5   :  { %vm3842_vm6 = vcmp.eq.f32.partialorder %v3839_v1, %v3841_v61  ;;  %v3847_v53 = vcvt.f32.s32 %v3841_v61 }
0x19a6   :  { %v3843_v0 = vsel %vm3842_vm6, %v3838_v29, inf  ;;  %v8645_v29 = vld [vmem:[#allocation18_spill] sm:$0xff] }
0x19a7   :  { %3844 = vmin.xlane.f32.xlu0 %v3843_v0  ;;  %v3848_v30 = vshll.u32 %v3847_v53, 16  ;;  %v1125_v0 = vmul.f32 1.442695, %v8645_v29 }
0x19ab   :  { %588 = vadd.xlane.f32.xlu0 %v6907_v26  ;;  %v8647_v26 = vld [vmem:[#allocation20_spill] sm:$0xff] }
0x19af   :  { %1667 = vadd.xlane.f32.xlu0 %v6909_v42  ;;  %v3285_v42 = vmul.f32 1.442695, %v8647_v26 }
0x19b3   :  { %2747 = vadd.xlane.f32.xlu0 %v6911_v15 }
0x19b7   :  { %3827 = vadd.xlane.f32.xlu0 %v6913_v44 }
0x1a34   :  { %v3845_v55 = vpop.xlane.xlu0 %3844 }
0x1a35   :  { %v3846_v4 = vcvt.f32.s32 %v3845_v55 }
0x1a37   :  { %v3849_v47 = vadd.s32 %v3848_v30, %v3846_v4 }
0x1a38   :  { %v589_v8 = vpop.xlane.xlu0 %588 }
0x1a39   :  { %vm3850_vm7 = vcmp.eq.s32.totalorder %v7234_v11, %v3849_v47  ;;  %6914 = vlog2.f32 %v589_v8 }
0x1a3a   :  { %4450 = vmatmul.mubr.msk.f32.vlgmr.msra.gmra.mrb[28].mxu1 %vm3850_vm7, %v8618_v57  ;;  %5631 = vmatmul.mubr.msk.f32.vlgmr.msra.gmra.mrb[28].mxu0 %vm3850_vm7, %v8618_v57 }
0x1a3b   :  { %6714 = vmatpush1.bf16.msra.mxu1 %v8294_v14  ;;  %6745 = vmatpush3.bf16.msra.mxu0 %v8296_v16 }
0x1a3c   :  { %v1668_v23 = vpop.xlane.xlu0 %1667  ;;  %6716 = vmatprep.subr.bf16.mxu1 %v8298_v40  ;;  %6746 = vmatprep.subr.bf16.mxu0 %v8616_v9 }
0x1a3d   :  { %6916 = vlog2.f32 %v1668_v23  ;;  %4171 = vmatprep.mubr.f32.mxu1 %v8615_v58  ;;  %5665 = vmatprep.mubr.msk.f32.mxu0 %vm7075_vm0, %v8615_v58 }
0x1a3f   :  { %6718 = vmatpush1.bf16.msra.mxu1 %v8305_v45  ;;  %6748 = vmatpush3.bf16.msra.mxu0 %v8307_v38 }
0x1a40   :  { %v2748_v11 = vpop.xlane.xlu0 %2747  ;;  %6720 = vmatprep.subr.bf16.mxu1 %v8311_v35  ;;  %6749 = vmatprep.subr.bf16.mxu0 %v8616_v9 }
0x1a41   :  { %6918 = vlog2.f32 %v2748_v11 }
0x1a43   :  { %v6915_v57 = vpop.eup %6914  ;;  %6722 = vmatpush1.bf16.msra.mxu1 %v8318_v6  ;;  %6751 = vmatpush3.bf16.msra.mxu0 %v8320_v5 }
0x1a44   :  { %v591_v14 = vmul.f32 0.6931472, %v6915_v57  ;;  %v3828_v16 = vpop.xlane.xlu0 %3827  ;;  %6724 = vmatprep.subr.bf16.mxu1 %v8324_v51  ;;  %6752 = vmatprep.subr.bf16.mxu0 %v8616_v9  ;;  %v8640_v51 = vld [vmem:[#allocation22_spill] sm:$0xff] }
0x1a45   :  { %6920 = vlog2.f32 %v3828_v16 }
0x1a46   :  { %v592_v40 = vsub.f32 %v8638_v10, %v591_v14 }
0x1a47   :  { %v6917_v45 = vpop.eup %6916  ;;  %6726 = vmatpush1.bf16.msra.mxu1 %v8328_v43  ;;  %6754 = vmatpush3.bf16.msra.mxu0 %v8330_v24 }
0x1a48   :  { %593 = vst [vmem:[#allocation8] sm:$0xff] %v592_v40  ;;  %v1670_v38 = vmul.f32 0.6931472, %v6917_v45  ;;  %6728 = vmatprep.subr.bf16.mxu1 %v8334_v37  ;;  %6755 = vmatprep.subr.bf16.mxu0 %v8616_v9 }
0x1a4a   :  { %v1671_v35 = vsub.f32 %v8639_v32, %v1670_v38 }
0x1a4b   :  { %v6919_v6 = vpop.eup %6918  ;;  %6730 = vmatpush1.bf16.msra.mxu1 %v8338_v27  ;;  %6757 = vmatpush3.bf16.msra.mxu0 %v8340_v12 }
0x1a4c   :  { %1673 = vst [vmem:[#allocation8 + $0x10] sm:$0xff] %v1671_v35  ;;  %v2750_v5 = vmul.f32 0.6931472, %v6919_v6  ;;  %6732 = vmatprep.subr.bf16.mxu1 %v8640_v51  ;;  %6758 = vmatprep.subr.bf16.mxu0 %v8616_v9 }
0x1a4e   :  { %v2751_v43 = vsub.f32 %v8124_v56, %v2750_v5 }
0x1a4f   :  { %v6921_v24 = vpop.eup %6920  ;;  %6734 = vmatpush1.bf16.msra.mxu1 %v8641_v20  ;;  %6760 = vmatpush3.bf16.msra.mxu0 %v8350_v17  ;;  %v8643_v17 = vld [vmem:[#allocation15_spill] sm:$0xff] }
0x1a50   :  { %2753 = vst [vmem:[#allocation8 + $0x20] sm:$0xff] %v2751_v43  ;;  %v3830_v37 = vmul.f32 0.6931472, %v6921_v24  ;;  %6736 = vmatprep.subr.bf16.mxu1 %v8354_v25  ;;  %6761 = vmatprep.subr.bf16.mxu0 %v8616_v9 }
0x1a52   :  { %v3831_v27 = vsub.f32 %v8465_v41, %v3830_v37 }
0x1a53   :  { %6738 = vmatpush1.bf16.msra.mxu1 %v8358_v21  ;;  %6763 = vmatpush3.bf16.msra.mxu0 %v8360_v60 }
0x1a54   :  { %3833 = vst [vmem:[#allocation8 + $0x30] sm:$0xff] %v3831_v27  ;;  %6740 = vmatprep.subr.bf16.mxu1 %v8364_v18  ;;  %6764 = vmatprep.subr.bf16.mxu0 %v8616_v9  ;;  %v8644_v18 = vld [vmem:[#allocation16_spill] sm:$0xff] }
0x1a57   :  { %6742 = vmatpush1.bf16.msra.mxu1 %v8368_v59  ;;  %6766 = vmatpush3.bf16.msra.mxu0 %v8370_v46  ;;  %v4090_v59 = vld [vmem:[%s8576_s2] sm:$0x7]  ;;  %s7077_s2 = smov [#allocation9]  }
0x1a58   :  { %6767 = vmatprep.subr.bf16.mxu1 %v8616_v9  ;;  %v4095_v25 = vrot.slane %v4090_v59, %v8643_v17  ;;  %v4099_v46 = vrot.slane %v4090_v59, %v8644_v18  ;;  %v4103_v52 = vrot.slane %v4090_v59, %v7411_v22  ;;  %v8646_v22 = vld [vmem:[#allocation19_spill] sm:$0xff]  ;;  %s4393_s3 = sshll.u32 %s7077_s2, 4  ;;  %s4394_s3 = int_to_ptr.vmem [resolvable:$true] %s4393_s3 }
0x1a59   :  { %v2205_v28 = vmul.f32 1.442695, %v8646_v22  ;;  %s7014_s16 = scalar_lea.vmem %s4394_s3, 128  ;;  %p7019_p11 = scmp.lt.s32.totalorder %s4394_s3, %s4394_s3 }
0x1a5a   :  { %4172 = vmatmul.mubr.f32.vlgmr.msra.gmra.mrb[28].mxu1 %v8438_v19  ;;  %5666 = vmatmul.mubr.f32.vlgmr.msra.gmra.mrb[30].mxu0 %v8438_v19  ;;  %p7015_p10 = scmp.ne.s32.totalorder %s4394_s3, %s7014_s16  ;;  %p7020_p12 = scmp.lt.s32.totalorder %s7014_s16, %s7014_s16 }
0x1a5b   :  { %6769 = vmatpush3.bf16.msra.mxu1 %v8399_v49  ;;  %5700 = vmatprep.mubr.msk.f32.mxu1 %vm7075_vm0, %v8615_v58  ;;  %v8642_v58 = vld [vmem:[#allocation24_spill] sm:$0xff] }
0x1a5c   :  { %6770 = vmatprep.subr.bf16.mxu1 %v8616_v9  ;;  %p7021_p13 = por %p7020_p12, %p7019_p11 }
0x1a5e   :  { %p7022_p0 = pnand %p7021_p13, %p7015_p10 }
0x1a5f   :  { %6772 = vmatpush3.bf16.msra.mxu1 %v8403_v13 }
0x1a60   :  { %6773 = vmatprep.subr.bf16.mxu1 %v8616_v9 }
0x1a63   :  { %6775 = vmatpush3.bf16.msra.mxu1 %v8407_v34 }
0x1a64   :  { %6776 = vmatprep.subr.bf16.mxu1 %v8616_v9 }
0x1a67   :  { %6778 = vmatpush3.bf16.msra.mxu1 %v8411_v54 }
0x1a68   :  { %6779 = vmatprep.subr.bf16.mxu1 %v8616_v9 }
0x1a6b   :  { %6781 = vmatpush3.bf16.msra.mxu1 %v8415_v7 }
0x1a6c   :  { %6782 = vmatprep.subr.bf16.mxu1 %v8616_v9 }
0x1a6f   :  { %6784 = vmatpush3.bf16.msra.mxu1 %v8419_v39 }
0x1a70   :  { %6785 = vmatprep.subr.bf16.mxu1 %v8616_v9 }
0x1a73   :  { %6787 = vmatpush3.bf16.msra.mxu1 %v8422_v33 }
0x1a74   :  { %6788 = vmatprep.subr.bf16.mxu1 %v8616_v9 }
0x1a77   :  { %6790 = vmatpush3.bf16.msra.mxu1 %v8642_v58 }
0x1b0d   :  { %v4038_v56 = vpop.f32.mrb[28].mxu0 }
0x1b0e   :  { %v5632_v12 = vpop.f32.mrb[29].mxu0 }
0x1b2d   :  { %v4173_v21 = vpop.f32.mrb[28].mxu1  ;;  %v4244_v60 = vpop.f32.mrb[30].mxu0 }
0x1b2e   :  { %v4174_v49 = vadd.f32 %v4173_v21, %v4095_v25  ;;  %v4175_v13 = vpop.f32.mrb[29].mxu1  ;;  %v5667_v34 = vpop.f32.mrb[31].mxu0  ;;  %v4245_v3 = vadd.f32 %v4244_v60, %v4103_v52 }
0x1b2f   :  { %v4176_v7 = vadd.f32 %v4175_v13, %v4099_v46 }
0x1b30   :  { %v4452_v54 = vmul.f32 -1.442695, %v4174_v49 }
0x1b31   :  { %v4453_v9 = vmul.f32 -1.442695, %v4176_v7 }
0x1b32   :  { %6922 = vpow2.f32 %v4452_v54 }
0x1b33   :  { %6924 = vpow2.f32 %v4453_v9 }
0x1b3c   :  { %v6923_v39 = vpop.eup %6922 }
0x1b3d   :  { %v4252_v33 = vadd.f32 1.0, %v6923_v39  ;;  %v6925_v62 = vpop.eup %6924 }
0x1b3e   :  { %v4259_v41 = vadd.f32 1.0, %v6925_v62 }
0x1b3f   :  { %6926 = vrcp.f32 %v4252_v33 }
0x1b40   :  { %6928 = vrcp.f32 %v4259_v41 }
0x1b49   :  { %v6927_v31 = vpop.eup %6926 }
0x1b4a   :  { %v4262_v1 = vmul.f32 %v6927_v31, %v4245_v3  ;;  %v6929_v36 = vpop.eup %6928 }
0x1b4b   :  { %v4265_v32 = vsub.f32 1.0, %v6929_v36  ;;  %v4267_v63 = vmul.f32 %v6929_v36, %v8438_v19 }
0x1b4c   :  { %v4263_v10 = vadd.f32 %v4262_v1, %v4038_v56 }
0x1b4e   :  { %6930 = vtanh.f32 %v4263_v10 }
0x1b4f   :  { %6932 = vpow2.f32 %v1125_v0 }
0x1b50   :  { %6934 = vpow2.f32 %v2205_v28 }
0x1b51   :  { %6936 = vpow2.f32 %v3285_v42 }
0x1b58   :  { %v6931_v2 = vpop.eup %6930 }
0x1b59   :  { %v4266_v50 = vmul.f32 %v6931_v2, %v4265_v32  ;;  %v6933_v55 = vpop.eup %6932 }
0x1b5a   :  { %v6935_v19 = vpop.eup %6934 }
0x1b5b   :  { %v4268_v61 = vadd.f32 %v4267_v63, %v4266_v50  ;;  %v6937_v30 = vpop.eup %6936 }
0x1b5d   :  { %5701 = vmatmul.mubr.f32.vlgmr.msra.gmra.mrb[30].mxu1 %v4268_v61  ;;  %4374 = vst [vmem:[#allocation9] sm:$0xff] %v4268_v61 }
0x1c30   :  { %v4358_v15 = vpop.f32.mrb[30].mxu1 }
0x1c31   :  { %v4359_v44 = vadd.f32 %v8462_v48, %v4358_v15  ;;  %v5702_v53 = vpop.f32.mrb[31].mxu1 }
0x1c33   :  { %4362 = vmax.xlane.f32.xlu1 %v4359_v44 }
0x1c37   :  { %1127 = vadd.xlane.f32.xlu1 %v6933_v55 }
0x1c3b   :  { %2207 = vadd.xlane.f32.xlu1 %v6935_v19 }
0x1c3f   :  { %3287 = vadd.xlane.f32.xlu1 %v6937_v30 }
0x1cc0   :  { %v4363_v4 = vpop.xlane.xlu1 %4362 }
0x1cc1   :  { %v4364_v47 = vsub.f32 %v4359_v44, %v4363_v4 }
0x1cc3   :  { %v4365_v8 = vmul.f32 1.442695, %v4364_v47 }
0x1cc4   :  { %v1128_v23 = vpop.xlane.xlu1 %1127 }
0x1cc5   :  { %6938 = vpow2.f32 %v4365_v8 }
0x1cc6   :  { %6940 = vlog2.f32 %v1128_v23 }
0x1cc8   :  { %v2208_v11 = vpop.xlane.xlu1 %2207 }
0x1cc9   :  { %6942 = vlog2.f32 %v2208_v11 }
0x1ccc   :  { %v3288_v57 = vpop.xlane.xlu1 %3287 }
0x1ccd   :  { %6944 = vlog2.f32 %v3288_v57 }
0x1ccf   :  { %v6939_v48 = vpop.eup %6938 }
0x1cd0   :  { %v6941_v14 = vpop.eup %6940  ;;  %4367 = vadd.xlane.f32.xlu1 %v6939_v48 }
0x1cd1   :  { %v1130_v16 = vmul.f32 0.6931472, %v6941_v14 }
0x1cd3   :  { %v6943_v40 = vpop.eup %6942  ;;  %v1131_v45 = vsub.f32 %v8645_v29, %v1130_v16 }
0x1cd4   :  { %v2210_v38 = vmul.f32 0.6931472, %v6943_v40 }
0x1cd5   :  { %1133 = vst [vmem:[#allocation8 + $0x8] sm:$0xff] %v1131_v45 }
0x1cd6   :  { %v2211_v35 = vsub.f32 %v8646_v22, %v2210_v38 }
0x1cd7   :  { %v6945_v6 = vpop.eup %6944 }
0x1cd8   :  { %2213 = vst [vmem:[#allocation8 + $0x18] sm:$0xff] %v2211_v35  ;;  %v3290_v5 = vmul.f32 0.6931472, %v6945_v6 }
0x1cda   :  { %v3291_v51 = vsub.f32 %v8647_v26, %v3290_v5 }
0x1cdc   :  { %3293 = vst [vmem:[#allocation8 + $0x28] sm:$0xff] %v3291_v51 }
0x1cdd   :  { %7025 = shalt.err (!%p7022_p0)
}
0x1cde   :  { %s7026_s18 = scalar_lea.hbm %s8581_s7, 128 }
0x1cdf   :  { %p7027_p1 = scmp.ne.s32.totalorder %s8581_s7, %s7026_s18  ;;  %p7030_p2 = scmp.lt.u32.totalorder %s7026_s18, %s8581_s7 }
0x1ce1   :  { %p7032_p3 = pnand %p7030_p2, %p7027_p1 }
0x1ce3   :  { %7035 = shalt.err (!%p7032_p3)
}
0x1ce4   :  { %4396 = dma.vmem_to_hbm [thread:$0]  %s4394_s3, 128, %s8581_s7, [#allocation10]  }
0x1ce5   :  { %s7078_s1 = smov [#allocation8]  }
0x1ce6   :  { %s4380_s25 = sshll.u32 %s7078_s1, 4  ;;  %s4381_s25 = int_to_ptr.vmem [resolvable:$true] %s4380_s25 }
0x1ce7   :  { %s7036_s26 = scalar_lea.vmem %s4381_s25, 1024  ;;  %p7041_p5 = scmp.lt.s32.totalorder %s4381_s25, %s4381_s25 }
0x1ce8   :  { %p7037_p4 = scmp.ne.s32.totalorder %s4381_s25, %s7036_s26  ;;  %p7042_p6 = scmp.lt.s32.totalorder %s7036_s26, %s7036_s26 }
0x1cea   :  { %p7043_p7 = por %p7042_p6, %p7041_p5 }
0x1cec   :  { %p7044_p8 = pnand %p7043_p7, %p7037_p4 }
0x1d5d   :  { %v4368_v43 = vpop.xlane.xlu1 %4367 }
0x1d5e   :  { %6946 = vlog2.f32 %v4368_v43 }
0x1d68   :  { %v6947_v24 = vpop.eup %6946 }
0x1d69   :  { %v4370_v20 = vmul.f32 0.6931472, %v6947_v24 }
0x1d6b   :  { %v4371_v37 = vsub.f32 %v4364_v47, %v4370_v20 }
0x1d6d   :  { %4373 = vst [vmem:[#allocation8 + $0x38] sm:$0xff] %v4371_v37 }
0x1d6e   :  { %7047 = shalt.err (!%p7044_p8)
}
0x1d6f   :  { %s7048_s7 = scalar_lea.hbm %s8580_s6, 1024 }
0x1d70   :  { %p7049_p9 = scmp.ne.s32.totalorder %s8580_s6, %s7048_s7  ;;  %p7052_p10 = scmp.lt.u32.totalorder %s7048_s7, %s8580_s6 }
0x1d72   :  { %p7054_p11 = pnand %p7052_p10, %p7049_p9 }
0x1d74   :  { %7057 = shalt.err (!%p7054_p11)
}
0x1d75   :  { %4386 = dma.vmem_to_hbm [thread:$0]  %s4381_s25, 1024, %s8580_s6, [#allocation4], %s7071_s0, %s7071_s0, %s7072_s27  }
0x1d76   :  { %7062 = dma.done.wait [#allocation4], 1024  }
0x1d77   :  { %7063 = vsyncadd [#allocation4], 4294966272 }
0x1d78   :  { %7064 = dma.done.wait [#allocation10], 128  }
0x1d79   :  { %7065 = vsyncadd [#allocation10], 4294967168 }
0x1d7a   :  { %4403 = vsyncpa [#allocation3], 1 }
0x1d7b   :  { %4404 = vsyncpa [#allocation6], 1 }
0x1d7c   :  { %4405 = vsyncpa [#allocation4], 1 }
0x1d7d   :  { %4406 = vsyncpa [#allocation10], 1 }

// kernel: tpu_custom_call.1
= control target key start
LH: loop header
LB: loop body
LE: loop exit
PB: predicated region body
PF: predicated region fallthrough
CT: control target
= control target key end

     0   :  { %13 = vsyncpa [#allocation3], 0  ;;  %s8574_s0 = inlined_call_operand.hbm [shape: f32[128,384], index: 0, kind: input, shape index: {}]   ;;  %s8575_s1 = inlined_call_operand.hbm [shape: f32[128,384], index: 1, kind: input, shape index: {}]   ;;  %s8576_s2 = inlined_call_operand.vmem [shape: f32[1,384], index: 2, kind: input, shape index: {}]   ;;  %s8577_s3 = inlined_call_operand.hbm [shape: f32[128,128], index: 3, kind: input, shape index: {}]   ;;  %s8578_s4 = inlined_call_operand.vmem [shape: f32[1,128], index: 4, kind: input, shape index: {}]   ;;  %s8579_s5 = inlined_call_operand.vmem [shape: f32[8,128], index: 5, kind: input, shape index: {}]   ;;  %s8580_s6 = inlined_call_operand.hbm [shape: f32[8,8,128], index: 6, kind: output, shape index: {0}]   ;;  %s8581_s7 = inlined_call_operand.hbm [shape: f32[8,128], index: 7, kind: output, shape index: {1}]  }
   0x1   :  { %14 = vsyncpa [#allocation6], 0 }
   0x2   :  { %15 = vsyncpa [#allocation4], 0 }
   0x3   :  { %16 = vsyncpa [#allocation10], 0  ;;  %s7066_s24 = smov [#allocation5]   ;;  %s7067_s26 = smov [#allocation2]  }
   0x4   :  { %s34_s25 = sshll.u32 %s7066_s24, 4  ;;  %s22_s27 = sshll.u32 %s7067_s26, 4  ;;  %s35_s25 = int_to_ptr.vmem [resolvable:$true] %s34_s25  ;;  %s7119_s27 = int_to_ptr.vmem [resolvable:$true] %s22_s27 }
   0x5   :  { %s6948_s30 = scalar_lea.hbm %s8575_s1, 6144 }
   0x6   :  { %p6949_p0 = scmp.ne.s32.totalorder %s8575_s1, %s6948_s30  ;;  %p6952_p1 = scmp.lt.u32.totalorder %s6948_s30, %s8575_s1 }
   0x8   :  { %p6954_p2 = pnand %p6952_p1, %p6949_p0 }
   0xa   :  { %6957 = shalt.err (!%p6954_p2)
}
   0xb   :  { %s6958_s12 = scalar_lea.vmem %s35_s25, 6144  ;;  %p6963_p4 = scmp.lt.s32.totalorder %s35_s25, %s35_s25 }
   0xc   :  { %p6959_p3 = scmp.ne.s32.totalorder %s35_s25, %s6958_s12  ;;  %p6964_p5 = scmp.lt.s32.totalorder %s6958_s12, %s6958_s12 }
   0xe   :  { %p6965_p6 = por %p6964_p5, %p6963_p4 }
  0x10   :  { %p6966_p7 = pnand %p6965_p6, %p6959_p3 }
  0x12   :  { %6969 = shalt.err (!%p6966_p7)
}
  0x13   :  { %s7068_s13 = smov 384   ;;  %s7069_s14 = smov 24  }
  0x14   :  { %40 = dma.hbm_to_vmem [thread:$0]  %s8575_s1, 6144, %s35_s25, [#allocation6], %s7068_s13, %s7068_s13, %s7069_s14  }
  0x15   :  { %s6970_s19 = scalar_lea.hbm %s8574_s0, 6144 }
  0x16   :  { %p6971_p8 = scmp.ne.s32.totalorder %s8574_s0, %s6970_s19  ;;  %p6974_p9 = scmp.lt.u32.totalorder %s6970_s19, %s8574_s0 }
  0x18   :  { %p6976_p10 = pnand %p6974_p9, %p6971_p8 }
  0x1a   :  { %6979 = shalt.err (!%p6976_p10)
}
  0x1b   :  { %s6980_s24 = scalar_lea.vmem %s7119_s27, 6144  ;;  %p6985_p12 = scmp.lt.s32.totalorder %s7119_s27, %s7119_s27 }
  0x1c   :  { %p6981_p11 = scmp.ne.s32.totalorder %s7119_s27, %s6980_s24  ;;  %p6986_p13 = scmp.lt.s32.totalorder %s6980_s24, %s6980_s24 }
  0x1e   :  { %p6987_p0 = por %p6986_p13, %p6985_p12 }
  0x20   :  { %p6988_p1 = pnand %p6987_p0, %p6981_p11 }
  0x22   :  { %6991 = shalt.err (!%p6988_p1)
}
  0x23   :  { %28 = dma.hbm_to_vmem [thread:$0]  %s8574_s0, 6144, %s7119_s27, [#allocation3], %s7068_s13, %s7068_s13, %s7069_s14  }
  0x24   :  { %s7070_s26 = smov [#allocation7]   ;;  %s6992_s8 = scalar_lea.hbm %s8577_s3, 2048 }
  0x25   :  { %s48_s28 = sshll.u32 %s7070_s26, 4  ;;  %p6993_p2 = scmp.ne.s32.totalorder %s8577_s3, %s6992_s8  ;;  %s49_s28 = int_to_ptr.vmem [resolvable:$true] %s48_s28 }
  0x26   :  { %p6996_p3 = scmp.lt.u32.totalorder %s6992_s8, %s8577_s3 }
  0x28   :  { %p6998_p4 = pnand %p6996_p3, %p6993_p2 }
  0x2a   :  { %7001 = shalt.err (!%p6998_p4)
}
  0x2b   :  { %s7002_s15 = scalar_lea.vmem %s49_s28, 2048  ;;  %p7007_p6 = scmp.lt.s32.totalorder %s49_s28, %s49_s28 }
  0x2c   :  { %p7003_p5 = scmp.ne.s32.totalorder %s49_s28, %s7002_s15  ;;  %p7008_p7 = scmp.lt.s32.totalorder %s7002_s15, %s7002_s15 }
  0x2e   :  { %p7009_p8 = por %p7008_p7, %p7007_p6 }
  0x30   :  { %p7010_p9 = pnand %p7009_p8, %p7003_p5 }
  0x32   :  { %7013 = shalt.err (!%p7010_p9)
}
  0x33   :  { %s7071_s0 = smov 128   ;;  %s7072_s27 = smov 8  }
  0x34   :  { %54 = dma.hbm_to_vmem [thread:$0]  %s8577_s3, 2048, %s49_s28, [#allocation6], %s7071_s0, %s7071_s0, %s7072_s27  }
  0x35   :  { %7058 = dma.done.wait [#allocation3], 6144  }
  0x36   :  { %7059 = vsyncadd [#allocation3], 4294961152 }
  0x37   :  { %7060 = dma.done.wait [#allocation6], 8192  }
  0x38   :  { %7061 = vsyncadd [#allocation6], 4294959104  ;;  %v8584_v0 = vmov 0.0|0.0   ;;  %v8586_v1 = vmov 0.0   ;;  %vm7075_vm0 = vmmov 0   ;;  %v75_v2 = vld [vmem:[#allocation2 + $0x8] sm:$0xff]  ;;  %v68_v61 = vlaneseq }
  0x39   :  { %5735 = vmatprep.subr.bf16.mxu1 %v8584_v0  ;;  %186 = vmatprep.mubr.f32.mxu0 %v8586_v1  ;;  %v78_v3 = vld [vmem:[#allocation2 + $0x20] sm:$0xff]  ;;  %v77_v6 = vld [vmem:[#allocation2 + $0x18] sm:$0xff]  ;;  %v84_v8 = vld [vmem:[#allocation2 + $0x50] sm:$0xff] }
  0x3a   :  { %4895 = vmatprep.mubr.msk.f32.mxu1 %vm7075_vm0, %v8586_v1  ;;  %v74_v4 = vld [vmem:[#allocation2] sm:$0xff]  ;;  %v7169_v5 = vpack.c.bf16 %v78_v3, %v75_v2  ;;  %v81_v7 = vld [vmem:[#allocation2 + $0x38] sm:$0xff]  ;;  %v80_v11 = vld [vmem:[#allocation2 + $0x30] sm:$0xff] }
  0x3b   :  { %v7171_v9 = vpack.c.bf16 %v77_v6, %v74_v4  ;;  %v7173_v10 = vpack.c.bf16 %v84_v8, %v81_v7  ;;  %v83_v12 = vld [vmem:[#allocation2 + $0x48] sm:$0xff]  ;;  %v90_v14 = vld [vmem:[#allocation2 + $0x80] sm:$0xff]  ;;  %v89_v18 = vld [vmem:[#allocation2 + $0x78] sm:$0xff] }
  0x3c   :  { %v87_v13 = vld [vmem:[#allocation2 + $0x68] sm:$0xff]  ;;  %5704 = vmatprep.subr.bf16.mxu0 %v7169_v5  ;;  %v7177_v15 = vpack.c.bf16 %v83_v12, %v80_v11  ;;  %v86_v17 = vld [vmem:[#allocation2 + $0x60] sm:$0xff]  ;;  %v93_v19 = vld [vmem:[#allocation2 + $0x98] sm:$0xff]  ;;  %v7234_v11 = vand.u32 127, %v68_v61 }
  0x3d   :  { %5706 = vmatpush1.bf16.msra.mxu0 %v7171_v9  ;;  %v7180_v16 = vpack.c.bf16 %v90_v14, %v87_v13  ;;  %v96_v20 = vld [vmem:[#allocation2 + $0xb0] sm:$0xff]  ;;  %v7183_v21 = vpack.c.bf16 %v89_v18, %v86_v17  ;;  %v95_v24 = vld [vmem:[#allocation2 + $0xa8] sm:$0xff]  ;;  %v102_v28 = vld [vmem:[#allocation2 + $0xe0] sm:$0xff] }
  0x3e   :  { %5708 = vmatprep.subr.bf16.mxu0 %v7173_v10  ;;  %v92_v22 = vld [vmem:[#allocation2 + $0x90] sm:$0xff]  ;;  %v7186_v23 = vpack.c.bf16 %v96_v20, %v93_v19  ;;  %v79_v26 = vld [vmem:[#allocation2 + $0x28] sm:$0xff]  ;;  %v82_v30 = vld [vmem:[#allocation2 + $0x40] sm:$0xff]  ;;  %vm71_vm1 = vcmp.eq.s32.totalorder %v7234_v11, 1 }
  0x3f   :  { %v76_v25 = vld [vmem:[#allocation2 + $0x10] sm:$0xff]  ;;  %v99_v27 = vld [vmem:[#allocation2 + $0xc8] sm:$0xff]  ;;  %v85_v31 = vld [vmem:[#allocation2 + $0x58] sm:$0xff]  ;;  %v7191_v32 = vpack.c.bf16 %v95_v24, %v92_v22 }
  0x40   :  { %v7188_v29 = vpack.c.bf16 %v79_v26, %v76_v25  ;;  %v98_v33 = vld [vmem:[#allocation2 + $0xc0] sm:$0xff]  ;;  %v7194_v34 = vpack.c.bf16 %v85_v31, %v82_v30  ;;  %v7197_v35 = vpack.c.bf16 %v102_v28, %v99_v27  ;;  %v101_v36 = vld [vmem:[#allocation2 + $0xd8] sm:$0xff]  ;;  %v88_v37 = vld [vmem:[#allocation2 + $0x70] sm:$0xff] }
  0x41   :  { %5710 = vmatpush1.bf16.msra.mxu0 %v7177_v15  ;;  %v91_v38 = vld [vmem:[#allocation2 + $0x88] sm:$0xff]  ;;  %v105_v39 = vld [vmem:[#allocation2 + $0xf8] sm:$0xff]  ;;  %v108_v40 = vld [vmem:[#allocation2 + $0x110] sm:$0xff]  ;;  %v7201_v41 = vpack.c.bf16 %v101_v36, %v98_v33 }
  0x42   :  { %5712 = vmatprep.subr.bf16.mxu0 %v7180_v16  ;;  %5737 = vmatpush3.bf16.msra.mxu1 %v7188_v29  ;;  %v104_v42 = vld [vmem:[#allocation2 + $0xf0] sm:$0xff]  ;;  %v7204_v43 = vpack.c.bf16 %v91_v38, %v88_v37  ;;  %v7207_v44 = vpack.c.bf16 %v108_v40, %v105_v39  ;;  %v107_v45 = vld [vmem:[#allocation2 + $0x108] sm:$0xff]  ;;  %v94_v46 = vld [vmem:[#allocation2 + $0xa0] sm:$0xff]  ;;  %v8582_v37 = vmov 1.0  }
  0x43   :  { %5738 = vmatprep.subr.bf16.mxu1 %v8584_v0  ;;  %v97_v47 = vld [vmem:[#allocation2 + $0xb8] sm:$0xff]  ;;  %v111_v48 = vld [vmem:[#allocation2 + $0x128] sm:$0xff]  ;;  %v114_v49 = vld [vmem:[#allocation2 + $0x140] sm:$0xff]  ;;  %v7211_v50 = vpack.c.bf16 %v107_v45, %v104_v42 }
  0x44   :  { %v110_v51 = vld [vmem:[#allocation2 + $0x120] sm:$0xff]  ;;  %v7214_v52 = vpack.c.bf16 %v97_v47, %v94_v46  ;;  %v7217_v53 = vpack.c.bf16 %v114_v49, %v111_v48  ;;  %v113_v54 = vld [vmem:[#allocation2 + $0x138] sm:$0xff]  ;;  %v100_v55 = vld [vmem:[#allocation2 + $0xd0] sm:$0xff] }
  0x45   :  { %5714 = vmatpush1.bf16.msra.mxu0 %v7183_v21  ;;  %v103_v56 = vld [vmem:[#allocation2 + $0xe8] sm:$0xff]  ;;  %v117_v57 = vld [vmem:[#allocation2 + $0x158] sm:$0xff]  ;;  %v120_v58 = vld [vmem:[#allocation2 + $0x170] sm:$0xff]  ;;  %v7221_v59 = vpack.c.bf16 %v113_v54, %v110_v51 }
  0x46   :  { %5716 = vmatprep.subr.bf16.mxu0 %v7186_v23  ;;  %5740 = vmatpush3.bf16.msra.mxu1 %v7194_v34  ;;  %v116_v60 = vld [vmem:[#allocation2 + $0x150] sm:$0xff]  ;;  %v7224_v62 = vpack.c.bf16 %v103_v56, %v100_v55  ;;  %v7227_v63 = vpack.c.bf16 %v120_v58, %v117_v57  ;;  %v119_v2 = vld [vmem:[#allocation2 + $0x168] sm:$0xff]  ;;  %v106_v3 = vld [vmem:[#allocation2 + $0x100] sm:$0xff] }
  0x47   :  { %5741 = vmatprep.subr.bf16.mxu1 %v8584_v0  ;;  %v109_v4 = vld [vmem:[#allocation2 + $0x118] sm:$0xff]  ;;  %v264_v6 = vld [vmem:[#allocation5 + $0x8] sm:$0xff]  ;;  %v267_v7 = vld [vmem:[#allocation5 + $0x20] sm:$0xff]  ;;  %v7231_v8 = vpack.c.bf16 %v119_v2, %v116_v60 }
  0x48   :  { %v263_v12 = vld [vmem:[#allocation5] sm:$0xff]  ;;  %v7237_v13 = vpack.c.bf16 %v109_v4, %v106_v3  ;;  %v7240_v14 = vpack.c.bf16 %v267_v7, %v264_v6  ;;  %v266_v17 = vld [vmem:[#allocation5 + $0x18] sm:$0xff]  ;;  %v112_v18 = vld [vmem:[#allocation2 + $0x130] sm:$0xff] }
  0x49   :  { %5718 = vmatpush1.bf16.msra.mxu0 %v7191_v32  ;;  %v115_v19 = vld [vmem:[#allocation2 + $0x148] sm:$0xff]  ;;  %v270_v20 = vld [vmem:[#allocation5 + $0x38] sm:$0xff]  ;;  %v273_v22 = vld [vmem:[#allocation5 + $0x50] sm:$0xff]  ;;  %v7245_v24 = vpack.c.bf16 %v266_v17, %v263_v12 }
  0x4a   :  { %5720 = vmatprep.subr.bf16.mxu0 %v7197_v35  ;;  %5743 = vmatpush3.bf16.msra.mxu1 %v7204_v43  ;;  %v269_v25 = vld [vmem:[#allocation5 + $0x30] sm:$0xff]  ;;  %v7248_v26 = vpack.c.bf16 %v115_v19, %v112_v18  ;;  %v7251_v27 = vpack.c.bf16 %v273_v22, %v270_v20  ;;  %v272_v28 = vld [vmem:[#allocation5 + $0x48] sm:$0xff]  ;;  %v118_v30 = vld [vmem:[#allocation2 + $0x160] sm:$0xff] }
  0x4b   :  { %5744 = vmatprep.subr.bf16.mxu1 %v8584_v0  ;;  %v121_v31 = vld [vmem:[#allocation2 + $0x178] sm:$0xff]  ;;  %v276_v33 = vld [vmem:[#allocation5 + $0x68] sm:$0xff]  ;;  %v279_v36 = vld [vmem:[#allocation5 + $0x80] sm:$0xff]  ;;  %v7258_v38 = vpack.c.bf16 %v272_v28, %v269_v25 }
  0x4c   :  { %v275_v39 = vld [vmem:[#allocation5 + $0x60] sm:$0xff]  ;;  %v7261_v40 = vpack.c.bf16 %v121_v31, %v118_v30  ;;  %v7264_v42 = vpack.c.bf16 %v279_v36, %v276_v33  ;;  %v278_v45 = vld [vmem:[#allocation5 + $0x78] sm:$0xff]  ;;  %v265_v46 = vld [vmem:[#allocation5 + $0x10] sm:$0xff] }
  0x4d   :  { %5722 = vmatpush1.bf16.msra.mxu0 %v7201_v41  ;;  %v268_v47 = vld [vmem:[#allocation5 + $0x28] sm:$0xff]  ;;  %v282_v48 = vld [vmem:[#allocation5 + $0x98] sm:$0xff]  ;;  %v285_v49 = vld [vmem:[#allocation5 + $0xb0] sm:$0xff]  ;;  %v7269_v51 = vpack.c.bf16 %v278_v45, %v275_v39 }
  0x4e   :  { %5724 = vmatprep.subr.bf16.mxu0 %v7207_v44  ;;  %5746 = vmatpush3.bf16.msra.mxu1 %v7214_v52  ;;  %v281_v54 = vld [vmem:[#allocation5 + $0x90] sm:$0xff]  ;;  %v7272_v55 = vpack.c.bf16 %v268_v47, %v265_v46  ;;  %v7275_v56 = vpack.c.bf16 %v285_v49, %v282_v48  ;;  %v284_v57 = vld [vmem:[#allocation5 + $0xa8] sm:$0xff]  ;;  %v271_v58 = vld [vmem:[#allocation5 + $0x40] sm:$0xff] }
  0x4f   :  { %5747 = vmatprep.subr.bf16.mxu1 %v8584_v0  ;;  %v274_v60 = vld [vmem:[#allocation5 + $0x58] sm:$0xff]  ;;  %v288_v2 = vld [vmem:[#allocation5 + $0xc8] sm:$0xff]  ;;  %v291_v3 = vld [vmem:[#allocation5 + $0xe0] sm:$0xff]  ;;  %v7282_v4 = vpack.c.bf16 %v284_v57, %v281_v54 }
  0x50   :  { %v287_v6 = vld [vmem:[#allocation5 + $0xc0] sm:$0xff]  ;;  %v7285_v7 = vpack.c.bf16 %v274_v60, %v271_v58  ;;  %v7288_v12 = vpack.c.bf16 %v291_v3, %v288_v2  ;;  %v290_v17 = vld [vmem:[#allocation5 + $0xd8] sm:$0xff]  ;;  %v277_v18 = vld [vmem:[#allocation5 + $0x70] sm:$0xff] }
  0x51   :  { %5726 = vmatpush1.bf16.msra.mxu0 %v7211_v50  ;;  %v280_v19 = vld [vmem:[#allocation5 + $0x88] sm:$0xff]  ;;  %v294_v20 = vld [vmem:[#allocation5 + $0xf8] sm:$0xff]  ;;  %v297_v22 = vld [vmem:[#allocation5 + $0x110] sm:$0xff]  ;;  %v7294_v25 = vpack.c.bf16 %v290_v17, %v287_v6 }
  0x52   :  { %5728 = vmatprep.subr.bf16.mxu0 %v7217_v53  ;;  %5749 = vmatpush3.bf16.msra.mxu1 %v7224_v62  ;;  %v293_v28 = vld [vmem:[#allocation5 + $0xf0] sm:$0xff]  ;;  %v7297_v30 = vpack.c.bf16 %v280_v19, %v277_v18  ;;  %v7300_v31 = vpack.c.bf16 %v297_v22, %v294_v20  ;;  %v296_v33 = vld [vmem:[#allocation5 + $0x108] sm:$0xff]  ;;  %v283_v36 = vld [vmem:[#allocation5 + $0xa0] sm:$0xff] }
  0x53   :  { %5750 = vmatprep.subr.bf16.mxu1 %v8584_v0  ;;  %v286_v39 = vld [vmem:[#allocation5 + $0xb8] sm:$0xff]  ;;  %v300_v45 = vld [vmem:[#allocation5 + $0x128] sm:$0xff]  ;;  %v303_v46 = vld [vmem:[#allocation5 + $0x140] sm:$0xff]  ;;  %v7304_v47 = vpack.c.bf16 %v296_v33, %v293_v28 }
  0x54   :  { %v299_v48 = vld [vmem:[#allocation5 + $0x120] sm:$0xff]  ;;  %v7307_v49 = vpack.c.bf16 %v286_v39, %v283_v36  ;;  %v7310_v54 = vpack.c.bf16 %v303_v46, %v300_v45  ;;  %v302_v57 = vld [vmem:[#allocation5 + $0x138] sm:$0xff]  ;;  %v289_v58 = vld [vmem:[#allocation5 + $0xd0] sm:$0xff] }
  0x55   :  { %5730 = vmatpush1.bf16.msra.mxu0 %v7221_v59  ;;  %v292_v60 = vld [vmem:[#allocation5 + $0xe8] sm:$0xff]  ;;  %v306_v2 = vld [vmem:[#allocation5 + $0x158] sm:$0xff]  ;;  %v309_v3 = vld [vmem:[#allocation5 + $0x170] sm:$0xff]  ;;  %v7314_v6 = vpack.c.bf16 %v302_v57, %v299_v48 }
  0x56   :  { %5732 = vmatprep.subr.bf16.mxu0 %v7227_v63  ;;  %5752 = vmatpush3.bf16.msra.mxu1 %v7237_v13  ;;  %v305_v17 = vld [vmem:[#allocation5 + $0x150] sm:$0xff]  ;;  %v7317_v18 = vpack.c.bf16 %v292_v60, %v289_v58  ;;  %v7320_v19 = vpack.c.bf16 %v309_v3, %v306_v2  ;;  %v308_v20 = vld [vmem:[#allocation5 + $0x168] sm:$0xff]  ;;  %v295_v22 = vld [vmem:[#allocation5 + $0x100] sm:$0xff] }
  0x57   :  { %5753 = vmatprep.subr.bf16.mxu1 %v8584_v0  ;;  %v298_v28 = vld [vmem:[#allocation5 + $0x118] sm:$0xff]  ;;  %v7324_v33 = vpack.c.bf16 %v308_v20, %v305_v17  ;;  %v301_v39 = vld [vmem:[#allocation5 + $0x130] sm:$0xff]  ;;  %v304_v45 = vld [vmem:[#allocation5 + $0x148] sm:$0xff] }
  0x58   :  { %v7327_v36 = vpack.c.bf16 %v298_v28, %v295_v22  ;;  %v7335_v46 = vld [vmem:[%s8579_s5] sm:$0xff]  ;;  %v7338_v48 = vpack.c.bf16 %v304_v45, %v301_v39  ;;  %v310_v58 = vld [vmem:[#allocation5 + $0x178] sm:$0xff]  ;;  %v503_v17 = vld [vmem:[#allocation7 + $0x68] sm:$0xff] }
  0x59   :  { %5734 = vmatpush1.bf16.msra.mxu0 %v7231_v8  ;;  %v307_v57 = vld [vmem:[#allocation5 + $0x160] sm:$0xff]  ;;  %v504_v22 = vld [vmem:[#allocation7 + $0x70] sm:$0xff]  ;;  %v505_v28 = vld [vmem:[#allocation7 + $0x78] sm:$0xff] }
  0x5a   :  { %5760 = vmatprep.subr.bf16.mxu0 %v7240_v14  ;;  %5755 = vmatpush3.bf16.msra.mxu1 %v7248_v26  ;;  %v7344_v60 = vpack.c.bf16 %v310_v58, %v307_v57  ;;  %v502_v3 = vld [vmem:[#allocation7 + $0x60] sm:$0xff]  ;;  %v7396_v39 = vpack.c.bf16 %v505_v28, %v504_v22  ;;  %v314_v58 = vshrl.u32 %v68_v61, 7 }
  0x5b   :  { %5756 = vmatprep.subr.bf16.mxu1 %v8584_v0  ;;  %v7392_v20 = vpack.c.bf16 %v503_v17, %v502_v3 }
  0x5c   :  { %4408 = vmatmul.mubr.msk.f32.vlgmr.msra.gmra.mrb[0].mxu0 %vm71_vm1, %v8582_v37  ;;  %v7411_v22 = vsub.s32 2, %v314_v58 }
  0x5d   :  { %5762 = vmatpush1.bf16.msra.mxu0 %v7245_v24  ;;  %392 = vmatprep.mubr.f32.mxu0 %v8586_v1 }
  0x5e   :  { %5764 = vmatprep.subr.bf16.mxu0 %v7251_v27  ;;  %5758 = vmatpush3.bf16.msra.mxu1 %v7261_v40 }
  0x5f   :  { %5791 = vmatprep.subr.bf16.mxu1 %v8584_v0 }
  0x61   :  { %5766 = vmatpush1.bf16.msra.mxu0 %v7258_v38  ;;  %4896 = vmatmul.mubr.msk.f32.vlgmr.msra.gmra.mrb[0].mxu1 %vm71_vm1, %v8582_v37 }
  0x62   :  { %5768 = vmatprep.subr.bf16.mxu0 %v7264_v42  ;;  %5793 = vmatpush3.bf16.msra.mxu1 %v7272_v55 }
  0x63   :  { %5794 = vmatprep.subr.bf16.mxu1 %v8584_v0  ;;  %4930 = vmatprep.mubr.msk.f32.mxu1 %vm7075_vm0, %v8586_v1 }
  0x65   :  { %5770 = vmatpush1.bf16.msra.mxu0 %v7269_v51 }
  0x66   :  { %5772 = vmatprep.subr.bf16.mxu0 %v7275_v56  ;;  %5796 = vmatpush3.bf16.msra.mxu1 %v7285_v7 }
  0x67   :  { %5797 = vmatprep.subr.bf16.mxu1 %v8584_v0 }
  0x69   :  { %5774 = vmatpush1.bf16.msra.mxu0 %v7282_v4 }
  0x6a   :  { %5776 = vmatprep.subr.bf16.mxu0 %v7288_v12  ;;  %5799 = vmatpush3.bf16.msra.mxu1 %v7297_v30 }
  0x6b   :  { %5800 = vmatprep.subr.bf16.mxu1 %v8584_v0 }
  0x6d   :  { %5778 = vmatpush1.bf16.msra.mxu0 %v7294_v25 }
  0x6e   :  { %5780 = vmatprep.subr.bf16.mxu0 %v7300_v31  ;;  %5802 = vmatpush3.bf16.msra.mxu1 %v7307_v49 }
  0x6f   :  { %5803 = vmatprep.subr.bf16.mxu1 %v8584_v0 }
  0x71   :  { %5782 = vmatpush1.bf16.msra.mxu0 %v7304_v47 }
  0x72   :  { %5784 = vmatprep.subr.bf16.mxu0 %v7310_v54  ;;  %5805 = vmatpush3.bf16.msra.mxu1 %v7317_v18 }
  0x73   :  { %5806 = vmatprep.subr.bf16.mxu1 %v8584_v0 }
  0x75   :  { %5786 = vmatpush1.bf16.msra.mxu0 %v7314_v6 }
  0x76   :  { %5788 = vmatprep.subr.bf16.mxu0 %v7320_v19  ;;  %5808 = vmatpush3.bf16.msra.mxu1 %v7327_v36 }
  0x77   :  { %5809 = vmatprep.subr.bf16.mxu1 %v8584_v0 }
  0x79   :  { %5790 = vmatpush1.bf16.msra.mxu0 %v7324_v33 }
  0x7a   :  { %5815 = vmatprep.subr.bf16.mxu0 %v8584_v0  ;;  %5811 = vmatpush3.bf16.msra.mxu1 %v7338_v48 }
  0x7b   :  { %5812 = vmatprep.subr.bf16.mxu1 %v8584_v0 }
  0x7c   :  { %393 = vmatmul.mubr.f32.vlgmr.msra.gmra.mrb[0].mxu0 %v7335_v46 }
  0x7d   :  { %4965 = vmatprep.mubr.msk.f32.mxu0 %vm7075_vm0, %v8586_v1 }
  0x7e   :  { %5814 = vmatpush3.bf16.msra.mxu1 %v7344_v60 }
  0x7f   :  { %5840 = vmatprep.subr.bf16.mxu1 %v7169_v5  ;;  %v490_v5 = vld [vmem:[#allocation7] sm:$0xff] }
  0x81   :  { %4931 = vmatmul.mubr.f32.vlgmr.msra.gmra.mrb[2].mxu1 %v7335_v46 }
  0x82   :  { %5842 = vmatpush1.bf16.msra.mxu1 %v7171_v9  ;;  %725 = vmatprep.mubr.f32.mxu1 %v8586_v1  ;;  %v491_v9 = vld [vmem:[#allocation7 + $0x8] sm:$0xff] }
  0x83   :  { %5844 = vmatprep.subr.bf16.mxu1 %v7173_v10  ;;  %v7369_v10 = vpack.c.bf16 %v491_v9, %v490_v5  ;;  %v7402_v5 = vsub.s32 0, %v314_v58  ;;  %v311_v9 = vld [vmem:[%s8576_s2] sm:$0x7] }
  0x84   :  { %v324_v28 = vrot.slane %v311_v9, %v7411_v22 }
  0x85   :  { %5817 = vmatpush3.bf16.msra.mxu0 %v7369_v10  ;;  %8613 = vst [vmem:[#allocation15_spill] sm:$0xff] %v7402_v5 }
  0x86   :  { %5846 = vmatpush1.bf16.msra.mxu1 %v7177_v15  ;;  %5818 = vmatprep.subr.bf16.mxu0 %v8584_v0  ;;  %v492_v15 = vld [vmem:[#allocation7 + $0x10] sm:$0xff] }
  0x87   :  { %5848 = vmatprep.subr.bf16.mxu1 %v7180_v16  ;;  %v493_v16 = vld [vmem:[#allocation7 + $0x18] sm:$0xff] }
  0x8a   :  { %5850 = vmatpush1.bf16.msra.mxu1 %v7183_v21  ;;  %v7373_v21 = vpack.c.bf16 %v493_v16, %v492_v15  ;;  %v7407_v15 = vsub.s32 1, %v314_v58  ;;  %v316_v16 = vrot.slane %v311_v9, %v7402_v5  ;;  %v8615_v58 = vmov 0.0  }
  0x8b   :  { %5852 = vmatprep.subr.bf16.mxu1 %v7186_v23  ;;  %v494_v23 = vld [vmem:[#allocation7 + $0x20] sm:$0xff] }
  0x8c   :  { %5820 = vmatpush3.bf16.msra.mxu0 %v7373_v21  ;;  %8614 = vst [vmem:[#allocation16_spill] sm:$0xff] %v7407_v15 }
  0x8d   :  { %5821 = vmatprep.subr.bf16.mxu0 %v8584_v0 }
  0x8e   :  { %5854 = vmatpush1.bf16.msra.mxu1 %v7191_v32  ;;  %v495_v32 = vld [vmem:[#allocation7 + $0x28] sm:$0xff] }
  0x8f   :  { %5856 = vmatprep.subr.bf16.mxu1 %v7197_v35  ;;  %v7377_v35 = vpack.c.bf16 %v495_v32, %v494_v23  ;;  %v320_v32 = vrot.slane %v311_v9, %v7407_v15  ;;  %v8616_v9 = vmov 0.0|0.0  }
  0x91   :  { %5823 = vmatpush3.bf16.msra.mxu0 %v7377_v35 }
  0x92   :  { %5858 = vmatpush1.bf16.msra.mxu1 %v7201_v41  ;;  %5824 = vmatprep.subr.bf16.mxu0 %v8584_v0  ;;  %v496_v41 = vld [vmem:[#allocation7 + $0x30] sm:$0xff] }
  0x93   :  { %5860 = vmatprep.subr.bf16.mxu1 %v7207_v44  ;;  %v497_v44 = vld [vmem:[#allocation7 + $0x38] sm:$0xff] }
  0x96   :  { %5862 = vmatpush1.bf16.msra.mxu1 %v7211_v50  ;;  %v7381_v50 = vpack.c.bf16 %v497_v44, %v496_v41 }
  0x97   :  { %5864 = vmatprep.subr.bf16.mxu1 %v7217_v53  ;;  %v498_v53 = vld [vmem:[#allocation7 + $0x40] sm:$0xff] }
  0x98   :  { %5826 = vmatpush3.bf16.msra.mxu0 %v7381_v50 }
  0x99   :  { %5827 = vmatprep.subr.bf16.mxu0 %v8584_v0 }
  0x9a   :  { %5866 = vmatpush1.bf16.msra.mxu1 %v7221_v59  ;;  %v499_v59 = vld [vmem:[#allocation7 + $0x48] sm:$0xff] }
  0x9b   :  { %5868 = vmatprep.subr.bf16.mxu1 %v7227_v63  ;;  %v7385_v63 = vpack.c.bf16 %v499_v59, %v498_v53 }
  0x9d   :  { %5829 = vmatpush3.bf16.msra.mxu0 %v7385_v63 }
  0x9e   :  { %5870 = vmatpush1.bf16.msra.mxu1 %v7231_v8  ;;  %v500_v8 = vld [vmem:[#allocation7 + $0x50] sm:$0xff]  ;;  %5830 = vmatprep.subr.bf16.mxu0 %v8584_v0 }
  0x9f   :  { %5896 = vmatprep.subr.bf16.mxu1 %v7240_v14  ;;  %v501_v14 = vld [vmem:[#allocation7 + $0x58] sm:$0xff] }
  0xa0   :  { %v7389_v2 = vpack.c.bf16 %v501_v14, %v500_v8 }
  0xa2   :  { %5832 = vmatpush3.bf16.msra.mxu0 %v7389_v2 }
  0xa3   :  { %5833 = vmatprep.subr.bf16.mxu0 %v8584_v0 }
  0xa6   :  { %5835 = vmatpush3.bf16.msra.mxu0 %v7392_v20 }
  0xa7   :  { %5836 = vmatprep.subr.bf16.mxu0 %v8584_v0 }
  0xaa   :  { %5838 = vmatpush3.bf16.msra.mxu0 %v7396_v39 }
  0xab   :  { %5871 = vmatprep.subr.bf16.mxu0 %v8584_v0 }
 0x134   :  { %v259_v45 = vpop.f32.mrb[0].mxu1 }
 0x135   :  { %v4897_v57 = vpop.f32.mrb[1].mxu1 }
 0x14f   :  { %v394_v23 = vpop.f32.mrb[0].mxu0 }
 0x150   :  { %v395_v41 = vadd.f32 %v394_v23, %v316_v16  ;;  %v396_v44 = vpop.f32.mrb[1].mxu0 }
 0x151   :  { %v397_v59 = vadd.f32 %v396_v44, %v320_v32 }
 0x152   :  { %v4410_v53 = vmul.f32 -1.442695, %v395_v41 }
 0x153   :  { %v4411_v8 = vmul.f32 -1.442695, %v397_v59 }
 0x154   :  { %6836 = vpow2.f32 %v4410_v53  ;;  %v465_v61 = vpop.f32.mrb[2].mxu1 }
 0x155   :  { %v4932_v14 = vpop.f32.mrb[3].mxu1  ;;  %6838 = vpow2.f32 %v4411_v8  ;;  %v466_v0 = vadd.f32 %v465_v61, %v324_v28 }
 0x15e   :  { %v6837_v3 = vpop.eup %6836 }
 0x15f   :  { %v473_v17 = vadd.f32 1.0, %v6837_v3  ;;  %v6839_v57 = vpop.eup %6838 }
 0x160   :  { %v480_v37 = vadd.f32 1.0, %v6839_v57  ;;  %v8618_v57 = vmov 1.0  }
 0x161   :  { %6840 = vrcp.f32 %v473_v17 }
 0x162   :  { %6842 = vrcp.f32 %v480_v37 }
 0x16b   :  { %v6841_v1 = vpop.eup %6840 }
 0x16c   :  { %v483_v16 = vmul.f32 %v6841_v1, %v466_v0  ;;  %v6843_v32 = vpop.eup %6842  ;;  %v7439_v0 = vld [vmem:[%s8578_s4] ss:$0 sm:$0xff] }
 0x16d   :  { %v486_v41 = vsub.f32 1.0, %v6843_v32  ;;  %v488_v59 = vmul.f32 %v6843_v32, %v7335_v46 }
 0x16e   :  { %v484_v23 = vadd.f32 %v483_v16, %v259_v45 }
 0x170   :  { %6844 = vtanh.f32 %v484_v23 }
 0x17a   :  { %v6845_v44 = vpop.eup %6844 }
 0x17b   :  { %v487_v53 = vmul.f32 %v6845_v44, %v486_v41 }
 0x17d   :  { %v7415_v8 = vadd.f32 %v488_v59, %v487_v53  ;;  %v1154_v53 = vld [vmem:[#allocation2 + $0x8] sm:$0xff]  ;;  %v1157_v59 = vld [vmem:[#allocation2 + $0x20] sm:$0xff] }
 0x17f   :  { %4966 = vmatmul.mubr.f32.vlgmr.msra.gmra.mrb[2].mxu0 %v7415_v8 }
 0x180   :  { %5873 = vmatpush3.bf16.msra.mxu0 %v7188_v29  ;;  %5000 = vmatprep.mubr.msk.f32.mxu0 %vm7075_vm0, %v8615_v58 }
 0x181   :  { %5874 = vmatprep.subr.bf16.mxu0 %v8616_v9 }
 0x184   :  { %5876 = vmatpush3.bf16.msra.mxu0 %v7194_v34 }
 0x185   :  { %5877 = vmatprep.subr.bf16.mxu0 %v8616_v9 }
 0x188   :  { %5879 = vmatpush3.bf16.msra.mxu0 %v7204_v43 }
 0x189   :  { %5880 = vmatprep.subr.bf16.mxu0 %v8616_v9 }
 0x18c   :  { %5882 = vmatpush3.bf16.msra.mxu0 %v7214_v52 }
 0x18d   :  { %5883 = vmatprep.subr.bf16.mxu0 %v8616_v9 }
 0x190   :  { %5885 = vmatpush3.bf16.msra.mxu0 %v7224_v62 }
 0x191   :  { %5886 = vmatprep.subr.bf16.mxu0 %v8616_v9 }
 0x194   :  { %5888 = vmatpush3.bf16.msra.mxu0 %v7237_v13 }
 0x195   :  { %5889 = vmatprep.subr.bf16.mxu0 %v8616_v9 }
 0x198   :  { %5891 = vmatpush3.bf16.msra.mxu0 %v7248_v26 }
 0x199   :  { %5892 = vmatprep.subr.bf16.mxu0 %v8616_v9 }
 0x19c   :  { %5894 = vmatpush3.bf16.msra.mxu0 %v7261_v40 }
 0x19d   :  { %5927 = vmatprep.subr.bf16.mxu0 %v8616_v9 }
 0x252   :  { %v579_v1 = vpop.f32.mrb[2].mxu0 }
 0x253   :  { %v580_v29 = vadd.f32 %v7439_v0, %v579_v1  ;;  %v4967_v34 = vpop.f32.mrb[3].mxu0  ;;  %v1156_v1 = vld [vmem:[#allocation2 + $0x18] sm:$0xff] }
 0x254   :  { %v1158_v34 = vld [vmem:[#allocation2 + $0x28] sm:$0xff] }
 0x255   :  { %583 = vmax.xlane.f32.xlu0 %v580_v29 }
 0x2e2   :  { %v584_v43 = vpop.xlane.xlu0 %583 }
 0x2e3   :  { %v7442_v52 = vsub.f32 %v580_v29, %v584_v43  ;;  %v1155_v29 = vld [vmem:[#allocation2 + $0x10] sm:$0xff] }
 0x2e5   :  { %8617 = vst [vmem:[#allocation17_spill] sm:$0xff] %v7442_v52  ;;  %vm594_vm2 = vcmp.eq.f32.partialorder %v7442_v52, 0.0  ;;  %v1389_v52 = vld [vmem:[#allocation5 + $0x178] sm:$0xff] }
 0x2e6   :  { %v595_v62 = vsel %vm594_vm2, %v7234_v11, 128 }
 0x2e7   :  { %v597_v13 = vshra.s32 %v595_v62, 16  ;;  %v596_v37 = vand.u32 65535, %v595_v62  ;;  %v7531_v62 = vpack.c.bf16 %v1158_v34, %v1155_v29  ;;  %v1189_v29 = vld [vmem:[#allocation2 + $0x120] sm:$0xff] }
 0x2e9   :  { %v599_v26 = vcvt.s32.f32 %v597_v13  ;;  %v598_v46 = vcvt.s32.f32 %v596_v37  ;;  %v1160_v13 = vld [vmem:[#allocation2 + $0x38] sm:$0xff]  ;;  %v1159_v37 = vld [vmem:[#allocation2 + $0x30] sm:$0xff] }
 0x2eb   :  { %600 = vmin.xlane.f32.xlu0 %v599_v26 }
 0x378   :  { %v601_v40 = vpop.xlane.xlu0 %600 }
 0x379   :  { %vm602_vm3 = vcmp.eq.f32.partialorder %v599_v26, %v601_v40  ;;  %v607_v61 = vcvt.f32.s32 %v601_v40  ;;  %v1163_v26 = vld [vmem:[#allocation2 + $0x50] sm:$0xff] }
 0x37a   :  { %v603_v45 = vsel %vm602_vm3, %v598_v46, inf  ;;  %v7534_v40 = vpack.c.bf16 %v1163_v26, %v1160_v13  ;;  %v1162_v46 = vld [vmem:[#allocation2 + $0x48] sm:$0xff]  ;;  %v1192_v13 = vld [vmem:[#allocation2 + $0x138] sm:$0xff]  ;;  %v1191_v26 = vld [vmem:[#allocation2 + $0x130] sm:$0xff] }
 0x37b   :  { %604 = vmin.xlane.f32.xlu1 %v603_v45  ;;  %v608_v3 = vshll.u32 %v607_v61, 16  ;;  %v1161_v45 = vld [vmem:[#allocation2 + $0x40] sm:$0xff]  ;;  %v1164_v61 = vld [vmem:[#allocation2 + $0x58] sm:$0xff] }
 0x408   :  { %v605_v14 = vpop.xlane.xlu1 %604 }
 0x409   :  { %v606_v17 = vcvt.f32.s32 %v605_v14  ;;  %v7538_v14 = vpack.c.bf16 %v1162_v46, %v1159_v37  ;;  %v1194_v37 = vld [vmem:[#allocation2 + $0x148] sm:$0xff]  ;;  %v7588_v46 = vpack.c.bf16 %v1192_v13, %v1189_v29  ;;  %v1348_v29 = vld [vmem:[#allocation5 + $0x30] sm:$0xff] }
 0x40b   :  { %v609_v28 = vadd.s32 %v608_v3, %v606_v17  ;;  %v7540_v3 = vpack.c.bf16 %v1164_v61, %v1161_v45  ;;  %v1166_v17 = vld [vmem:[#allocation2 + $0x68] sm:$0xff]  ;;  %v7590_v45 = vpack.c.bf16 %v1194_v37, %v1191_v26  ;;  %v1350_v37 = vld [vmem:[#allocation5 + $0x40] sm:$0xff] }
 0x40c   :  { %v1351_v26 = vld [vmem:[#allocation5 + $0x48] sm:$0xff] }
 0x40d   :  { %vm610_vm4 = vcmp.eq.s32.totalorder %v7234_v11, %v609_v28  ;;  %v1169_v28 = vld [vmem:[#allocation2 + $0x80] sm:$0xff] }
 0x40e   :  { %4414 = vmatmul.mubr.msk.f32.vlgmr.msra.gmra.mrb[4].mxu1 %vm610_vm4, %v8618_v57  ;;  %5001 = vmatmul.mubr.msk.f32.vlgmr.msra.gmra.mrb[4].mxu0 %vm610_vm4, %v8618_v57 }
 0x40f   :  { %5898 = vmatpush1.bf16.msra.mxu1 %v7245_v24  ;;  %5929 = vmatpush3.bf16.msra.mxu0 %v7272_v55 }
 0x410   :  { %5900 = vmatprep.subr.bf16.mxu1 %v7251_v27  ;;  %5930 = vmatprep.subr.bf16.mxu0 %v8616_v9 }
 0x411   :  { %931 = vmatprep.mubr.f32.mxu1 %v8615_v58  ;;  %5035 = vmatprep.mubr.msk.f32.mxu0 %vm7075_vm0, %v8615_v58 }
 0x413   :  { %5902 = vmatpush1.bf16.msra.mxu1 %v7258_v38  ;;  %5932 = vmatpush3.bf16.msra.mxu0 %v7285_v7  ;;  %v850_v38 = vld [vmem:[%s8576_s2] sm:$0x7] }
 0x414   :  { %5904 = vmatprep.subr.bf16.mxu1 %v7264_v42  ;;  %5933 = vmatprep.subr.bf16.mxu0 %v8616_v9  ;;  %v855_v42 = vrot.slane %v850_v38, %v7402_v5 }
 0x417   :  { %5906 = vmatpush1.bf16.msra.mxu1 %v7269_v51  ;;  %5935 = vmatpush3.bf16.msra.mxu0 %v7297_v30 }
 0x418   :  { %5908 = vmatprep.subr.bf16.mxu1 %v7275_v56  ;;  %5936 = vmatprep.subr.bf16.mxu0 %v8616_v9  ;;  %v859_v56 = vrot.slane %v850_v38, %v7407_v15 }
 0x41b   :  { %5910 = vmatpush1.bf16.msra.mxu1 %v7282_v4  ;;  %5938 = vmatpush3.bf16.msra.mxu0 %v7307_v49 }
 0x41c   :  { %5912 = vmatprep.subr.bf16.mxu1 %v7288_v12  ;;  %5939 = vmatprep.subr.bf16.mxu0 %v8616_v9 }
 0x41f   :  { %5914 = vmatpush1.bf16.msra.mxu1 %v7294_v25  ;;  %5941 = vmatpush3.bf16.msra.mxu0 %v7317_v18 }
 0x420   :  { %5916 = vmatprep.subr.bf16.mxu1 %v7300_v31  ;;  %5942 = vmatprep.subr.bf16.mxu0 %v8616_v9 }
 0x423   :  { %5918 = vmatpush1.bf16.msra.mxu1 %v7304_v47  ;;  %5944 = vmatpush3.bf16.msra.mxu0 %v7327_v36 }
 0x424   :  { %5920 = vmatprep.subr.bf16.mxu1 %v7310_v54  ;;  %5945 = vmatprep.subr.bf16.mxu0 %v8616_v9 }
 0x427   :  { %5922 = vmatpush1.bf16.msra.mxu1 %v7314_v6  ;;  %5947 = vmatpush3.bf16.msra.mxu0 %v7338_v48  ;;  %v863_v6 = vrot.slane %v850_v38, %v7411_v22  ;;  %v1168_v38 = vld [vmem:[#allocation2 + $0x78] sm:$0xff] }
 0x428   :  { %5924 = vmatprep.subr.bf16.mxu1 %v7320_v19  ;;  %5948 = vmatprep.subr.bf16.mxu0 %v8616_v9 }
 0x42b   :  { %5926 = vmatpush1.bf16.msra.mxu1 %v7324_v33  ;;  %5950 = vmatpush3.bf16.msra.mxu0 %v7344_v60 }
 0x42c   :  { %5951 = vmatprep.subr.bf16.mxu1 %v8616_v9 }
 0x42e   :  { %932 = vmatmul.mubr.f32.vlgmr.msra.gmra.mrb[4].mxu1 %v7415_v8  ;;  %5036 = vmatmul.mubr.f32.vlgmr.msra.gmra.mrb[6].mxu0 %v7415_v8 }
 0x42f   :  { %5953 = vmatpush3.bf16.msra.mxu1 %v7369_v10  ;;  %5070 = vmatprep.mubr.msk.f32.mxu1 %vm7075_vm0, %v8615_v58 }
 0x430   :  { %5954 = vmatprep.subr.bf16.mxu1 %v8616_v9  ;;  %1265 = vmatprep.mubr.f32.mxu0 %v8615_v58 }
 0x433   :  { %5956 = vmatpush3.bf16.msra.mxu1 %v7373_v21 }
 0x434   :  { %5957 = vmatprep.subr.bf16.mxu1 %v8616_v9 }
 0x437   :  { %5959 = vmatpush3.bf16.msra.mxu1 %v7377_v35 }
 0x438   :  { %5960 = vmatprep.subr.bf16.mxu1 %v8616_v9 }
 0x43b   :  { %5962 = vmatpush3.bf16.msra.mxu1 %v7381_v50 }
 0x43c   :  { %5963 = vmatprep.subr.bf16.mxu1 %v8616_v9 }
 0x43f   :  { %5965 = vmatpush3.bf16.msra.mxu1 %v7385_v63 }
 0x440   :  { %5966 = vmatprep.subr.bf16.mxu1 %v8616_v9 }
 0x443   :  { %5968 = vmatpush3.bf16.msra.mxu1 %v7389_v2 }
 0x444   :  { %5969 = vmatprep.subr.bf16.mxu1 %v8616_v9 }
 0x447   :  { %5971 = vmatpush3.bf16.msra.mxu1 %v7392_v20 }
 0x448   :  { %5972 = vmatprep.subr.bf16.mxu1 %v8616_v9 }
 0x44b   :  { %5974 = vmatpush3.bf16.msra.mxu1 %v7396_v39 }
 0x44c   :  { %6007 = vmatprep.subr.bf16.mxu1 %v8616_v9 }
 0x4e1   :  { %v798_v24 = vpop.f32.mrb[4].mxu0 }
 0x4e2   :  { %v5002_v27 = vpop.f32.mrb[5].mxu0 }
 0x4e3   :  { %v7544_v27 = vpack.c.bf16 %v1169_v28, %v1166_v17 }
 0x501   :  { %v933_v51 = vpop.f32.mrb[4].mxu1  ;;  %v1004_v55 = vpop.f32.mrb[6].mxu0 }
 0x502   :  { %v934_v4 = vadd.f32 %v933_v51, %v855_v42  ;;  %v935_v7 = vpop.f32.mrb[5].mxu1  ;;  %v5037_v12 = vpop.f32.mrb[7].mxu0  ;;  %v1005_v19 = vadd.f32 %v1004_v55, %v863_v6  ;;  %v1167_v42 = vld [vmem:[#allocation2 + $0x70] sm:$0xff]  ;;  %v1170_v51 = vld [vmem:[#allocation2 + $0x88] sm:$0xff]  ;;  %v1172_v55 = vld [vmem:[#allocation2 + $0x98] sm:$0xff] }
 0x503   :  { %v936_v30 = vadd.f32 %v935_v7, %v859_v56  ;;  %v1175_v56 = vld [vmem:[#allocation2 + $0xb0] sm:$0xff]  ;;  %v7550_v7 = vpack.c.bf16 %v1170_v51, %v1167_v42 }
 0x504   :  { %v4416_v25 = vmul.f32 -1.442695, %v934_v4  ;;  %v1171_v12 = vld [vmem:[#allocation2 + $0x90] sm:$0xff] }
 0x505   :  { %v4417_v31 = vmul.f32 -1.442695, %v936_v30  ;;  %v1174_v30 = vld [vmem:[#allocation2 + $0xa8] sm:$0xff]  ;;  %v1199_v42 = vld [vmem:[#allocation2 + $0x170] sm:$0xff] }
 0x506   :  { %6846 = vpow2.f32 %v4416_v25  ;;  %v7554_v25 = vpack.c.bf16 %v1175_v56, %v1172_v55  ;;  %v7558_v6 = vpack.c.bf16 %v1174_v30, %v1171_v12  ;;  %v1195_v55 = vld [vmem:[#allocation2 + $0x150] sm:$0xff]  ;;  %v1198_v56 = vld [vmem:[#allocation2 + $0x168] sm:$0xff]  ;;  %v1197_v12 = vld [vmem:[#allocation2 + $0x160] sm:$0xff] }
 0x507   :  { %6848 = vpow2.f32 %v4417_v31  ;;  %v1173_v31 = vld [vmem:[#allocation2 + $0xa0] sm:$0xff]  ;;  %v7601_v30 = vpack.c.bf16 %v1198_v56, %v1195_v55  ;;  %v1357_v56 = vld [vmem:[#allocation5 + $0x78] sm:$0xff] }
 0x510   :  { %v6847_v47 = vpop.eup %6846 }
 0x511   :  { %v1012_v49 = vadd.f32 1.0, %v6847_v47  ;;  %v6849_v54 = vpop.eup %6848  ;;  %v1176_v47 = vld [vmem:[#allocation2 + $0xb8] sm:$0xff] }
 0x512   :  { %v1019_v18 = vadd.f32 1.0, %v6849_v54  ;;  %v1181_v54 = vld [vmem:[#allocation2 + $0xe0] sm:$0xff] }
 0x513   :  { %6850 = vrcp.f32 %v1012_v49  ;;  %v1178_v49 = vld [vmem:[#allocation2 + $0xc8] sm:$0xff] }
 0x514   :  { %6852 = vrcp.f32 %v1019_v18  ;;  %v7560_v18 = vpack.c.bf16 %v1176_v47, %v1173_v31  ;;  %v1200_v31 = vld [vmem:[#allocation2 + $0x178] sm:$0xff] }
 0x515   :  { %v7604_v47 = vpack.c.bf16 %v1200_v31, %v1197_v12  ;;  %v1356_v12 = vld [vmem:[#allocation5 + $0x70] sm:$0xff]  ;;  %v1359_v31 = vld [vmem:[#allocation5 + $0x88] sm:$0xff] }
 0x51d   :  { %v6851_v33 = vpop.eup %6850 }
 0x51e   :  { %v1022_v36 = vmul.f32 %v6851_v33, %v1005_v19  ;;  %v6853_v60 = vpop.eup %6852  ;;  %v1177_v19 = vld [vmem:[#allocation2 + $0xc0] sm:$0xff]  ;;  %v7564_v33 = vpack.c.bf16 %v1181_v54, %v1178_v49 }
 0x51f   :  { %v1025_v10 = vsub.f32 1.0, %v6853_v60  ;;  %v1027_v50 = vmul.f32 %v6853_v60, %v7415_v8  ;;  %v1153_v8 = vld [vmem:[#allocation2] sm:$0xff]  ;;  %v1182_v60 = vld [vmem:[#allocation2 + $0xe8] sm:$0xff] }
 0x520   :  { %v1023_v48 = vadd.f32 %v1022_v36, %v798_v24  ;;  %v7529_v43 = vpack.c.bf16 %v1156_v1, %v1153_v8  ;;  %v1165_v24 = vld [vmem:[#allocation2 + $0x60] sm:$0xff]  ;;  %v1180_v36 = vld [vmem:[#allocation2 + $0xd8] sm:$0xff] }
 0x521   :  { %v7548_v4 = vpack.c.bf16 %v1168_v38, %v1165_v24  ;;  %v1196_v38 = vld [vmem:[#allocation2 + $0x158] sm:$0xff] }
 0x522   :  { %6854 = vtanh.f32 %v1023_v48  ;;  %v1179_v48 = vld [vmem:[#allocation2 + $0xd0] sm:$0xff]  ;;  %v7599_v51 = vpack.c.bf16 %v1199_v42, %v1196_v38  ;;  %v1354_v42 = vld [vmem:[#allocation5 + $0x60] sm:$0xff] }
 0x52c   :  { %v6855_v21 = vpop.eup %6854 }
 0x52d   :  { %v1026_v35 = vmul.f32 %v6855_v21, %v1025_v10  ;;  %v1184_v10 = vld [vmem:[#allocation2 + $0xf8] sm:$0xff]  ;;  %v1187_v21 = vld [vmem:[#allocation2 + $0x110] sm:$0xff] }
 0x52f   :  { %v7511_v63 = vadd.f32 %v1027_v50, %v1026_v35  ;;  %v7568_v35 = vpack.c.bf16 %v1180_v36, %v1177_v19  ;;  %v7570_v50 = vpack.c.bf16 %v1182_v60, %v1179_v48  ;;  %v1342_v19 = vld [vmem:[#allocation5] sm:$0xff]  ;;  %v1345_v48 = vld [vmem:[#allocation5 + $0x18] sm:$0xff]  ;;  %v1344_v60 = vld [vmem:[#allocation5 + $0x10] sm:$0xff] }
 0x531   :  { %5071 = vmatmul.mubr.f32.vlgmr.msra.gmra.mrb[6].mxu1 %v7511_v63 }
 0x532   :  { %5105 = vmatprep.mubr.msk.f32.mxu1 %vm7075_vm0, %v8615_v58  ;;  %6009 = vmatpush3.bf16.msra.mxu1 %v7531_v62 }
 0x533   :  { %6010 = vmatprep.subr.bf16.mxu1 %v8616_v9 }
 0x536   :  { %6012 = vmatpush3.bf16.msra.mxu1 %v7540_v3 }
 0x537   :  { %6013 = vmatprep.subr.bf16.mxu1 %v8616_v9 }
 0x53a   :  { %6015 = vmatpush3.bf16.msra.mxu1 %v7550_v7 }
 0x53b   :  { %6016 = vmatprep.subr.bf16.mxu1 %v8616_v9 }
 0x53e   :  { %6018 = vmatpush3.bf16.msra.mxu1 %v7560_v18 }
 0x53f   :  { %6019 = vmatprep.subr.bf16.mxu1 %v8616_v9 }
 0x542   :  { %6021 = vmatpush3.bf16.msra.mxu1 %v7570_v50 }
 0x543   :  { %6022 = vmatprep.subr.bf16.mxu1 %v8616_v9 }
 0x604   :  { %v1118_v2 = vpop.f32.mrb[6].mxu1 }
 0x605   :  { %v1119_v20 = vadd.f32 %v7439_v0, %v1118_v2  ;;  %v5072_v39 = vpop.f32.mrb[7].mxu1  ;;  %v7527_v0 = vpack.c.bf16 %v1157_v59, %v1154_v53  ;;  %v1183_v2 = vld [vmem:[#allocation2 + $0xf0] sm:$0xff]  ;;  %v1190_v53 = vld [vmem:[#allocation2 + $0x128] sm:$0xff]  ;;  %v1193_v59 = vld [vmem:[#allocation2 + $0x140] sm:$0xff] }
 0x606   :  { %v1186_v39 = vld [vmem:[#allocation2 + $0x108] sm:$0xff]  ;;  %v7584_v34 = vpack.c.bf16 %v1193_v59, %v1190_v53  ;;  %v7612_v53 = vpack.c.bf16 %v1345_v48, %v1342_v19  ;;  %v7638_v19 = vpack.c.bf16 %v1359_v31, %v1356_v12  ;;  %v1372_v31 = vld [vmem:[#allocation5 + $0xf0] sm:$0xff] }
 0x607   :  { %1122 = vmax.xlane.f32.xlu1 %v1119_v20  ;;  %5976 = vmatprep.subr.bf16.mxu0 %v7527_v0  ;;  %v7578_v8 = vpack.c.bf16 %v1186_v39, %v1183_v2  ;;  %v1349_v39 = vld [vmem:[#allocation5 + $0x38] sm:$0xff] }
 0x608   :  { %5978 = vmatpush1.bf16.msra.mxu0 %v7529_v43 }
 0x609   :  { %5980 = vmatprep.subr.bf16.mxu0 %v7534_v40 }
 0x60c   :  { %5982 = vmatpush1.bf16.msra.mxu0 %v7538_v14 }
 0x60d   :  { %5984 = vmatprep.subr.bf16.mxu0 %v7544_v27 }
 0x610   :  { %5986 = vmatpush1.bf16.msra.mxu0 %v7548_v4 }
 0x611   :  { %5988 = vmatprep.subr.bf16.mxu0 %v7554_v25 }
 0x614   :  { %5990 = vmatpush1.bf16.msra.mxu0 %v7558_v6 }
 0x615   :  { %5992 = vmatprep.subr.bf16.mxu0 %v7564_v33 }
 0x618   :  { %5994 = vmatpush1.bf16.msra.mxu0 %v7568_v35 }
 0x694   :  { %v1123_v16 = vpop.xlane.xlu1 %1122 }
 0x695   :  { %v7517_v23 = vsub.f32 %v1119_v20, %v1123_v16  ;;  %v7574_v20 = vpack.c.bf16 %v1187_v21, %v1184_v10  ;;  %v1185_v16 = vld [vmem:[#allocation2 + $0x100] sm:$0xff]  ;;  %v1347_v10 = vld [vmem:[#allocation5 + $0x28] sm:$0xff] }
 0x696   :  { %v7614_v59 = vpack.c.bf16 %v1347_v10, %v1344_v60  ;;  %v1363_v60 = vld [vmem:[#allocation5 + $0xa8] sm:$0xff]  ;;  %v1362_v10 = vld [vmem:[#allocation5 + $0xa0] sm:$0xff] }
 0x697   :  { %8619 = vst [vmem:[#allocation18_spill] sm:$0xff] %v7517_v23  ;;  %vm1134_vm5 = vcmp.eq.f32.partialorder %v7517_v23, 0.0  ;;  %5996 = vmatprep.subr.bf16.mxu0 %v7574_v20  ;;  %v1388_v23 = vld [vmem:[#allocation5 + $0x170] sm:$0xff] }
 0x698   :  { %v7521_v32 = vsel %vm1134_vm5, %v7234_v11, 128  ;;  %5998 = vmatpush1.bf16.msra.mxu0 %v7578_v8 }
 0x699   :  { %v1137_v41 = vshra.s32 %v7521_v32, 16  ;;  %6000 = vmatprep.subr.bf16.mxu0 %v7584_v34  ;;  %v1136_v61 = vand.u32 65535, %v7521_v32  ;;  %v1343_v32 = vld [vmem:[#allocation5 + $0x8] sm:$0xff] }
 0x69b   :  { %v7524_v44 = vcvt.s32.f32 %v1137_v41  ;;  %v1188_v41 = vld [vmem:[#allocation2 + $0x118] sm:$0xff]  ;;  %v1138_v28 = vcvt.s32.f32 %v1136_v61 }
 0x69c   :  { %v7580_v1 = vpack.c.bf16 %v1188_v41, %v1185_v16  ;;  %6002 = vmatpush1.bf16.msra.mxu0 %v7588_v46  ;;  %v1352_v16 = vld [vmem:[#allocation5 + $0x50] sm:$0xff]  ;;  %v1353_v61 = vld [vmem:[#allocation5 + $0x58] sm:$0xff] }
 0x69d   :  { %1140 = vmin.xlane.f32.xlu0 %v7524_v44  ;;  %6004 = vmatprep.subr.bf16.mxu0 %v7599_v51  ;;  %v7616_v13 = vpack.c.bf16 %v1352_v16, %v1349_v39  ;;  %v7625_v38 = vpack.c.bf16 %v1353_v61, %v1350_v37  ;;  %v1370_v39 = vld [vmem:[#allocation5 + $0xe0] sm:$0xff]  ;;  %v1369_v37 = vld [vmem:[#allocation5 + $0xd8] sm:$0xff]  ;;  %v1368_v61 = vld [vmem:[#allocation5 + $0xd0] sm:$0xff] }
 0x69e   :  { %6024 = vmatpush3.bf16.msra.mxu1 %v7580_v1 }
 0x69f   :  { %6025 = vmatprep.subr.bf16.mxu1 %v8616_v9 }
 0x6a0   :  { %6006 = vmatpush1.bf16.msra.mxu0 %v7601_v30 }
 0x6a2   :  { %6027 = vmatpush3.bf16.msra.mxu1 %v7590_v45 }
 0x6a3   :  { %6028 = vmatprep.subr.bf16.mxu1 %v8616_v9 }
 0x6a6   :  { %6030 = vmatpush3.bf16.msra.mxu1 %v7604_v47 }
 0x6a7   :  { %6063 = vmatprep.subr.bf16.mxu1 %v8616_v9 }
 0x72a   :  { %v1141_v17 = vpop.xlane.xlu0 %1140 }
 0x72b   :  { %vm1142_vm6 = vcmp.eq.f32.partialorder %v7524_v44, %v1141_v17  ;;  %v1346_v44 = vld [vmem:[#allocation5 + $0x20] sm:$0xff]  ;;  %v1147_v54 = vcvt.f32.s32 %v1141_v17  ;;  %v1355_v17 = vld [vmem:[#allocation5 + $0x68] sm:$0xff] }
 0x72c   :  { %v1143_v24 = vsel %vm1142_vm6, %v1138_v28, inf  ;;  %v7608_v49 = vpack.c.bf16 %v1346_v44, %v1343_v32  ;;  %v1358_v28 = vld [vmem:[#allocation5 + $0x80] sm:$0xff]  ;;  %v1361_v32 = vld [vmem:[#allocation5 + $0x98] sm:$0xff]  ;;  %v1364_v44 = vld [vmem:[#allocation5 + $0xb0] sm:$0xff] }
 0x72d   :  { %1144 = vmin.xlane.f32.xlu1 %v1143_v24  ;;  %v1148_v21 = vshll.u32 %v1147_v54, 16  ;;  %v7623_v24 = vpack.c.bf16 %v1351_v26, %v1348_v29  ;;  %v7629_v55 = vpack.c.bf16 %v1358_v28, %v1355_v17  ;;  %v7636_v54 = vpack.c.bf16 %v1357_v56, %v1354_v42  ;;  %v1366_v29 = vld [vmem:[#allocation5 + $0xc0] sm:$0xff]  ;;  %v1371_v17 = vld [vmem:[#allocation5 + $0xe8] sm:$0xff]  ;;  %v1373_v28 = vld [vmem:[#allocation5 + $0xf8] sm:$0xff] }
 0x72e   :  { %6032 = vmatprep.subr.bf16.mxu0 %v7608_v49  ;;  %v7642_v48 = vpack.c.bf16 %v1364_v44, %v1361_v32  ;;  %v1376_v42 = vld [vmem:[#allocation5 + $0x110] sm:$0xff]  ;;  %v7656_v56 = vpack.c.bf16 %v1369_v37, %v1366_v29  ;;  %v7658_v12 = vpack.c.bf16 %v1371_v17, %v1368_v61  ;;  %v1375_v44 = vld [vmem:[#allocation5 + $0x108] sm:$0xff]  ;;  %v1378_v29 = vld [vmem:[#allocation5 + $0x120] sm:$0xff] }
 0x72f   :  { %v7662_v32 = vpack.c.bf16 %v1376_v42, %v1373_v28  ;;  %v1381_v61 = vld [vmem:[#allocation5 + $0x138] sm:$0xff]  ;;  %v1380_v17 = vld [vmem:[#allocation5 + $0x130] sm:$0xff]  ;;  %v1383_v28 = vld [vmem:[#allocation5 + $0x148] sm:$0xff] }
 0x730   :  { %v1385_v42 = vld [vmem:[#allocation5 + $0x158] sm:$0xff] }
 0x7ba   :  { %v1145_v36 = vpop.xlane.xlu1 %1144 }
 0x7bb   :  { %v1146_v2 = vcvt.f32.s32 %v1145_v36  ;;  %v1360_v36 = vld [vmem:[#allocation5 + $0x90] sm:$0xff] }
 0x7bc   :  { %v7646_v16 = vpack.c.bf16 %v1363_v60, %v1360_v36  ;;  %v1374_v36 = vld [vmem:[#allocation5 + $0x100] sm:$0xff]  ;;  %v1377_v60 = vld [vmem:[#allocation5 + $0x118] sm:$0xff] }
 0x7bd   :  { %v1149_v41 = vadd.s32 %v1148_v21, %v1146_v2  ;;  %v1365_v21 = vld [vmem:[#allocation5 + $0xb8] sm:$0xff]  ;;  %v1367_v2 = vld [vmem:[#allocation5 + $0xc8] sm:$0xff] }
 0x7be   :  { %v7652_v26 = vpack.c.bf16 %v1370_v39, %v1367_v2  ;;  %v7666_v2 = vpack.c.bf16 %v1375_v44, %v1372_v31  ;;  %v7668_v39 = vpack.c.bf16 %v1377_v60, %v1374_v36  ;;  %v7676_v31 = vpack.c.bf16 %v1381_v61, %v1378_v29  ;;  %v1384_v36 = vld [vmem:[#allocation5 + $0x150] sm:$0xff]  ;;  %v1582_v61 = vld [vmem:[#allocation7 + $0x68] sm:$0xff] }
 0x7bf   :  { %vm1150_vm7 = vcmp.eq.s32.totalorder %v7234_v11, %v1149_v41  ;;  %v7648_v41 = vpack.c.bf16 %v1365_v21, %v1362_v10  ;;  %v1379_v10 = vld [vmem:[#allocation5 + $0x128] sm:$0xff]  ;;  %v1382_v21 = vld [vmem:[#allocation5 + $0x140] sm:$0xff]  ;;  %v7678_v44 = vpack.c.bf16 %v1383_v28, %v1380_v17  ;;  %v7682_v60 = vpack.c.bf16 %v1388_v23, %v1385_v42  ;;  %v1583_v28 = vld [vmem:[#allocation7 + $0x70] sm:$0xff] }
 0x7c0   :  { %4420 = vmatmul.mubr.msk.f32.vlgmr.msra.gmra.mrb[8].mxu0 %vm1150_vm7, %v8618_v57  ;;  %5106 = vmatmul.mubr.msk.f32.vlgmr.msra.gmra.mrb[8].mxu1 %vm1150_vm7, %v8618_v57  ;;  %8620 = vst [vmem:[#allocation19_spill] sm:$0xff] %v7666_v2  ;;  %v7672_v37 = vpack.c.bf16 %v1382_v21, %v1379_v10  ;;  %v1387_v10 = vld [vmem:[#allocation5 + $0x168] sm:$0xff]  ;;  %v1386_v21 = vld [vmem:[#allocation5 + $0x160] sm:$0xff]  ;;  %v1584_v42 = vld [vmem:[#allocation7 + $0x78] sm:$0xff] }
 0x7c1   :  { %6034 = vmatpush1.bf16.msra.mxu0 %v7612_v53  ;;  %6065 = vmatpush3.bf16.msra.mxu1 %v7614_v59  ;;  %v7688_v29 = vpack.c.bf16 %v1389_v52, %v1386_v21  ;;  %v1569_v52 = vld [vmem:[#allocation7] sm:$0xff]  ;;  %v1570_v23 = vld [vmem:[#allocation7 + $0x8] sm:$0xff] }
 0x7c2   :  { %6036 = vmatprep.subr.bf16.mxu0 %v7616_v13  ;;  %6066 = vmatprep.subr.bf16.mxu1 %v8616_v9 }
 0x7c3   :  { %1471 = vmatprep.mubr.f32.mxu0 %v8615_v58  ;;  %5140 = vmatprep.mubr.msk.f32.mxu1 %vm7075_vm0, %v8615_v58 }
 0x7c5   :  { %6038 = vmatpush1.bf16.msra.mxu0 %v7623_v24  ;;  %6068 = vmatpush3.bf16.msra.mxu1 %v7625_v38 }
 0x7c6   :  { %6040 = vmatprep.subr.bf16.mxu0 %v7629_v55  ;;  %6069 = vmatprep.subr.bf16.mxu1 %v8616_v9 }
 0x7c9   :  { %6042 = vmatpush1.bf16.msra.mxu0 %v7636_v54  ;;  %6071 = vmatpush3.bf16.msra.mxu1 %v7638_v19 }
 0x7ca   :  { %6044 = vmatprep.subr.bf16.mxu0 %v7642_v48  ;;  %6072 = vmatprep.subr.bf16.mxu1 %v8616_v9 }
 0x7cd   :  { %6046 = vmatpush1.bf16.msra.mxu0 %v7646_v16  ;;  %6074 = vmatpush3.bf16.msra.mxu1 %v7648_v41 }
 0x7ce   :  { %6048 = vmatprep.subr.bf16.mxu0 %v7652_v26  ;;  %6075 = vmatprep.subr.bf16.mxu1 %v8616_v9 }
 0x7d1   :  { %6050 = vmatpush1.bf16.msra.mxu0 %v7656_v56  ;;  %6077 = vmatpush3.bf16.msra.mxu1 %v7658_v12 }
 0x7d2   :  { %6052 = vmatprep.subr.bf16.mxu0 %v7662_v32  ;;  %6078 = vmatprep.subr.bf16.mxu1 %v8616_v9 }
 0x7d5   :  { %6054 = vmatpush1.bf16.msra.mxu0 %v7666_v2  ;;  %6080 = vmatpush3.bf16.msra.mxu1 %v7668_v39  ;;  %v7686_v2 = vpack.c.bf16 %v1387_v10, %v1384_v36  ;;  %v7744_v36 = vpack.c.bf16 %v1584_v42, %v1583_v28 }
 0x7d6   :  { %6056 = vmatprep.subr.bf16.mxu0 %v7672_v37  ;;  %6081 = vmatprep.subr.bf16.mxu1 %v8616_v9 }
 0x7d7   :  { %8621 = vst [vmem:[#allocation20_spill] sm:$0xff] %v7744_v36 }
 0x7d9   :  { %6058 = vmatpush1.bf16.msra.mxu0 %v7676_v31  ;;  %6083 = vmatpush3.bf16.msra.mxu1 %v7678_v44 }
 0x7da   :  { %6060 = vmatprep.subr.bf16.mxu0 %v7682_v60  ;;  %6084 = vmatprep.subr.bf16.mxu1 %v8616_v9 }
 0x7dd   :  { %6062 = vmatpush1.bf16.msra.mxu0 %v7686_v2  ;;  %6086 = vmatpush3.bf16.msra.mxu1 %v7688_v29 }
 0x7de   :  { %6087 = vmatprep.subr.bf16.mxu0 %v8616_v9  ;;  %6112 = vmatprep.subr.bf16.mxu1 %v7527_v0  ;;  %v7717_v0 = vpack.c.bf16 %v1570_v23, %v1569_v52  ;;  %v1390_v52 = vld [vmem:[%s8576_s2] sm:$0x7] }
 0x7df   :  { %v1395_v23 = vrot.slane %v1390_v52, %v7402_v5  ;;  %v1403_v28 = vrot.slane %v1390_v52, %v7411_v22 }
 0x7e0   :  { %1472 = vmatmul.mubr.f32.vlgmr.msra.gmra.mrb[8].mxu0 %v7511_v63  ;;  %5141 = vmatmul.mubr.f32.vlgmr.msra.gmra.mrb[10].mxu1 %v7511_v63 }
 0x7e1   :  { %5175 = vmatprep.mubr.msk.f32.mxu0 %vm7075_vm0, %v8615_v58  ;;  %6114 = vmatpush1.bf16.msra.mxu1 %v7529_v43  ;;  %v1571_v43 = vld [vmem:[#allocation7 + $0x10] sm:$0xff] }
 0x7e2   :  { %6116 = vmatprep.subr.bf16.mxu1 %v7534_v40  ;;  %1805 = vmatprep.mubr.f32.mxu1 %v8615_v58  ;;  %v1572_v40 = vld [vmem:[#allocation7 + $0x18] sm:$0xff] }
 0x7e3   :  { %6089 = vmatpush3.bf16.msra.mxu0 %v7717_v0 }
 0x7e4   :  { %6090 = vmatprep.subr.bf16.mxu0 %v8616_v9 }
 0x7e5   :  { %6118 = vmatpush1.bf16.msra.mxu1 %v7538_v14  ;;  %v7721_v14 = vpack.c.bf16 %v1572_v40, %v1571_v43 }
 0x7e6   :  { %6120 = vmatprep.subr.bf16.mxu1 %v7544_v27  ;;  %v1573_v27 = vld [vmem:[#allocation7 + $0x20] sm:$0xff] }
 0x7e7   :  { %6092 = vmatpush3.bf16.msra.mxu0 %v7721_v14 }
 0x7e8   :  { %6093 = vmatprep.subr.bf16.mxu0 %v8616_v9 }
 0x7e9   :  { %6122 = vmatpush1.bf16.msra.mxu1 %v7548_v4  ;;  %v1574_v4 = vld [vmem:[#allocation7 + $0x28] sm:$0xff] }
 0x7ea   :  { %6124 = vmatprep.subr.bf16.mxu1 %v7554_v25  ;;  %v7725_v25 = vpack.c.bf16 %v1574_v4, %v1573_v27  ;;  %v1399_v27 = vrot.slane %v1390_v52, %v7407_v15 }
 0x7ec   :  { %6095 = vmatpush3.bf16.msra.mxu0 %v7725_v25 }
 0x7ed   :  { %6126 = vmatpush1.bf16.msra.mxu1 %v7558_v6  ;;  %6096 = vmatprep.subr.bf16.mxu0 %v8616_v9  ;;  %v1575_v6 = vld [vmem:[#allocation7 + $0x30] sm:$0xff] }
 0x7ee   :  { %6128 = vmatprep.subr.bf16.mxu1 %v7564_v33  ;;  %v1576_v33 = vld [vmem:[#allocation7 + $0x38] sm:$0xff] }
 0x7f1   :  { %6130 = vmatpush1.bf16.msra.mxu1 %v7568_v35  ;;  %v7729_v35 = vpack.c.bf16 %v1576_v33, %v1575_v6 }
 0x7f2   :  { %6132 = vmatprep.subr.bf16.mxu1 %v7574_v20  ;;  %v1577_v20 = vld [vmem:[#allocation7 + $0x40] sm:$0xff] }
 0x7f3   :  { %6098 = vmatpush3.bf16.msra.mxu0 %v7729_v35 }
 0x7f4   :  { %6099 = vmatprep.subr.bf16.mxu0 %v8616_v9 }
 0x7f5   :  { %6134 = vmatpush1.bf16.msra.mxu1 %v7578_v8  ;;  %v1578_v8 = vld [vmem:[#allocation7 + $0x48] sm:$0xff] }
 0x7f6   :  { %6136 = vmatprep.subr.bf16.mxu1 %v7584_v34  ;;  %v7733_v34 = vpack.c.bf16 %v1578_v8, %v1577_v20 }
 0x7f8   :  { %6101 = vmatpush3.bf16.msra.mxu0 %v7733_v34 }
 0x7f9   :  { %6138 = vmatpush1.bf16.msra.mxu1 %v7588_v46  ;;  %v1579_v46 = vld [vmem:[#allocation7 + $0x50] sm:$0xff]  ;;  %6102 = vmatprep.subr.bf16.mxu0 %v8616_v9 }
 0x7fa   :  { %6140 = vmatprep.subr.bf16.mxu1 %v7599_v51  ;;  %v1580_v51 = vld [vmem:[#allocation7 + $0x58] sm:$0xff] }
 0x7fd   :  { %6142 = vmatpush1.bf16.msra.mxu1 %v7601_v30  ;;  %v7737_v30 = vpack.c.bf16 %v1580_v51, %v1579_v46 }
 0x7fe   :  { %6168 = vmatprep.subr.bf16.mxu1 %v7608_v49  ;;  %v1581_v49 = vld [vmem:[#allocation7 + $0x60] sm:$0xff] }
 0x7ff   :  { %6104 = vmatpush3.bf16.msra.mxu0 %v7737_v30  ;;  %v7740_v17 = vpack.c.bf16 %v1582_v61, %v1581_v49 }
 0x800   :  { %6105 = vmatprep.subr.bf16.mxu0 %v8616_v9 }
 0x803   :  { %6107 = vmatpush3.bf16.msra.mxu0 %v7740_v17 }
 0x804   :  { %6108 = vmatprep.subr.bf16.mxu0 %v8616_v9 }
 0x807   :  { %6110 = vmatpush3.bf16.msra.mxu0 %v7744_v36 }
 0x808   :  { %6143 = vmatprep.subr.bf16.mxu0 %v8616_v9 }
 0x893   :  { %v1338_v10 = vpop.f32.mrb[8].mxu1 }
 0x894   :  { %v5107_v21 = vpop.f32.mrb[9].mxu1 }
 0x8b3   :  { %v1473_v43 = vpop.f32.mrb[8].mxu0  ;;  %v1544_v40 = vpop.f32.mrb[10].mxu1 }
 0x8b4   :  { %v1474_v4 = vadd.f32 %v1473_v43, %v1395_v23  ;;  %v1475_v6 = vpop.f32.mrb[9].mxu0  ;;  %v5142_v33 = vpop.f32.mrb[11].mxu1  ;;  %v1545_v21 = vadd.f32 %v1544_v40, %v1403_v28 }
 0x8b5   :  { %v1476_v8 = vadd.f32 %v1475_v6, %v1399_v27 }
 0x8b6   :  { %v4422_v20 = vmul.f32 -1.442695, %v1474_v4 }
 0x8b7   :  { %v4423_v46 = vmul.f32 -1.442695, %v1476_v8 }
 0x8b8   :  { %6856 = vpow2.f32 %v4422_v20 }
 0x8b9   :  { %6858 = vpow2.f32 %v4423_v46 }
 0x8c2   :  { %v6857_v51 = vpop.eup %6856 }
 0x8c3   :  { %v1552_v49 = vadd.f32 1.0, %v6857_v51  ;;  %v6859_v61 = vpop.eup %6858 }
 0x8c4   :  { %v1559_v42 = vadd.f32 1.0, %v6859_v61 }
 0x8c5   :  { %6860 = vrcp.f32 %v1552_v49 }
 0x8c6   :  { %6862 = vrcp.f32 %v1559_v42 }
 0x8cf   :  { %v6861_v5 = vpop.eup %6860 }
 0x8d0   :  { %v1562_v36 = vmul.f32 %v6861_v5, %v1545_v21  ;;  %v6863_v23 = vpop.eup %6862  ;;  %v7780_v5 = vld [vmem:[%s8578_s4] ss:$0 sm:$0xff] }
 0x8d1   :  { %v1565_v43 = vsub.f32 1.0, %v6863_v23  ;;  %v1567_v6 = vmul.f32 %v6863_v23, %v7511_v63 }
 0x8d2   :  { %v1563_v15 = vadd.f32 %v1562_v36, %v1338_v10 }
 0x8d4   :  { %6864 = vtanh.f32 %v1563_v15 }
 0x8de   :  { %v6865_v4 = vpop.eup %6864 }
 0x8df   :  { %v1566_v27 = vmul.f32 %v6865_v4, %v1565_v43 }
 0x8e1   :  { %v7756_v33 = vadd.f32 %v1567_v6, %v1566_v27 }
 0x8e3   :  { %5176 = vmatmul.mubr.f32.vlgmr.msra.gmra.mrb[10].mxu0 %v7756_v33 }
 0x8e4   :  { %6145 = vmatpush3.bf16.msra.mxu0 %v7531_v62  ;;  %5210 = vmatprep.mubr.msk.f32.mxu0 %vm7075_vm0, %v8615_v58 }
 0x8e5   :  { %6146 = vmatprep.subr.bf16.mxu0 %v8616_v9 }
 0x8e8   :  { %6148 = vmatpush3.bf16.msra.mxu0 %v7540_v3 }
 0x8e9   :  { %6149 = vmatprep.subr.bf16.mxu0 %v8616_v9 }
 0x8ec   :  { %6151 = vmatpush3.bf16.msra.mxu0 %v7550_v7 }
 0x8ed   :  { %6152 = vmatprep.subr.bf16.mxu0 %v8616_v9 }
 0x8f0   :  { %6154 = vmatpush3.bf16.msra.mxu0 %v7560_v18 }
 0x8f1   :  { %6155 = vmatprep.subr.bf16.mxu0 %v8616_v9 }
 0x8f4   :  { %6157 = vmatpush3.bf16.msra.mxu0 %v7570_v50 }
 0x8f5   :  { %6158 = vmatprep.subr.bf16.mxu0 %v8616_v9 }
 0x8f8   :  { %6160 = vmatpush3.bf16.msra.mxu0 %v7580_v1 }
 0x8f9   :  { %6161 = vmatprep.subr.bf16.mxu0 %v8616_v9 }
 0x8fc   :  { %6163 = vmatpush3.bf16.msra.mxu0 %v7590_v45 }
 0x8fd   :  { %6164 = vmatprep.subr.bf16.mxu0 %v8616_v9 }
 0x900   :  { %6166 = vmatpush3.bf16.msra.mxu0 %v7604_v47 }
 0x901   :  { %6199 = vmatprep.subr.bf16.mxu0 %v8616_v9 }
 0x9b6   :  { %v1658_v15 = vpop.f32.mrb[10].mxu0 }
 0x9b7   :  { %v1659_v63 = vadd.f32 %v7780_v5, %v1658_v15  ;;  %v5177_v62 = vpop.f32.mrb[11].mxu0  ;;  %v2237_v15 = vld [vmem:[#allocation2 + $0x20] sm:$0xff] }
 0x9b8   :  { %v2236_v62 = vld [vmem:[#allocation2 + $0x18] sm:$0xff] }
 0x9b9   :  { %1662 = vmax.xlane.f32.xlu0 %v1659_v63 }
 0xa46   :  { %v1663_v3 = vpop.xlane.xlu0 %1662 }
 0xa47   :  { %v7783_v7 = vsub.f32 %v1659_v63, %v1663_v3  ;;  %v2233_v63 = vld [vmem:[#allocation2] sm:$0xff]  ;;  %v2235_v3 = vld [vmem:[#allocation2 + $0x10] sm:$0xff] }
 0xa49   :  { %8622 = vst [vmem:[#allocation21_spill] sm:$0xff] %v7783_v7  ;;  %vm1674_vm8 = vcmp.eq.f32.partialorder %v7783_v7, 0.0  ;;  %v2469_v7 = vld [vmem:[#allocation5 + $0x178] sm:$0xff] }
 0xa4a   :  { %v1675_v18 = vsel %vm1674_vm8, %v7234_v11, 128 }
 0xa4b   :  { %v1677_v50 = vshra.s32 %v1675_v18, 16  ;;  %v1676_v45 = vand.u32 65535, %v1675_v18  ;;  %v2238_v18 = vld [vmem:[#allocation2 + $0x28] sm:$0xff] }
 0xa4d   :  { %v1679_v1 = vcvt.s32.f32 %v1677_v50  ;;  %v1678_v36 = vcvt.s32.f32 %v1676_v45  ;;  %v7870_v50 = vpack.c.bf16 %v2236_v62, %v2233_v63  ;;  %v2240_v45 = vld [vmem:[#allocation2 + $0x38] sm:$0xff] }
 0xa4f   :  { %1680 = vmin.xlane.f32.xlu1 %v1679_v1 }
 0xadc   :  { %v1681_v47 = vpop.xlane.xlu1 %1680 }
 0xadd   :  { %vm1682_vm9 = vcmp.eq.f32.partialorder %v1679_v1, %v1681_v47  ;;  %v1687_v52 = vcvt.f32.s32 %v1681_v47  ;;  %v7872_v1 = vpack.c.bf16 %v2238_v18, %v2235_v3  ;;  %v2243_v47 = vld [vmem:[#allocation2 + $0x50] sm:$0xff]  ;;  %v2269_v3 = vld [vmem:[#allocation2 + $0x120] sm:$0xff] }
 0xade   :  { %v1683_v10 = vsel %vm1682_vm9, %v1678_v36, inf  ;;  %v2239_v36 = vld [vmem:[#allocation2 + $0x30] sm:$0xff] }
 0xadf   :  { %1684 = vmin.xlane.f32.xlu0 %v1683_v10  ;;  %v1688_v20 = vshll.u32 %v1687_v52, 16  ;;  %v7875_v10 = vpack.c.bf16 %v2243_v47, %v2240_v45  ;;  %v2242_v52 = vld [vmem:[#allocation2 + $0x48] sm:$0xff]  ;;  %v2272_v45 = vld [vmem:[#allocation2 + $0x138] sm:$0xff]  ;;  %v2271_v47 = vld [vmem:[#allocation2 + $0x130] sm:$0xff] }
 0xb6c   :  { %v1685_v40 = vpop.xlane.xlu0 %1684 }
 0xb6d   :  { %v1686_v8 = vcvt.f32.s32 %v1685_v40  ;;  %v2241_v40 = vld [vmem:[#allocation2 + $0x40] sm:$0xff] }
 0xb6f   :  { %v1689_v46 = vadd.s32 %v1688_v20, %v1686_v8  ;;  %v2244_v20 = vld [vmem:[#allocation2 + $0x58] sm:$0xff]  ;;  %v7879_v8 = vpack.c.bf16 %v2242_v52, %v2239_v36  ;;  %v2274_v36 = vld [vmem:[#allocation2 + $0x148] sm:$0xff]  ;;  %v7929_v52 = vpack.c.bf16 %v2272_v45, %v2269_v3  ;;  %v2428_v3 = vld [vmem:[#allocation5 + $0x30] sm:$0xff] }
 0xb71   :  { %vm1690_vm10 = vcmp.eq.s32.totalorder %v7234_v11, %v1689_v46  ;;  %v7881_v46 = vpack.c.bf16 %v2244_v20, %v2241_v40  ;;  %v7931_v40 = vpack.c.bf16 %v2274_v36, %v2271_v47  ;;  %v2431_v47 = vld [vmem:[#allocation5 + $0x48] sm:$0xff]  ;;  %v2430_v36 = vld [vmem:[#allocation5 + $0x40] sm:$0xff] }
 0xb72   :  { %4426 = vmatmul.mubr.msk.f32.vlgmr.msra.gmra.mrb[12].mxu1 %vm1690_vm10, %v8618_v57  ;;  %5211 = vmatmul.mubr.msk.f32.vlgmr.msra.gmra.mrb[12].mxu0 %vm1690_vm10, %v8618_v57 }
 0xb73   :  { %6170 = vmatpush1.bf16.msra.mxu1 %v7612_v53  ;;  %6201 = vmatpush3.bf16.msra.mxu0 %v7614_v59  ;;  %v8623_v53 = vld [vmem:[#allocation19_spill] sm:$0xff]  ;;  %v8624_v59 = vld [vmem:[#allocation20_spill] sm:$0xff] }
 0xb74   :  { %6172 = vmatprep.subr.bf16.mxu1 %v7616_v13  ;;  %6202 = vmatprep.subr.bf16.mxu0 %v8616_v9 }
 0xb75   :  { %2011 = vmatprep.mubr.f32.mxu1 %v8615_v58  ;;  %5245 = vmatprep.mubr.msk.f32.mxu0 %vm7075_vm0, %v8615_v58 }
 0xb77   :  { %6174 = vmatpush1.bf16.msra.mxu1 %v7623_v24  ;;  %6204 = vmatpush3.bf16.msra.mxu0 %v7625_v38  ;;  %v1930_v38 = vld [vmem:[%s8576_s2] sm:$0x7] }
 0xb78   :  { %6176 = vmatprep.subr.bf16.mxu1 %v7629_v55  ;;  %6205 = vmatprep.subr.bf16.mxu0 %v8616_v9  ;;  %v8625_v55 = vld [vmem:[#allocation15_spill] sm:$0xff] }
 0xb7b   :  { %6178 = vmatpush1.bf16.msra.mxu1 %v7636_v54  ;;  %6207 = vmatpush3.bf16.msra.mxu0 %v7638_v19  ;;  %v1935_v54 = vrot.slane %v1930_v38, %v8625_v55 }
 0xb7c   :  { %6180 = vmatprep.subr.bf16.mxu1 %v7642_v48  ;;  %6208 = vmatprep.subr.bf16.mxu0 %v8616_v9 }
 0xb7f   :  { %6182 = vmatpush1.bf16.msra.mxu1 %v7646_v16  ;;  %6210 = vmatpush3.bf16.msra.mxu0 %v7648_v41  ;;  %v8626_v16 = vld [vmem:[#allocation16_spill] sm:$0xff] }
 0xb80   :  { %6184 = vmatprep.subr.bf16.mxu1 %v7652_v26  ;;  %6211 = vmatprep.subr.bf16.mxu0 %v8616_v9  ;;  %v1939_v41 = vrot.slane %v1930_v38, %v8626_v16 }
 0xb83   :  { %6186 = vmatpush1.bf16.msra.mxu1 %v7656_v56  ;;  %6213 = vmatpush3.bf16.msra.mxu0 %v7658_v12 }
 0xb84   :  { %6188 = vmatprep.subr.bf16.mxu1 %v7662_v32  ;;  %6214 = vmatprep.subr.bf16.mxu0 %v8616_v9 }
 0xb87   :  { %6190 = vmatpush1.bf16.msra.mxu1 %v8623_v53  ;;  %6216 = vmatpush3.bf16.msra.mxu0 %v7668_v39  ;;  %v2246_v53 = vld [vmem:[#allocation2 + $0x68] sm:$0xff] }
 0xb88   :  { %6192 = vmatprep.subr.bf16.mxu1 %v7672_v37  ;;  %6217 = vmatprep.subr.bf16.mxu0 %v8616_v9 }
 0xb8b   :  { %6194 = vmatpush1.bf16.msra.mxu1 %v7676_v31  ;;  %6219 = vmatpush3.bf16.msra.mxu0 %v7678_v44 }
 0xb8c   :  { %6196 = vmatprep.subr.bf16.mxu1 %v7682_v60  ;;  %6220 = vmatprep.subr.bf16.mxu0 %v8616_v9  ;;  %v1943_v60 = vrot.slane %v1930_v38, %v7411_v22  ;;  %v2248_v38 = vld [vmem:[#allocation2 + $0x78] sm:$0xff] }
 0xb8f   :  { %6198 = vmatpush1.bf16.msra.mxu1 %v7686_v2  ;;  %6222 = vmatpush3.bf16.msra.mxu0 %v7688_v29 }
 0xb90   :  { %6223 = vmatprep.subr.bf16.mxu1 %v8616_v9 }
 0xb92   :  { %2012 = vmatmul.mubr.f32.vlgmr.msra.gmra.mrb[12].mxu1 %v7756_v33  ;;  %5246 = vmatmul.mubr.f32.vlgmr.msra.gmra.mrb[14].mxu0 %v7756_v33 }
 0xb93   :  { %6225 = vmatpush3.bf16.msra.mxu1 %v7717_v0  ;;  %5280 = vmatprep.mubr.msk.f32.mxu1 %vm7075_vm0, %v8615_v58 }
 0xb94   :  { %6226 = vmatprep.subr.bf16.mxu1 %v8616_v9  ;;  %2345 = vmatprep.mubr.f32.mxu0 %v8615_v58 }
 0xb97   :  { %6228 = vmatpush3.bf16.msra.mxu1 %v7721_v14 }
 0xb98   :  { %6229 = vmatprep.subr.bf16.mxu1 %v8616_v9 }
 0xb9b   :  { %6231 = vmatpush3.bf16.msra.mxu1 %v7725_v25 }
 0xb9c   :  { %6232 = vmatprep.subr.bf16.mxu1 %v8616_v9 }
 0xb9f   :  { %6234 = vmatpush3.bf16.msra.mxu1 %v7729_v35 }
 0xba0   :  { %6235 = vmatprep.subr.bf16.mxu1 %v8616_v9 }
 0xba3   :  { %6237 = vmatpush3.bf16.msra.mxu1 %v7733_v34 }
 0xba4   :  { %6238 = vmatprep.subr.bf16.mxu1 %v8616_v9 }
 0xba7   :  { %6240 = vmatpush3.bf16.msra.mxu1 %v7737_v30 }
 0xba8   :  { %6241 = vmatprep.subr.bf16.mxu1 %v8616_v9 }
 0xbab   :  { %6243 = vmatpush3.bf16.msra.mxu1 %v7740_v17 }
 0xbac   :  { %6244 = vmatprep.subr.bf16.mxu1 %v8616_v9 }
 0xbaf   :  { %6246 = vmatpush3.bf16.msra.mxu1 %v8624_v59  ;;  %v2249_v59 = vld [vmem:[#allocation2 + $0x80] sm:$0xff] }
 0xbb0   :  { %6279 = vmatprep.subr.bf16.mxu1 %v8616_v9 }
 0xc45   :  { %v1878_v13 = vpop.f32.mrb[12].mxu0 }
 0xc46   :  { %v5212_v24 = vpop.f32.mrb[13].mxu0 }
 0xc47   :  { %v7885_v24 = vpack.c.bf16 %v2249_v59, %v2246_v53 }
 0xc65   :  { %v2013_v19 = vpop.f32.mrb[12].mxu1  ;;  %v2084_v48 = vpop.f32.mrb[14].mxu0 }
 0xc66   :  { %v2014_v26 = vadd.f32 %v2013_v19, %v1935_v54  ;;  %v2015_v56 = vpop.f32.mrb[13].mxu1  ;;  %v5247_v12 = vpop.f32.mrb[15].mxu0  ;;  %v2085_v0 = vadd.f32 %v2084_v48, %v1943_v60  ;;  %v2247_v54 = vld [vmem:[#allocation2 + $0x70] sm:$0xff]  ;;  %v2250_v19 = vld [vmem:[#allocation2 + $0x88] sm:$0xff]  ;;  %v2252_v48 = vld [vmem:[#allocation2 + $0x98] sm:$0xff] }
 0xc67   :  { %v2016_v2 = vadd.f32 %v2015_v56, %v1939_v41  ;;  %v2255_v41 = vld [vmem:[#allocation2 + $0xb0] sm:$0xff]  ;;  %v7891_v56 = vpack.c.bf16 %v2250_v19, %v2247_v54 }
 0xc68   :  { %v4428_v32 = vmul.f32 -1.442695, %v2014_v26  ;;  %v2251_v12 = vld [vmem:[#allocation2 + $0x90] sm:$0xff] }
 0xc69   :  { %v4429_v39 = vmul.f32 -1.442695, %v2016_v2  ;;  %v2254_v2 = vld [vmem:[#allocation2 + $0xa8] sm:$0xff]  ;;  %v2279_v54 = vld [vmem:[#allocation2 + $0x170] sm:$0xff] }
 0xc6a   :  { %6866 = vpow2.f32 %v4428_v32  ;;  %v7895_v32 = vpack.c.bf16 %v2255_v41, %v2252_v48  ;;  %v7899_v60 = vpack.c.bf16 %v2254_v2, %v2251_v12  ;;  %v2275_v48 = vld [vmem:[#allocation2 + $0x150] sm:$0xff]  ;;  %v2278_v41 = vld [vmem:[#allocation2 + $0x168] sm:$0xff]  ;;  %v2277_v12 = vld [vmem:[#allocation2 + $0x160] sm:$0xff] }
 0xc6b   :  { %6868 = vpow2.f32 %v4429_v39  ;;  %v2253_v39 = vld [vmem:[#allocation2 + $0xa0] sm:$0xff]  ;;  %v7942_v2 = vpack.c.bf16 %v2278_v41, %v2275_v48  ;;  %v2437_v41 = vld [vmem:[#allocation5 + $0x78] sm:$0xff] }
 0xc74   :  { %v6867_v37 = vpop.eup %6866 }
 0xc75   :  { %v2092_v31 = vadd.f32 1.0, %v6867_v37  ;;  %v6869_v44 = vpop.eup %6868  ;;  %v2256_v37 = vld [vmem:[#allocation2 + $0xb8] sm:$0xff] }
 0xc76   :  { %v2099_v29 = vadd.f32 1.0, %v6869_v44  ;;  %v2261_v44 = vld [vmem:[#allocation2 + $0xe0] sm:$0xff] }
 0xc77   :  { %6870 = vrcp.f32 %v2092_v31  ;;  %v2258_v31 = vld [vmem:[#allocation2 + $0xc8] sm:$0xff] }
 0xc78   :  { %6872 = vrcp.f32 %v2099_v29  ;;  %v7901_v29 = vpack.c.bf16 %v2256_v37, %v2253_v39  ;;  %v2280_v39 = vld [vmem:[#allocation2 + $0x178] sm:$0xff] }
 0xc79   :  { %v7945_v37 = vpack.c.bf16 %v2280_v39, %v2277_v12  ;;  %v2436_v12 = vld [vmem:[#allocation5 + $0x70] sm:$0xff]  ;;  %v2439_v39 = vld [vmem:[#allocation5 + $0x88] sm:$0xff] }
 0xc81   :  { %v6871_v14 = vpop.eup %6870 }
 0xc82   :  { %v2102_v25 = vmul.f32 %v6871_v14, %v2085_v0  ;;  %v6873_v34 = vpop.eup %6872  ;;  %v2257_v0 = vld [vmem:[#allocation2 + $0xc0] sm:$0xff]  ;;  %v7905_v14 = vpack.c.bf16 %v2261_v44, %v2258_v31 }
 0xc83   :  { %v2105_v30 = vsub.f32 1.0, %v6873_v34  ;;  %v2107_v49 = vmul.f32 %v6873_v34, %v7756_v33  ;;  %v2234_v33 = vld [vmem:[#allocation2 + $0x8] sm:$0xff] }
 0xc84   :  { %v2103_v35 = vadd.f32 %v2102_v25, %v1878_v13  ;;  %v2245_v13 = vld [vmem:[#allocation2 + $0x60] sm:$0xff]  ;;  %v2260_v25 = vld [vmem:[#allocation2 + $0xd8] sm:$0xff]  ;;  %v2262_v34 = vld [vmem:[#allocation2 + $0xe8] sm:$0xff] }
 0xc85   :  { %v7889_v26 = vpack.c.bf16 %v2248_v38, %v2245_v13  ;;  %v2276_v38 = vld [vmem:[#allocation2 + $0x158] sm:$0xff] }
 0xc86   :  { %6874 = vtanh.f32 %v2103_v35  ;;  %v2259_v35 = vld [vmem:[#allocation2 + $0xd0] sm:$0xff]  ;;  %v7940_v19 = vpack.c.bf16 %v2279_v54, %v2276_v38  ;;  %v2434_v54 = vld [vmem:[#allocation5 + $0x60] sm:$0xff] }
 0xc90   :  { %v6875_v17 = vpop.eup %6874 }
 0xc91   :  { %v2106_v51 = vmul.f32 %v6875_v17, %v2105_v30  ;;  %v2264_v30 = vld [vmem:[#allocation2 + $0xf8] sm:$0xff]  ;;  %v2267_v17 = vld [vmem:[#allocation2 + $0x110] sm:$0xff] }
 0xc93   :  { %v7852_v61 = vadd.f32 %v2107_v49, %v2106_v51  ;;  %v7909_v51 = vpack.c.bf16 %v2260_v25, %v2257_v0  ;;  %v7911_v49 = vpack.c.bf16 %v2262_v34, %v2259_v35  ;;  %v2422_v0 = vld [vmem:[#allocation5] sm:$0xff]  ;;  %v2425_v35 = vld [vmem:[#allocation5 + $0x18] sm:$0xff]  ;;  %v2424_v34 = vld [vmem:[#allocation5 + $0x10] sm:$0xff] }
 0xc95   :  { %5281 = vmatmul.mubr.f32.vlgmr.msra.gmra.mrb[14].mxu1 %v7852_v61 }
 0xc96   :  { %5315 = vmatprep.mubr.msk.f32.mxu1 %vm7075_vm0, %v8615_v58  ;;  %6281 = vmatpush3.bf16.msra.mxu1 %v7872_v1 }
 0xc97   :  { %6282 = vmatprep.subr.bf16.mxu1 %v8616_v9 }
 0xc9a   :  { %6284 = vmatpush3.bf16.msra.mxu1 %v7881_v46 }
 0xc9b   :  { %6285 = vmatprep.subr.bf16.mxu1 %v8616_v9 }
 0xc9e   :  { %6287 = vmatpush3.bf16.msra.mxu1 %v7891_v56 }
 0xc9f   :  { %6288 = vmatprep.subr.bf16.mxu1 %v8616_v9 }
 0xca2   :  { %6290 = vmatpush3.bf16.msra.mxu1 %v7901_v29 }
 0xca3   :  { %6291 = vmatprep.subr.bf16.mxu1 %v8616_v9 }
 0xca6   :  { %6293 = vmatpush3.bf16.msra.mxu1 %v7911_v49 }
 0xca7   :  { %6294 = vmatprep.subr.bf16.mxu1 %v8616_v9 }
 0xd68   :  { %v2198_v28 = vpop.f32.mrb[14].mxu1 }
 0xd69   :  { %v2199_v42 = vadd.f32 %v7780_v5, %v2198_v28  ;;  %v5282_v21 = vpop.f32.mrb[15].mxu1  ;;  %v7868_v5 = vpack.c.bf16 %v2237_v15, %v2234_v33  ;;  %v2263_v28 = vld [vmem:[#allocation2 + $0xf0] sm:$0xff]  ;;  %v2270_v33 = vld [vmem:[#allocation2 + $0x128] sm:$0xff]  ;;  %v2273_v15 = vld [vmem:[#allocation2 + $0x140] sm:$0xff] }
 0xd6a   :  { %v2266_v21 = vld [vmem:[#allocation2 + $0x108] sm:$0xff]  ;;  %v7925_v18 = vpack.c.bf16 %v2273_v15, %v2270_v33  ;;  %v7953_v33 = vpack.c.bf16 %v2425_v35, %v2422_v0  ;;  %v7979_v0 = vpack.c.bf16 %v2439_v39, %v2436_v12  ;;  %v2452_v39 = vld [vmem:[#allocation5 + $0xf0] sm:$0xff] }
 0xd6b   :  { %2202 = vmax.xlane.f32.xlu1 %v2199_v42  ;;  %6248 = vmatprep.subr.bf16.mxu0 %v7868_v5  ;;  %v7919_v63 = vpack.c.bf16 %v2266_v21, %v2263_v28  ;;  %v2429_v21 = vld [vmem:[#allocation5 + $0x38] sm:$0xff] }
 0xd6c   :  { %6250 = vmatpush1.bf16.msra.mxu0 %v7870_v50 }
 0xd6d   :  { %6252 = vmatprep.subr.bf16.mxu0 %v7875_v10 }
 0xd70   :  { %6254 = vmatpush1.bf16.msra.mxu0 %v7879_v8 }
 0xd71   :  { %6256 = vmatprep.subr.bf16.mxu0 %v7885_v24 }
 0xd74   :  { %6258 = vmatpush1.bf16.msra.mxu0 %v7889_v26 }
 0xd75   :  { %6260 = vmatprep.subr.bf16.mxu0 %v7895_v32 }
 0xd78   :  { %6262 = vmatpush1.bf16.msra.mxu0 %v7899_v60 }
 0xd79   :  { %6264 = vmatprep.subr.bf16.mxu0 %v7905_v14 }
 0xd7c   :  { %6266 = vmatpush1.bf16.msra.mxu0 %v7909_v51 }
 0xdf8   :  { %v2203_v23 = vpop.xlane.xlu1 %2202 }
 0xdf9   :  { %v7858_v43 = vsub.f32 %v2199_v42, %v2203_v23  ;;  %v7915_v42 = vpack.c.bf16 %v2267_v17, %v2264_v30  ;;  %v2265_v23 = vld [vmem:[#allocation2 + $0x100] sm:$0xff]  ;;  %v2427_v30 = vld [vmem:[#allocation5 + $0x28] sm:$0xff] }
 0xdfa   :  { %v7955_v15 = vpack.c.bf16 %v2427_v30, %v2424_v34  ;;  %v2443_v34 = vld [vmem:[#allocation5 + $0xa8] sm:$0xff]  ;;  %v2442_v30 = vld [vmem:[#allocation5 + $0xa0] sm:$0xff] }
 0xdfb   :  { %8627 = vst [vmem:[#allocation19_spill] sm:$0xff] %v7858_v43  ;;  %vm2214_vm11 = vcmp.eq.f32.partialorder %v7858_v43, 0.0  ;;  %6268 = vmatprep.subr.bf16.mxu0 %v7915_v42  ;;  %v2468_v43 = vld [vmem:[#allocation5 + $0x170] sm:$0xff] }
 0xdfc   :  { %v7862_v4 = vsel %vm2214_vm11, %v7234_v11, 128  ;;  %6270 = vmatpush1.bf16.msra.mxu0 %v7919_v63 }
 0xdfd   :  { %v2217_v27 = vshra.s32 %v7862_v4, 16  ;;  %6272 = vmatprep.subr.bf16.mxu0 %v7925_v18  ;;  %v2216_v20 = vand.u32 65535, %v7862_v4  ;;  %v2423_v4 = vld [vmem:[#allocation5 + $0x8] sm:$0xff] }
 0xdff   :  { %v7865_v6 = vcvt.s32.f32 %v2217_v27  ;;  %v2268_v27 = vld [vmem:[#allocation2 + $0x118] sm:$0xff]  ;;  %v2218_v59 = vcvt.s32.f32 %v2216_v20 }
 0xe00   :  { %v7921_v62 = vpack.c.bf16 %v2268_v27, %v2265_v23  ;;  %6274 = vmatpush1.bf16.msra.mxu0 %v7929_v52  ;;  %v2432_v23 = vld [vmem:[#allocation5 + $0x50] sm:$0xff]  ;;  %v2433_v20 = vld [vmem:[#allocation5 + $0x58] sm:$0xff] }
 0xe01   :  { %2220 = vmin.xlane.f32.xlu0 %v7865_v6  ;;  %6276 = vmatprep.subr.bf16.mxu0 %v7940_v19  ;;  %v7957_v45 = vpack.c.bf16 %v2432_v23, %v2429_v21  ;;  %v7966_v38 = vpack.c.bf16 %v2433_v20, %v2430_v36  ;;  %v2450_v21 = vld [vmem:[#allocation5 + $0xe0] sm:$0xff]  ;;  %v2449_v36 = vld [vmem:[#allocation5 + $0xd8] sm:$0xff]  ;;  %v2448_v20 = vld [vmem:[#allocation5 + $0xd0] sm:$0xff] }
 0xe02   :  { %6296 = vmatpush3.bf16.msra.mxu1 %v7921_v62 }
 0xe03   :  { %6297 = vmatprep.subr.bf16.mxu1 %v8616_v9 }
 0xe04   :  { %6278 = vmatpush1.bf16.msra.mxu0 %v7942_v2 }
 0xe06   :  { %6299 = vmatpush3.bf16.msra.mxu1 %v7931_v40 }
 0xe07   :  { %6300 = vmatprep.subr.bf16.mxu1 %v8616_v9 }
 0xe0a   :  { %6302 = vmatpush3.bf16.msra.mxu1 %v7945_v37 }
 0xe0b   :  { %6335 = vmatprep.subr.bf16.mxu1 %v8616_v9 }
 0xe8e   :  { %v2221_v53 = vpop.xlane.xlu0 %2220 }
 0xe8f   :  { %vm2222_vm12 = vcmp.eq.f32.partialorder %v7865_v6, %v2221_v53  ;;  %v2426_v6 = vld [vmem:[#allocation5 + $0x20] sm:$0xff]  ;;  %v2227_v44 = vcvt.f32.s32 %v2221_v53  ;;  %v2435_v53 = vld [vmem:[#allocation5 + $0x68] sm:$0xff] }
 0xe90   :  { %v2223_v13 = vsel %vm2222_vm12, %v2218_v59, inf  ;;  %v7949_v31 = vpack.c.bf16 %v2426_v6, %v2423_v4  ;;  %v2438_v59 = vld [vmem:[#allocation5 + $0x80] sm:$0xff]  ;;  %v2441_v4 = vld [vmem:[#allocation5 + $0x98] sm:$0xff]  ;;  %v2444_v6 = vld [vmem:[#allocation5 + $0xb0] sm:$0xff] }
 0xe91   :  { %2224 = vmin.xlane.f32.xlu1 %v2223_v13  ;;  %v2228_v17 = vshll.u32 %v2227_v44, 16  ;;  %v7964_v13 = vpack.c.bf16 %v2431_v47, %v2428_v3  ;;  %v7970_v48 = vpack.c.bf16 %v2438_v59, %v2435_v53  ;;  %v7977_v44 = vpack.c.bf16 %v2437_v41, %v2434_v54  ;;  %v2446_v3 = vld [vmem:[#allocation5 + $0xc0] sm:$0xff]  ;;  %v2451_v53 = vld [vmem:[#allocation5 + $0xe8] sm:$0xff]  ;;  %v2453_v59 = vld [vmem:[#allocation5 + $0xf8] sm:$0xff] }
 0xe92   :  { %6304 = vmatprep.subr.bf16.mxu0 %v7949_v31  ;;  %v7983_v35 = vpack.c.bf16 %v2444_v6, %v2441_v4  ;;  %v2456_v54 = vld [vmem:[#allocation5 + $0x110] sm:$0xff]  ;;  %v7997_v41 = vpack.c.bf16 %v2449_v36, %v2446_v3  ;;  %v7999_v12 = vpack.c.bf16 %v2451_v53, %v2448_v20  ;;  %v2455_v6 = vld [vmem:[#allocation5 + $0x108] sm:$0xff]  ;;  %v2458_v3 = vld [vmem:[#allocation5 + $0x120] sm:$0xff] }
 0xe93   :  { %v8003_v4 = vpack.c.bf16 %v2456_v54, %v2453_v59  ;;  %v2461_v20 = vld [vmem:[#allocation5 + $0x138] sm:$0xff]  ;;  %v2460_v53 = vld [vmem:[#allocation5 + $0x130] sm:$0xff]  ;;  %v2463_v59 = vld [vmem:[#allocation5 + $0x148] sm:$0xff] }
 0xe94   :  { %v2465_v54 = vld [vmem:[#allocation5 + $0x158] sm:$0xff] }
 0xf1e   :  { %v2225_v25 = vpop.xlane.xlu1 %2224 }
 0xf1f   :  { %v2226_v28 = vcvt.f32.s32 %v2225_v25  ;;  %v2440_v25 = vld [vmem:[#allocation5 + $0x90] sm:$0xff] }
 0xf20   :  { %v7987_v23 = vpack.c.bf16 %v2443_v34, %v2440_v25  ;;  %v2454_v25 = vld [vmem:[#allocation5 + $0x100] sm:$0xff]  ;;  %v2457_v34 = vld [vmem:[#allocation5 + $0x118] sm:$0xff] }
 0xf21   :  { %v2229_v27 = vadd.s32 %v2228_v17, %v2226_v28  ;;  %v2445_v17 = vld [vmem:[#allocation5 + $0xb8] sm:$0xff]  ;;  %v2447_v28 = vld [vmem:[#allocation5 + $0xc8] sm:$0xff] }
 0xf22   :  { %v7993_v47 = vpack.c.bf16 %v2450_v21, %v2447_v28  ;;  %v8007_v28 = vpack.c.bf16 %v2455_v6, %v2452_v39  ;;  %v8009_v21 = vpack.c.bf16 %v2457_v34, %v2454_v25  ;;  %v8017_v39 = vpack.c.bf16 %v2461_v20, %v2458_v3  ;;  %v2464_v25 = vld [vmem:[#allocation5 + $0x150] sm:$0xff]  ;;  %v2662_v20 = vld [vmem:[#allocation7 + $0x68] sm:$0xff] }
 0xf23   :  { %vm2230_vm13 = vcmp.eq.s32.totalorder %v7234_v11, %v2229_v27  ;;  %v7989_v27 = vpack.c.bf16 %v2445_v17, %v2442_v30  ;;  %v2459_v30 = vld [vmem:[#allocation5 + $0x128] sm:$0xff]  ;;  %v2462_v17 = vld [vmem:[#allocation5 + $0x140] sm:$0xff]  ;;  %v8019_v6 = vpack.c.bf16 %v2463_v59, %v2460_v53  ;;  %v8023_v34 = vpack.c.bf16 %v2468_v43, %v2465_v54  ;;  %v2663_v59 = vld [vmem:[#allocation7 + $0x70] sm:$0xff] }
 0xf24   :  { %4432 = vmatmul.mubr.msk.f32.vlgmr.msra.gmra.mrb[16].mxu0 %vm2230_vm13, %v8618_v57  ;;  %5316 = vmatmul.mubr.msk.f32.vlgmr.msra.gmra.mrb[16].mxu1 %vm2230_vm13, %v8618_v57  ;;  %8628 = vst [vmem:[#allocation20_spill] sm:$0xff] %v8007_v28  ;;  %v8013_v36 = vpack.c.bf16 %v2462_v17, %v2459_v30  ;;  %v2467_v30 = vld [vmem:[#allocation5 + $0x168] sm:$0xff]  ;;  %v2466_v17 = vld [vmem:[#allocation5 + $0x160] sm:$0xff]  ;;  %v2664_v54 = vld [vmem:[#allocation7 + $0x78] sm:$0xff] }
 0xf25   :  { %6306 = vmatpush1.bf16.msra.mxu0 %v7953_v33  ;;  %6337 = vmatpush3.bf16.msra.mxu1 %v7955_v15  ;;  %v8029_v3 = vpack.c.bf16 %v2469_v7, %v2466_v17  ;;  %v2649_v7 = vld [vmem:[#allocation7] sm:$0xff]  ;;  %v2650_v43 = vld [vmem:[#allocation7 + $0x8] sm:$0xff] }
 0xf26   :  { %6308 = vmatprep.subr.bf16.mxu0 %v7957_v45  ;;  %6338 = vmatprep.subr.bf16.mxu1 %v8616_v9 }
 0xf27   :  { %2551 = vmatprep.mubr.f32.mxu0 %v8615_v58  ;;  %5350 = vmatprep.mubr.msk.f32.mxu1 %vm7075_vm0, %v8615_v58 }
 0xf29   :  { %6310 = vmatpush1.bf16.msra.mxu0 %v7964_v13  ;;  %6340 = vmatpush3.bf16.msra.mxu1 %v7966_v38 }
 0xf2a   :  { %6312 = vmatprep.subr.bf16.mxu0 %v7970_v48  ;;  %6341 = vmatprep.subr.bf16.mxu1 %v8616_v9 }
 0xf2d   :  { %6314 = vmatpush1.bf16.msra.mxu0 %v7977_v44  ;;  %6343 = vmatpush3.bf16.msra.mxu1 %v7979_v0 }
 0xf2e   :  { %6316 = vmatprep.subr.bf16.mxu0 %v7983_v35  ;;  %6344 = vmatprep.subr.bf16.mxu1 %v8616_v9 }
 0xf31   :  { %6318 = vmatpush1.bf16.msra.mxu0 %v7987_v23  ;;  %6346 = vmatpush3.bf16.msra.mxu1 %v7989_v27 }
 0xf32   :  { %6320 = vmatprep.subr.bf16.mxu0 %v7993_v47  ;;  %6347 = vmatprep.subr.bf16.mxu1 %v8616_v9 }
 0xf35   :  { %6322 = vmatpush1.bf16.msra.mxu0 %v7997_v41  ;;  %6349 = vmatpush3.bf16.msra.mxu1 %v7999_v12 }
 0xf36   :  { %6324 = vmatprep.subr.bf16.mxu0 %v8003_v4  ;;  %6350 = vmatprep.subr.bf16.mxu1 %v8616_v9 }
 0xf39   :  { %6326 = vmatpush1.bf16.msra.mxu0 %v8007_v28  ;;  %6352 = vmatpush3.bf16.msra.mxu1 %v8009_v21  ;;  %v8027_v28 = vpack.c.bf16 %v2467_v30, %v2464_v25  ;;  %v8085_v25 = vpack.c.bf16 %v2664_v54, %v2663_v59 }
 0xf3a   :  { %6328 = vmatprep.subr.bf16.mxu0 %v8013_v36  ;;  %6353 = vmatprep.subr.bf16.mxu1 %v8616_v9 }
 0xf3b   :  { %8629 = vst [vmem:[#allocation22_spill] sm:$0xff] %v8085_v25 }
 0xf3d   :  { %6330 = vmatpush1.bf16.msra.mxu0 %v8017_v39  ;;  %6355 = vmatpush3.bf16.msra.mxu1 %v8019_v6 }
 0xf3e   :  { %6332 = vmatprep.subr.bf16.mxu0 %v8023_v34  ;;  %6356 = vmatprep.subr.bf16.mxu1 %v8616_v9 }
 0xf41   :  { %6334 = vmatpush1.bf16.msra.mxu0 %v8027_v28  ;;  %6358 = vmatpush3.bf16.msra.mxu1 %v8029_v3 }
 0xf42   :  { %6359 = vmatprep.subr.bf16.mxu0 %v8616_v9  ;;  %6384 = vmatprep.subr.bf16.mxu1 %v7868_v5  ;;  %v8058_v5 = vpack.c.bf16 %v2650_v43, %v2649_v7  ;;  %v2470_v7 = vld [vmem:[%s8576_s2] sm:$0x7] }
 0xf43   :  { %v2475_v43 = vrot.slane %v2470_v7, %v8625_v55  ;;  %v2483_v59 = vrot.slane %v2470_v7, %v7411_v22 }
 0xf44   :  { %2552 = vmatmul.mubr.f32.vlgmr.msra.gmra.mrb[16].mxu0 %v7852_v61  ;;  %5351 = vmatmul.mubr.f32.vlgmr.msra.gmra.mrb[18].mxu1 %v7852_v61 }
 0xf45   :  { %5385 = vmatprep.mubr.msk.f32.mxu0 %vm7075_vm0, %v8615_v58  ;;  %6386 = vmatpush1.bf16.msra.mxu1 %v7870_v50  ;;  %v2651_v50 = vld [vmem:[#allocation7 + $0x10] sm:$0xff] }
 0xf46   :  { %6388 = vmatprep.subr.bf16.mxu1 %v7875_v10  ;;  %2885 = vmatprep.mubr.f32.mxu1 %v8615_v58  ;;  %v2652_v10 = vld [vmem:[#allocation7 + $0x18] sm:$0xff] }
 0xf47   :  { %6361 = vmatpush3.bf16.msra.mxu0 %v8058_v5 }
 0xf48   :  { %6362 = vmatprep.subr.bf16.mxu0 %v8616_v9 }
 0xf49   :  { %6390 = vmatpush1.bf16.msra.mxu1 %v7879_v8  ;;  %v8062_v8 = vpack.c.bf16 %v2652_v10, %v2651_v50 }
 0xf4a   :  { %6392 = vmatprep.subr.bf16.mxu1 %v7885_v24  ;;  %v2653_v24 = vld [vmem:[#allocation7 + $0x20] sm:$0xff] }
 0xf4b   :  { %6364 = vmatpush3.bf16.msra.mxu0 %v8062_v8 }
 0xf4c   :  { %6365 = vmatprep.subr.bf16.mxu0 %v8616_v9 }
 0xf4d   :  { %6394 = vmatpush1.bf16.msra.mxu1 %v7889_v26  ;;  %v2654_v26 = vld [vmem:[#allocation7 + $0x28] sm:$0xff] }
 0xf4e   :  { %6396 = vmatprep.subr.bf16.mxu1 %v7895_v32  ;;  %v8066_v32 = vpack.c.bf16 %v2654_v26, %v2653_v24  ;;  %v2479_v24 = vrot.slane %v2470_v7, %v8626_v16 }
 0xf50   :  { %6367 = vmatpush3.bf16.msra.mxu0 %v8066_v32 }
 0xf51   :  { %6398 = vmatpush1.bf16.msra.mxu1 %v7899_v60  ;;  %6368 = vmatprep.subr.bf16.mxu0 %v8616_v9  ;;  %v2655_v60 = vld [vmem:[#allocation7 + $0x30] sm:$0xff] }
 0xf52   :  { %6400 = vmatprep.subr.bf16.mxu1 %v7905_v14  ;;  %v2656_v14 = vld [vmem:[#allocation7 + $0x38] sm:$0xff] }
 0xf55   :  { %6402 = vmatpush1.bf16.msra.mxu1 %v7909_v51  ;;  %v8070_v51 = vpack.c.bf16 %v2656_v14, %v2655_v60 }
 0xf56   :  { %6404 = vmatprep.subr.bf16.mxu1 %v7915_v42  ;;  %v2657_v42 = vld [vmem:[#allocation7 + $0x40] sm:$0xff] }
 0xf57   :  { %6370 = vmatpush3.bf16.msra.mxu0 %v8070_v51 }
 0xf58   :  { %6371 = vmatprep.subr.bf16.mxu0 %v8616_v9 }
 0xf59   :  { %6406 = vmatpush1.bf16.msra.mxu1 %v7919_v63  ;;  %v2658_v63 = vld [vmem:[#allocation7 + $0x48] sm:$0xff] }
 0xf5a   :  { %6408 = vmatprep.subr.bf16.mxu1 %v7925_v18  ;;  %v8074_v18 = vpack.c.bf16 %v2658_v63, %v2657_v42 }
 0xf5c   :  { %6373 = vmatpush3.bf16.msra.mxu0 %v8074_v18 }
 0xf5d   :  { %6410 = vmatpush1.bf16.msra.mxu1 %v7929_v52  ;;  %v2659_v52 = vld [vmem:[#allocation7 + $0x50] sm:$0xff]  ;;  %6374 = vmatprep.subr.bf16.mxu0 %v8616_v9 }
 0xf5e   :  { %6412 = vmatprep.subr.bf16.mxu1 %v7940_v19  ;;  %v2660_v19 = vld [vmem:[#allocation7 + $0x58] sm:$0xff] }
 0xf61   :  { %6414 = vmatpush1.bf16.msra.mxu1 %v7942_v2  ;;  %v8078_v2 = vpack.c.bf16 %v2660_v19, %v2659_v52 }
 0xf62   :  { %6440 = vmatprep.subr.bf16.mxu1 %v7949_v31  ;;  %v2661_v31 = vld [vmem:[#allocation7 + $0x60] sm:$0xff] }
 0xf63   :  { %6376 = vmatpush3.bf16.msra.mxu0 %v8078_v2  ;;  %v8081_v53 = vpack.c.bf16 %v2662_v20, %v2661_v31 }
 0xf64   :  { %6377 = vmatprep.subr.bf16.mxu0 %v8616_v9 }
 0xf67   :  { %6379 = vmatpush3.bf16.msra.mxu0 %v8081_v53 }
 0xf68   :  { %6380 = vmatprep.subr.bf16.mxu0 %v8616_v9 }
 0xf6b   :  { %6382 = vmatpush3.bf16.msra.mxu0 %v8085_v25 }
 0xf6c   :  { %6415 = vmatprep.subr.bf16.mxu0 %v8616_v9 }
 0xff7   :  { %v2418_v30 = vpop.f32.mrb[16].mxu1 }
 0xff8   :  { %v5317_v17 = vpop.f32.mrb[17].mxu1 }
0x1017   :  { %v2553_v50 = vpop.f32.mrb[16].mxu0  ;;  %v2624_v10 = vpop.f32.mrb[18].mxu1 }
0x1018   :  { %v2554_v26 = vadd.f32 %v2553_v50, %v2475_v43  ;;  %v2555_v60 = vpop.f32.mrb[17].mxu0  ;;  %v5352_v14 = vpop.f32.mrb[19].mxu1  ;;  %v2625_v17 = vadd.f32 %v2624_v10, %v2483_v59 }
0x1019   :  { %v2556_v63 = vadd.f32 %v2555_v60, %v2479_v24 }
0x101a   :  { %v4434_v42 = vmul.f32 -1.442695, %v2554_v26 }
0x101b   :  { %v4435_v52 = vmul.f32 -1.442695, %v2556_v63 }
0x101c   :  { %6876 = vpow2.f32 %v4434_v42 }
0x101d   :  { %6878 = vpow2.f32 %v4435_v52 }
0x1026   :  { %v6877_v19 = vpop.eup %6876 }
0x1027   :  { %v2632_v31 = vadd.f32 1.0, %v6877_v19  ;;  %v6879_v20 = vpop.eup %6878 }
0x1028   :  { %v2639_v54 = vadd.f32 1.0, %v6879_v20 }
0x1029   :  { %6880 = vrcp.f32 %v2632_v31 }
0x102a   :  { %6882 = vrcp.f32 %v2639_v54 }
0x1033   :  { %v6881_v55 = vpop.eup %6880 }
0x1034   :  { %v2642_v25 = vmul.f32 %v6881_v55, %v2625_v17  ;;  %v6883_v43 = vpop.eup %6882  ;;  %v8121_v55 = vld [vmem:[%s8578_s4] ss:$0 sm:$0xff] }
0x1035   :  { %v2645_v50 = vsub.f32 1.0, %v6883_v43  ;;  %v2647_v60 = vmul.f32 %v6883_v43, %v7852_v61 }
0x1036   :  { %v2643_v16 = vadd.f32 %v2642_v25, %v2418_v30 }
0x1038   :  { %6884 = vtanh.f32 %v2643_v16 }
0x1042   :  { %v6885_v26 = vpop.eup %6884 }
0x1043   :  { %v2646_v24 = vmul.f32 %v6885_v26, %v2645_v50 }
0x1045   :  { %v8097_v14 = vadd.f32 %v2647_v60, %v2646_v24 }
0x1047   :  { %5386 = vmatmul.mubr.f32.vlgmr.msra.gmra.mrb[18].mxu0 %v8097_v14 }
0x1048   :  { %6417 = vmatpush3.bf16.msra.mxu0 %v7872_v1  ;;  %5420 = vmatprep.mubr.msk.f32.mxu0 %vm7075_vm0, %v8615_v58 }
0x1049   :  { %6418 = vmatprep.subr.bf16.mxu0 %v8616_v9 }
0x104c   :  { %6420 = vmatpush3.bf16.msra.mxu0 %v7881_v46 }
0x104d   :  { %6421 = vmatprep.subr.bf16.mxu0 %v8616_v9 }
0x1050   :  { %6423 = vmatpush3.bf16.msra.mxu0 %v7891_v56 }
0x1051   :  { %6424 = vmatprep.subr.bf16.mxu0 %v8616_v9 }
0x1054   :  { %6426 = vmatpush3.bf16.msra.mxu0 %v7901_v29 }
0x1055   :  { %6427 = vmatprep.subr.bf16.mxu0 %v8616_v9 }
0x1058   :  { %6429 = vmatpush3.bf16.msra.mxu0 %v7911_v49 }
0x1059   :  { %6430 = vmatprep.subr.bf16.mxu0 %v8616_v9 }
0x105c   :  { %6432 = vmatpush3.bf16.msra.mxu0 %v7921_v62 }
0x105d   :  { %6433 = vmatprep.subr.bf16.mxu0 %v8616_v9 }
0x1060   :  { %6435 = vmatpush3.bf16.msra.mxu0 %v7931_v40 }
0x1061   :  { %6436 = vmatprep.subr.bf16.mxu0 %v8616_v9 }
0x1064   :  { %6438 = vmatpush3.bf16.msra.mxu0 %v7945_v37 }
0x1065   :  { %6471 = vmatprep.subr.bf16.mxu0 %v8616_v9 }
0x111a   :  { %v2738_v16 = vpop.f32.mrb[18].mxu0 }
0x111b   :  { %v2739_v61 = vadd.f32 %v8121_v55, %v2738_v16  ;;  %v5387_v1 = vpop.f32.mrb[19].mxu0  ;;  %v3317_v16 = vld [vmem:[#allocation2 + $0x20] sm:$0xff] }
0x111c   :  { %v3316_v1 = vld [vmem:[#allocation2 + $0x18] sm:$0xff] }
0x111d   :  { %2742 = vmax.xlane.f32.xlu0 %v2739_v61 }
0x11aa   :  { %v2743_v46 = vpop.xlane.xlu0 %2742 }
0x11ab   :  { %v8124_v56 = vsub.f32 %v2739_v61, %v2743_v46  ;;  %v3313_v61 = vld [vmem:[#allocation2] sm:$0xff]  ;;  %v3315_v46 = vld [vmem:[#allocation2 + $0x10] sm:$0xff] }
0x11ad   :  { %vm2754_vm14 = vcmp.eq.f32.partialorder %v8124_v56, 0.0 }
0x11ae   :  { %v2755_v29 = vsel %vm2754_vm14, %v7234_v11, 128 }
0x11af   :  { %v2757_v49 = vshra.s32 %v2755_v29, 16  ;;  %v2756_v40 = vand.u32 65535, %v2755_v29  ;;  %v3318_v29 = vld [vmem:[#allocation2 + $0x28] sm:$0xff] }
0x11b1   :  { %v2759_v62 = vcvt.s32.f32 %v2757_v49  ;;  %v2758_v25 = vcvt.s32.f32 %v2756_v40  ;;  %v8211_v49 = vpack.c.bf16 %v3316_v1, %v3313_v61  ;;  %v3320_v40 = vld [vmem:[#allocation2 + $0x38] sm:$0xff] }
0x11b3   :  { %2760 = vmin.xlane.f32.xlu1 %v2759_v62 }
0x1240   :  { %v2761_v37 = vpop.xlane.xlu1 %2760 }
0x1241   :  { %vm2762_vm15 = vcmp.eq.f32.partialorder %v2759_v62, %v2761_v37  ;;  %v2767_v7 = vcvt.f32.s32 %v2761_v37  ;;  %v8213_v62 = vpack.c.bf16 %v3318_v29, %v3315_v46  ;;  %v3323_v37 = vld [vmem:[#allocation2 + $0x50] sm:$0xff]  ;;  %v3349_v46 = vld [vmem:[#allocation2 + $0x120] sm:$0xff] }
0x1242   :  { %v2763_v30 = vsel %vm2762_vm15, %v2758_v25, inf  ;;  %v3319_v25 = vld [vmem:[#allocation2 + $0x30] sm:$0xff] }
0x1243   :  { %2764 = vmin.xlane.f32.xlu0 %v2763_v30  ;;  %v2768_v42 = vshll.u32 %v2767_v7, 16  ;;  %v8216_v30 = vpack.c.bf16 %v3323_v37, %v3320_v40  ;;  %v3322_v7 = vld [vmem:[#allocation2 + $0x48] sm:$0xff]  ;;  %v3352_v40 = vld [vmem:[#allocation2 + $0x138] sm:$0xff]  ;;  %v3351_v37 = vld [vmem:[#allocation2 + $0x130] sm:$0xff] }
0x12d0   :  { %v2765_v10 = vpop.xlane.xlu0 %2764 }
0x12d1   :  { %v2766_v63 = vcvt.f32.s32 %v2765_v10  ;;  %v3321_v10 = vld [vmem:[#allocation2 + $0x40] sm:$0xff] }
0x12d3   :  { %v2769_v52 = vadd.s32 %v2768_v42, %v2766_v63  ;;  %v3324_v42 = vld [vmem:[#allocation2 + $0x58] sm:$0xff]  ;;  %v8220_v63 = vpack.c.bf16 %v3322_v7, %v3319_v25  ;;  %v3354_v25 = vld [vmem:[#allocation2 + $0x148] sm:$0xff]  ;;  %v8270_v7 = vpack.c.bf16 %v3352_v40, %v3349_v46  ;;  %v3508_v46 = vld [vmem:[#allocation5 + $0x30] sm:$0xff] }
0x12d5   :  { %vm2770_vm1 = vcmp.eq.s32.totalorder %v7234_v11, %v2769_v52  ;;  %v8222_v52 = vpack.c.bf16 %v3324_v42, %v3321_v10  ;;  %v8272_v10 = vpack.c.bf16 %v3354_v25, %v3351_v37  ;;  %v3511_v37 = vld [vmem:[#allocation5 + $0x48] sm:$0xff]  ;;  %v3510_v25 = vld [vmem:[#allocation5 + $0x40] sm:$0xff] }
0x12d6   :  { %4438 = vmatmul.mubr.msk.f32.vlgmr.msra.gmra.mrb[20].mxu1 %vm2770_vm1, %v8618_v57  ;;  %5421 = vmatmul.mubr.msk.f32.vlgmr.msra.gmra.mrb[20].mxu0 %vm2770_vm1, %v8618_v57 }
0x12d7   :  { %6442 = vmatpush1.bf16.msra.mxu1 %v7953_v33  ;;  %6473 = vmatpush3.bf16.msra.mxu0 %v7955_v15  ;;  %v8630_v33 = vld [vmem:[#allocation20_spill] sm:$0xff]  ;;  %v8631_v15 = vld [vmem:[#allocation22_spill] sm:$0xff] }
0x12d8   :  { %6444 = vmatprep.subr.bf16.mxu1 %v7957_v45  ;;  %6474 = vmatprep.subr.bf16.mxu0 %v8616_v9 }
0x12d9   :  { %3091 = vmatprep.mubr.f32.mxu1 %v8615_v58  ;;  %5455 = vmatprep.mubr.msk.f32.mxu0 %vm7075_vm0, %v8615_v58 }
0x12db   :  { %6446 = vmatpush1.bf16.msra.mxu1 %v7964_v13  ;;  %6476 = vmatpush3.bf16.msra.mxu0 %v7966_v38  ;;  %v3010_v38 = vld [vmem:[%s8576_s2] sm:$0x7] }
0x12dc   :  { %6448 = vmatprep.subr.bf16.mxu1 %v7970_v48  ;;  %6477 = vmatprep.subr.bf16.mxu0 %v8616_v9  ;;  %v8632_v48 = vld [vmem:[#allocation15_spill] sm:$0xff] }
0x12df   :  { %6450 = vmatpush1.bf16.msra.mxu1 %v7977_v44  ;;  %6479 = vmatpush3.bf16.msra.mxu0 %v7979_v0  ;;  %v3015_v44 = vrot.slane %v3010_v38, %v8632_v48 }
0x12e0   :  { %6452 = vmatprep.subr.bf16.mxu1 %v7983_v35  ;;  %6480 = vmatprep.subr.bf16.mxu0 %v8616_v9 }
0x12e3   :  { %6454 = vmatpush1.bf16.msra.mxu1 %v7987_v23  ;;  %6482 = vmatpush3.bf16.msra.mxu0 %v7989_v27  ;;  %v8633_v23 = vld [vmem:[#allocation16_spill] sm:$0xff] }
0x12e4   :  { %6456 = vmatprep.subr.bf16.mxu1 %v7993_v47  ;;  %6483 = vmatprep.subr.bf16.mxu0 %v8616_v9  ;;  %v3019_v27 = vrot.slane %v3010_v38, %v8633_v23 }
0x12e7   :  { %6458 = vmatpush1.bf16.msra.mxu1 %v7997_v41  ;;  %6485 = vmatpush3.bf16.msra.mxu0 %v7999_v12 }
0x12e8   :  { %6460 = vmatprep.subr.bf16.mxu1 %v8003_v4  ;;  %6486 = vmatprep.subr.bf16.mxu0 %v8616_v9 }
0x12eb   :  { %6462 = vmatpush1.bf16.msra.mxu1 %v8630_v33  ;;  %6488 = vmatpush3.bf16.msra.mxu0 %v8009_v21  ;;  %v3326_v33 = vld [vmem:[#allocation2 + $0x68] sm:$0xff] }
0x12ec   :  { %6464 = vmatprep.subr.bf16.mxu1 %v8013_v36  ;;  %6489 = vmatprep.subr.bf16.mxu0 %v8616_v9 }
0x12ef   :  { %6466 = vmatpush1.bf16.msra.mxu1 %v8017_v39  ;;  %6491 = vmatpush3.bf16.msra.mxu0 %v8019_v6 }
0x12f0   :  { %6468 = vmatprep.subr.bf16.mxu1 %v8023_v34  ;;  %6492 = vmatprep.subr.bf16.mxu0 %v8616_v9  ;;  %v3023_v34 = vrot.slane %v3010_v38, %v7411_v22  ;;  %v3328_v38 = vld [vmem:[#allocation2 + $0x78] sm:$0xff] }
0x12f3   :  { %6470 = vmatpush1.bf16.msra.mxu1 %v8027_v28  ;;  %6494 = vmatpush3.bf16.msra.mxu0 %v8029_v3 }
0x12f4   :  { %6495 = vmatprep.subr.bf16.mxu1 %v8616_v9 }
0x12f6   :  { %3092 = vmatmul.mubr.f32.vlgmr.msra.gmra.mrb[20].mxu1 %v8097_v14  ;;  %5456 = vmatmul.mubr.f32.vlgmr.msra.gmra.mrb[22].mxu0 %v8097_v14 }
0x12f7   :  { %6497 = vmatpush3.bf16.msra.mxu1 %v8058_v5  ;;  %5490 = vmatprep.mubr.msk.f32.mxu1 %vm7075_vm0, %v8615_v58 }
0x12f8   :  { %6498 = vmatprep.subr.bf16.mxu1 %v8616_v9  ;;  %3425 = vmatprep.mubr.f32.mxu0 %v8615_v58 }
0x12fb   :  { %6500 = vmatpush3.bf16.msra.mxu1 %v8062_v8 }
0x12fc   :  { %6501 = vmatprep.subr.bf16.mxu1 %v8616_v9 }
0x12ff   :  { %6503 = vmatpush3.bf16.msra.mxu1 %v8066_v32 }
0x1300   :  { %6504 = vmatprep.subr.bf16.mxu1 %v8616_v9 }
0x1303   :  { %6506 = vmatpush3.bf16.msra.mxu1 %v8070_v51 }
0x1304   :  { %6507 = vmatprep.subr.bf16.mxu1 %v8616_v9 }
0x1307   :  { %6509 = vmatpush3.bf16.msra.mxu1 %v8074_v18 }
0x1308   :  { %6510 = vmatprep.subr.bf16.mxu1 %v8616_v9 }
0x130b   :  { %6512 = vmatpush3.bf16.msra.mxu1 %v8078_v2 }
0x130c   :  { %6513 = vmatprep.subr.bf16.mxu1 %v8616_v9 }
0x130f   :  { %6515 = vmatpush3.bf16.msra.mxu1 %v8081_v53 }
0x1310   :  { %6516 = vmatprep.subr.bf16.mxu1 %v8616_v9 }
0x1313   :  { %6518 = vmatpush3.bf16.msra.mxu1 %v8631_v15  ;;  %v3329_v15 = vld [vmem:[#allocation2 + $0x80] sm:$0xff] }
0x1314   :  { %6551 = vmatprep.subr.bf16.mxu1 %v8616_v9 }
0x13a9   :  { %v2958_v45 = vpop.f32.mrb[20].mxu0 }
0x13aa   :  { %v5422_v13 = vpop.f32.mrb[21].mxu0 }
0x13ab   :  { %v8226_v13 = vpack.c.bf16 %v3329_v15, %v3326_v33 }
0x13c9   :  { %v3093_v0 = vpop.f32.mrb[20].mxu1  ;;  %v3164_v35 = vpop.f32.mrb[22].mxu0 }
0x13ca   :  { %v3094_v47 = vadd.f32 %v3093_v0, %v3015_v44  ;;  %v3095_v41 = vpop.f32.mrb[21].mxu1  ;;  %v5457_v12 = vpop.f32.mrb[23].mxu0  ;;  %v3165_v5 = vadd.f32 %v3164_v35, %v3023_v34  ;;  %v3327_v44 = vld [vmem:[#allocation2 + $0x70] sm:$0xff]  ;;  %v3330_v0 = vld [vmem:[#allocation2 + $0x88] sm:$0xff]  ;;  %v3332_v35 = vld [vmem:[#allocation2 + $0x98] sm:$0xff] }
0x13cb   :  { %v3096_v28 = vadd.f32 %v3095_v41, %v3019_v27  ;;  %v3335_v27 = vld [vmem:[#allocation2 + $0xb0] sm:$0xff]  ;;  %v8232_v41 = vpack.c.bf16 %v3330_v0, %v3327_v44 }
0x13cc   :  { %v4440_v4 = vmul.f32 -1.442695, %v3094_v47  ;;  %v3331_v12 = vld [vmem:[#allocation2 + $0x90] sm:$0xff] }
0x13cd   :  { %v4441_v21 = vmul.f32 -1.442695, %v3096_v28  ;;  %v3334_v28 = vld [vmem:[#allocation2 + $0xa8] sm:$0xff]  ;;  %v3359_v44 = vld [vmem:[#allocation2 + $0x170] sm:$0xff] }
0x13ce   :  { %6886 = vpow2.f32 %v4440_v4  ;;  %v8236_v4 = vpack.c.bf16 %v3335_v27, %v3332_v35  ;;  %v8240_v34 = vpack.c.bf16 %v3334_v28, %v3331_v12  ;;  %v3355_v35 = vld [vmem:[#allocation2 + $0x150] sm:$0xff]  ;;  %v3358_v27 = vld [vmem:[#allocation2 + $0x168] sm:$0xff]  ;;  %v3357_v12 = vld [vmem:[#allocation2 + $0x160] sm:$0xff] }
0x13cf   :  { %6888 = vpow2.f32 %v4441_v21  ;;  %v3333_v21 = vld [vmem:[#allocation2 + $0xa0] sm:$0xff]  ;;  %v8283_v28 = vpack.c.bf16 %v3358_v27, %v3355_v35  ;;  %v3517_v27 = vld [vmem:[#allocation5 + $0x78] sm:$0xff] }
0x13d8   :  { %v6887_v36 = vpop.eup %6886 }
0x13d9   :  { %v3172_v39 = vadd.f32 1.0, %v6887_v36  ;;  %v6889_v6 = vpop.eup %6888  ;;  %v3336_v36 = vld [vmem:[#allocation2 + $0xb8] sm:$0xff] }
0x13da   :  { %v3179_v3 = vadd.f32 1.0, %v6889_v6  ;;  %v3341_v6 = vld [vmem:[#allocation2 + $0xe0] sm:$0xff] }
0x13db   :  { %6890 = vrcp.f32 %v3172_v39  ;;  %v3338_v39 = vld [vmem:[#allocation2 + $0xc8] sm:$0xff] }
0x13dc   :  { %6892 = vrcp.f32 %v3179_v3  ;;  %v8242_v3 = vpack.c.bf16 %v3336_v36, %v3333_v21  ;;  %v3360_v21 = vld [vmem:[#allocation2 + $0x178] sm:$0xff] }
0x13dd   :  { %v8286_v36 = vpack.c.bf16 %v3360_v21, %v3357_v12  ;;  %v3516_v12 = vld [vmem:[#allocation5 + $0x70] sm:$0xff]  ;;  %v3519_v21 = vld [vmem:[#allocation5 + $0x88] sm:$0xff] }
0x13e5   :  { %v6891_v8 = vpop.eup %6890 }
0x13e6   :  { %v3182_v32 = vmul.f32 %v6891_v8, %v3165_v5  ;;  %v6893_v18 = vpop.eup %6892  ;;  %v3337_v5 = vld [vmem:[#allocation2 + $0xc0] sm:$0xff]  ;;  %v8246_v8 = vpack.c.bf16 %v3341_v6, %v3338_v39 }
0x13e7   :  { %v3185_v2 = vsub.f32 1.0, %v6893_v18  ;;  %v3187_v31 = vmul.f32 %v6893_v18, %v8097_v14  ;;  %v3314_v14 = vld [vmem:[#allocation2 + $0x8] sm:$0xff] }
0x13e8   :  { %v3183_v51 = vadd.f32 %v3182_v32, %v2958_v45  ;;  %v3325_v45 = vld [vmem:[#allocation2 + $0x60] sm:$0xff]  ;;  %v3340_v32 = vld [vmem:[#allocation2 + $0xd8] sm:$0xff]  ;;  %v3342_v18 = vld [vmem:[#allocation2 + $0xe8] sm:$0xff] }
0x13e9   :  { %v8230_v47 = vpack.c.bf16 %v3328_v38, %v3325_v45  ;;  %v3356_v38 = vld [vmem:[#allocation2 + $0x158] sm:$0xff] }
0x13ea   :  { %6894 = vtanh.f32 %v3183_v51  ;;  %v3339_v51 = vld [vmem:[#allocation2 + $0xd0] sm:$0xff]  ;;  %v8281_v0 = vpack.c.bf16 %v3359_v44, %v3356_v38  ;;  %v3514_v44 = vld [vmem:[#allocation5 + $0x60] sm:$0xff] }
0x13f4   :  { %v6895_v53 = vpop.eup %6894 }
0x13f5   :  { %v3186_v19 = vmul.f32 %v6895_v53, %v3185_v2  ;;  %v3344_v2 = vld [vmem:[#allocation2 + $0xf8] sm:$0xff]  ;;  %v3347_v53 = vld [vmem:[#allocation2 + $0x110] sm:$0xff] }
0x13f7   :  { %v8193_v20 = vadd.f32 %v3187_v31, %v3186_v19  ;;  %v8250_v19 = vpack.c.bf16 %v3340_v32, %v3337_v5  ;;  %v8252_v31 = vpack.c.bf16 %v3342_v18, %v3339_v51  ;;  %v3502_v5 = vld [vmem:[#allocation5] sm:$0xff]  ;;  %v3505_v51 = vld [vmem:[#allocation5 + $0x18] sm:$0xff]  ;;  %v3504_v18 = vld [vmem:[#allocation5 + $0x10] sm:$0xff] }
0x13f9   :  { %5491 = vmatmul.mubr.f32.vlgmr.msra.gmra.mrb[22].mxu1 %v8193_v20 }
0x13fa   :  { %5525 = vmatprep.mubr.msk.f32.mxu1 %vm7075_vm0, %v8615_v58  ;;  %6553 = vmatpush3.bf16.msra.mxu1 %v8213_v62 }
0x13fb   :  { %6554 = vmatprep.subr.bf16.mxu1 %v8616_v9 }
0x13fe   :  { %6556 = vmatpush3.bf16.msra.mxu1 %v8222_v52 }
0x13ff   :  { %6557 = vmatprep.subr.bf16.mxu1 %v8616_v9 }
0x1402   :  { %6559 = vmatpush3.bf16.msra.mxu1 %v8232_v41 }
0x1403   :  { %6560 = vmatprep.subr.bf16.mxu1 %v8616_v9 }
0x1406   :  { %6562 = vmatpush3.bf16.msra.mxu1 %v8242_v3 }
0x1407   :  { %6563 = vmatprep.subr.bf16.mxu1 %v8616_v9 }
0x140a   :  { %6565 = vmatpush3.bf16.msra.mxu1 %v8252_v31 }
0x140b   :  { %6566 = vmatprep.subr.bf16.mxu1 %v8616_v9 }
0x14cc   :  { %v3278_v59 = vpop.f32.mrb[22].mxu1 }
0x14cd   :  { %v3279_v54 = vadd.f32 %v8121_v55, %v3278_v59  ;;  %v5492_v17 = vpop.f32.mrb[23].mxu1  ;;  %v8209_v55 = vpack.c.bf16 %v3317_v16, %v3314_v14  ;;  %v3343_v59 = vld [vmem:[#allocation2 + $0xf0] sm:$0xff]  ;;  %v3350_v14 = vld [vmem:[#allocation2 + $0x128] sm:$0xff]  ;;  %v3353_v16 = vld [vmem:[#allocation2 + $0x140] sm:$0xff] }
0x14ce   :  { %v3346_v17 = vld [vmem:[#allocation2 + $0x108] sm:$0xff]  ;;  %v8266_v29 = vpack.c.bf16 %v3353_v16, %v3350_v14  ;;  %v8294_v14 = vpack.c.bf16 %v3505_v51, %v3502_v5  ;;  %v8320_v5 = vpack.c.bf16 %v3519_v21, %v3516_v12  ;;  %v3532_v21 = vld [vmem:[#allocation5 + $0xf0] sm:$0xff] }
0x14cf   :  { %3282 = vmax.xlane.f32.xlu1 %v3279_v54  ;;  %6520 = vmatprep.subr.bf16.mxu0 %v8209_v55  ;;  %v8260_v61 = vpack.c.bf16 %v3346_v17, %v3343_v59  ;;  %v3509_v17 = vld [vmem:[#allocation5 + $0x38] sm:$0xff] }
0x14d0   :  { %6522 = vmatpush1.bf16.msra.mxu0 %v8211_v49 }
0x14d1   :  { %6524 = vmatprep.subr.bf16.mxu0 %v8216_v30 }
0x14d4   :  { %6526 = vmatpush1.bf16.msra.mxu0 %v8220_v63 }
0x14d5   :  { %6528 = vmatprep.subr.bf16.mxu0 %v8226_v13 }
0x14d8   :  { %6530 = vmatpush1.bf16.msra.mxu0 %v8230_v47 }
0x14d9   :  { %6532 = vmatprep.subr.bf16.mxu0 %v8236_v4 }
0x14dc   :  { %6534 = vmatpush1.bf16.msra.mxu0 %v8240_v34 }
0x14dd   :  { %6536 = vmatprep.subr.bf16.mxu0 %v8246_v8 }
0x14e0   :  { %6538 = vmatpush1.bf16.msra.mxu0 %v8250_v19 }
0x155c   :  { %v3283_v43 = vpop.xlane.xlu1 %3282 }
0x155d   :  { %v8199_v50 = vsub.f32 %v3279_v54, %v3283_v43  ;;  %v8256_v54 = vpack.c.bf16 %v3347_v53, %v3344_v2  ;;  %v3345_v43 = vld [vmem:[#allocation2 + $0x100] sm:$0xff]  ;;  %v3507_v2 = vld [vmem:[#allocation5 + $0x28] sm:$0xff] }
0x155e   :  { %v8296_v16 = vpack.c.bf16 %v3507_v2, %v3504_v18  ;;  %v3523_v18 = vld [vmem:[#allocation5 + $0xa8] sm:$0xff]  ;;  %v3522_v2 = vld [vmem:[#allocation5 + $0xa0] sm:$0xff] }
0x155f   :  { %8634 = vst [vmem:[#allocation20_spill] sm:$0xff] %v8199_v50  ;;  %vm3294_vm2 = vcmp.eq.f32.partialorder %v8199_v50, 0.0  ;;  %6540 = vmatprep.subr.bf16.mxu0 %v8256_v54  ;;  %v3548_v50 = vld [vmem:[#allocation5 + $0x170] sm:$0xff] }
0x1560   :  { %v8203_v26 = vsel %vm3294_vm2, %v7234_v11, 128  ;;  %6542 = vmatpush1.bf16.msra.mxu0 %v8260_v61 }
0x1561   :  { %v3297_v24 = vshra.s32 %v8203_v26, 16  ;;  %6544 = vmatprep.subr.bf16.mxu0 %v8266_v29  ;;  %v3296_v42 = vand.u32 65535, %v8203_v26  ;;  %v3503_v26 = vld [vmem:[#allocation5 + $0x8] sm:$0xff] }
0x1563   :  { %v8206_v60 = vcvt.s32.f32 %v3297_v24  ;;  %v3348_v24 = vld [vmem:[#allocation2 + $0x118] sm:$0xff]  ;;  %v3298_v15 = vcvt.s32.f32 %v3296_v42 }
0x1564   :  { %v8262_v1 = vpack.c.bf16 %v3348_v24, %v3345_v43  ;;  %6546 = vmatpush1.bf16.msra.mxu0 %v8270_v7  ;;  %v3512_v43 = vld [vmem:[#allocation5 + $0x50] sm:$0xff]  ;;  %v3513_v42 = vld [vmem:[#allocation5 + $0x58] sm:$0xff] }
0x1565   :  { %3300 = vmin.xlane.f32.xlu0 %v8206_v60  ;;  %6548 = vmatprep.subr.bf16.mxu0 %v8281_v0  ;;  %v8298_v40 = vpack.c.bf16 %v3512_v43, %v3509_v17  ;;  %v8307_v38 = vpack.c.bf16 %v3513_v42, %v3510_v25  ;;  %v3530_v17 = vld [vmem:[#allocation5 + $0xe0] sm:$0xff]  ;;  %v3529_v25 = vld [vmem:[#allocation5 + $0xd8] sm:$0xff]  ;;  %v3528_v42 = vld [vmem:[#allocation5 + $0xd0] sm:$0xff] }
0x1566   :  { %6568 = vmatpush3.bf16.msra.mxu1 %v8262_v1 }
0x1567   :  { %6569 = vmatprep.subr.bf16.mxu1 %v8616_v9 }
0x1568   :  { %6550 = vmatpush1.bf16.msra.mxu0 %v8283_v28 }
0x156a   :  { %6571 = vmatpush3.bf16.msra.mxu1 %v8272_v10 }
0x156b   :  { %6572 = vmatprep.subr.bf16.mxu1 %v8616_v9 }
0x156e   :  { %6574 = vmatpush3.bf16.msra.mxu1 %v8286_v36 }
0x156f   :  { %6607 = vmatprep.subr.bf16.mxu1 %v8616_v9 }
0x15f2   :  { %v3301_v33 = vpop.xlane.xlu0 %3300 }
0x15f3   :  { %vm3302_vm3 = vcmp.eq.f32.partialorder %v8206_v60, %v3301_v33  ;;  %v3506_v60 = vld [vmem:[#allocation5 + $0x20] sm:$0xff]  ;;  %v3307_v6 = vcvt.f32.s32 %v3301_v33  ;;  %v3515_v33 = vld [vmem:[#allocation5 + $0x68] sm:$0xff] }
0x15f4   :  { %v3303_v45 = vsel %vm3302_vm3, %v3298_v15, inf  ;;  %v8290_v39 = vpack.c.bf16 %v3506_v60, %v3503_v26  ;;  %v3518_v15 = vld [vmem:[#allocation5 + $0x80] sm:$0xff]  ;;  %v3521_v26 = vld [vmem:[#allocation5 + $0x98] sm:$0xff]  ;;  %v3524_v60 = vld [vmem:[#allocation5 + $0xb0] sm:$0xff] }
0x15f5   :  { %3304 = vmin.xlane.f32.xlu1 %v3303_v45  ;;  %v3308_v53 = vshll.u32 %v3307_v6, 16  ;;  %v8305_v45 = vpack.c.bf16 %v3511_v37, %v3508_v46  ;;  %v8311_v35 = vpack.c.bf16 %v3518_v15, %v3515_v33  ;;  %v8318_v6 = vpack.c.bf16 %v3517_v27, %v3514_v44  ;;  %v3526_v46 = vld [vmem:[#allocation5 + $0xc0] sm:$0xff]  ;;  %v3531_v33 = vld [vmem:[#allocation5 + $0xe8] sm:$0xff]  ;;  %v3533_v15 = vld [vmem:[#allocation5 + $0xf8] sm:$0xff] }
0x15f6   :  { %6576 = vmatprep.subr.bf16.mxu0 %v8290_v39  ;;  %v8324_v51 = vpack.c.bf16 %v3524_v60, %v3521_v26  ;;  %v3536_v44 = vld [vmem:[#allocation5 + $0x110] sm:$0xff]  ;;  %v8338_v27 = vpack.c.bf16 %v3529_v25, %v3526_v46  ;;  %v8340_v12 = vpack.c.bf16 %v3531_v33, %v3528_v42  ;;  %v3535_v60 = vld [vmem:[#allocation5 + $0x108] sm:$0xff]  ;;  %v3538_v46 = vld [vmem:[#allocation5 + $0x120] sm:$0xff] }
0x15f7   :  { %v8344_v26 = vpack.c.bf16 %v3536_v44, %v3533_v15  ;;  %v3541_v42 = vld [vmem:[#allocation5 + $0x138] sm:$0xff]  ;;  %v3540_v33 = vld [vmem:[#allocation5 + $0x130] sm:$0xff]  ;;  %v3543_v15 = vld [vmem:[#allocation5 + $0x148] sm:$0xff] }
0x15f8   :  { %v3545_v44 = vld [vmem:[#allocation5 + $0x158] sm:$0xff] }
0x15f9   :  { %8635 = vst [vmem:[#allocation22_spill] sm:$0xff] %v8344_v26 }
0x1682   :  { %v3305_v32 = vpop.xlane.xlu1 %3304 }
0x1683   :  { %v3306_v59 = vcvt.f32.s32 %v3305_v32  ;;  %v3520_v32 = vld [vmem:[#allocation5 + $0x90] sm:$0xff] }
0x1684   :  { %v8328_v43 = vpack.c.bf16 %v3523_v18, %v3520_v32  ;;  %v3534_v32 = vld [vmem:[#allocation5 + $0x100] sm:$0xff]  ;;  %v3537_v18 = vld [vmem:[#allocation5 + $0x118] sm:$0xff] }
0x1685   :  { %v3309_v24 = vadd.s32 %v3308_v53, %v3306_v59  ;;  %v3525_v53 = vld [vmem:[#allocation5 + $0xb8] sm:$0xff]  ;;  %v3527_v59 = vld [vmem:[#allocation5 + $0xc8] sm:$0xff] }
0x1686   :  { %v8334_v37 = vpack.c.bf16 %v3530_v17, %v3527_v59  ;;  %v8348_v59 = vpack.c.bf16 %v3535_v60, %v3532_v21  ;;  %v8350_v17 = vpack.c.bf16 %v3537_v18, %v3534_v32  ;;  %v8358_v21 = vpack.c.bf16 %v3541_v42, %v3538_v46  ;;  %v3544_v32 = vld [vmem:[#allocation5 + $0x150] sm:$0xff]  ;;  %v3742_v42 = vld [vmem:[#allocation7 + $0x68] sm:$0xff] }
0x1687   :  { %vm3310_vm4 = vcmp.eq.s32.totalorder %v7234_v11, %v3309_v24  ;;  %v8330_v24 = vpack.c.bf16 %v3525_v53, %v3522_v2  ;;  %v3539_v2 = vld [vmem:[#allocation5 + $0x128] sm:$0xff]  ;;  %v3542_v53 = vld [vmem:[#allocation5 + $0x140] sm:$0xff]  ;;  %v8360_v60 = vpack.c.bf16 %v3543_v15, %v3540_v33  ;;  %v8364_v18 = vpack.c.bf16 %v3548_v50, %v3545_v44  ;;  %v3743_v15 = vld [vmem:[#allocation7 + $0x70] sm:$0xff] }
0x1688   :  { %4444 = vmatmul.mubr.msk.f32.vlgmr.msra.gmra.mrb[24].mxu0 %vm3310_vm4, %v8618_v57  ;;  %5526 = vmatmul.mubr.msk.f32.vlgmr.msra.gmra.mrb[24].mxu1 %vm3310_vm4, %v8618_v57  ;;  %8636 = vst [vmem:[#allocation23_spill] sm:$0xff] %v8348_v59  ;;  %v8354_v25 = vpack.c.bf16 %v3542_v53, %v3539_v2  ;;  %v3547_v2 = vld [vmem:[#allocation5 + $0x168] sm:$0xff]  ;;  %v3546_v53 = vld [vmem:[#allocation5 + $0x160] sm:$0xff]  ;;  %v3744_v44 = vld [vmem:[#allocation7 + $0x78] sm:$0xff] }
0x1689   :  { %6578 = vmatpush1.bf16.msra.mxu0 %v8294_v14  ;;  %6609 = vmatpush3.bf16.msra.mxu1 %v8296_v16  ;;  %v3729_v50 = vld [vmem:[#allocation7] sm:$0xff] }
0x168a   :  { %6580 = vmatprep.subr.bf16.mxu0 %v8298_v40  ;;  %6610 = vmatprep.subr.bf16.mxu1 %v8616_v9 }
0x168b   :  { %3631 = vmatprep.mubr.f32.mxu0 %v8615_v58  ;;  %5560 = vmatprep.mubr.msk.f32.mxu1 %vm7075_vm0, %v8615_v58 }
0x168d   :  { %6582 = vmatpush1.bf16.msra.mxu0 %v8305_v45  ;;  %6612 = vmatpush3.bf16.msra.mxu1 %v8307_v38 }
0x168e   :  { %6584 = vmatprep.subr.bf16.mxu0 %v8311_v35  ;;  %6613 = vmatprep.subr.bf16.mxu1 %v8616_v9 }
0x1691   :  { %6586 = vmatpush1.bf16.msra.mxu0 %v8318_v6  ;;  %6615 = vmatpush3.bf16.msra.mxu1 %v8320_v5 }
0x1692   :  { %6588 = vmatprep.subr.bf16.mxu0 %v8324_v51  ;;  %6616 = vmatprep.subr.bf16.mxu1 %v8616_v9 }
0x1695   :  { %6590 = vmatpush1.bf16.msra.mxu0 %v8328_v43  ;;  %6618 = vmatpush3.bf16.msra.mxu1 %v8330_v24 }
0x1696   :  { %6592 = vmatprep.subr.bf16.mxu0 %v8334_v37  ;;  %6619 = vmatprep.subr.bf16.mxu1 %v8616_v9 }
0x1699   :  { %6594 = vmatpush1.bf16.msra.mxu0 %v8338_v27  ;;  %6621 = vmatpush3.bf16.msra.mxu1 %v8340_v12 }
0x169a   :  { %6596 = vmatprep.subr.bf16.mxu0 %v8344_v26  ;;  %6622 = vmatprep.subr.bf16.mxu1 %v8616_v9  ;;  %v3549_v26 = vld [vmem:[#allocation5 + $0x178] sm:$0xff] }
0x169b   :  { %v8370_v46 = vpack.c.bf16 %v3549_v26, %v3546_v53  ;;  %v3741_v26 = vld [vmem:[#allocation7 + $0x60] sm:$0xff] }
0x169c   :  { %v8422_v33 = vpack.c.bf16 %v3742_v42, %v3741_v26 }
0x169d   :  { %6598 = vmatpush1.bf16.msra.mxu0 %v8348_v59  ;;  %6624 = vmatpush3.bf16.msra.mxu1 %v8350_v17  ;;  %v8368_v59 = vpack.c.bf16 %v3547_v2, %v3544_v32  ;;  %v8426_v32 = vpack.c.bf16 %v3744_v44, %v3743_v15 }
0x169e   :  { %6600 = vmatprep.subr.bf16.mxu0 %v8354_v25  ;;  %6625 = vmatprep.subr.bf16.mxu1 %v8616_v9 }
0x169f   :  { %8637 = vst [vmem:[#allocation24_spill] sm:$0xff] %v8426_v32 }
0x16a1   :  { %6602 = vmatpush1.bf16.msra.mxu0 %v8358_v21  ;;  %6627 = vmatpush3.bf16.msra.mxu1 %v8360_v60 }
0x16a2   :  { %6604 = vmatprep.subr.bf16.mxu0 %v8364_v18  ;;  %6628 = vmatprep.subr.bf16.mxu1 %v8616_v9 }
0x16a5   :  { %6606 = vmatpush1.bf16.msra.mxu0 %v8368_v59  ;;  %6630 = vmatpush3.bf16.msra.mxu1 %v8370_v46 }
0x16a6   :  { %6631 = vmatprep.subr.bf16.mxu0 %v8616_v9  ;;  %6656 = vmatprep.subr.bf16.mxu1 %v8209_v55  ;;  %v3730_v55 = vld [vmem:[#allocation7 + $0x8] sm:$0xff] }
0x16a8   :  { %3632 = vmatmul.mubr.f32.vlgmr.msra.gmra.mrb[24].mxu0 %v8193_v20  ;;  %5561 = vmatmul.mubr.f32.vlgmr.msra.gmra.mrb[26].mxu1 %v8193_v20 }
0x16a9   :  { %5595 = vmatprep.mubr.msk.f32.mxu0 %vm7075_vm0, %v8615_v58  ;;  %6658 = vmatpush1.bf16.msra.mxu1 %v8211_v49  ;;  %v8399_v49 = vpack.c.bf16 %v3730_v55, %v3729_v50  ;;  %v3550_v50 = vld [vmem:[%s8576_s2] sm:$0x7] }
0x16aa   :  { %6660 = vmatprep.subr.bf16.mxu1 %v8216_v30  ;;  %3965 = vmatprep.mubr.f32.mxu1 %v8615_v58  ;;  %v3731_v30 = vld [vmem:[#allocation7 + $0x10] sm:$0xff]  ;;  %v3555_v55 = vrot.slane %v3550_v50, %v8632_v48  ;;  %v3563_v15 = vrot.slane %v3550_v50, %v7411_v22 }
0x16ab   :  { %6633 = vmatpush3.bf16.msra.mxu0 %v8399_v49 }
0x16ac   :  { %6634 = vmatprep.subr.bf16.mxu0 %v8616_v9 }
0x16ad   :  { %6662 = vmatpush1.bf16.msra.mxu1 %v8220_v63  ;;  %v3732_v63 = vld [vmem:[#allocation7 + $0x18] sm:$0xff] }
0x16ae   :  { %6664 = vmatprep.subr.bf16.mxu1 %v8226_v13  ;;  %v8403_v13 = vpack.c.bf16 %v3732_v63, %v3731_v30 }
0x16b0   :  { %6636 = vmatpush3.bf16.msra.mxu0 %v8403_v13 }
0x16b1   :  { %6666 = vmatpush1.bf16.msra.mxu1 %v8230_v47  ;;  %6637 = vmatprep.subr.bf16.mxu0 %v8616_v9  ;;  %v3733_v47 = vld [vmem:[#allocation7 + $0x20] sm:$0xff] }
0x16b2   :  { %6668 = vmatprep.subr.bf16.mxu1 %v8236_v4  ;;  %v3734_v4 = vld [vmem:[#allocation7 + $0x28] sm:$0xff] }
0x16b5   :  { %6670 = vmatpush1.bf16.msra.mxu1 %v8240_v34  ;;  %v8407_v34 = vpack.c.bf16 %v3734_v4, %v3733_v47  ;;  %v3559_v47 = vrot.slane %v3550_v50, %v8633_v23 }
0x16b6   :  { %6672 = vmatprep.subr.bf16.mxu1 %v8246_v8  ;;  %v3735_v8 = vld [vmem:[#allocation7 + $0x30] sm:$0xff] }
0x16b7   :  { %6639 = vmatpush3.bf16.msra.mxu0 %v8407_v34 }
0x16b8   :  { %6640 = vmatprep.subr.bf16.mxu0 %v8616_v9 }
0x16b9   :  { %6674 = vmatpush1.bf16.msra.mxu1 %v8250_v19  ;;  %v3736_v19 = vld [vmem:[#allocation7 + $0x38] sm:$0xff] }
0x16ba   :  { %6676 = vmatprep.subr.bf16.mxu1 %v8256_v54  ;;  %v8411_v54 = vpack.c.bf16 %v3736_v19, %v3735_v8 }
0x16bc   :  { %6642 = vmatpush3.bf16.msra.mxu0 %v8411_v54 }
0x16bd   :  { %6678 = vmatpush1.bf16.msra.mxu1 %v8260_v61  ;;  %6643 = vmatprep.subr.bf16.mxu0 %v8616_v9  ;;  %v3737_v61 = vld [vmem:[#allocation7 + $0x40] sm:$0xff] }
0x16be   :  { %6680 = vmatprep.subr.bf16.mxu1 %v8266_v29  ;;  %v3738_v29 = vld [vmem:[#allocation7 + $0x48] sm:$0xff] }
0x16c1   :  { %6682 = vmatpush1.bf16.msra.mxu1 %v8270_v7  ;;  %v8415_v7 = vpack.c.bf16 %v3738_v29, %v3737_v61 }
0x16c2   :  { %6684 = vmatprep.subr.bf16.mxu1 %v8281_v0  ;;  %v3739_v0 = vld [vmem:[#allocation7 + $0x50] sm:$0xff] }
0x16c3   :  { %6645 = vmatpush3.bf16.msra.mxu0 %v8415_v7 }
0x16c4   :  { %6646 = vmatprep.subr.bf16.mxu0 %v8616_v9 }
0x16c5   :  { %6686 = vmatpush1.bf16.msra.mxu1 %v8283_v28  ;;  %v3740_v28 = vld [vmem:[#allocation7 + $0x58] sm:$0xff] }
0x16c6   :  { %6712 = vmatprep.subr.bf16.mxu1 %v8290_v39  ;;  %v8419_v39 = vpack.c.bf16 %v3740_v28, %v3739_v0 }
0x16c8   :  { %6648 = vmatpush3.bf16.msra.mxu0 %v8419_v39 }
0x16c9   :  { %6649 = vmatprep.subr.bf16.mxu0 %v8616_v9 }
0x16cc   :  { %6651 = vmatpush3.bf16.msra.mxu0 %v8422_v33 }
0x16cd   :  { %6652 = vmatprep.subr.bf16.mxu0 %v8616_v9 }
0x16d0   :  { %6654 = vmatpush3.bf16.msra.mxu0 %v8426_v32 }
0x16d1   :  { %6687 = vmatprep.subr.bf16.mxu0 %v8616_v9 }
0x175b   :  { %v3498_v2 = vpop.f32.mrb[24].mxu1 }
0x175c   :  { %v5527_v53 = vpop.f32.mrb[25].mxu1 }
0x177b   :  { %v3633_v30 = vpop.f32.mrb[24].mxu0  ;;  %v3704_v63 = vpop.f32.mrb[26].mxu1 }
0x177c   :  { %v3634_v4 = vadd.f32 %v3633_v30, %v3555_v55  ;;  %v3635_v8 = vpop.f32.mrb[25].mxu0  ;;  %v5562_v19 = vpop.f32.mrb[27].mxu1  ;;  %v3705_v53 = vadd.f32 %v3704_v63, %v3563_v15  ;;  %v2745_v63 = vmul.f32 1.442695, %v8124_v56 }
0x177d   :  { %v3636_v29 = vadd.f32 %v3635_v8, %v3559_v47 }
0x177e   :  { %v4446_v61 = vmul.f32 -1.442695, %v3634_v4 }
0x177f   :  { %v4447_v0 = vmul.f32 -1.442695, %v3636_v29 }
0x1780   :  { %6896 = vpow2.f32 %v4446_v61 }
0x1781   :  { %6898 = vpow2.f32 %v4447_v0 }
0x178a   :  { %v6897_v28 = vpop.eup %6896 }
0x178b   :  { %v3712_v26 = vadd.f32 1.0, %v6897_v28  ;;  %v6899_v42 = vpop.eup %6898 }
0x178c   :  { %v3719_v44 = vadd.f32 1.0, %v6899_v42 }
0x178d   :  { %6900 = vrcp.f32 %v3712_v26 }
0x178e   :  { %6902 = vrcp.f32 %v3719_v44 }
0x1797   :  { %v6901_v48 = vpop.eup %6900 }
0x1798   :  { %v3722_v32 = vmul.f32 %v6901_v48, %v3705_v53  ;;  %v6903_v55 = vpop.eup %6902  ;;  %v8462_v48 = vld [vmem:[%s8578_s4] ss:$0 sm:$0xff] }
0x1799   :  { %v3725_v30 = vsub.f32 1.0, %v6903_v55  ;;  %v3727_v8 = vmul.f32 %v6903_v55, %v8193_v20 }
0x179a   :  { %v3723_v23 = vadd.f32 %v3722_v32, %v3498_v2  ;;  %v8639_v32 = vld [vmem:[#allocation21_spill] sm:$0xff] }
0x179b   :  { %v1665_v2 = vmul.f32 1.442695, %v8639_v32 }
0x179c   :  { %6904 = vtanh.f32 %v3723_v23 }
0x17a6   :  { %v6905_v4 = vpop.eup %6904 }
0x17a7   :  { %v3726_v47 = vmul.f32 %v6905_v4, %v3725_v30 }
0x17a9   :  { %v8438_v19 = vadd.f32 %v3727_v8, %v3726_v47 }
0x17ab   :  { %5596 = vmatmul.mubr.f32.vlgmr.msra.gmra.mrb[26].mxu0 %v8438_v19 }
0x17ac   :  { %6689 = vmatpush3.bf16.msra.mxu0 %v8213_v62  ;;  %5630 = vmatprep.mubr.msk.f32.mxu0 %vm7075_vm0, %v8615_v58 }
0x17ad   :  { %6690 = vmatprep.subr.bf16.mxu0 %v8616_v9 }
0x17b0   :  { %6692 = vmatpush3.bf16.msra.mxu0 %v8222_v52 }
0x17b1   :  { %6693 = vmatprep.subr.bf16.mxu0 %v8616_v9 }
0x17b4   :  { %6695 = vmatpush3.bf16.msra.mxu0 %v8232_v41 }
0x17b5   :  { %6696 = vmatprep.subr.bf16.mxu0 %v8616_v9 }
0x17b8   :  { %6698 = vmatpush3.bf16.msra.mxu0 %v8242_v3 }
0x17b9   :  { %6699 = vmatprep.subr.bf16.mxu0 %v8616_v9 }
0x17bc   :  { %6701 = vmatpush3.bf16.msra.mxu0 %v8252_v31 }
0x17bd   :  { %6702 = vmatprep.subr.bf16.mxu0 %v8616_v9 }
0x17c0   :  { %6704 = vmatpush3.bf16.msra.mxu0 %v8262_v1 }
0x17c1   :  { %6705 = vmatprep.subr.bf16.mxu0 %v8616_v9 }
0x17c4   :  { %6707 = vmatpush3.bf16.msra.mxu0 %v8272_v10  ;;  %v8638_v10 = vld [vmem:[#allocation17_spill] sm:$0xff] }
0x17c5   :  { %6708 = vmatprep.subr.bf16.mxu0 %v8616_v9 }
0x17c8   :  { %6710 = vmatpush3.bf16.msra.mxu0 %v8286_v36  ;;  %v586_v36 = vmul.f32 1.442695, %v8638_v10 }
0x17c9   :  { %6743 = vmatprep.subr.bf16.mxu0 %v8616_v9 }
0x17ca   :  { %6906 = vpow2.f32 %v586_v36 }
0x17cb   :  { %6908 = vpow2.f32 %v1665_v2 }
0x17cc   :  { %6910 = vpow2.f32 %v2745_v63 }
0x17d4   :  { %v6907_v26 = vpop.eup %6906 }
0x17d5   :  { %v6909_v42 = vpop.eup %6908 }
0x17d6   :  { %v6911_v15 = vpop.eup %6910 }
0x187e   :  { %v3818_v23 = vpop.f32.mrb[26].mxu0 }
0x187f   :  { %v3819_v20 = vadd.f32 %v8462_v48, %v3818_v23  ;;  %v5597_v62 = vpop.f32.mrb[27].mxu0 }
0x1881   :  { %3822 = vmax.xlane.f32.xlu0 %v3819_v20 }
0x190e   :  { %v3823_v52 = vpop.xlane.xlu0 %3822 }
0x190f   :  { %v8465_v41 = vsub.f32 %v3819_v20, %v3823_v52  ;;  %v8641_v20 = vld [vmem:[#allocation23_spill] sm:$0xff] }
0x1911   :  { %vm3834_vm5 = vcmp.eq.f32.partialorder %v8465_v41, 0.0  ;;  %v3825_v28 = vmul.f32 1.442695, %v8465_v41 }
0x1912   :  { %v3835_v3 = vsel %vm3834_vm5, %v7234_v11, 128 }
0x1913   :  { %v3837_v31 = vshra.s32 %v3835_v3, 16  ;;  %v3836_v50 = vand.u32 65535, %v3835_v3  ;;  %6912 = vpow2.f32 %v3825_v28 }
0x1915   :  { %v3839_v1 = vcvt.s32.f32 %v3837_v31  ;;  %v3838_v29 = vcvt.s32.f32 %v3836_v50 }
0x1917   :  { %3840 = vmin.xlane.f32.xlu1 %v3839_v1 }
0x191d   :  { %v6913_v44 = vpop.eup %6912 }
0x19a4   :  { %v3841_v61 = vpop.xlane.xlu1 %3840 }
0x19a5   :  { %vm3842_vm6 = vcmp.eq.f32.partialorder %v3839_v1, %v3841_v61  ;;  %v3847_v53 = vcvt.f32.s32 %v3841_v61 }
0x19a6   :  { %v3843_v0 = vsel %vm3842_vm6, %v3838_v29, inf  ;;  %v8645_v29 = vld [vmem:[#allocation18_spill] sm:$0xff] }
0x19a7   :  { %3844 = vmin.xlane.f32.xlu0 %v3843_v0  ;;  %v3848_v30 = vshll.u32 %v3847_v53, 16  ;;  %v1125_v0 = vmul.f32 1.442695, %v8645_v29 }
0x19ab   :  { %588 = vadd.xlane.f32.xlu0 %v6907_v26  ;;  %v8647_v26 = vld [vmem:[#allocation20_spill] sm:$0xff] }
0x19af   :  { %1667 = vadd.xlane.f32.xlu0 %v6909_v42  ;;  %v3285_v42 = vmul.f32 1.442695, %v8647_v26 }
0x19b3   :  { %2747 = vadd.xlane.f32.xlu0 %v6911_v15 }
0x19b7   :  { %3827 = vadd.xlane.f32.xlu0 %v6913_v44 }
0x1a34   :  { %v3845_v55 = vpop.xlane.xlu0 %3844 }
0x1a35   :  { %v3846_v4 = vcvt.f32.s32 %v3845_v55 }
0x1a37   :  { %v3849_v47 = vadd.s32 %v3848_v30, %v3846_v4 }
0x1a38   :  { %v589_v8 = vpop.xlane.xlu0 %588 }
0x1a39   :  { %vm3850_vm7 = vcmp.eq.s32.totalorder %v7234_v11, %v3849_v47  ;;  %6914 = vlog2.f32 %v589_v8 }
0x1a3a   :  { %4450 = vmatmul.mubr.msk.f32.vlgmr.msra.gmra.mrb[28].mxu1 %vm3850_vm7, %v8618_v57  ;;  %5631 = vmatmul.mubr.msk.f32.vlgmr.msra.gmra.mrb[28].mxu0 %vm3850_vm7, %v8618_v57 }
0x1a3b   :  { %6714 = vmatpush1.bf16.msra.mxu1 %v8294_v14  ;;  %6745 = vmatpush3.bf16.msra.mxu0 %v8296_v16 }
0x1a3c   :  { %v1668_v23 = vpop.xlane.xlu0 %1667  ;;  %6716 = vmatprep.subr.bf16.mxu1 %v8298_v40  ;;  %6746 = vmatprep.subr.bf16.mxu0 %v8616_v9 }
0x1a3d   :  { %6916 = vlog2.f32 %v1668_v23  ;;  %4171 = vmatprep.mubr.f32.mxu1 %v8615_v58  ;;  %5665 = vmatprep.mubr.msk.f32.mxu0 %vm7075_vm0, %v8615_v58 }
0x1a3f   :  { %6718 = vmatpush1.bf16.msra.mxu1 %v8305_v45  ;;  %6748 = vmatpush3.bf16.msra.mxu0 %v8307_v38 }
0x1a40   :  { %v2748_v11 = vpop.xlane.xlu0 %2747  ;;  %6720 = vmatprep.subr.bf16.mxu1 %v8311_v35  ;;  %6749 = vmatprep.subr.bf16.mxu0 %v8616_v9 }
0x1a41   :  { %6918 = vlog2.f32 %v2748_v11 }
0x1a43   :  { %v6915_v57 = vpop.eup %6914  ;;  %6722 = vmatpush1.bf16.msra.mxu1 %v8318_v6  ;;  %6751 = vmatpush3.bf16.msra.mxu0 %v8320_v5 }
0x1a44   :  { %v591_v14 = vmul.f32 0.6931472, %v6915_v57  ;;  %v3828_v16 = vpop.xlane.xlu0 %3827  ;;  %6724 = vmatprep.subr.bf16.mxu1 %v8324_v51  ;;  %6752 = vmatprep.subr.bf16.mxu0 %v8616_v9  ;;  %v8640_v51 = vld [vmem:[#allocation22_spill] sm:$0xff] }
0x1a45   :  { %6920 = vlog2.f32 %v3828_v16 }
0x1a46   :  { %v592_v40 = vsub.f32 %v8638_v10, %v591_v14 }
0x1a47   :  { %v6917_v45 = vpop.eup %6916  ;;  %6726 = vmatpush1.bf16.msra.mxu1 %v8328_v43  ;;  %6754 = vmatpush3.bf16.msra.mxu0 %v8330_v24 }
0x1a48   :  { %593 = vst [vmem:[#allocation8] sm:$0xff] %v592_v40  ;;  %v1670_v38 = vmul.f32 0.6931472, %v6917_v45  ;;  %6728 = vmatprep.subr.bf16.mxu1 %v8334_v37  ;;  %6755 = vmatprep.subr.bf16.mxu0 %v8616_v9 }
0x1a4a   :  { %v1671_v35 = vsub.f32 %v8639_v32, %v1670_v38 }
0x1a4b   :  { %v6919_v6 = vpop.eup %6918  ;;  %6730 = vmatpush1.bf16.msra.mxu1 %v8338_v27  ;;  %6757 = vmatpush3.bf16.msra.mxu0 %v8340_v12 }
0x1a4c   :  { %1673 = vst [vmem:[#allocation8 + $0x10] sm:$0xff] %v1671_v35  ;;  %v2750_v5 = vmul.f32 0.6931472, %v6919_v6  ;;  %6732 = vmatprep.subr.bf16.mxu1 %v8640_v51  ;;  %6758 = vmatprep.subr.bf16.mxu0 %v8616_v9 }
0x1a4e   :  { %v2751_v43 = vsub.f32 %v8124_v56, %v2750_v5 }
0x1a4f   :  { %v6921_v24 = vpop.eup %6920  ;;  %6734 = vmatpush1.bf16.msra.mxu1 %v8641_v20  ;;  %6760 = vmatpush3.bf16.msra.mxu0 %v8350_v17  ;;  %v8643_v17 = vld [vmem:[#allocation15_spill] sm:$0xff] }
0x1a50   :  { %2753 = vst [vmem:[#allocation8 + $0x20] sm:$0xff] %v2751_v43  ;;  %v3830_v37 = vmul.f32 0.6931472, %v6921_v24  ;;  %6736 = vmatprep.subr.bf16.mxu1 %v8354_v25  ;;  %6761 = vmatprep.subr.bf16.mxu0 %v8616_v9 }
0x1a52   :  { %v3831_v27 = vsub.f32 %v8465_v41, %v3830_v37 }
0x1a53   :  { %6738 = vmatpush1.bf16.msra.mxu1 %v8358_v21  ;;  %6763 = vmatpush3.bf16.msra.mxu0 %v8360_v60 }
0x1a54   :  { %3833 = vst [vmem:[#allocation8 + $0x30] sm:$0xff] %v3831_v27  ;;  %6740 = vmatprep.subr.bf16.mxu1 %v8364_v18  ;;  %6764 = vmatprep.subr.bf16.mxu0 %v8616_v9  ;;  %v8644_v18 = vld [vmem:[#allocation16_spill] sm:$0xff] }
0x1a57   :  { %6742 = vmatpush1.bf16.msra.mxu1 %v8368_v59  ;;  %6766 = vmatpush3.bf16.msra.mxu0 %v8370_v46  ;;  %v4090_v59 = vld [vmem:[%s8576_s2] sm:$0x7]  ;;  %s7077_s2 = smov [#allocation9]  }
0x1a58   :  { %6767 = vmatprep.subr.bf16.mxu1 %v8616_v9  ;;  %v4095_v25 = vrot.slane %v4090_v59, %v8643_v17  ;;  %v4099_v46 = vrot.slane %v4090_v59, %v8644_v18  ;;  %v4103_v52 = vrot.slane %v4090_v59, %v7411_v22  ;;  %v8646_v22 = vld [vmem:[#allocation19_spill] sm:$0xff]  ;;  %s4393_s3 = sshll.u32 %s7077_s2, 4  ;;  %s4394_s3 = int_to_ptr.vmem [resolvable:$true] %s4393_s3 }
0x1a59   :  { %v2205_v28 = vmul.f32 1.442695, %v8646_v22  ;;  %s7014_s16 = scalar_lea.vmem %s4394_s3, 128  ;;  %p7019_p11 = scmp.lt.s32.totalorder %s4394_s3, %s4394_s3 }
0x1a5a   :  { %4172 = vmatmul.mubr.f32.vlgmr.msra.gmra.mrb[28].mxu1 %v8438_v19  ;;  %5666 = vmatmul.mubr.f32.vlgmr.msra.gmra.mrb[30].mxu0 %v8438_v19  ;;  %p7015_p10 = scmp.ne.s32.totalorder %s4394_s3, %s7014_s16  ;;  %p7020_p12 = scmp.lt.s32.totalorder %s7014_s16, %s7014_s16 }
0x1a5b   :  { %6769 = vmatpush3.bf16.msra.mxu1 %v8399_v49  ;;  %5700 = vmatprep.mubr.msk.f32.mxu1 %vm7075_vm0, %v8615_v58  ;;  %v8642_v58 = vld [vmem:[#allocation24_spill] sm:$0xff] }
0x1a5c   :  { %6770 = vmatprep.subr.bf16.mxu1 %v8616_v9  ;;  %p7021_p13 = por %p7020_p12, %p7019_p11 }
0x1a5e   :  { %p7022_p0 = pnand %p7021_p13, %p7015_p10 }
0x1a5f   :  { %6772 = vmatpush3.bf16.msra.mxu1 %v8403_v13 }
0x1a60   :  { %6773 = vmatprep.subr.bf16.mxu1 %v8616_v9 }
0x1a63   :  { %6775 = vmatpush3.bf16.msra.mxu1 %v8407_v34 }
0x1a64   :  { %6776 = vmatprep.subr.bf16.mxu1 %v8616_v9 }
0x1a67   :  { %6778 = vmatpush3.bf16.msra.mxu1 %v8411_v54 }
0x1a68   :  { %6779 = vmatprep.subr.bf16.mxu1 %v8616_v9 }
0x1a6b   :  { %6781 = vmatpush3.bf16.msra.mxu1 %v8415_v7 }
0x1a6c   :  { %6782 = vmatprep.subr.bf16.mxu1 %v8616_v9 }
0x1a6f   :  { %6784 = vmatpush3.bf16.msra.mxu1 %v8419_v39 }
0x1a70   :  { %6785 = vmatprep.subr.bf16.mxu1 %v8616_v9 }
0x1a73   :  { %6787 = vmatpush3.bf16.msra.mxu1 %v8422_v33 }
0x1a74   :  { %6788 = vmatprep.subr.bf16.mxu1 %v8616_v9 }
0x1a77   :  { %6790 = vmatpush3.bf16.msra.mxu1 %v8642_v58 }
0x1b0d   :  { %v4038_v56 = vpop.f32.mrb[28].mxu0 }
0x1b0e   :  { %v5632_v12 = vpop.f32.mrb[29].mxu0 }
0x1b2d   :  { %v4173_v21 = vpop.f32.mrb[28].mxu1  ;;  %v4244_v60 = vpop.f32.mrb[30].mxu0 }
0x1b2e   :  { %v4174_v49 = vadd.f32 %v4173_v21, %v4095_v25  ;;  %v4175_v13 = vpop.f32.mrb[29].mxu1  ;;  %v5667_v34 = vpop.f32.mrb[31].mxu0  ;;  %v4245_v3 = vadd.f32 %v4244_v60, %v4103_v52 }
0x1b2f   :  { %v4176_v7 = vadd.f32 %v4175_v13, %v4099_v46 }
0x1b30   :  { %v4452_v54 = vmul.f32 -1.442695, %v4174_v49 }
0x1b31   :  { %v4453_v9 = vmul.f32 -1.442695, %v4176_v7 }
0x1b32   :  { %6922 = vpow2.f32 %v4452_v54 }
0x1b33   :  { %6924 = vpow2.f32 %v4453_v9 }
0x1b3c   :  { %v6923_v39 = vpop.eup %6922 }
0x1b3d   :  { %v4252_v33 = vadd.f32 1.0, %v6923_v39  ;;  %v6925_v62 = vpop.eup %6924 }
0x1b3e   :  { %v4259_v41 = vadd.f32 1.0, %v6925_v62 }
0x1b3f   :  { %6926 = vrcp.f32 %v4252_v33 }
0x1b40   :  { %6928 = vrcp.f32 %v4259_v41 }
0x1b49   :  { %v6927_v31 = vpop.eup %6926 }
0x1b4a   :  { %v4262_v1 = vmul.f32 %v6927_v31, %v4245_v3  ;;  %v6929_v36 = vpop.eup %6928 }
0x1b4b   :  { %v4265_v32 = vsub.f32 1.0, %v6929_v36  ;;  %v4267_v63 = vmul.f32 %v6929_v36, %v8438_v19 }
0x1b4c   :  { %v4263_v10 = vadd.f32 %v4262_v1, %v4038_v56 }
0x1b4e   :  { %6930 = vtanh.f32 %v4263_v10 }
0x1b4f   :  { %6932 = vpow2.f32 %v1125_v0 }
0x1b50   :  { %6934 = vpow2.f32 %v2205_v28 }
0x1b51   :  { %6936 = vpow2.f32 %v3285_v42 }
0x1b58   :  { %v6931_v2 = vpop.eup %6930 }
0x1b59   :  { %v4266_v50 = vmul.f32 %v6931_v2, %v4265_v32  ;;  %v6933_v55 = vpop.eup %6932 }
0x1b5a   :  { %v6935_v19 = vpop.eup %6934 }
0x1b5b   :  { %v4268_v61 = vadd.f32 %v4267_v63, %v4266_v50  ;;  %v6937_v30 = vpop.eup %6936 }
0x1b5d   :  { %5701 = vmatmul.mubr.f32.vlgmr.msra.gmra.mrb[30].mxu1 %v4268_v61  ;;  %4374 = vst [vmem:[#allocation9] sm:$0xff] %v4268_v61 }
0x1c30   :  { %v4358_v15 = vpop.f32.mrb[30].mxu1 }
0x1c31   :  { %v4359_v44 = vadd.f32 %v8462_v48, %v4358_v15  ;;  %v5702_v53 = vpop.f32.mrb[31].mxu1 }
0x1c33   :  { %4362 = vmax.xlane.f32.xlu1 %v4359_v44 }
0x1c37   :  { %1127 = vadd.xlane.f32.xlu1 %v6933_v55 }
0x1c3b   :  { %2207 = vadd.xlane.f32.xlu1 %v6935_v19 }
0x1c3f   :  { %3287 = vadd.xlane.f32.xlu1 %v6937_v30 }
0x1cc0   :  { %v4363_v4 = vpop.xlane.xlu1 %4362 }
0x1cc1   :  { %v4364_v47 = vsub.f32 %v4359_v44, %v4363_v4 }
0x1cc3   :  { %v4365_v8 = vmul.f32 1.442695, %v4364_v47 }
0x1cc4   :  { %v1128_v23 = vpop.xlane.xlu1 %1127 }
0x1cc5   :  { %6938 = vpow2.f32 %v4365_v8 }
0x1cc6   :  { %6940 = vlog2.f32 %v1128_v23 }
0x1cc8   :  { %v2208_v11 = vpop.xlane.xlu1 %2207 }
0x1cc9   :  { %6942 = vlog2.f32 %v2208_v11 }
0x1ccc   :  { %v3288_v57 = vpop.xlane.xlu1 %3287 }
0x1ccd   :  { %6944 = vlog2.f32 %v3288_v57 }
0x1ccf   :  { %v6939_v48 = vpop.eup %6938 }
0x1cd0   :  { %v6941_v14 = vpop.eup %6940  ;;  %4367 = vadd.xlane.f32.xlu1 %v6939_v48 }
0x1cd1   :  { %v1130_v16 = vmul.f32 0.6931472, %v6941_v14 }
0x1cd3   :  { %v6943_v40 = vpop.eup %6942  ;;  %v1131_v45 = vsub.f32 %v8645_v29, %v1130_v16 }
0x1cd4   :  { %v2210_v38 = vmul.f32 0.6931472, %v6943_v40 }
0x1cd5   :  { %1133 = vst [vmem:[#allocation8 + $0x8] sm:$0xff] %v1131_v45 }
0x1cd6   :  { %v2211_v35 = vsub.f32 %v8646_v22, %v2210_v38 }
0x1cd7   :  { %v6945_v6 = vpop.eup %6944 }
0x1cd8   :  { %2213 = vst [vmem:[#allocation8 + $0x18] sm:$0xff] %v2211_v35  ;;  %v3290_v5 = vmul.f32 0.6931472, %v6945_v6 }
0x1cda   :  { %v3291_v51 = vsub.f32 %v8647_v26, %v3290_v5 }
0x1cdc   :  { %3293 = vst [vmem:[#allocation8 + $0x28] sm:$0xff] %v3291_v51 }
0x1cdd   :  { %7025 = shalt.err (!%p7022_p0)
}
0x1cde   :  { %s7026_s18 = scalar_lea.hbm %s8581_s7, 128 }
0x1cdf   :  { %p7027_p1 = scmp.ne.s32.totalorder %s8581_s7, %s7026_s18  ;;  %p7030_p2 = scmp.lt.u32.totalorder %s7026_s18, %s8581_s7 }
0x1ce1   :  { %p7032_p3 = pnand %p7030_p2, %p7027_p1 }
0x1ce3   :  { %7035 = shalt.err (!%p7032_p3)
}
0x1ce4   :  { %4396 = dma.vmem_to_hbm [thread:$0]  %s4394_s3, 128, %s8581_s7, [#allocation10]  }
0x1ce5   :  { %s7078_s1 = smov [#allocation8]  }
0x1ce6   :  { %s4380_s25 = sshll.u32 %s7078_s1, 4  ;;  %s4381_s25 = int_to_ptr.vmem [resolvable:$true] %s4380_s25 }
0x1ce7   :  { %s7036_s26 = scalar_lea.vmem %s4381_s25, 1024  ;;  %p7041_p5 = scmp.lt.s32.totalorder %s4381_s25, %s4381_s25 }
0x1ce8   :  { %p7037_p4 = scmp.ne.s32.totalorder %s4381_s25, %s7036_s26  ;;  %p7042_p6 = scmp.lt.s32.totalorder %s7036_s26, %s7036_s26 }
0x1cea   :  { %p7043_p7 = por %p7042_p6, %p7041_p5 }
0x1cec   :  { %p7044_p8 = pnand %p7043_p7, %p7037_p4 }
0x1d5d   :  { %v4368_v43 = vpop.xlane.xlu1 %4367 }
0x1d5e   :  { %6946 = vlog2.f32 %v4368_v43 }
0x1d68   :  { %v6947_v24 = vpop.eup %6946 }
0x1d69   :  { %v4370_v20 = vmul.f32 0.6931472, %v6947_v24 }
0x1d6b   :  { %v4371_v37 = vsub.f32 %v4364_v47, %v4370_v20 }
0x1d6d   :  { %4373 = vst [vmem:[#allocation8 + $0x38] sm:$0xff] %v4371_v37 }
0x1d6e   :  { %7047 = shalt.err (!%p7044_p8)
}
0x1d6f   :  { %s7048_s7 = scalar_lea.hbm %s8580_s6, 1024 }
0x1d70   :  { %p7049_p9 = scmp.ne.s32.totalorder %s8580_s6, %s7048_s7  ;;  %p7052_p10 = scmp.lt.u32.totalorder %s7048_s7, %s8580_s6 }
0x1d72   :  { %p7054_p11 = pnand %p7052_p10, %p7049_p9 }
0x1d74   :  { %7057 = shalt.err (!%p7054_p11)
}
0x1d75   :  { %4386 = dma.vmem_to_hbm [thread:$0]  %s4381_s25, 1024, %s8580_s6, [#allocation4], %s7071_s0, %s7071_s0, %s7072_s27  }
0x1d76   :  { %7062 = dma.done.wait [#allocation4], 1024  }
0x1d77   :  { %7063 = vsyncadd [#allocation4], 4294966272 }
0x1d78   :  { %7064 = dma.done.wait [#allocation10], 128  }
0x1d79   :  { %7065 = vsyncadd [#allocation10], 4294967168 }
0x1d7a   :  { %4403 = vsyncpa [#allocation3], 1 }
0x1d7b   :  { %4404 = vsyncpa [#allocation6], 1 }
0x1d7c   :  { %4405 = vsyncpa [#allocation4], 1 }
0x1d7d   :  { %4406 = vsyncpa [#allocation10], 1 }

</bundles_post_ra>
